<compile_context>
chip_gen: v7x
topology: tpu7x:2x2x1
jax: 0.10.0
libtpu: 0.0.40
codegen_flags: <defaults>
</compile_context>

<pallas_src>
import math

import numpy as np
import jax
import jax.numpy as jnp
from jax.experimental import pallas as pl
from jax.experimental.pallas import tpu as pltpu

F32 = jnp.float32

# ---------------- configuration (small, consistent with the forward pass) ----------------
IMG_SIZE = 32          # image H = W
IN_CH = 3              # RGB
PATCH = 8              # patch size -> 4x4 feature grid
EMBED = 32             # transformer dim (encoder & decoder)
FEAT = IMG_SIZE // PATCH
SEQ = FEAT * FEAT      # 16 image tokens
MLP_HID = 64
NUM_MASK_TOKENS = 4    # SAM default; multimask_output=False selects mask 0
NUM_TOKENS = 1 + NUM_MASK_TOKENS + 2   # output tokens + 2 box-corner prompt tokens
D8 = EMBED // 8        # mask channel dim after the two 2x upscales
C4 = EMBED // 4        # channels after the first 2x upscale
ATTN_SCALE = 1.0 / math.sqrt(EMBED)
PATCH_DIM = IN_CH * PATCH * PATCH
OUT_ROWS = (IMG_SIZE * IMG_SIZE) // 128    # 8 -> one (8,128) vreg-aligned mask slab per box


# =======================  in-kernel helpers (traced inside the kernel)  =======================

def _ln(x, g, b, eps=1e-5):
    mu = jnp.mean(x, axis=-1, keepdims=True)
    var = jnp.mean((x - mu) ** 2, axis=-1, keepdims=True)
    return (x - mu) * jax.lax.rsqrt(var + eps) * g + b


def _softmax_last(s):
    s = s - jnp.max(s, axis=-1, keepdims=True)
    p = jnp.exp(s)
    return p * pl.reciprocal(jnp.sum(p, axis=-1, keepdims=True), approx=True)


def _sdpa(q, k, v, wo, bo):
    # q @ k^T via dot_general (contract last dims of both); query weights are pre-scaled
    # by 1/sqrt(D) at preprocess time, so no per-score multiply here.
    s = jax.lax.dot_general(q, k, (((1,), (1,)), ((), ())), preferred_element_type=F32)
    p = _softmax_last(s)
    o = jnp.dot(p, v, preferred_element_type=F32)
    return jnp.dot(o, wo, preferred_element_type=F32) + bo


# =======================  single fused MedSAM forward kernel  =======================

def _medsam_kernel(
        patches_ref, tok_ref, img_pe_ref,
        # image encoder
        enc_pos_ref, enc_pw_ref, enc_pb_ref,
        enc_aw_ref, enc_ab_ref, enc_wo_ref, enc_bo_ref,
        enc_lng_ref, enc_lnb_ref,
        enc_mw1_ref, enc_mb1_ref, enc_mw2_ref, enc_mb2_ref,
        enc_nw_ref, enc_nb_ref,
        # mask decoder
        nme_ref,
        dec_aw_ref, dec_ab_ref, dec_wo_ref, dec_bo_ref,
        dec_lng_ref, dec_lnb_ref,
        dec_mw1_ref, dec_mb1_ref, dec_mw2_ref, dec_mb2_ref,
        hyp_w12_ref, hyp_b12_ref, hyp_w3_ref, hyp_b3_ref,
        up_w1_ref, up_b1_ref, up_w2_ref, up_b2_ref,
        esel_ref, qmat_ref, pcat_ref,
        out_ref):
    n_boxes = tok_ref.shape[1]

    # ---------------- image encoder: patch embed + 1 transformer block + neck ----------------
    x = jnp.dot(patches_ref[0], enc_pw_ref[...], preferred_element_type=F32) + enc_pb_ref[...]
    x = x + enc_pos_ref[...]
    h = _ln(x, enc_lng_ref[0], enc_lnb_ref[0])
    q = jnp.dot(h, enc_aw_ref[0], preferred_element_type=F32) + enc_ab_ref[0]
    k = jnp.dot(h, enc_aw_ref[1], preferred_element_type=F32) + enc_ab_ref[1]
    v = jnp.dot(h, enc_aw_ref[2], preferred_element_type=F32) + enc_ab_ref[2]
    x = x + _sdpa(q, k, v, enc_wo_ref[...], enc_bo_ref[...])
    h = _ln(x, enc_lng_ref[1], enc_lnb_ref[1])
    h = jax.nn.gelu(jnp.dot(h, enc_mw1_ref[...], preferred_element_type=F32) + enc_mb1_ref[...])
    x = x + jnp.dot(h, enc_mw2_ref[...], preferred_element_type=F32) + enc_mb2_ref[...]
    img = jnp.dot(x, enc_nw_ref[...], preferred_element_type=F32) + enc_nb_ref[...]   # (SEQ, D)

    # ---------------- per-image shared decoder precompute (reused for every box) -------------
    pos = img_pe_ref[...]
    kf0 = img + nme_ref[...]                 # dense (no-mask) prompt embedding
    kf0_pos = kf0 + pos
    # cross token->image (layer 1): image-side K / V are box-independent
    kA = jnp.dot(kf0_pos, dec_aw_ref[1, 1], preferred_element_type=F32) + dec_ab_ref[1, 1]
    vA = jnp.dot(kf0, dec_aw_ref[1, 2], preferred_element_type=F32) + dec_ab_ref[1, 2]
    # cross image->token (layer 2): image-side Q is box-independent
    qB = jnp.dot(kf0_pos, dec_aw_ref[2, 0], preferred_element_type=F32) + dec_ab_ref[2, 0]

    # ---------------- per-box decoder (unrolled; Nb is tiny and static) ----------------------
    for n in range(n_boxes):
        toks = tok_ref[0, n]                 # (NUM_TOKENS, EMBED)
        qpe = toks

        # self-attention on the prompt/output tokens (layer 0)
        q = jnp.dot(toks, dec_aw_ref[0, 0], preferred_element_type=F32) + dec_ab_ref[0, 0]
        k = jnp.dot(toks, dec_aw_ref[0, 1], preferred_element_type=F32) + dec_ab_ref[0, 1]
        v = jnp.dot(toks, dec_aw_ref[0, 2], preferred_element_type=F32) + dec_ab_ref[0, 2]
        qf = _ln(toks + _sdpa(q, k, v, dec_wo_ref[0], dec_bo_ref[0]),
                 dec_lng_ref[0], dec_lnb_ref[0])

        # cross-attention tokens -> image (layer 1); image K/V cached above
        q = jnp.dot(qf + qpe, dec_aw_ref[1, 0], preferred_element_type=F32) + dec_ab_ref[1, 0]
        qf = _ln(qf + _sdpa(q, kA, vA, dec_wo_ref[1], dec_bo_ref[1]),
                 dec_lng_ref[1], dec_lnb_ref[1])

        # token MLP (ReLU)
        h = jnp.maximum(jnp.dot(qf, dec_mw1_ref[...], preferred_element_type=F32)
                        + dec_mb1_ref[...], 0.0)
        h = jnp.dot(h, dec_mw2_ref[...], preferred_element_type=F32) + dec_mb2_ref[...]
        qf = _ln(qf + h, dec_lng_ref[2], dec_lnb_ref[2])

        # cross-attention image -> tokens (layer 2); image Q cached above
        k = jnp.dot(qf + qpe, dec_aw_ref[2, 1], preferred_element_type=F32) + dec_ab_ref[2, 1]
        v = jnp.dot(qf, dec_aw_ref[2, 2], preferred_element_type=F32) + dec_ab_ref[2, 2]
        kf = _ln(kf0 + _sdpa(qB, k, v, dec_wo_ref[2], dec_bo_ref[2]),
                 dec_lng_ref[3], dec_lnb_ref[3])

        # final tokens -> image attention (layer 3)
        kf_pos = kf + pos
        q = jnp.dot(qf + qpe, dec_aw_ref[3, 0], preferred_element_type=F32) + dec_ab_ref[3, 0]
        k = jnp.dot(kf_pos, dec_aw_ref[3, 1], preferred_element_type=F32) + dec_ab_ref[3, 1]
        v = jnp.dot(kf, dec_aw_ref[3, 2], preferred_element_type=F32) + dec_ab_ref[3, 2]
        qf = _ln(qf + _sdpa(q, k, v, dec_wo_ref[3], dec_bo_ref[3]),
                 dec_lng_ref[4], dec_lnb_ref[4])

        # hypernetwork MLP for mask token 0 only
        # TODO(synk): hyper heads 1..3 and the IoU head are skipped — MedSAM.forward discards
        # them (multimask_output=False keeps only mask 0, "_" drops the IoU predictions).
        t = qf[1:2, :]
        t = jnp.maximum(jnp.dot(t, hyp_w12_ref[0], preferred_element_type=F32)
                        + hyp_b12_ref[0], 0.0)
        t = jnp.maximum(jnp.dot(t, hyp_w12_ref[1], preferred_element_type=F32)
                        + hyp_b12_ref[1], 0.0)
        hyper0 = jnp.dot(t, hyp_w3_ref[...], preferred_element_type=F32) + hyp_b3_ref[...]  # (1,D8)

        # fused 2x ConvT -> GELU -> 2x ConvT -> GELU, hyper mask product and bilinear resize,
        # expressed as 4 dense MXU matmuls + a handful of broadcasts (all spatial scattering
        # lives in host-precomputed constant matrices).
        # TODO(synk): the LayerNorm2d between SAM's two upscale ConvTransposes is omitted,
        # matching the simplified reference used for this model size.
        u1 = jax.nn.gelu(jnp.dot(kf, up_w1_ref[...], preferred_element_type=F32)
                         + up_b1_ref[...])                                     # (SEQ, 4*C4)
        u2 = jax.nn.gelu(jnp.dot(u1, up_w2_ref[...], preferred_element_type=F32)
                         + up_b2_ref[...])                                     # (SEQ, 16*D8)
        hv = jnp.concatenate([hyper0] * 16, axis=1)                            # (1, 16*D8)
        s_all = jnp.dot(u2 * hv, esel_ref[...], preferred_element_type=F32)    # (SEQ, 16)

        accs = []
        for ky in range(4):
            acc = None
            for kx in range(4):
                col = (2 * (ky // 2) + kx // 2) * 4 + 2 * (ky % 2) + kx % 2
                term = s_all[:, col:col + 1] * qmat_ref[kx]                    # (SEQ, IMG)
                acc = term if acc is None else acc + term
            accs.append(acc)
        acc_stack = jnp.concatenate(accs, axis=0)                              # (4*SEQ, IMG)

        # single resize matmul; P rows are host-permuted so the result concatenates straight
        # into a lane-dense (8, 128) slab (no in-kernel reshape of the (32,32) mask needed).
        ori_p = jnp.dot(pcat_ref[...], acc_stack, preferred_element_type=F32)  # (IMG, IMG) perm.
        flat = jnp.concatenate(
            [ori_p[8 * blk:8 * (blk + 1)] for blk in range(4)], axis=1)        # (8, 128)
        out_ref[0, n] = flat


def run_medsam(patches, tokens, prep):
    B = patches.shape[0]
    Nb = tokens.shape[1]
    e = prep["enc"]
    d = prep["dec"]

    def fixed(shape):
        zeros = (0,) * len(shape)
        return pl.BlockSpec(shape, lambda b, _z=zeros: _z)

    in_specs = [
        pl.BlockSpec((1, SEQ, PATCH_DIM), lambda b: (b, 0, 0)),                 # patches
        pl.BlockSpec((1, Nb, NUM_TOKENS, EMBED), lambda b: (b, 0, 0, 0)),       # per-box tokens
        fixed((SEQ, EMBED)),                                                    # dense pos enc
        # encoder weights
        fixed((SEQ, EMBED)),
        fixed((PATCH_DIM, EMBED)), fixed((1, EMBED)),
        fixed((3, EMBED, EMBED)), fixed((3, 1, EMBED)),
        fixed((EMBED, EMBED)), fixed((1, EMBED)),
        fixed((2, 1, EMBED)), fixed((2, 1, EMBED)),
        fixed((EMBED, MLP_HID)), fixed((1, MLP_HID)),
        fixed((MLP_HID, EMBED)), fixed((1, EMBED)),
        fixed((EMBED, EMBED)), fixed((1, EMBED)),
        # decoder weights
        fixed((1, EMBED)),
        fixed((4, 3, EMBED, EMBED)), fixed((4, 3, 1, EMBED)),
        fixed((4, EMBED, EMBED)), fixed((4, 1, EMBED)),
        fixed((5, 1, EMBED)), fixed((5, 1, EMBED)),
        fixed((EMBED, MLP_HID)), fixed((1, MLP_HID)),
        fixed((MLP_HID, EMBED)), fixed((1, EMBED)),
        fixed((2, EMBED, EMBED)), fixed((2, 1, EMBED)),
        fixed((EMBED, D8)), fixed((1, D8)),
        fixed((EMBED, 4 * C4)), fixed((1, 4 * C4)),
        fixed((4 * C4, 16 * D8)), fixed((1, 16 * D8)),
        fixed((16 * D8, 16)),
        fixed((4, SEQ, IMG_SIZE)),
        fixed((IMG_SIZE, 4 * SEQ)),
    ]
    out = pl.pallas_call(
        _medsam_kernel,
        grid=(B,),
        in_specs=in_specs,
        out_specs=pl.BlockSpec((1, Nb, OUT_ROWS, 128), lambda b: (b, 0, 0, 0)),
        out_shape=jax.ShapeDtypeStruct((B, Nb, OUT_ROWS, 128), F32),
        compiler_params=pltpu.CompilerParams(dimension_semantics=("parallel",)),
    )(patches, tokens, prep["image_pe"],
      e["pos"], e["patch_w"], e["patch_b"],
      e["attn_w"], e["attn_b"], e["wo"], e["bo"],
      e["ln_g"], e["ln_b"],
      e["mlp_w1"], e["mlp_b1"], e["mlp_w2"], e["mlp_b2"],
      e["neck_w"], e["neck_b"],
      d["nme"],
      d["attn_w"], d["attn_b"], d["attn_wo"], d["attn_bo"],
      d["ln_g"], d["ln_b"],
      d["mlp_w1"], d["mlp_b1"], d["mlp_w2"], d["mlp_b2"],
      d["hyp_w12"], d["hyp_b12"], d["hyp_w3"], d["hyp_b3"],
      d["up_w1"], d["up_b1"], d["up_w2"], d["up_b2"],
      d["esel"], d["Q"], d["Pcat"])
    # (8,128) slab per box is the row-major view of the (32,32) mask -> free reshape.
    return out.reshape(B, Nb, IMG_SIZE, IMG_SIZE)


# =======================  glue (prompt encoding, patchify, preprocessing)  =======================

def _pe_encode(coords, gauss):
    c = 2.0 * coords - 1.0
    c = c @ gauss
    c = 2.0 * np.pi * c
    return jnp.concatenate([jnp.sin(c), jnp.cos(c)], axis=-1)


def get_dense_pe(prm):
    ys = (jnp.arange(FEAT, dtype=F32) + 0.5) / FEAT
    xs = (jnp.arange(FEAT, dtype=F32) + 0.5) / FEAT
    gy, gx = jnp.meshgrid(ys, xs, indexing="ij")
    coords = jnp.stack([gx, gy], axis=-1)                  # (FEAT, FEAT, 2)
    pe = _pe_encode(coords, prm["pe_gauss"])               # (FEAT, FEAT, EMBED)
    return pe.reshape(SEQ, EMBED)


def _bilinear_matrix(out_size, in_size):
    """Row-interpolation matrix matching F.interpolate(mode='bilinear', align_corners=False)."""
    scale = in_size / out_size
    i = np.arange(out_size, dtype=np.float64)
    src = np.maximum((i + 0.5) * scale - 0.5, 0.0)
    x0 = np.minimum(np.floor(src).astype(np.int64), in_size - 1)
    x1 = np.minimum(x0 + 1, in_size - 1)
    lam = src - x0
    W = np.zeros((out_size, in_size), dtype=np.float32)
    W[np.arange(out_size), x0] += (1.0 - lam)
    W[np.arange(out_size), x1] += lam
    return W


def preprocess_params(params):
    """One-time host-side weight packing: per-layer stacked Q/K/V (scale folded into Wq/bq),
    stacked LNs, merged upscale weights (concatenated up_w1, block-diagonal up_w2), the 0/1
    selection matrix that turns the 16 hyper reductions into one matmul, and the constant
    P/Q matrices folding the 4x upscale scatter + bilinear resize into plain matmuls (with P
    row-permuted so the kernel can store a lane-dense (8,128) mask slab without a reshape)."""
    enc = params["enc"]
    blk = enc["block"]
    dec = params["dec"]
    prm = params["prompt"]

    def attn_pack(a):
        w = jnp.stack([a["wq"] * ATTN_SCALE, a["wk"], a["wv"]])                 # (3, D, D)
        b = jnp.stack([a["bq"] * ATTN_SCALE, a["bk"], a["bv"]]).reshape(3, 1, EMBED)
        return w, b

    enc_w, enc_b = attn_pack(blk)
    enc_prep = dict(
        pos=enc["pos_embed"].reshape(SEQ, EMBED),
        patch_w=enc["patch_w"], patch_b=enc["patch_b"].reshape(1, EMBED),
        attn_w=enc_w, attn_b=enc_b,
        wo=blk["wo"], bo=blk["bo"].reshape(1, EMBED),
        ln_g=jnp.stack([blk["ln1_g"], blk["ln2_g"]]).reshape(2, 1, EMBED),
        ln_b=jnp.stack([blk["ln1_b"], blk["ln2_b"]]).reshape(2, 1, EMBED),
        mlp_w1=blk["mlp_w1"], mlp_b1=blk["mlp_b1"].reshape(1, MLP_HID),
        mlp_w2=blk["mlp_w2"], mlp_b2=blk["mlp_b2"].reshape(1, EMBED),
        neck_w=enc["neck_w"], neck_b=enc["neck_b"].reshape(1, EMBED),
    )

    layers = [dec["self_attn"], dec["cross_ti"], dec["cross_it"], dec["final_attn"]]
    packed = [attn_pack(a) for a in layers]
    attn_w = jnp.stack([p[0] for p in packed])                                  # (4,3,D,D)
    attn_b = jnp.stack([p[1] for p in packed])                                  # (4,3,1,D)
    attn_wo = jnp.stack([a["wo"] for a in layers])
    attn_bo = jnp.stack([a["bo"].reshape(1, EMBED) for a in layers])
    ln_g = jnp.stack([dec["ln%d_g" % i] for i in range(1, 6)]).reshape(5, 1, EMBED)
    ln_b = jnp.stack([dec["ln%d_b" % i] for i in range(1, 6)]).reshape(5, 1, EMBED)

    hyp0 = dec["hyper"][0]
    hyp_w12 = jnp.stack([hyp0["w1"], hyp0["w2"]])
    hyp_b12 = jnp.stack([hyp0["b1"].reshape(1, EMBED), hyp0["b2"].reshape(1, EMBED)])
    hyp_w3 = hyp0["w3"]
    hyp_b3 = hyp0["b3"].reshape(1, D8)

    # ConvTranspose2d(k=2, s=2) #1, all 4 sub-pixel offsets concatenated along N:
    # original column order is c*4 + (dy*2+dx); merged column k1*C4 + c.
    cols1 = np.concatenate([np.arange(C4) * 4 + k1 for k1 in range(4)])
    up_w1 = dec["up1_w"][:, cols1]                                              # (D, 4*C4)
    up_b1 = jnp.tile(dec["up1_b"], 4).reshape(1, 4 * C4)
    # ConvTranspose2d #2 as a block-diagonal so all four u2 blocks come from one matmul.
    perm2 = np.array([c2 * 4 + k2 for k2 in range(4) for c2 in range(D8)])
    uw2p = dec["up2_w"][:, perm2]                                               # (C4, 4*D8)
    up_w2 = jnp.kron(jnp.eye(4, dtype=F32), uw2p)                               # (4*C4, 16*D8)
    up_b2 = jnp.tile(dec["up2_b"], 16).reshape(1, 16 * D8)

    # Selection matrix: S = (u2 * tiled_hyper) @ esel gives all 16 per-offset hyper dots.
    esel = np.zeros((16 * D8, 16), dtype=np.float32)
    for k1 in range(4):
        for k2 in range(4):
            for dd in range(D8):
                esel[16 * k1 + 4 * k2 + dd, 4 * k1 + k2] = 1.0

    # Bilinear-resize matrices with the 4x (=2x * 2x) upscale scatter folded in.
    # Low-res mask pixel (4h+ky, 4w+kx) lives at row r=h*FEAT+w, sub-pixel (ky, kx):
    #   P[ky][i, r] = wh[i, 4*(r//FEAT)+ky],   Q[kx][r, j] = ww[j, 4*(r%FEAT)+kx]
    wh = _bilinear_matrix(IMG_SIZE, 4 * FEAT)
    ww = _bilinear_matrix(IMG_SIZE, 4 * FEAT)
    r = np.arange(SEQ)
    P = np.stack([wh[:, 4 * (r // FEAT) + ky] for ky in range(4)])              # (4, 32, 16)
    Q = np.stack([ww[:, 4 * (r % FEAT) + kx].T for kx in range(4)])             # (4, 16, 32)
    pcat = np.concatenate([P[ky] for ky in range(4)], axis=1)                   # (32, 64)
    # Row-permute so kernel output row a*8+p is original mask row 4p+a => (8,128) slab is
    # exactly the row-major flattening of the (32,32) mask (lane-dense store, no reshape).
    row_perm = np.array([4 * p + a for a in range(4) for p in range(IMG_SIZE // 4)])
    pcat = pcat[row_perm]

    dec_prep = dict(
        nme=prm["no_mask_embed"].reshape(1, EMBED),
        output_tokens=dec["output_tokens"],
        attn_w=attn_w, attn_b=attn_b, attn_wo=attn_wo, attn_bo=attn_bo,
        ln_g=ln_g, ln_b=ln_b,
        mlp_w1=dec["mlp_w1"], mlp_b1=dec["mlp_b1"].reshape(1, MLP_HID),
        mlp_w2=dec["mlp_w2"], mlp_b2=dec["mlp_b2"].reshape(1, EMBED),
        hyp_w12=hyp_w12, hyp_b12=hyp_b12, hyp_w3=hyp_w3, hyp_b3=hyp_b3,
        up_w1=up_w1, up_b1=up_b1, up_w2=up_w2, up_b2=up_b2,
        esel=jnp.asarray(esel), Q=jnp.asarray(Q), Pcat=jnp.asarray(pcat),
    )

    prompt_prep = dict(pe_gauss=prm["pe_gauss"], corner_embed=prm["corner_embed"])
    return dict(enc=enc_prep, dec=dec_prep, prompt=prompt_prep, image_pe=get_dense_pe(prm))


@jax.jit
def medsam_forward(image, boxes, prep):
    """Mirrors MedSAM.forward: encode image, per-(image,box) prompt+decode+resize — all inside
    ONE fused pallas_call with grid=(B,) (boxes handled by an in-kernel loop)."""
    B, C, H, W = image.shape
    Nb = boxes.shape[1]
    gh, gw = H // PATCH, W // PATCH

    # patchify (one-time XLA relayout of the raw input)
    patches = image.reshape(B, C, gh, PATCH, gw, PATCH).transpose(0, 2, 4, 1, 3, 5)
    patches = patches.reshape(B, gh * gw, C * PATCH * PATCH)

    # prompt encoder (frozen, tiny) — random-Fourier box-corner embeddings in glue
    coords = boxes.reshape(B, Nb, 2, 2)
    coords = (coords + 0.5) / IMG_SIZE
    pe = _pe_encode(coords, prep["prompt"]["pe_gauss"])            # (B, Nb, 2, EMBED)
    sparse = pe + prep["prompt"]["corner_embed"][None, None]
    out_tok = jnp.broadcast_to(prep["dec"]["output_tokens"][None, None],
                               (B, Nb, 1 + NUM_MASK_TOKENS, EMBED))
    tokens = jnp.concatenate([out_tok, sparse], axis=2)            # (B, Nb, NUM_TOKENS, EMBED)

    return run_medsam(patches, tokens, prep)                       # (B, Nb, H, W)


# =======================  deterministic parameter init (unchanged structure)  =======================

def init_params(key):
    keys = iter(jax.random.split(key, 256))

    def nk():
        return next(keys)

    def dense(shape, scale=0.02):
        return scale * jax.random.normal(nk(), shape, dtype=F32)

    def attn_params():
        return dict(
            wq=dense((EMBED, EMBED)), bq=jnp.zeros((EMBED,), F32),
            wk=dense((EMBED, EMBED)), bk=jnp.zeros((EMBED,), F32),
            wv=dense((EMBED, EMBED)), bv=jnp.zeros((EMBED,), F32),
            wo=dense((EMBED, EMBED)), bo=jnp.zeros((EMBED,), F32))

    enc_block = dict(
        ln1_g=jnp.ones((EMBED,), F32), ln1_b=jnp.zeros((EMBED,), F32),
        ln2_g=jnp.ones((EMBED,), F32), ln2_b=jnp.zeros((EMBED,), F32),
        mlp_w1=dense((EMBED, MLP_HID)), mlp_b1=jnp.zeros((MLP_HID,), F32),
        mlp_w2=dense((MLP_HID, EMBED)), mlp_b2=jnp.zeros((EMBED,), F32),
        **attn_params())

    enc = dict(
        patch_w=dense((IN_CH * PATCH * PATCH, EMBED)), patch_b=jnp.zeros((EMBED,), F32),
        pos_embed=dense((1, SEQ, EMBED)),
        block=enc_block,
        neck_w=dense((EMBED, EMBED)), neck_b=jnp.zeros((EMBED,), F32))

    prompt = dict(
        pe_gauss=jax.random.normal(nk(), (2, EMBED // 2), dtype=F32),
        corner_embed=dense((2, EMBED)),
        no_mask_embed=dense((EMBED,)))

    dec = dict(
        output_tokens=dense((1 + NUM_MASK_TOKENS, EMBED)),
        self_attn=attn_params(), cross_ti=attn_params(),
        cross_it=attn_params(), final_attn=attn_params(),
        mlp_w1=dense((EMBED, MLP_HID)), mlp_b1=jnp.zeros((MLP_HID,), F32),
        mlp_w2=dense((MLP_HID, EMBED)), mlp_b2=jnp.zeros((EMBED,), F32),
        up1_w=dense((EMBED, (EMBED // 4) * 4)), up1_b=jnp.zeros((EMBED // 4,), F32),
        up2_w=dense((EMBED // 4, (EMBED // 8) * 4)), up2_b=jnp.zeros((EMBED // 8,), F32),
        hyper=[dict(w1=dense((EMBED, EMBED)), b1=jnp.zeros((EMBED,), F32),
                    w2=dense((EMBED, EMBED)), b2=jnp.zeros((EMBED,), F32),
                    w3=dense((EMBED, EMBED // 8)), b3=jnp.zeros((EMBED // 8,), F32))
               for _ in range(NUM_MASK_TOKENS)])
    for name in ("ln1", "ln2", "ln3", "ln4", "ln5"):
        dec[name + "_g"] = jnp.ones((EMBED,), F32)
        dec[name + "_b"] = jnp.zeros((EMBED,), F32)

    return dict(enc=enc, prompt=prompt, dec=dec)


# =======================  main  =======================

if __name__ == "__main__":
    key = jax.random.PRNGKey(0)
    k_img, k_lo, k_delta = jax.random.split(key, 3)

    B, Nb = 2, 2
    image = jax.random.normal(k_img, (B, IN_CH, IMG_SIZE, IMG_SIZE), dtype=F32)
    lo = jax.random.uniform(k_lo, (B, Nb, 2), minval=0.0, maxval=IMG_SIZE / 2, dtype=F32)
    delta = jax.random.uniform(k_delta, (B, Nb, 2), minval=1.0, maxval=IMG_SIZE / 2, dtype=F32)
    boxes = jnp.concatenate([lo, lo + delta], axis=-1)     # (B, Nb, 4) xyxy

    params = init_params(jax.random.PRNGKey(42))
    prep = preprocess_params(params)

    out = medsam_forward(image, boxes, prep)
    out = jax.block_until_ready(out)
    assert out.shape == (B, Nb, IMG_SIZE, IMG_SIZE), out.shape
    assert bool(jnp.all(jnp.isfinite(out)))
    print("KERNEL_OK")
</pallas_src>

<mosaic_0001>
module attributes {stable_mosaic.version = 11 : i64} {
  func.func @_medsam_kernel(%arg0: i32, %arg1: memref<1x16x192xf32, #tpu.memory_space<vmem>>, %arg2: memref<1x2x7x32xf32, #tpu.memory_space<vmem>>, %arg3: memref<16x32xf32, #tpu.memory_space<vmem>>, %arg4: memref<16x32xf32, #tpu.memory_space<vmem>>, %arg5: memref<192x32xf32, #tpu.memory_space<vmem>>, %arg6: memref<1x32xf32, #tpu.memory_space<vmem>>, %arg7: memref<3x32x32xf32, #tpu.memory_space<vmem>>, %arg8: memref<3x1x32xf32, #tpu.memory_space<vmem>>, %arg9: memref<32x32xf32, #tpu.memory_space<vmem>>, %arg10: memref<1x32xf32, #tpu.memory_space<vmem>>, %arg11: memref<2x1x32xf32, #tpu.memory_space<vmem>>, %arg12: memref<2x1x32xf32, #tpu.memory_space<vmem>>, %arg13: memref<32x64xf32, #tpu.memory_space<vmem>>, %arg14: memref<1x64xf32, #tpu.memory_space<vmem>>, %arg15: memref<64x32xf32, #tpu.memory_space<vmem>>, %arg16: memref<1x32xf32, #tpu.memory_space<vmem>>, %arg17: memref<32x32xf32, #tpu.memory_space<vmem>>, %arg18: memref<1x32xf32, #tpu.memory_space<vmem>>, %arg19: memref<1x32xf32, #tpu.memory_space<vmem>>, %arg20: memref<4x3x32x32xf32, #tpu.memory_space<vmem>>, %arg21: memref<4x3x1x32xf32, #tpu.memory_space<vmem>>, %arg22: memref<4x32x32xf32, #tpu.memory_space<vmem>>, %arg23: memref<4x1x32xf32, #tpu.memory_space<vmem>>, %arg24: memref<5x1x32xf32, #tpu.memory_space<vmem>>, %arg25: memref<5x1x32xf32, #tpu.memory_space<vmem>>, %arg26: memref<32x64xf32, #tpu.memory_space<vmem>>, %arg27: memref<1x64xf32, #tpu.memory_space<vmem>>, %arg28: memref<64x32xf32, #tpu.memory_space<vmem>>, %arg29: memref<1x32xf32, #tpu.memory_space<vmem>>, %arg30: memref<2x32x32xf32, #tpu.memory_space<vmem>>, %arg31: memref<2x1x32xf32, #tpu.memory_space<vmem>>, %arg32: memref<32x4xf32, #tpu.memory_space<vmem>>, %arg33: memref<1x4xf32, #tpu.memory_space<vmem>>, %arg34: memref<32x32xf32, #tpu.memory_space<vmem>>, %arg35: memref<1x32xf32, #tpu.memory_space<vmem>>, %arg36: memref<32x64xf32, #tpu.memory_space<vmem>>, %arg37: memref<1x64xf32, #tpu.memory_space<vmem>>, %arg38: memref<64x16xf32, #tpu.memory_space<vmem>>, %arg39: memref<4x16x32xf32, #tpu.memory_space<vmem>>, %arg40: memref<32x64xf32, #tpu.memory_space<vmem>>, %arg41: memref<1x2x8x128xf32, #tpu.memory_space<vmem>>) attributes {dimension_semantics = [#tpu.dimension_semantics<parallel>], iteration_bounds = array<i64: 2>, scalar_prefetch = 0 : i64, scratch_operands = 0 : i64, tpu.core_type = #tpu.core_type<tc>, window_params = [{transform_indices = @transform_0, window_bounds = array<i64: 1, 16, 192>}, {transform_indices = @transform_1, window_bounds = array<i64: 1, 2, 7, 32>}, {pipeline_mode = #tpu.pipeline_mode<synchronous>, transform_indices = @transform_2, window_bounds = array<i64: 16, 32>}, {pipeline_mode = #tpu.pipeline_mode<synchronous>, transform_indices = @transform_3, window_bounds = array<i64: 16, 32>}, {pipeline_mode = #tpu.pipeline_mode<synchronous>, transform_indices = @transform_4, window_bounds = array<i64: 192, 32>}, {pipeline_mode = #tpu.pipeline_mode<synchronous>, transform_indices = @transform_5, window_bounds = array<i64: 1, 32>}, {pipeline_mode = #tpu.pipeline_mode<synchronous>, transform_indices = @transform_6, window_bounds = array<i64: 3, 32, 32>}, {pipeline_mode = #tpu.pipeline_mode<synchronous>, transform_indices = @transform_7, window_bounds = array<i64: 3, 1, 32>}, {pipeline_mode = #tpu.pipeline_mode<synchronous>, transform_indices = @transform_8, window_bounds = array<i64: 32, 32>}, {pipeline_mode = #tpu.pipeline_mode<synchronous>, transform_indices = @transform_9, window_bounds = array<i64: 1, 32>}, {pipeline_mode = #tpu.pipeline_mode<synchronous>, transform_indices = @transform_10, window_bounds = array<i64: 2, 1, 32>}, {pipeline_mode = #tpu.pipeline_mode<synchronous>, transform_indices = @transform_11, window_bounds = array<i64: 2, 1, 32>}, {pipeline_mode = #tpu.pipeline_mode<synchronous>, transform_indices = @transform_12, window_bounds = array<i64: 32, 64>}, {pipeline_mode = #tpu.pipeline_mode<synchronous>, transform_indices = @transform_13, window_bounds = array<i64: 1, 64>}, {pipeline_mode = #tpu.pipeline_mode<synchronous>, transform_indices = @transform_14, window_bounds = array<i64: 64, 32>}, {pipeline_mode = #tpu.pipeline_mode<synchronous>, transform_indices = @transform_15, window_bounds = array<i64: 1, 32>}, {pipeline_mode = #tpu.pipeline_mode<synchronous>, transform_indices = @transform_16, window_bounds = array<i64: 32, 32>}, {pipeline_mode = #tpu.pipeline_mode<synchronous>, transform_indices = @transform_17, window_bounds = array<i64: 1, 32>}, {pipeline_mode = #tpu.pipeline_mode<synchronous>, transform_indices = @transform_18, window_bounds = array<i64: 1, 32>}, {pipeline_mode = #tpu.pipeline_mode<synchronous>, transform_indices = @transform_19, window_bounds = array<i64: 4, 3, 32, 32>}, {pipeline_mode = #tpu.pipeline_mode<synchronous>, transform_indices = @transform_20, window_bounds = array<i64: 4, 3, 1, 32>}, {pipeline_mode = #tpu.pipeline_mode<synchronous>, transform_indices = @transform_21, window_bounds = array<i64: 4, 32, 32>}, {pipeline_mode = #tpu.pipeline_mode<synchronous>, transform_indices = @transform_22, window_bounds = array<i64: 4, 1, 32>}, {pipeline_mode = #tpu.pipeline_mode<synchronous>, transform_indices = @transform_23, window_bounds = array<i64: 5, 1, 32>}, {pipeline_mode = #tpu.pipeline_mode<synchronous>, transform_indices = @transform_24, window_bounds = array<i64: 5, 1, 32>}, {pipeline_mode = #tpu.pipeline_mode<synchronous>, transform_indices = @transform_25, window_bounds = array<i64: 32, 64>}, {pipeline_mode = #tpu.pipeline_mode<synchronous>, transform_indices = @transform_26, window_bounds = array<i64: 1, 64>}, {pipeline_mode = #tpu.pipeline_mode<synchronous>, transform_indices = @transform_27, window_bounds = array<i64: 64, 32>}, {pipeline_mode = #tpu.pipeline_mode<synchronous>, transform_indices = @transform_28, window_bounds = array<i64: 1, 32>}, {pipeline_mode = #tpu.pipeline_mode<synchronous>, transform_indices = @transform_29, window_bounds = array<i64: 2, 32, 32>}, {pipeline_mode = #tpu.pipeline_mode<synchronous>, transform_indices = @transform_30, window_bounds = array<i64: 2, 1, 32>}, {pipeline_mode = #tpu.pipeline_mode<synchronous>, transform_indices = @transform_31, window_bounds = array<i64: 32, 4>}, {pipeline_mode = #tpu.pipeline_mode<synchronous>, transform_indices = @transform_32, window_bounds = array<i64: 1, 4>}, {pipeline_mode = #tpu.pipeline_mode<synchronous>, transform_indices = @transform_33, window_bounds = array<i64: 32, 32>}, {pipeline_mode = #tpu.pipeline_mode<synchronous>, transform_indices = @transform_34, window_bounds = array<i64: 1, 32>}, {pipeline_mode = #tpu.pipeline_mode<synchronous>, transform_indices = @transform_35, window_bounds = array<i64: 32, 64>}, {pipeline_mode = #tpu.pipeline_mode<synchronous>, transform_indices = @transform_36, window_bounds = array<i64: 1, 64>}, {pipeline_mode = #tpu.pipeline_mode<synchronous>, transform_indices = @transform_37, window_bounds = array<i64: 64, 16>}, {pipeline_mode = #tpu.pipeline_mode<synchronous>, transform_indices = @transform_38, window_bounds = array<i64: 4, 16, 32>}, {pipeline_mode = #tpu.pipeline_mode<synchronous>, transform_indices = @transform_39, window_bounds = array<i64: 32, 64>}, {transform_indices = @transform_40, window_bounds = array<i64: 1, 2, 8, 128>}]} {
    %c0 = arith.constant 0 : index
    %c0_0 = arith.constant 0 : index
    %c0_1 = arith.constant 0 : index
    %0 = vector.load %arg1[%c0, %c0_0, %c0_1] : memref<1x16x192xf32, #tpu.memory_space<vmem>>, vector<1x16x192xf32>
    %1 = vector.shape_cast %0 : vector<1x16x192xf32> to vector<16x192xf32>
    %c0_2 = arith.constant 0 : index
    %c0_3 = arith.constant 0 : index
    %2 = vector.load %arg5[%c0_2, %c0_3] : memref<192x32xf32, #tpu.memory_space<vmem>>, vector<192x32xf32>
    %cst = arith.constant dense<0.000000e+00> : vector<16x32xf32>
    %3 = tpu.matmul %1, %2, %cst {dimension_numbers = #tpu.dot_dimension_numbers<[1], [0], [0], [1], [0, 0, 1, 1], [], []>} : vector<16x192xf32>, vector<192x32xf32>, vector<16x32xf32> -> vector<16x32xf32>
    %c0_4 = arith.constant 0 : index
    %c0_5 = arith.constant 0 : index
    %4 = vector.load %arg6[%c0_4, %c0_5] : memref<1x32xf32, #tpu.memory_space<vmem>>, vector<1x32xf32>
    %5 = vector.broadcast %4 : vector<1x32xf32> to vector<16x32xf32>
    %6 = arith.addf %3, %5 : vector<16x32xf32>
    %c0_6 = arith.constant 0 : index
    %c0_7 = arith.constant 0 : index
    %7 = vector.load %arg4[%c0_6, %c0_7] : memref<16x32xf32, #tpu.memory_space<vmem>>, vector<16x32xf32>
    %8 = arith.addf %6, %7 : vector<16x32xf32>
    %c0_8 = arith.constant 0 : index
    %c0_9 = arith.constant 0 : index
    %c0_10 = arith.constant 0 : index
    %9 = vector.load %arg11[%c0_8, %c0_9, %c0_10] : memref<2x1x32xf32, #tpu.memory_space<vmem>>, vector<1x1x32xf32>
    %10 = vector.shape_cast %9 : vector<1x1x32xf32> to vector<1x32xf32>
    %c0_11 = arith.constant 0 : index
    %c0_12 = arith.constant 0 : index
    %c0_13 = arith.constant 0 : index
    %11 = vector.load %arg12[%c0_11, %c0_12, %c0_13] : memref<2x1x32xf32, #tpu.memory_space<vmem>>, vector<1x1x32xf32>
    %12 = vector.shape_cast %11 : vector<1x1x32xf32> to vector<1x32xf32>
    %cst_14 = arith.constant dense<0.000000e+00> : vector<16xf32>
    %13 = vector.multi_reduction <add>, %8, %cst_14 [1] : vector<16x32xf32> to vector<16xf32>
    %14 = vector.shape_cast %13 : vector<16xf32> to vector<16x1xf32>
    %cst_15 = arith.constant 3.200000e+01 : f32
    %15 = vector.broadcast %cst_15 : f32 to vector<16x1xf32>
    %16 = arith.divf %14, %15 : vector<16x1xf32>
    %17 = vector.broadcast %16 : vector<16x1xf32> to vector<16x32xf32>
    %18 = arith.subf %8, %17 : vector<16x32xf32>
    %19 = arith.mulf %18, %18 : vector<16x32xf32>
    %cst_16 = arith.constant dense<0.000000e+00> : vector<16xf32>
    %20 = vector.multi_reduction <add>, %19, %cst_16 [1] : vector<16x32xf32> to vector<16xf32>
    %21 = vector.shape_cast %20 : vector<16xf32> to vector<16x1xf32>
    %cst_17 = arith.constant 3.200000e+01 : f32
    %22 = vector.broadcast %cst_17 : f32 to vector<16x1xf32>
    %23 = arith.divf %21, %22 : vector<16x1xf32>
    %24 = vector.broadcast %16 : vector<16x1xf32> to vector<16x32xf32>
    %25 = arith.subf %8, %24 : vector<16x32xf32>
    %cst_18 = arith.constant 9.99999974E-6 : f32
    %26 = vector.broadcast %cst_18 : f32 to vector<16x1xf32>
    %27 = arith.addf %23, %26 : vector<16x1xf32>
    %28 = math.rsqrt %27 : vector<16x1xf32>
    %29 = vector.broadcast %28 : vector<16x1xf32> to vector<16x32xf32>
    %30 = arith.mulf %25, %29 : vector<16x32xf32>
    %31 = vector.broadcast %10 : vector<1x32xf32> to vector<16x32xf32>
    %32 = arith.mulf %30, %31 : vector<16x32xf32>
    %33 = vector.broadcast %12 : vector<1x32xf32> to vector<16x32xf32>
    %34 = arith.addf %32, %33 : vector<16x32xf32>
    %c0_19 = arith.constant 0 : index
    %c0_20 = arith.constant 0 : index
    %c0_21 = arith.constant 0 : index
    %35 = vector.load %arg7[%c0_19, %c0_20, %c0_21] : memref<3x32x32xf32, #tpu.memory_space<vmem>>, vector<1x32x32xf32>
    %36 = vector.shape_cast %35 : vector<1x32x32xf32> to vector<32x32xf32>
    %cst_22 = arith.constant dense<0.000000e+00> : vector<16x32xf32>
    %37 = tpu.matmul %34, %36, %cst_22 {dimension_numbers = #tpu.dot_dimension_numbers<[1], [0], [0], [1], [0, 0, 1, 1], [], []>} : vector<16x32xf32>, vector<32x32xf32>, vector<16x32xf32> -> vector<16x32xf32>
    %c0_23 = arith.constant 0 : index
    %c0_24 = arith.constant 0 : index
    %c0_25 = arith.constant 0 : index
    %38 = vector.load %arg8[%c0_23, %c0_24, %c0_25] : memref<3x1x32xf32, #tpu.memory_space<vmem>>, vector<1x1x32xf32>
    %39 = vector.shape_cast %38 : vector<1x1x32xf32> to vector<1x32xf32>
    %40 = vector.broadcast %39 : vector<1x32xf32> to vector<16x32xf32>
    %41 = arith.addf %37, %40 : vector<16x32xf32>
    %c1 = arith.constant 1 : index
    %c0_26 = arith.constant 0 : index
    %c0_27 = arith.constant 0 : index
    %42 = vector.load %arg7[%c1, %c0_26, %c0_27] : memref<3x32x32xf32, #tpu.memory_space<vmem>>, vector<1x32x32xf32>
    %43 = vector.shape_cast %42 : vector<1x32x32xf32> to vector<32x32xf32>
    %cst_28 = arith.constant dense<0.000000e+00> : vector<16x32xf32>
    %44 = tpu.matmul %34, %43, %cst_28 {dimension_numbers = #tpu.dot_dimension_numbers<[1], [0], [0], [1], [0, 0, 1, 1], [], []>} : vector<16x32xf32>, vector<32x32xf32>, vector<16x32xf32> -> vector<16x32xf32>
    %c1_29 = arith.constant 1 : index
    %c0_30 = arith.constant 0 : index
    %c0_31 = arith.constant 0 : index
    %45 = vector.load %arg8[%c1_29, %c0_30, %c0_31] : memref<3x1x32xf32, #tpu.memory_space<vmem>>, vector<1x1x32xf32>
    %46 = vector.shape_cast %45 : vector<1x1x32xf32> to vector<1x32xf32>
    %47 = vector.broadcast %46 : vector<1x32xf32> to vector<16x32xf32>
    %48 = arith.addf %44, %47 : vector<16x32xf32>
    %c2 = arith.constant 2 : index
    %c0_32 = arith.constant 0 : index
    %c0_33 = arith.constant 0 : index
    %49 = vector.load %arg7[%c2, %c0_32, %c0_33] : memref<3x32x32xf32, #tpu.memory_space<vmem>>, vector<1x32x32xf32>
    %50 = vector.shape_cast %49 : vector<1x32x32xf32> to vector<32x32xf32>
    %cst_34 = arith.constant dense<0.000000e+00> : vector<16x32xf32>
    %51 = tpu.matmul %34, %50, %cst_34 {dimension_numbers = #tpu.dot_dimension_numbers<[1], [0], [0], [1], [0, 0, 1, 1], [], []>} : vector<16x32xf32>, vector<32x32xf32>, vector<16x32xf32> -> vector<16x32xf32>
    %c2_35 = arith.constant 2 : index
    %c0_36 = arith.constant 0 : index
    %c0_37 = arith.constant 0 : index
    %52 = vector.load %arg8[%c2_35, %c0_36, %c0_37] : memref<3x1x32xf32, #tpu.memory_space<vmem>>, vector<1x1x32xf32>
    %53 = vector.shape_cast %52 : vector<1x1x32xf32> to vector<1x32xf32>
    %54 = vector.broadcast %53 : vector<1x32xf32> to vector<16x32xf32>
    %55 = arith.addf %51, %54 : vector<16x32xf32>
    %c0_38 = arith.constant 0 : index
    %c0_39 = arith.constant 0 : index
    %56 = vector.load %arg9[%c0_38, %c0_39] : memref<32x32xf32, #tpu.memory_space<vmem>>, vector<32x32xf32>
    %c0_40 = arith.constant 0 : index
    %c0_41 = arith.constant 0 : index
    %57 = vector.load %arg10[%c0_40, %c0_41] : memref<1x32xf32, #tpu.memory_space<vmem>>, vector<1x32xf32>
    %cst_42 = arith.constant dense<0.000000e+00> : vector<16x16xf32>
    %58 = tpu.matmul %41, %48, %cst_42 {dimension_numbers = #tpu.dot_dimension_numbers<[1], [1], [0], [0], [0, 0, 1, 0], [], []>} : vector<16x32xf32>, vector<16x32xf32>, vector<16x16xf32> -> vector<16x16xf32>
    %cst_43 = arith.constant dense<0xFF800000> : vector<16xf32>
    %59 = vector.multi_reduction <maximumf>, %58, %cst_43 [1] : vector<16x16xf32> to vector<16xf32>
    %60 = vector.shape_cast %59 : vector<16xf32> to vector<16x1xf32>
    %61 = vector.broadcast %60 : vector<16x1xf32> to vector<16x16xf32>
    %62 = arith.subf %58, %61 : vector<16x16xf32>
    %63 = math.exp %62 : vector<16x16xf32>
    %cst_44 = arith.constant dense<0.000000e+00> : vector<16xf32>
    %64 = vector.multi_reduction <add>, %63, %cst_44 [1] : vector<16x16xf32> to vector<16xf32>
    %65 = vector.shape_cast %64 : vector<16xf32> to vector<16x1xf32>
    %66 = tpu.reciprocal %65 {approx = true} : vector<16x1xf32> -> vector<16x1xf32>
    %67 = vector.broadcast %66 : vector<16x1xf32> to vector<16x16xf32>
    %68 = arith.mulf %63, %67 : vector<16x16xf32>
    %cst_45 = arith.constant dense<0.000000e+00> : vector<16x32xf32>
    %69 = tpu.matmul %68, %55, %cst_45 {dimension_numbers = #tpu.dot_dimension_numbers<[1], [0], [0], [1], [0, 0, 1, 1], [], []>} : vector<16x16xf32>, vector<16x32xf32>, vector<16x32xf32> -> vector<16x32xf32>
    %cst_46 = arith.constant dense<0.000000e+00> : vector<16x32xf32>
    %70 = tpu.matmul %69, %56, %cst_46 {dimension_numbers = #tpu.dot_dimension_numbers<[1], [0], [0], [1], [0, 0, 1, 1], [], []>} : vector<16x32xf32>, vector<32x32xf32>, vector<16x32xf32> -> vector<16x32xf32>
    %71 = vector.broadcast %57 : vector<1x32xf32> to vector<16x32xf32>
    %72 = arith.addf %70, %71 : vector<16x32xf32>
    %73 = arith.addf %8, %72 : vector<16x32xf32>
    %c1_47 = arith.constant 1 : index
    %c0_48 = arith.constant 0 : index
    %c0_49 = arith.constant 0 : index
    %74 = vector.load %arg11[%c1_47, %c0_48, %c0_49] : memref<2x1x32xf32, #tpu.memory_space<vmem>>, vector<1x1x32xf32>
    %75 = vector.shape_cast %74 : vector<1x1x32xf32> to vector<1x32xf32>
    %c1_50 = arith.constant 1 : index
    %c0_51 = arith.constant 0 : index
    %c0_52 = arith.constant 0 : index
    %76 = vector.load %arg12[%c1_50, %c0_51, %c0_52] : memref<2x1x32xf32, #tpu.memory_space<vmem>>, vector<1x1x32xf32>
    %77 = vector.shape_cast %76 : vector<1x1x32xf32> to vector<1x32xf32>
    %cst_53 = arith.constant dense<0.000000e+00> : vector<16xf32>
    %78 = vector.multi_reduction <add>, %73, %cst_53 [1] : vector<16x32xf32> to vector<16xf32>
    %79 = vector.shape_cast %78 : vector<16xf32> to vector<16x1xf32>
    %cst_54 = arith.constant 3.200000e+01 : f32
    %80 = vector.broadcast %cst_54 : f32 to vector<16x1xf32>
    %81 = arith.divf %79, %80 : vector<16x1xf32>
    %82 = vector.broadcast %81 : vector<16x1xf32> to vector<16x32xf32>
    %83 = arith.subf %73, %82 : vector<16x32xf32>
    %84 = arith.mulf %83, %83 : vector<16x32xf32>
    %cst_55 = arith.constant dense<0.000000e+00> : vector<16xf32>
    %85 = vector.multi_reduction <add>, %84, %cst_55 [1] : vector<16x32xf32> to vector<16xf32>
    %86 = vector.shape_cast %85 : vector<16xf32> to vector<16x1xf32>
    %cst_56 = arith.constant 3.200000e+01 : f32
    %87 = vector.broadcast %cst_56 : f32 to vector<16x1xf32>
    %88 = arith.divf %86, %87 : vector<16x1xf32>
    %89 = vector.broadcast %81 : vector<16x1xf32> to vector<16x32xf32>
    %90 = arith.subf %73, %89 : vector<16x32xf32>
    %cst_57 = arith.constant 9.99999974E-6 : f32
    %91 = vector.broadcast %cst_57 : f32 to vector<16x1xf32>
    %92 = arith.addf %88, %91 : vector<16x1xf32>
    %93 = math.rsqrt %92 : vector<16x1xf32>
    %94 = vector.broadcast %93 : vector<16x1xf32> to vector<16x32xf32>
    %95 = arith.mulf %90, %94 : vector<16x32xf32>
    %96 = vector.broadcast %75 : vector<1x32xf32> to vector<16x32xf32>
    %97 = arith.mulf %95, %96 : vector<16x32xf32>
    %98 = vector.broadcast %77 : vector<1x32xf32> to vector<16x32xf32>
    %99 = arith.addf %97, %98 : vector<16x32xf32>
    %c0_58 = arith.constant 0 : index
    %c0_59 = arith.constant 0 : index
    %100 = vector.load %arg13[%c0_58, %c0_59] : memref<32x64xf32, #tpu.memory_space<vmem>>, vector<32x64xf32>
    %cst_60 = arith.constant dense<0.000000e+00> : vector<16x64xf32>
    %101 = tpu.matmul %99, %100, %cst_60 {dimension_numbers = #tpu.dot_dimension_numbers<[1], [0], [0], [1], [0, 0, 1, 1], [], []>} : vector<16x32xf32>, vector<32x64xf32>, vector<16x64xf32> -> vector<16x64xf32>
    %c0_61 = arith.constant 0 : index
    %c0_62 = arith.constant 0 : index
    %102 = vector.load %arg14[%c0_61, %c0_62] : memref<1x64xf32, #tpu.memory_space<vmem>>, vector<1x64xf32>
    %103 = vector.broadcast %102 : vector<1x64xf32> to vector<16x64xf32>
    %104 = arith.addf %101, %103 : vector<16x64xf32>
    %105 = arith.mulf %104, %104 : vector<16x64xf32>
    %106 = arith.mulf %104, %105 : vector<16x64xf32>
    %cst_63 = arith.constant 4.471500e-02 : f32
    %107 = vector.broadcast %cst_63 : f32 to vector<16x64xf32>
    %108 = arith.mulf %107, %106 : vector<16x64xf32>
    %109 = arith.addf %104, %108 : vector<16x64xf32>
    %cst_64 = arith.constant 0.797884583 : f32
    %110 = vector.broadcast %cst_64 : f32 to vector<16x64xf32>
    %111 = arith.mulf %110, %109 : vector<16x64xf32>
    %112 = math.tanh %111 : vector<16x64xf32>
    %cst_65 = arith.constant 1.000000e+00 : f32
    %113 = vector.broadcast %cst_65 : f32 to vector<16x64xf32>
    %114 = arith.addf %113, %112 : vector<16x64xf32>
    %cst_66 = arith.constant 5.000000e-01 : f32
    %115 = vector.broadcast %cst_66 : f32 to vector<16x64xf32>
    %116 = arith.mulf %115, %114 : vector<16x64xf32>
    %117 = arith.mulf %104, %116 : vector<16x64xf32>
    %c0_67 = arith.constant 0 : index
    %c0_68 = arith.constant 0 : index
    %118 = vector.load %arg15[%c0_67, %c0_68] : memref<64x32xf32, #tpu.memory_space<vmem>>, vector<64x32xf32>
    %cst_69 = arith.constant dense<0.000000e+00> : vector<16x32xf32>
    %119 = tpu.matmul %117, %118, %cst_69 {dimension_numbers = #tpu.dot_dimension_numbers<[1], [0], [0], [1], [0, 0, 1, 1], [], []>} : vector<16x64xf32>, vector<64x32xf32>, vector<16x32xf32> -> vector<16x32xf32>
    %120 = arith.addf %73, %119 : vector<16x32xf32>
    %c0_70 = arith.constant 0 : index
    %c0_71 = arith.constant 0 : index
    %121 = vector.load %arg16[%c0_70, %c0_71] : memref<1x32xf32, #tpu.memory_space<vmem>>, vector<1x32xf32>
    %122 = vector.broadcast %121 : vector<1x32xf32> to vector<16x32xf32>
    %123 = arith.addf %120, %122 : vector<16x32xf32>
    %c0_72 = arith.constant 0 : index
    %c0_73 = arith.constant 0 : index
    %124 = vector.load %arg17[%c0_72, %c0_73] : memref<32x32xf32, #tpu.memory_space<vmem>>, vector<32x32xf32>
    %cst_74 = arith.constant dense<0.000000e+00> : vector<16x32xf32>
    %125 = tpu.matmul %123, %124, %cst_74 {dimension_numbers = #tpu.dot_dimension_numbers<[1], [0], [0], [1], [0, 0, 1, 1], [], []>} : vector<16x32xf32>, vector<32x32xf32>, vector<16x32xf32> -> vector<16x32xf32>
    %c0_75 = arith.constant 0 : index
    %c0_76 = arith.constant 0 : index
    %126 = vector.load %arg18[%c0_75, %c0_76] : memref<1x32xf32, #tpu.memory_space<vmem>>, vector<1x32xf32>
    %127 = vector.broadcast %126 : vector<1x32xf32> to vector<16x32xf32>
    %128 = arith.addf %125, %127 : vector<16x32xf32>
    %c0_77 = arith.constant 0 : index
    %c0_78 = arith.constant 0 : index
    %129 = vector.load %arg3[%c0_77, %c0_78] : memref<16x32xf32, #tpu.memory_space<vmem>>, vector<16x32xf32>
    %c0_79 = arith.constant 0 : index
    %c0_80 = arith.constant 0 : index
    %130 = vector.load %arg19[%c0_79, %c0_80] : memref<1x32xf32, #tpu.memory_space<vmem>>, vector<1x32xf32>
    %131 = vector.broadcast %130 : vector<1x32xf32> to vector<16x32xf32>
    %132 = arith.addf %128, %131 : vector<16x32xf32>
    %133 = arith.addf %132, %129 : vector<16x32xf32>
    %c1_81 = arith.constant 1 : index
    %c1_82 = arith.constant 1 : index
    %c0_83 = arith.constant 0 : index
    %c0_84 = arith.constant 0 : index
    %134 = vector.load %arg20[%c1_81, %c1_82, %c0_83, %c0_84] : memref<4x3x32x32xf32, #tpu.memory_space<vmem>>, vector<1x1x32x32xf32>
    %135 = vector.shape_cast %134 : vector<1x1x32x32xf32> to vector<32x32xf32>
    %cst_85 = arith.constant dense<0.000000e+00> : vector<16x32xf32>
    %136 = tpu.matmul %133, %135, %cst_85 {dimension_numbers = #tpu.dot_dimension_numbers<[1], [0], [0], [1], [0, 0, 1, 1], [], []>} : vector<16x32xf32>, vector<32x32xf32>, vector<16x32xf32> -> vector<16x32xf32>
    %c1_86 = arith.constant 1 : index
    %c1_87 = arith.constant 1 : index
    %c0_88 = arith.constant 0 : index
    %c0_89 = arith.constant 0 : index
    %137 = vector.load %arg21[%c1_86, %c1_87, %c0_88, %c0_89] : memref<4x3x1x32xf32, #tpu.memory_space<vmem>>, vector<1x1x1x32xf32>
    %138 = vector.shape_cast %137 : vector<1x1x1x32xf32> to vector<1x32xf32>
    %139 = vector.broadcast %138 : vector<1x32xf32> to vector<16x32xf32>
    %140 = arith.addf %136, %139 : vector<16x32xf32>
    %c1_90 = arith.constant 1 : index
    %c2_91 = arith.constant 2 : index
    %c0_92 = arith.constant 0 : index
    %c0_93 = arith.constant 0 : index
    %141 = vector.load %arg20[%c1_90, %c2_91, %c0_92, %c0_93] : memref<4x3x32x32xf32, #tpu.memory_space<vmem>>, vector<1x1x32x32xf32>
    %142 = vector.shape_cast %141 : vector<1x1x32x32xf32> to vector<32x32xf32>
    %cst_94 = arith.constant dense<0.000000e+00> : vector<16x32xf32>
    %143 = tpu.matmul %132, %142, %cst_94 {dimension_numbers = #tpu.dot_dimension_numbers<[1], [0], [0], [1], [0, 0, 1, 1], [], []>} : vector<16x32xf32>, vector<32x32xf32>, vector<16x32xf32> -> vector<16x32xf32>
    %c1_95 = arith.constant 1 : index
    %c2_96 = arith.constant 2 : index
    %c0_97 = arith.constant 0 : index
    %c0_98 = arith.constant 0 : index
    %144 = vector.load %arg21[%c1_95, %c2_96, %c0_97, %c0_98] : memref<4x3x1x32xf32, #tpu.memory_space<vmem>>, vector<1x1x1x32xf32>
    %145 = vector.shape_cast %144 : vector<1x1x1x32xf32> to vector<1x32xf32>
    %146 = vector.broadcast %145 : vector<1x32xf32> to vector<16x32xf32>
    %147 = arith.addf %143, %146 : vector<16x32xf32>
    %c2_99 = arith.constant 2 : index
    %c0_100 = arith.constant 0 : index
    %c0_101 = arith.constant 0 : index
    %c0_102 = arith.constant 0 : index
    %148 = vector.load %arg20[%c2_99, %c0_100, %c0_101, %c0_102] : memref<4x3x32x32xf32, #tpu.memory_space<vmem>>, vector<1x1x32x32xf32>
    %149 = vector.shape_cast %148 : vector<1x1x32x32xf32> to vector<32x32xf32>
    %cst_103 = arith.constant dense<0.000000e+00> : vector<16x32xf32>
    %150 = tpu.matmul %133, %149, %cst_103 {dimension_numbers = #tpu.dot_dimension_numbers<[1], [0], [0], [1], [0, 0, 1, 1], [], []>} : vector<16x32xf32>, vector<32x32xf32>, vector<16x32xf32> -> vector<16x32xf32>
    %c2_104 = arith.constant 2 : index
    %c0_105 = arith.constant 0 : index
    %c0_106 = arith.constant 0 : index
    %c0_107 = arith.constant 0 : index
    %151 = vector.load %arg21[%c2_104, %c0_105, %c0_106, %c0_107] : memref<4x3x1x32xf32, #tpu.memory_space<vmem>>, vector<1x1x1x32xf32>
    %152 = vector.shape_cast %151 : vector<1x1x1x32xf32> to vector<1x32xf32>
    %153 = vector.broadcast %152 : vector<1x32xf32> to vector<16x32xf32>
    %154 = arith.addf %150, %153 : vector<16x32xf32>
    %c0_108 = arith.constant 0 : index
    %c0_109 = arith.constant 0 : index
    %c0_110 = arith.constant 0 : index
    %c0_111 = arith.constant 0 : index
    %155 = vector.load %arg2[%c0_108, %c0_109, %c0_110, %c0_111] : memref<1x2x7x32xf32, #tpu.memory_space<vmem>>, vector<1x1x7x32xf32>
    %156 = vector.shape_cast %155 : vector<1x1x7x32xf32> to vector<7x32xf32>
    %c0_112 = arith.constant 0 : index
    %c0_113 = arith.constant 0 : index
    %c0_114 = arith.constant 0 : index
    %c0_115 = arith.constant 0 : index
    %157 = vector.load %arg20[%c0_112, %c0_113, %c0_114, %c0_115] : memref<4x3x32x32xf32, #tpu.memory_space<vmem>>, vector<1x1x32x32xf32>
    %158 = vector.shape_cast %157 : vector<1x1x32x32xf32> to vector<32x32xf32>
    %cst_116 = arith.constant dense<0.000000e+00> : vector<7x32xf32>
    %159 = tpu.matmul %156, %158, %cst_116 {dimension_numbers = #tpu.dot_dimension_numbers<[1], [0], [0], [1], [0, 0, 1, 1], [], []>} : vector<7x32xf32>, vector<32x32xf32>, vector<7x32xf32> -> vector<7x32xf32>
    %c0_117 = arith.constant 0 : index
    %c0_118 = arith.constant 0 : index
    %c0_119 = arith.constant 0 : index
    %c0_120 = arith.constant 0 : index
    %160 = vector.load %arg21[%c0_117, %c0_118, %c0_119, %c0_120] : memref<4x3x1x32xf32, #tpu.memory_space<vmem>>, vector<1x1x1x32xf32>
    %161 = vector.shape_cast %160 : vector<1x1x1x32xf32> to vector<1x32xf32>
    %162 = vector.broadcast %161 : vector<1x32xf32> to vector<7x32xf32>
    %163 = arith.addf %159, %162 : vector<7x32xf32>
    %c0_121 = arith.constant 0 : index
    %c1_122 = arith.constant 1 : index
    %c0_123 = arith.constant 0 : index
    %c0_124 = arith.constant 0 : index
    %164 = vector.load %arg20[%c0_121, %c1_122, %c0_123, %c0_124] : memref<4x3x32x32xf32, #tpu.memory_space<vmem>>, vector<1x1x32x32xf32>
    %165 = vector.shape_cast %164 : vector<1x1x32x32xf32> to vector<32x32xf32>
    %cst_125 = arith.constant dense<0.000000e+00> : vector<7x32xf32>
    %166 = tpu.matmul %156, %165, %cst_125 {dimension_numbers = #tpu.dot_dimension_numbers<[1], [0], [0], [1], [0, 0, 1, 1], [], []>} : vector<7x32xf32>, vector<32x32xf32>, vector<7x32xf32> -> vector<7x32xf32>
    %c0_126 = arith.constant 0 : index
    %c1_127 = arith.constant 1 : index
    %c0_128 = arith.constant 0 : index
    %c0_129 = arith.constant 0 : index
    %167 = vector.load %arg21[%c0_126, %c1_127, %c0_128, %c0_129] : memref<4x3x1x32xf32, #tpu.memory_space<vmem>>, vector<1x1x1x32xf32>
    %168 = vector.shape_cast %167 : vector<1x1x1x32xf32> to vector<1x32xf32>
    %169 = vector.broadcast %168 : vector<1x32xf32> to vector<7x32xf32>
    %170 = arith.addf %166, %169 : vector<7x32xf32>
    %c0_130 = arith.constant 0 : index
    %c2_131 = arith.constant 2 : index
    %c0_132 = arith.constant 0 : index
    %c0_133 = arith.constant 0 : index
    %171 = vector.load %arg20[%c0_130, %c2_131, %c0_132, %c0_133] : memref<4x3x32x32xf32, #tpu.memory_space<vmem>>, vector<1x1x32x32xf32>
    %172 = vector.shape_cast %171 : vector<1x1x32x32xf32> to vector<32x32xf32>
    %cst_134 = arith.constant dense<0.000000e+00> : vector<7x32xf32>
    %173 = tpu.matmul %156, %172, %cst_134 {dimension_numbers = #tpu.dot_dimension_numbers<[1], [0], [0], [1], [0, 0, 1, 1], [], []>} : vector<7x32xf32>, vector<32x32xf32>, vector<7x32xf32> -> vector<7x32xf32>
    %c0_135 = arith.constant 0 : index
    %c2_136 = arith.constant 2 : index
    %c0_137 = arith.constant 0 : index
    %c0_138 = arith.constant 0 : index
    %174 = vector.load %arg21[%c0_135, %c2_136, %c0_137, %c0_138] : memref<4x3x1x32xf32, #tpu.memory_space<vmem>>, vector<1x1x1x32xf32>
    %175 = vector.shape_cast %174 : vector<1x1x1x32xf32> to vector<1x32xf32>
    %176 = vector.broadcast %175 : vector<1x32xf32> to vector<7x32xf32>
    %177 = arith.addf %173, %176 : vector<7x32xf32>
    %c0_139 = arith.constant 0 : index
    %c0_140 = arith.constant 0 : index
    %c0_141 = arith.constant 0 : index
    %178 = vector.load %arg22[%c0_139, %c0_140, %c0_141] : memref<4x32x32xf32, #tpu.memory_space<vmem>>, vector<1x32x32xf32>
    %179 = vector.shape_cast %178 : vector<1x32x32xf32> to vector<32x32xf32>
    %c0_142 = arith.constant 0 : index
    %c0_143 = arith.constant 0 : index
    %c0_144 = arith.constant 0 : index
    %180 = vector.load %arg23[%c0_142, %c0_143, %c0_144] : memref<4x1x32xf32, #tpu.memory_space<vmem>>, vector<1x1x32xf32>
    %181 = vector.shape_cast %180 : vector<1x1x32xf32> to vector<1x32xf32>
    %cst_145 = arith.constant dense<0.000000e+00> : vector<7x7xf32>
    %182 = tpu.matmul %163, %170, %cst_145 {dimension_numbers = #tpu.dot_dimension_numbers<[1], [1], [0], [0], [0, 0, 1, 0], [], []>} : vector<7x32xf32>, vector<7x32xf32>, vector<7x7xf32> -> vector<7x7xf32>
    %cst_146 = arith.constant dense<0xFF800000> : vector<7xf32>
    %183 = vector.multi_reduction <maximumf>, %182, %cst_146 [1] : vector<7x7xf32> to vector<7xf32>
    %184 = vector.shape_cast %183 : vector<7xf32> to vector<7x1xf32>
    %185 = vector.broadcast %184 : vector<7x1xf32> to vector<7x7xf32>
    %186 = arith.subf %182, %185 : vector<7x7xf32>
    %187 = math.exp %186 : vector<7x7xf32>
    %cst_147 = arith.constant dense<0.000000e+00> : vector<7xf32>
    %188 = vector.multi_reduction <add>, %187, %cst_147 [1] : vector<7x7xf32> to vector<7xf32>
    %189 = vector.shape_cast %188 : vector<7xf32> to vector<7x1xf32>
    %190 = tpu.reciprocal %189 {approx = true} : vector<7x1xf32> -> vector<7x1xf32>
    %191 = vector.broadcast %190 : vector<7x1xf32> to vector<7x7xf32>
    %192 = arith.mulf %187, %191 : vector<7x7xf32>
    %cst_148 = arith.constant dense<0.000000e+00> : vector<7x32xf32>
    %193 = tpu.matmul %192, %177, %cst_148 {dimension_numbers = #tpu.dot_dimension_numbers<[1], [0], [0], [1], [0, 0, 1, 1], [], []>} : vector<7x7xf32>, vector<7x32xf32>, vector<7x32xf32> -> vector<7x32xf32>
    %cst_149 = arith.constant dense<0.000000e+00> : vector<7x32xf32>
    %194 = tpu.matmul %193, %179, %cst_149 {dimension_numbers = #tpu.dot_dimension_numbers<[1], [0], [0], [1], [0, 0, 1, 1], [], []>} : vector<7x32xf32>, vector<32x32xf32>, vector<7x32xf32> -> vector<7x32xf32>
    %195 = vector.broadcast %181 : vector<1x32xf32> to vector<7x32xf32>
    %196 = arith.addf %194, %195 : vector<7x32xf32>
    %197 = arith.addf %156, %196 : vector<7x32xf32>
    %c0_150 = arith.constant 0 : index
    %c0_151 = arith.constant 0 : index
    %c0_152 = arith.constant 0 : index
    %198 = vector.load %arg24[%c0_150, %c0_151, %c0_152] : memref<5x1x32xf32, #tpu.memory_space<vmem>>, vector<1x1x32xf32>
    %199 = vector.shape_cast %198 : vector<1x1x32xf32> to vector<1x32xf32>
    %c0_153 = arith.constant 0 : index
    %c0_154 = arith.constant 0 : index
    %c0_155 = arith.constant 0 : index
    %200 = vector.load %arg25[%c0_153, %c0_154, %c0_155] : memref<5x1x32xf32, #tpu.memory_space<vmem>>, vector<1x1x32xf32>
    %201 = vector.shape_cast %200 : vector<1x1x32xf32> to vector<1x32xf32>
    %cst_156 = arith.constant dense<0.000000e+00> : vector<7xf32>
    %202 = vector.multi_reduction <add>, %197, %cst_156 [1] : vector<7x32xf32> to vector<7xf32>
    %203 = vector.shape_cast %202 : vector<7xf32> to vector<7x1xf32>
    %cst_157 = arith.constant 3.200000e+01 : f32
    %204 = vector.broadcast %cst_157 : f32 to vector<7x1xf32>
    %205 = arith.divf %203, %204 : vector<7x1xf32>
    %206 = vector.broadcast %205 : vector<7x1xf32> to vector<7x32xf32>
    %207 = arith.subf %197, %206 : vector<7x32xf32>
    %208 = arith.mulf %207, %207 : vector<7x32xf32>
    %cst_158 = arith.constant dense<0.000000e+00> : vector<7xf32>
    %209 = vector.multi_reduction <add>, %208, %cst_158 [1] : vector<7x32xf32> to vector<7xf32>
    %210 = vector.shape_cast %209 : vector<7xf32> to vector<7x1xf32>
    %cst_159 = arith.constant 3.200000e+01 : f32
    %211 = vector.broadcast %cst_159 : f32 to vector<7x1xf32>
    %212 = arith.divf %210, %211 : vector<7x1xf32>
    %213 = vector.broadcast %205 : vector<7x1xf32> to vector<7x32xf32>
    %214 = arith.subf %197, %213 : vector<7x32xf32>
    %cst_160 = arith.constant 9.99999974E-6 : f32
    %215 = vector.broadcast %cst_160 : f32 to vector<7x1xf32>
    %216 = arith.addf %212, %215 : vector<7x1xf32>
    %217 = math.rsqrt %216 : vector<7x1xf32>
    %218 = vector.broadcast %217 : vector<7x1xf32> to vector<7x32xf32>
    %219 = arith.mulf %214, %218 : vector<7x32xf32>
    %220 = vector.broadcast %199 : vector<1x32xf32> to vector<7x32xf32>
    %221 = arith.mulf %219, %220 : vector<7x32xf32>
    %222 = vector.broadcast %201 : vector<1x32xf32> to vector<7x32xf32>
    %223 = arith.addf %221, %222 : vector<7x32xf32>
    %224 = arith.addf %223, %156 : vector<7x32xf32>
    %c1_161 = arith.constant 1 : index
    %c0_162 = arith.constant 0 : index
    %c0_163 = arith.constant 0 : index
    %c0_164 = arith.constant 0 : index
    %225 = vector.load %arg20[%c1_161, %c0_162, %c0_163, %c0_164] : memref<4x3x32x32xf32, #tpu.memory_space<vmem>>, vector<1x1x32x32xf32>
    %226 = vector.shape_cast %225 : vector<1x1x32x32xf32> to vector<32x32xf32>
    %cst_165 = arith.constant dense<0.000000e+00> : vector<7x32xf32>
    %227 = tpu.matmul %224, %226, %cst_165 {dimension_numbers = #tpu.dot_dimension_numbers<[1], [0], [0], [1], [0, 0, 1, 1], [], []>} : vector<7x32xf32>, vector<32x32xf32>, vector<7x32xf32> -> vector<7x32xf32>
    %c1_166 = arith.constant 1 : index
    %c0_167 = arith.constant 0 : index
    %c0_168 = arith.constant 0 : index
    %c0_169 = arith.constant 0 : index
    %228 = vector.load %arg21[%c1_166, %c0_167, %c0_168, %c0_169] : memref<4x3x1x32xf32, #tpu.memory_space<vmem>>, vector<1x1x1x32xf32>
    %229 = vector.shape_cast %228 : vector<1x1x1x32xf32> to vector<1x32xf32>
    %230 = vector.broadcast %229 : vector<1x32xf32> to vector<7x32xf32>
    %231 = arith.addf %227, %230 : vector<7x32xf32>
    %c1_170 = arith.constant 1 : index
    %c0_171 = arith.constant 0 : index
    %c0_172 = arith.constant 0 : index
    %232 = vector.load %arg22[%c1_170, %c0_171, %c0_172] : memref<4x32x32xf32, #tpu.memory_space<vmem>>, vector<1x32x32xf32>
    %233 = vector.shape_cast %232 : vector<1x32x32xf32> to vector<32x32xf32>
    %c1_173 = arith.constant 1 : index
    %c0_174 = arith.constant 0 : index
    %c0_175 = arith.constant 0 : index
    %234 = vector.load %arg23[%c1_173, %c0_174, %c0_175] : memref<4x1x32xf32, #tpu.memory_space<vmem>>, vector<1x1x32xf32>
    %235 = vector.shape_cast %234 : vector<1x1x32xf32> to vector<1x32xf32>
    %cst_176 = arith.constant dense<0.000000e+00> : vector<7x16xf32>
    %236 = tpu.matmul %231, %140, %cst_176 {dimension_numbers = #tpu.dot_dimension_numbers<[1], [1], [0], [0], [0, 0, 1, 0], [], []>} : vector<7x32xf32>, vector<16x32xf32>, vector<7x16xf32> -> vector<7x16xf32>
    %cst_177 = arith.constant dense<0xFF800000> : vector<7xf32>
    %237 = vector.multi_reduction <maximumf>, %236, %cst_177 [1] : vector<7x16xf32> to vector<7xf32>
    %238 = vector.shape_cast %237 : vector<7xf32> to vector<7x1xf32>
    %239 = vector.broadcast %238 : vector<7x1xf32> to vector<7x16xf32>
    %240 = arith.subf %236, %239 : vector<7x16xf32>
    %241 = math.exp %240 : vector<7x16xf32>
    %cst_178 = arith.constant dense<0.000000e+00> : vector<7xf32>
    %242 = vector.multi_reduction <add>, %241, %cst_178 [1] : vector<7x16xf32> to vector<7xf32>
    %243 = vector.shape_cast %242 : vector<7xf32> to vector<7x1xf32>
    %244 = tpu.reciprocal %243 {approx = true} : vector<7x1xf32> -> vector<7x1xf32>
    %245 = vector.broadcast %244 : vector<7x1xf32> to vector<7x16xf32>
    %246 = arith.mulf %241, %245 : vector<7x16xf32>
    %cst_179 = arith.constant dense<0.000000e+00> : vector<7x32xf32>
    %247 = tpu.matmul %246, %147, %cst_179 {dimension_numbers = #tpu.dot_dimension_numbers<[1], [0], [0], [1], [0, 0, 1, 1], [], []>} : vector<7x16xf32>, vector<16x32xf32>, vector<7x32xf32> -> vector<7x32xf32>
    %cst_180 = arith.constant dense<0.000000e+00> : vector<7x32xf32>
    %248 = tpu.matmul %247, %233, %cst_180 {dimension_numbers = #tpu.dot_dimension_numbers<[1], [0], [0], [1], [0, 0, 1, 1], [], []>} : vector<7x32xf32>, vector<32x32xf32>, vector<7x32xf32> -> vector<7x32xf32>
    %249 = vector.broadcast %235 : vector<1x32xf32> to vector<7x32xf32>
    %250 = arith.addf %248, %249 : vector<7x32xf32>
    %251 = arith.addf %223, %250 : vector<7x32xf32>
    %c1_181 = arith.constant 1 : index
    %c0_182 = arith.constant 0 : index
    %c0_183 = arith.constant 0 : index
    %252 = vector.load %arg24[%c1_181, %c0_182, %c0_183] : memref<5x1x32xf32, #tpu.memory_space<vmem>>, vector<1x1x32xf32>
    %253 = vector.shape_cast %252 : vector<1x1x32xf32> to vector<1x32xf32>
    %c1_184 = arith.constant 1 : index
    %c0_185 = arith.constant 0 : index
    %c0_186 = arith.constant 0 : index
    %254 = vector.load %arg25[%c1_184, %c0_185, %c0_186] : memref<5x1x32xf32, #tpu.memory_space<vmem>>, vector<1x1x32xf32>
    %255 = vector.shape_cast %254 : vector<1x1x32xf32> to vector<1x32xf32>
    %cst_187 = arith.constant dense<0.000000e+00> : vector<7xf32>
    %256 = vector.multi_reduction <add>, %251, %cst_187 [1] : vector<7x32xf32> to vector<7xf32>
    %257 = vector.shape_cast %256 : vector<7xf32> to vector<7x1xf32>
    %cst_188 = arith.constant 3.200000e+01 : f32
    %258 = vector.broadcast %cst_188 : f32 to vector<7x1xf32>
    %259 = arith.divf %257, %258 : vector<7x1xf32>
    %260 = vector.broadcast %259 : vector<7x1xf32> to vector<7x32xf32>
    %261 = arith.subf %251, %260 : vector<7x32xf32>
    %262 = arith.mulf %261, %261 : vector<7x32xf32>
    %cst_189 = arith.constant dense<0.000000e+00> : vector<7xf32>
    %263 = vector.multi_reduction <add>, %262, %cst_189 [1] : vector<7x32xf32> to vector<7xf32>
    %264 = vector.shape_cast %263 : vector<7xf32> to vector<7x1xf32>
    %cst_190 = arith.constant 3.200000e+01 : f32
    %265 = vector.broadcast %cst_190 : f32 to vector<7x1xf32>
    %266 = arith.divf %264, %265 : vector<7x1xf32>
    %267 = vector.broadcast %259 : vector<7x1xf32> to vector<7x32xf32>
    %268 = arith.subf %251, %267 : vector<7x32xf32>
    %cst_191 = arith.constant 9.99999974E-6 : f32
    %269 = vector.broadcast %cst_191 : f32 to vector<7x1xf32>
    %270 = arith.addf %266, %269 : vector<7x1xf32>
    %271 = math.rsqrt %270 : vector<7x1xf32>
    %272 = vector.broadcast %271 : vector<7x1xf32> to vector<7x32xf32>
    %273 = arith.mulf %268, %272 : vector<7x32xf32>
    %274 = vector.broadcast %253 : vector<1x32xf32> to vector<7x32xf32>
    %275 = arith.mulf %273, %274 : vector<7x32xf32>
    %276 = vector.broadcast %255 : vector<1x32xf32> to vector<7x32xf32>
    %277 = arith.addf %275, %276 : vector<7x32xf32>
    %c0_192 = arith.constant 0 : index
    %c0_193 = arith.constant 0 : index
    %278 = vector.load %arg26[%c0_192, %c0_193] : memref<32x64xf32, #tpu.memory_space<vmem>>, vector<32x64xf32>
    %cst_194 = arith.constant dense<0.000000e+00> : vector<7x64xf32>
    %279 = tpu.matmul %277, %278, %cst_194 {dimension_numbers = #tpu.dot_dimension_numbers<[1], [0], [0], [1], [0, 0, 1, 1], [], []>} : vector<7x32xf32>, vector<32x64xf32>, vector<7x64xf32> -> vector<7x64xf32>
    %c0_195 = arith.constant 0 : index
    %c0_196 = arith.constant 0 : index
    %280 = vector.load %arg27[%c0_195, %c0_196] : memref<1x64xf32, #tpu.memory_space<vmem>>, vector<1x64xf32>
    %281 = vector.broadcast %280 : vector<1x64xf32> to vector<7x64xf32>
    %282 = arith.addf %279, %281 : vector<7x64xf32>
    %cst_197 = arith.constant 0.000000e+00 : f32
    %283 = vector.broadcast %cst_197 : f32 to vector<7x64xf32>
    %284 = arith.maximumf %282, %283 : vector<7x64xf32>
    %c0_198 = arith.constant 0 : index
    %c0_199 = arith.constant 0 : index
    %285 = vector.load %arg28[%c0_198, %c0_199] : memref<64x32xf32, #tpu.memory_space<vmem>>, vector<64x32xf32>
    %cst_200 = arith.constant dense<0.000000e+00> : vector<7x32xf32>
    %286 = tpu.matmul %284, %285, %cst_200 {dimension_numbers = #tpu.dot_dimension_numbers<[1], [0], [0], [1], [0, 0, 1, 1], [], []>} : vector<7x64xf32>, vector<64x32xf32>, vector<7x32xf32> -> vector<7x32xf32>
    %c0_201 = arith.constant 0 : index
    %c0_202 = arith.constant 0 : index
    %287 = vector.load %arg29[%c0_201, %c0_202] : memref<1x32xf32, #tpu.memory_space<vmem>>, vector<1x32xf32>
    %288 = vector.broadcast %287 : vector<1x32xf32> to vector<7x32xf32>
    %289 = arith.addf %286, %288 : vector<7x32xf32>
    %290 = arith.addf %277, %289 : vector<7x32xf32>
    %c2_203 = arith.constant 2 : index
    %c0_204 = arith.constant 0 : index
    %c0_205 = arith.constant 0 : index
    %291 = vector.load %arg24[%c2_203, %c0_204, %c0_205] : memref<5x1x32xf32, #tpu.memory_space<vmem>>, vector<1x1x32xf32>
    %292 = vector.shape_cast %291 : vector<1x1x32xf32> to vector<1x32xf32>
    %c2_206 = arith.constant 2 : index
    %c0_207 = arith.constant 0 : index
    %c0_208 = arith.constant 0 : index
    %293 = vector.load %arg25[%c2_206, %c0_207, %c0_208] : memref<5x1x32xf32, #tpu.memory_space<vmem>>, vector<1x1x32xf32>
    %294 = vector.shape_cast %293 : vector<1x1x32xf32> to vector<1x32xf32>
    %cst_209 = arith.constant dense<0.000000e+00> : vector<7xf32>
    %295 = vector.multi_reduction <add>, %290, %cst_209 [1] : vector<7x32xf32> to vector<7xf32>
    %296 = vector.shape_cast %295 : vector<7xf32> to vector<7x1xf32>
    %cst_210 = arith.constant 3.200000e+01 : f32
    %297 = vector.broadcast %cst_210 : f32 to vector<7x1xf32>
    %298 = arith.divf %296, %297 : vector<7x1xf32>
    %299 = vector.broadcast %298 : vector<7x1xf32> to vector<7x32xf32>
    %300 = arith.subf %290, %299 : vector<7x32xf32>
    %301 = arith.mulf %300, %300 : vector<7x32xf32>
    %cst_211 = arith.constant dense<0.000000e+00> : vector<7xf32>
    %302 = vector.multi_reduction <add>, %301, %cst_211 [1] : vector<7x32xf32> to vector<7xf32>
    %303 = vector.shape_cast %302 : vector<7xf32> to vector<7x1xf32>
    %cst_212 = arith.constant 3.200000e+01 : f32
    %304 = vector.broadcast %cst_212 : f32 to vector<7x1xf32>
    %305 = arith.divf %303, %304 : vector<7x1xf32>
    %306 = vector.broadcast %298 : vector<7x1xf32> to vector<7x32xf32>
    %307 = arith.subf %290, %306 : vector<7x32xf32>
    %cst_213 = arith.constant 9.99999974E-6 : f32
    %308 = vector.broadcast %cst_213 : f32 to vector<7x1xf32>
    %309 = arith.addf %305, %308 : vector<7x1xf32>
    %310 = math.rsqrt %309 : vector<7x1xf32>
    %311 = vector.broadcast %310 : vector<7x1xf32> to vector<7x32xf32>
    %312 = arith.mulf %307, %311 : vector<7x32xf32>
    %313 = vector.broadcast %292 : vector<1x32xf32> to vector<7x32xf32>
    %314 = arith.mulf %312, %313 : vector<7x32xf32>
    %315 = vector.broadcast %294 : vector<1x32xf32> to vector<7x32xf32>
    %316 = arith.addf %314, %315 : vector<7x32xf32>
    %317 = arith.addf %316, %156 : vector<7x32xf32>
    %c2_214 = arith.constant 2 : index
    %c1_215 = arith.constant 1 : index
    %c0_216 = arith.constant 0 : index
    %c0_217 = arith.constant 0 : index
    %318 = vector.load %arg20[%c2_214, %c1_215, %c0_216, %c0_217] : memref<4x3x32x32xf32, #tpu.memory_space<vmem>>, vector<1x1x32x32xf32>
    %319 = vector.shape_cast %318 : vector<1x1x32x32xf32> to vector<32x32xf32>
    %cst_218 = arith.constant dense<0.000000e+00> : vector<7x32xf32>
    %320 = tpu.matmul %317, %319, %cst_218 {dimension_numbers = #tpu.dot_dimension_numbers<[1], [0], [0], [1], [0, 0, 1, 1], [], []>} : vector<7x32xf32>, vector<32x32xf32>, vector<7x32xf32> -> vector<7x32xf32>
    %c2_219 = arith.constant 2 : index
    %c1_220 = arith.constant 1 : index
    %c0_221 = arith.constant 0 : index
    %c0_222 = arith.constant 0 : index
    %321 = vector.load %arg21[%c2_219, %c1_220, %c0_221, %c0_222] : memref<4x3x1x32xf32, #tpu.memory_space<vmem>>, vector<1x1x1x32xf32>
    %322 = vector.shape_cast %321 : vector<1x1x1x32xf32> to vector<1x32xf32>
    %323 = vector.broadcast %322 : vector<1x32xf32> to vector<7x32xf32>
    %324 = arith.addf %320, %323 : vector<7x32xf32>
    %c2_223 = arith.constant 2 : index
    %c2_224 = arith.constant 2 : index
    %c0_225 = arith.constant 0 : index
    %c0_226 = arith.constant 0 : index
    %325 = vector.load %arg20[%c2_223, %c2_224, %c0_225, %c0_226] : memref<4x3x32x32xf32, #tpu.memory_space<vmem>>, vector<1x1x32x32xf32>
    %326 = vector.shape_cast %325 : vector<1x1x32x32xf32> to vector<32x32xf32>
    %cst_227 = arith.constant dense<0.000000e+00> : vector<7x32xf32>
    %327 = tpu.matmul %316, %326, %cst_227 {dimension_numbers = #tpu.dot_dimension_numbers<[1], [0], [0], [1], [0, 0, 1, 1], [], []>} : vector<7x32xf32>, vector<32x32xf32>, vector<7x32xf32> -> vector<7x32xf32>
    %c2_228 = arith.constant 2 : index
    %c2_229 = arith.constant 2 : index
    %c0_230 = arith.constant 0 : index
    %c0_231 = arith.constant 0 : index
    %328 = vector.load %arg21[%c2_228, %c2_229, %c0_230, %c0_231] : memref<4x3x1x32xf32, #tpu.memory_space<vmem>>, vector<1x1x1x32xf32>
    %329 = vector.shape_cast %328 : vector<1x1x1x32xf32> to vector<1x32xf32>
    %330 = vector.broadcast %329 : vector<1x32xf32> to vector<7x32xf32>
    %331 = arith.addf %327, %330 : vector<7x32xf32>
    %c2_232 = arith.constant 2 : index
    %c0_233 = arith.constant 0 : index
    %c0_234 = arith.constant 0 : index
    %332 = vector.load %arg22[%c2_232, %c0_233, %c0_234] : memref<4x32x32xf32, #tpu.memory_space<vmem>>, vector<1x32x32xf32>
    %333 = vector.shape_cast %332 : vector<1x32x32xf32> to vector<32x32xf32>
    %c2_235 = arith.constant 2 : index
    %c0_236 = arith.constant 0 : index
    %c0_237 = arith.constant 0 : index
    %334 = vector.load %arg23[%c2_235, %c0_236, %c0_237] : memref<4x1x32xf32, #tpu.memory_space<vmem>>, vector<1x1x32xf32>
    %335 = vector.shape_cast %334 : vector<1x1x32xf32> to vector<1x32xf32>
    %cst_238 = arith.constant dense<0.000000e+00> : vector<16x7xf32>
    %336 = tpu.matmul %154, %324, %cst_238 {dimension_numbers = #tpu.dot_dimension_numbers<[1], [1], [0], [0], [0, 0, 1, 0], [], []>} : vector<16x32xf32>, vector<7x32xf32>, vector<16x7xf32> -> vector<16x7xf32>
    %cst_239 = arith.constant dense<0xFF800000> : vector<16xf32>
    %337 = vector.multi_reduction <maximumf>, %336, %cst_239 [1] : vector<16x7xf32> to vector<16xf32>
    %338 = vector.shape_cast %337 : vector<16xf32> to vector<16x1xf32>
    %339 = vector.broadcast %338 : vector<16x1xf32> to vector<16x7xf32>
    %340 = arith.subf %336, %339 : vector<16x7xf32>
    %341 = math.exp %340 : vector<16x7xf32>
    %cst_240 = arith.constant dense<0.000000e+00> : vector<16xf32>
    %342 = vector.multi_reduction <add>, %341, %cst_240 [1] : vector<16x7xf32> to vector<16xf32>
    %343 = vector.shape_cast %342 : vector<16xf32> to vector<16x1xf32>
    %344 = tpu.reciprocal %343 {approx = true} : vector<16x1xf32> -> vector<16x1xf32>
    %345 = vector.broadcast %344 : vector<16x1xf32> to vector<16x7xf32>
    %346 = arith.mulf %341, %345 : vector<16x7xf32>
    %cst_241 = arith.constant dense<0.000000e+00> : vector<16x32xf32>
    %347 = tpu.matmul %346, %331, %cst_241 {dimension_numbers = #tpu.dot_dimension_numbers<[1], [0], [0], [1], [0, 0, 1, 1], [], []>} : vector<16x7xf32>, vector<7x32xf32>, vector<16x32xf32> -> vector<16x32xf32>
    %cst_242 = arith.constant dense<0.000000e+00> : vector<16x32xf32>
    %348 = tpu.matmul %347, %333, %cst_242 {dimension_numbers = #tpu.dot_dimension_numbers<[1], [0], [0], [1], [0, 0, 1, 1], [], []>} : vector<16x32xf32>, vector<32x32xf32>, vector<16x32xf32> -> vector<16x32xf32>
    %349 = vector.broadcast %335 : vector<1x32xf32> to vector<16x32xf32>
    %350 = arith.addf %348, %349 : vector<16x32xf32>
    %351 = arith.addf %132, %350 : vector<16x32xf32>
    %c3 = arith.constant 3 : index
    %c0_243 = arith.constant 0 : index
    %c0_244 = arith.constant 0 : index
    %352 = vector.load %arg24[%c3, %c0_243, %c0_244] : memref<5x1x32xf32, #tpu.memory_space<vmem>>, vector<1x1x32xf32>
    %353 = vector.shape_cast %352 : vector<1x1x32xf32> to vector<1x32xf32>
    %c3_245 = arith.constant 3 : index
    %c0_246 = arith.constant 0 : index
    %c0_247 = arith.constant 0 : index
    %354 = vector.load %arg25[%c3_245, %c0_246, %c0_247] : memref<5x1x32xf32, #tpu.memory_space<vmem>>, vector<1x1x32xf32>
    %355 = vector.shape_cast %354 : vector<1x1x32xf32> to vector<1x32xf32>
    %cst_248 = arith.constant dense<0.000000e+00> : vector<16xf32>
    %356 = vector.multi_reduction <add>, %351, %cst_248 [1] : vector<16x32xf32> to vector<16xf32>
    %357 = vector.shape_cast %356 : vector<16xf32> to vector<16x1xf32>
    %cst_249 = arith.constant 3.200000e+01 : f32
    %358 = vector.broadcast %cst_249 : f32 to vector<16x1xf32>
    %359 = arith.divf %357, %358 : vector<16x1xf32>
    %360 = vector.broadcast %359 : vector<16x1xf32> to vector<16x32xf32>
    %361 = arith.subf %351, %360 : vector<16x32xf32>
    %362 = arith.mulf %361, %361 : vector<16x32xf32>
    %cst_250 = arith.constant dense<0.000000e+00> : vector<16xf32>
    %363 = vector.multi_reduction <add>, %362, %cst_250 [1] : vector<16x32xf32> to vector<16xf32>
    %364 = vector.shape_cast %363 : vector<16xf32> to vector<16x1xf32>
    %cst_251 = arith.constant 3.200000e+01 : f32
    %365 = vector.broadcast %cst_251 : f32 to vector<16x1xf32>
    %366 = arith.divf %364, %365 : vector<16x1xf32>
    %367 = vector.broadcast %359 : vector<16x1xf32> to vector<16x32xf32>
    %368 = arith.subf %351, %367 : vector<16x32xf32>
    %cst_252 = arith.constant 9.99999974E-6 : f32
    %369 = vector.broadcast %cst_252 : f32 to vector<16x1xf32>
    %370 = arith.addf %366, %369 : vector<16x1xf32>
    %371 = math.rsqrt %370 : vector<16x1xf32>
    %372 = vector.broadcast %371 : vector<16x1xf32> to vector<16x32xf32>
    %373 = arith.mulf %368, %372 : vector<16x32xf32>
    %374 = vector.broadcast %353 : vector<1x32xf32> to vector<16x32xf32>
    %375 = arith.mulf %373, %374 : vector<16x32xf32>
    %376 = vector.broadcast %355 : vector<1x32xf32> to vector<16x32xf32>
    %377 = arith.addf %375, %376 : vector<16x32xf32>
    %378 = arith.addf %377, %129 : vector<16x32xf32>
    %379 = arith.addf %316, %156 : vector<7x32xf32>
    %c3_253 = arith.constant 3 : index
    %c0_254 = arith.constant 0 : index
    %c0_255 = arith.constant 0 : index
    %c0_256 = arith.constant 0 : index
    %380 = vector.load %arg20[%c3_253, %c0_254, %c0_255, %c0_256] : memref<4x3x32x32xf32, #tpu.memory_space<vmem>>, vector<1x1x32x32xf32>
    %381 = vector.shape_cast %380 : vector<1x1x32x32xf32> to vector<32x32xf32>
    %cst_257 = arith.constant dense<0.000000e+00> : vector<7x32xf32>
    %382 = tpu.matmul %379, %381, %cst_257 {dimension_numbers = #tpu.dot_dimension_numbers<[1], [0], [0], [1], [0, 0, 1, 1], [], []>} : vector<7x32xf32>, vector<32x32xf32>, vector<7x32xf32> -> vector<7x32xf32>
    %c3_258 = arith.constant 3 : index
    %c0_259 = arith.constant 0 : index
    %c0_260 = arith.constant 0 : index
    %c0_261 = arith.constant 0 : index
    %383 = vector.load %arg21[%c3_258, %c0_259, %c0_260, %c0_261] : memref<4x3x1x32xf32, #tpu.memory_space<vmem>>, vector<1x1x1x32xf32>
    %384 = vector.shape_cast %383 : vector<1x1x1x32xf32> to vector<1x32xf32>
    %385 = vector.broadcast %384 : vector<1x32xf32> to vector<7x32xf32>
    %386 = arith.addf %382, %385 : vector<7x32xf32>
    %c3_262 = arith.constant 3 : index
    %c1_263 = arith.constant 1 : index
    %c0_264 = arith.constant 0 : index
    %c0_265 = arith.constant 0 : index
    %387 = vector.load %arg20[%c3_262, %c1_263, %c0_264, %c0_265] : memref<4x3x32x32xf32, #tpu.memory_space<vmem>>, vector<1x1x32x32xf32>
    %388 = vector.shape_cast %387 : vector<1x1x32x32xf32> to vector<32x32xf32>
    %cst_266 = arith.constant dense<0.000000e+00> : vector<16x32xf32>
    %389 = tpu.matmul %378, %388, %cst_266 {dimension_numbers = #tpu.dot_dimension_numbers<[1], [0], [0], [1], [0, 0, 1, 1], [], []>} : vector<16x32xf32>, vector<32x32xf32>, vector<16x32xf32> -> vector<16x32xf32>
    %c3_267 = arith.constant 3 : index
    %c1_268 = arith.constant 1 : index
    %c0_269 = arith.constant 0 : index
    %c0_270 = arith.constant 0 : index
    %390 = vector.load %arg21[%c3_267, %c1_268, %c0_269, %c0_270] : memref<4x3x1x32xf32, #tpu.memory_space<vmem>>, vector<1x1x1x32xf32>
    %391 = vector.shape_cast %390 : vector<1x1x1x32xf32> to vector<1x32xf32>
    %392 = vector.broadcast %391 : vector<1x32xf32> to vector<16x32xf32>
    %393 = arith.addf %389, %392 : vector<16x32xf32>
    %c3_271 = arith.constant 3 : index
    %c2_272 = arith.constant 2 : index
    %c0_273 = arith.constant 0 : index
    %c0_274 = arith.constant 0 : index
    %394 = vector.load %arg20[%c3_271, %c2_272, %c0_273, %c0_274] : memref<4x3x32x32xf32, #tpu.memory_space<vmem>>, vector<1x1x32x32xf32>
    %395 = vector.shape_cast %394 : vector<1x1x32x32xf32> to vector<32x32xf32>
    %cst_275 = arith.constant dense<0.000000e+00> : vector<16x32xf32>
    %396 = tpu.matmul %377, %395, %cst_275 {dimension_numbers = #tpu.dot_dimension_numbers<[1], [0], [0], [1], [0, 0, 1, 1], [], []>} : vector<16x32xf32>, vector<32x32xf32>, vector<16x32xf32> -> vector<16x32xf32>
    %c3_276 = arith.constant 3 : index
    %c2_277 = arith.constant 2 : index
    %c0_278 = arith.constant 0 : index
    %c0_279 = arith.constant 0 : index
    %397 = vector.load %arg21[%c3_276, %c2_277, %c0_278, %c0_279] : memref<4x3x1x32xf32, #tpu.memory_space<vmem>>, vector<1x1x1x32xf32>
    %398 = vector.shape_cast %397 : vector<1x1x1x32xf32> to vector<1x32xf32>
    %399 = vector.broadcast %398 : vector<1x32xf32> to vector<16x32xf32>
    %400 = arith.addf %396, %399 : vector<16x32xf32>
    %c3_280 = arith.constant 3 : index
    %c0_281 = arith.constant 0 : index
    %c0_282 = arith.constant 0 : index
    %401 = vector.load %arg22[%c3_280, %c0_281, %c0_282] : memref<4x32x32xf32, #tpu.memory_space<vmem>>, vector<1x32x32xf32>
    %402 = vector.shape_cast %401 : vector<1x32x32xf32> to vector<32x32xf32>
    %c3_283 = arith.constant 3 : index
    %c0_284 = arith.constant 0 : index
    %c0_285 = arith.constant 0 : index
    %403 = vector.load %arg23[%c3_283, %c0_284, %c0_285] : memref<4x1x32xf32, #tpu.memory_space<vmem>>, vector<1x1x32xf32>
    %404 = vector.shape_cast %403 : vector<1x1x32xf32> to vector<1x32xf32>
    %cst_286 = arith.constant dense<0.000000e+00> : vector<7x16xf32>
    %405 = tpu.matmul %386, %393, %cst_286 {dimension_numbers = #tpu.dot_dimension_numbers<[1], [1], [0], [0], [0, 0, 1, 0], [], []>} : vector<7x32xf32>, vector<16x32xf32>, vector<7x16xf32> -> vector<7x16xf32>
    %cst_287 = arith.constant dense<0xFF800000> : vector<7xf32>
    %406 = vector.multi_reduction <maximumf>, %405, %cst_287 [1] : vector<7x16xf32> to vector<7xf32>
    %407 = vector.shape_cast %406 : vector<7xf32> to vector<7x1xf32>
    %408 = vector.broadcast %407 : vector<7x1xf32> to vector<7x16xf32>
    %409 = arith.subf %405, %408 : vector<7x16xf32>
    %410 = math.exp %409 : vector<7x16xf32>
    %cst_288 = arith.constant dense<0.000000e+00> : vector<7xf32>
    %411 = vector.multi_reduction <add>, %410, %cst_288 [1] : vector<7x16xf32> to vector<7xf32>
    %412 = vector.shape_cast %411 : vector<7xf32> to vector<7x1xf32>
    %413 = tpu.reciprocal %412 {approx = true} : vector<7x1xf32> -> vector<7x1xf32>
    %414 = vector.broadcast %413 : vector<7x1xf32> to vector<7x16xf32>
    %415 = arith.mulf %410, %414 : vector<7x16xf32>
    %cst_289 = arith.constant dense<0.000000e+00> : vector<7x32xf32>
    %416 = tpu.matmul %415, %400, %cst_289 {dimension_numbers = #tpu.dot_dimension_numbers<[1], [0], [0], [1], [0, 0, 1, 1], [], []>} : vector<7x16xf32>, vector<16x32xf32>, vector<7x32xf32> -> vector<7x32xf32>
    %cst_290 = arith.constant dense<0.000000e+00> : vector<7x32xf32>
    %417 = tpu.matmul %416, %402, %cst_290 {dimension_numbers = #tpu.dot_dimension_numbers<[1], [0], [0], [1], [0, 0, 1, 1], [], []>} : vector<7x32xf32>, vector<32x32xf32>, vector<7x32xf32> -> vector<7x32xf32>
    %418 = vector.broadcast %404 : vector<1x32xf32> to vector<7x32xf32>
    %419 = arith.addf %417, %418 : vector<7x32xf32>
    %420 = arith.addf %316, %419 : vector<7x32xf32>
    %c4 = arith.constant 4 : index
    %c0_291 = arith.constant 0 : index
    %c0_292 = arith.constant 0 : index
    %421 = vector.load %arg24[%c4, %c0_291, %c0_292] : memref<5x1x32xf32, #tpu.memory_space<vmem>>, vector<1x1x32xf32>
    %422 = vector.shape_cast %421 : vector<1x1x32xf32> to vector<1x32xf32>
    %c4_293 = arith.constant 4 : index
    %c0_294 = arith.constant 0 : index
    %c0_295 = arith.constant 0 : index
    %423 = vector.load %arg25[%c4_293, %c0_294, %c0_295] : memref<5x1x32xf32, #tpu.memory_space<vmem>>, vector<1x1x32xf32>
    %424 = vector.shape_cast %423 : vector<1x1x32xf32> to vector<1x32xf32>
    %cst_296 = arith.constant dense<0.000000e+00> : vector<7xf32>
    %425 = vector.multi_reduction <add>, %420, %cst_296 [1] : vector<7x32xf32> to vector<7xf32>
    %426 = vector.shape_cast %425 : vector<7xf32> to vector<7x1xf32>
    %cst_297 = arith.constant 3.200000e+01 : f32
    %427 = vector.broadcast %cst_297 : f32 to vector<7x1xf32>
    %428 = arith.divf %426, %427 : vector<7x1xf32>
    %429 = vector.broadcast %428 : vector<7x1xf32> to vector<7x32xf32>
    %430 = arith.subf %420, %429 : vector<7x32xf32>
    %431 = arith.mulf %430, %430 : vector<7x32xf32>
    %cst_298 = arith.constant dense<0.000000e+00> : vector<7xf32>
    %432 = vector.multi_reduction <add>, %431, %cst_298 [1] : vector<7x32xf32> to vector<7xf32>
    %433 = vector.shape_cast %432 : vector<7xf32> to vector<7x1xf32>
    %cst_299 = arith.constant 3.200000e+01 : f32
    %434 = vector.broadcast %cst_299 : f32 to vector<7x1xf32>
    %435 = arith.divf %433, %434 : vector<7x1xf32>
    %436 = vector.broadcast %428 : vector<7x1xf32> to vector<7x32xf32>
    %437 = arith.subf %420, %436 : vector<7x32xf32>
    %cst_300 = arith.constant 9.99999974E-6 : f32
    %438 = vector.broadcast %cst_300 : f32 to vector<7x1xf32>
    %439 = arith.addf %435, %438 : vector<7x1xf32>
    %440 = math.rsqrt %439 : vector<7x1xf32>
    %441 = vector.broadcast %440 : vector<7x1xf32> to vector<7x32xf32>
    %442 = arith.mulf %437, %441 : vector<7x32xf32>
    %443 = vector.broadcast %422 : vector<1x32xf32> to vector<7x32xf32>
    %444 = arith.mulf %442, %443 : vector<7x32xf32>
    %445 = vector.broadcast %424 : vector<1x32xf32> to vector<7x32xf32>
    %446 = arith.addf %444, %445 : vector<7x32xf32>
    %447 = vector.extract_strided_slice %446 {offsets = [1, 0], sizes = [1, 32], strides = [1, 1]} : vector<7x32xf32> to vector<1x32xf32>
    %c0_301 = arith.constant 0 : index
    %c0_302 = arith.constant 0 : index
    %c0_303 = arith.constant 0 : index
    %448 = vector.load %arg30[%c0_301, %c0_302, %c0_303] : memref<2x32x32xf32, #tpu.memory_space<vmem>>, vector<1x32x32xf32>
    %449 = vector.shape_cast %448 : vector<1x32x32xf32> to vector<32x32xf32>
    %cst_304 = arith.constant dense<0.000000e+00> : vector<1x32xf32>
    %450 = tpu.matmul %447, %449, %cst_304 {dimension_numbers = #tpu.dot_dimension_numbers<[1], [0], [0], [1], [0, 0, 1, 1], [], []>} : vector<1x32xf32>, vector<32x32xf32>, vector<1x32xf32> -> vector<1x32xf32>
    %c0_305 = arith.constant 0 : index
    %c0_306 = arith.constant 0 : index
    %c0_307 = arith.constant 0 : index
    %451 = vector.load %arg31[%c0_305, %c0_306, %c0_307] : memref<2x1x32xf32, #tpu.memory_space<vmem>>, vector<1x1x32xf32>
    %452 = vector.shape_cast %451 : vector<1x1x32xf32> to vector<1x32xf32>
    %453 = arith.addf %450, %452 : vector<1x32xf32>
    %cst_308 = arith.constant 0.000000e+00 : f32
    %454 = vector.broadcast %cst_308 : f32 to vector<1x32xf32>
    %455 = arith.maximumf %453, %454 : vector<1x32xf32>
    %c1_309 = arith.constant 1 : index
    %c0_310 = arith.constant 0 : index
    %c0_311 = arith.constant 0 : index
    %456 = vector.load %arg30[%c1_309, %c0_310, %c0_311] : memref<2x32x32xf32, #tpu.memory_space<vmem>>, vector<1x32x32xf32>
    %457 = vector.shape_cast %456 : vector<1x32x32xf32> to vector<32x32xf32>
    %cst_312 = arith.constant dense<0.000000e+00> : vector<1x32xf32>
    %458 = tpu.matmul %455, %457, %cst_312 {dimension_numbers = #tpu.dot_dimension_numbers<[1], [0], [0], [1], [0, 0, 1, 1], [], []>} : vector<1x32xf32>, vector<32x32xf32>, vector<1x32xf32> -> vector<1x32xf32>
    %c1_313 = arith.constant 1 : index
    %c0_314 = arith.constant 0 : index
    %c0_315 = arith.constant 0 : index
    %459 = vector.load %arg31[%c1_313, %c0_314, %c0_315] : memref<2x1x32xf32, #tpu.memory_space<vmem>>, vector<1x1x32xf32>
    %460 = vector.shape_cast %459 : vector<1x1x32xf32> to vector<1x32xf32>
    %461 = arith.addf %458, %460 : vector<1x32xf32>
    %cst_316 = arith.constant 0.000000e+00 : f32
    %462 = vector.broadcast %cst_316 : f32 to vector<1x32xf32>
    %463 = arith.maximumf %461, %462 : vector<1x32xf32>
    %c0_317 = arith.constant 0 : index
    %c0_318 = arith.constant 0 : index
    %464 = vector.load %arg32[%c0_317, %c0_318] : memref<32x4xf32, #tpu.memory_space<vmem>>, vector<32x4xf32>
    %cst_319 = arith.constant dense<0.000000e+00> : vector<1x4xf32>
    %465 = tpu.matmul %463, %464, %cst_319 {dimension_numbers = #tpu.dot_dimension_numbers<[1], [0], [0], [1], [0, 0, 1, 1], [], []>} : vector<1x32xf32>, vector<32x4xf32>, vector<1x4xf32> -> vector<1x4xf32>
    %c0_320 = arith.constant 0 : index
    %c0_321 = arith.constant 0 : index
    %466 = vector.load %arg33[%c0_320, %c0_321] : memref<1x4xf32, #tpu.memory_space<vmem>>, vector<1x4xf32>
    %467 = arith.addf %465, %466 : vector<1x4xf32>
    %c0_322 = arith.constant 0 : index
    %c0_323 = arith.constant 0 : index
    %468 = vector.load %arg34[%c0_322, %c0_323] : memref<32x32xf32, #tpu.memory_space<vmem>>, vector<32x32xf32>
    %cst_324 = arith.constant dense<0.000000e+00> : vector<16x32xf32>
    %469 = tpu.matmul %377, %468, %cst_324 {dimension_numbers = #tpu.dot_dimension_numbers<[1], [0], [0], [1], [0, 0, 1, 1], [], []>} : vector<16x32xf32>, vector<32x32xf32>, vector<16x32xf32> -> vector<16x32xf32>
    %c0_325 = arith.constant 0 : index
    %c0_326 = arith.constant 0 : index
    %470 = vector.load %arg35[%c0_325, %c0_326] : memref<1x32xf32, #tpu.memory_space<vmem>>, vector<1x32xf32>
    %471 = vector.broadcast %470 : vector<1x32xf32> to vector<16x32xf32>
    %472 = arith.addf %469, %471 : vector<16x32xf32>
    %473 = arith.mulf %472, %472 : vector<16x32xf32>
    %474 = arith.mulf %472, %473 : vector<16x32xf32>
    %cst_327 = arith.constant 4.471500e-02 : f32
    %475 = vector.broadcast %cst_327 : f32 to vector<16x32xf32>
    %476 = arith.mulf %475, %474 : vector<16x32xf32>
    %477 = arith.addf %472, %476 : vector<16x32xf32>
    %cst_328 = arith.constant 0.797884583 : f32
    %478 = vector.broadcast %cst_328 : f32 to vector<16x32xf32>
    %479 = arith.mulf %478, %477 : vector<16x32xf32>
    %480 = math.tanh %479 : vector<16x32xf32>
    %cst_329 = arith.constant 1.000000e+00 : f32
    %481 = vector.broadcast %cst_329 : f32 to vector<16x32xf32>
    %482 = arith.addf %481, %480 : vector<16x32xf32>
    %cst_330 = arith.constant 5.000000e-01 : f32
    %483 = vector.broadcast %cst_330 : f32 to vector<16x32xf32>
    %484 = arith.mulf %483, %482 : vector<16x32xf32>
    %485 = arith.mulf %472, %484 : vector<16x32xf32>
    %c0_331 = arith.constant 0 : index
    %c0_332 = arith.constant 0 : index
    %486 = vector.load %arg36[%c0_331, %c0_332] : memref<32x64xf32, #tpu.memory_space<vmem>>, vector<32x64xf32>
    %cst_333 = arith.constant dense<0.000000e+00> : vector<16x64xf32>
    %487 = tpu.matmul %485, %486, %cst_333 {dimension_numbers = #tpu.dot_dimension_numbers<[1], [0], [0], [1], [0, 0, 1, 1], [], []>} : vector<16x32xf32>, vector<32x64xf32>, vector<16x64xf32> -> vector<16x64xf32>
    %c0_334 = arith.constant 0 : index
    %c0_335 = arith.constant 0 : index
    %488 = vector.load %arg37[%c0_334, %c0_335] : memref<1x64xf32, #tpu.memory_space<vmem>>, vector<1x64xf32>
    %489 = vector.broadcast %488 : vector<1x64xf32> to vector<16x64xf32>
    %490 = arith.addf %487, %489 : vector<16x64xf32>
    %491 = arith.mulf %490, %490 : vector<16x64xf32>
    %492 = arith.mulf %490, %491 : vector<16x64xf32>
    %cst_336 = arith.constant 4.471500e-02 : f32
    %493 = vector.broadcast %cst_336 : f32 to vector<16x64xf32>
    %494 = arith.mulf %493, %492 : vector<16x64xf32>
    %495 = arith.addf %490, %494 : vector<16x64xf32>
    %cst_337 = arith.constant 0.797884583 : f32
    %496 = vector.broadcast %cst_337 : f32 to vector<16x64xf32>
    %497 = arith.mulf %496, %495 : vector<16x64xf32>
    %498 = math.tanh %497 : vector<16x64xf32>
    %cst_338 = arith.constant 1.000000e+00 : f32
    %499 = vector.broadcast %cst_338 : f32 to vector<16x64xf32>
    %500 = arith.addf %499, %498 : vector<16x64xf32>
    %cst_339 = arith.constant 5.000000e-01 : f32
    %501 = vector.broadcast %cst_339 : f32 to vector<16x64xf32>
    %502 = arith.mulf %501, %500 : vector<16x64xf32>
    %503 = arith.mulf %490, %502 : vector<16x64xf32>
    %504 = tpu.concatenate %467, %467, %467, %467, %467, %467, %467, %467, %467, %467, %467, %467, %467, %467, %467, %467 in 1 : vector<1x4xf32>, vector<1x4xf32>, vector<1x4xf32>, vector<1x4xf32>, vector<1x4xf32>, vector<1x4xf32>, vector<1x4xf32>, vector<1x4xf32>, vector<1x4xf32>, vector<1x4xf32>, vector<1x4xf32>, vector<1x4xf32>, vector<1x4xf32>, vector<1x4xf32>, vector<1x4xf32>, vector<1x4xf32> -> vector<1x64xf32>
    %505 = vector.broadcast %504 : vector<1x64xf32> to vector<16x64xf32>
    %506 = arith.mulf %503, %505 : vector<16x64xf32>
    %c0_340 = arith.constant 0 : index
    %c0_341 = arith.constant 0 : index
    %507 = vector.load %arg38[%c0_340, %c0_341] : memref<64x16xf32, #tpu.memory_space<vmem>>, vector<64x16xf32>
    %cst_342 = arith.constant dense<0.000000e+00> : vector<16x16xf32>
    %508 = tpu.matmul %506, %507, %cst_342 {dimension_numbers = #tpu.dot_dimension_numbers<[1], [0], [0], [1], [0, 0, 1, 1], [], []>} : vector<16x64xf32>, vector<64x16xf32>, vector<16x16xf32> -> vector<16x16xf32>
    %509 = vector.extract_strided_slice %508 {offsets = [0, 0], sizes = [16, 1], strides = [1, 1]} : vector<16x16xf32> to vector<16x1xf32>
    %c0_343 = arith.constant 0 : index
    %c0_344 = arith.constant 0 : index
    %c0_345 = arith.constant 0 : index
    %510 = vector.load %arg39[%c0_343, %c0_344, %c0_345] : memref<4x16x32xf32, #tpu.memory_space<vmem>>, vector<1x16x32xf32>
    %511 = vector.shape_cast %510 : vector<1x16x32xf32> to vector<16x32xf32>
    %512 = vector.broadcast %509 : vector<16x1xf32> to vector<16x32xf32>
    %513 = arith.mulf %512, %511 : vector<16x32xf32>
    %514 = vector.extract_strided_slice %508 {offsets = [0, 1], sizes = [16, 1], strides = [1, 1]} : vector<16x16xf32> to vector<16x1xf32>
    %c1_346 = arith.constant 1 : index
    %c0_347 = arith.constant 0 : index
    %c0_348 = arith.constant 0 : index
    %515 = vector.load %arg39[%c1_346, %c0_347, %c0_348] : memref<4x16x32xf32, #tpu.memory_space<vmem>>, vector<1x16x32xf32>
    %516 = vector.shape_cast %515 : vector<1x16x32xf32> to vector<16x32xf32>
    %517 = vector.broadcast %514 : vector<16x1xf32> to vector<16x32xf32>
    %518 = arith.mulf %517, %516 : vector<16x32xf32>
    %519 = arith.addf %513, %518 : vector<16x32xf32>
    %520 = vector.extract_strided_slice %508 {offsets = [0, 4], sizes = [16, 1], strides = [1, 1]} : vector<16x16xf32> to vector<16x1xf32>
    %c2_349 = arith.constant 2 : index
    %c0_350 = arith.constant 0 : index
    %c0_351 = arith.constant 0 : index
    %521 = vector.load %arg39[%c2_349, %c0_350, %c0_351] : memref<4x16x32xf32, #tpu.memory_space<vmem>>, vector<1x16x32xf32>
    %522 = vector.shape_cast %521 : vector<1x16x32xf32> to vector<16x32xf32>
    %523 = vector.broadcast %520 : vector<16x1xf32> to vector<16x32xf32>
    %524 = arith.mulf %523, %522 : vector<16x32xf32>
    %525 = arith.addf %519, %524 : vector<16x32xf32>
    %526 = vector.extract_strided_slice %508 {offsets = [0, 5], sizes = [16, 1], strides = [1, 1]} : vector<16x16xf32> to vector<16x1xf32>
    %c3_352 = arith.constant 3 : index
    %c0_353 = arith.constant 0 : index
    %c0_354 = arith.constant 0 : index
    %527 = vector.load %arg39[%c3_352, %c0_353, %c0_354] : memref<4x16x32xf32, #tpu.memory_space<vmem>>, vector<1x16x32xf32>
    %528 = vector.shape_cast %527 : vector<1x16x32xf32> to vector<16x32xf32>
    %529 = vector.broadcast %526 : vector<16x1xf32> to vector<16x32xf32>
    %530 = arith.mulf %529, %528 : vector<16x32xf32>
    %531 = arith.addf %525, %530 : vector<16x32xf32>
    %532 = vector.extract_strided_slice %508 {offsets = [0, 2], sizes = [16, 1], strides = [1, 1]} : vector<16x16xf32> to vector<16x1xf32>
    %c0_355 = arith.constant 0 : index
    %c0_356 = arith.constant 0 : index
    %c0_357 = arith.constant 0 : index
    %533 = vector.load %arg39[%c0_355, %c0_356, %c0_357] : memref<4x16x32xf32, #tpu.memory_space<vmem>>, vector<1x16x32xf32>
    %534 = vector.shape_cast %533 : vector<1x16x32xf32> to vector<16x32xf32>
    %535 = vector.broadcast %532 : vector<16x1xf32> to vector<16x32xf32>
    %536 = arith.mulf %535, %534 : vector<16x32xf32>
    %537 = vector.extract_strided_slice %508 {offsets = [0, 3], sizes = [16, 1], strides = [1, 1]} : vector<16x16xf32> to vector<16x1xf32>
    %c1_358 = arith.constant 1 : index
    %c0_359 = arith.constant 0 : index
    %c0_360 = arith.constant 0 : index
    %538 = vector.load %arg39[%c1_358, %c0_359, %c0_360] : memref<4x16x32xf32, #tpu.memory_space<vmem>>, vector<1x16x32xf32>
    %539 = vector.shape_cast %538 : vector<1x16x32xf32> to vector<16x32xf32>
    %540 = vector.broadcast %537 : vector<16x1xf32> to vector<16x32xf32>
    %541 = arith.mulf %540, %539 : vector<16x32xf32>
    %542 = arith.addf %536, %541 : vector<16x32xf32>
    %543 = vector.extract_strided_slice %508 {offsets = [0, 6], sizes = [16, 1], strides = [1, 1]} : vector<16x16xf32> to vector<16x1xf32>
    %c2_361 = arith.constant 2 : index
    %c0_362 = arith.constant 0 : index
    %c0_363 = arith.constant 0 : index
    %544 = vector.load %arg39[%c2_361, %c0_362, %c0_363] : memref<4x16x32xf32, #tpu.memory_space<vmem>>, vector<1x16x32xf32>
    %545 = vector.shape_cast %544 : vector<1x16x32xf32> to vector<16x32xf32>
    %546 = vector.broadcast %543 : vector<16x1xf32> to vector<16x32xf32>
    %547 = arith.mulf %546, %545 : vector<16x32xf32>
    %548 = arith.addf %542, %547 : vector<16x32xf32>
    %549 = vector.extract_strided_slice %508 {offsets = [0, 7], sizes = [16, 1], strides = [1, 1]} : vector<16x16xf32> to vector<16x1xf32>
    %c3_364 = arith.constant 3 : index
    %c0_365 = arith.constant 0 : index
    %c0_366 = arith.constant 0 : index
    %550 = vector.load %arg39[%c3_364, %c0_365, %c0_366] : memref<4x16x32xf32, #tpu.memory_space<vmem>>, vector<1x16x32xf32>
    %551 = vector.shape_cast %550 : vector<1x16x32xf32> to vector<16x32xf32>
    %552 = vector.broadcast %549 : vector<16x1xf32> to vector<16x32xf32>
    %553 = arith.mulf %552, %551 : vector<16x32xf32>
    %554 = arith.addf %548, %553 : vector<16x32xf32>
    %555 = vector.extract_strided_slice %508 {offsets = [0, 8], sizes = [16, 1], strides = [1, 1]} : vector<16x16xf32> to vector<16x1xf32>
    %c0_367 = arith.constant 0 : index
    %c0_368 = arith.constant 0 : index
    %c0_369 = arith.constant 0 : index
    %556 = vector.load %arg39[%c0_367, %c0_368, %c0_369] : memref<4x16x32xf32, #tpu.memory_space<vmem>>, vector<1x16x32xf32>
    %557 = vector.shape_cast %556 : vector<1x16x32xf32> to vector<16x32xf32>
    %558 = vector.broadcast %555 : vector<16x1xf32> to vector<16x32xf32>
    %559 = arith.mulf %558, %557 : vector<16x32xf32>
    %560 = vector.extract_strided_slice %508 {offsets = [0, 9], sizes = [16, 1], strides = [1, 1]} : vector<16x16xf32> to vector<16x1xf32>
    %c1_370 = arith.constant 1 : index
    %c0_371 = arith.constant 0 : index
    %c0_372 = arith.constant 0 : index
    %561 = vector.load %arg39[%c1_370, %c0_371, %c0_372] : memref<4x16x32xf32, #tpu.memory_space<vmem>>, vector<1x16x32xf32>
    %562 = vector.shape_cast %561 : vector<1x16x32xf32> to vector<16x32xf32>
    %563 = vector.broadcast %560 : vector<16x1xf32> to vector<16x32xf32>
    %564 = arith.mulf %563, %562 : vector<16x32xf32>
    %565 = arith.addf %559, %564 : vector<16x32xf32>
    %566 = vector.extract_strided_slice %508 {offsets = [0, 12], sizes = [16, 1], strides = [1, 1]} : vector<16x16xf32> to vector<16x1xf32>
    %c2_373 = arith.constant 2 : index
    %c0_374 = arith.constant 0 : index
    %c0_375 = arith.constant 0 : index
    %567 = vector.load %arg39[%c2_373, %c0_374, %c0_375] : memref<4x16x32xf32, #tpu.memory_space<vmem>>, vector<1x16x32xf32>
    %568 = vector.shape_cast %567 : vector<1x16x32xf32> to vector<16x32xf32>
    %569 = vector.broadcast %566 : vector<16x1xf32> to vector<16x32xf32>
    %570 = arith.mulf %569, %568 : vector<16x32xf32>
    %571 = arith.addf %565, %570 : vector<16x32xf32>
    %572 = vector.extract_strided_slice %508 {offsets = [0, 13], sizes = [16, 1], strides = [1, 1]} : vector<16x16xf32> to vector<16x1xf32>
    %c3_376 = arith.constant 3 : index
    %c0_377 = arith.constant 0 : index
    %c0_378 = arith.constant 0 : index
    %573 = vector.load %arg39[%c3_376, %c0_377, %c0_378] : memref<4x16x32xf32, #tpu.memory_space<vmem>>, vector<1x16x32xf32>
    %574 = vector.shape_cast %573 : vector<1x16x32xf32> to vector<16x32xf32>
    %575 = vector.broadcast %572 : vector<16x1xf32> to vector<16x32xf32>
    %576 = arith.mulf %575, %574 : vector<16x32xf32>
    %577 = arith.addf %571, %576 : vector<16x32xf32>
    %578 = vector.extract_strided_slice %508 {offsets = [0, 10], sizes = [16, 1], strides = [1, 1]} : vector<16x16xf32> to vector<16x1xf32>
    %c0_379 = arith.constant 0 : index
    %c0_380 = arith.constant 0 : index
    %c0_381 = arith.constant 0 : index
    %579 = vector.load %arg39[%c0_379, %c0_380, %c0_381] : memref<4x16x32xf32, #tpu.memory_space<vmem>>, vector<1x16x32xf32>
    %580 = vector.shape_cast %579 : vector<1x16x32xf32> to vector<16x32xf32>
    %581 = vector.broadcast %578 : vector<16x1xf32> to vector<16x32xf32>
    %582 = arith.mulf %581, %580 : vector<16x32xf32>
    %583 = vector.extract_strided_slice %508 {offsets = [0, 11], sizes = [16, 1], strides = [1, 1]} : vector<16x16xf32> to vector<16x1xf32>
    %c1_382 = arith.constant 1 : index
    %c0_383 = arith.constant 0 : index
    %c0_384 = arith.constant 0 : index
    %584 = vector.load %arg39[%c1_382, %c0_383, %c0_384] : memref<4x16x32xf32, #tpu.memory_space<vmem>>, vector<1x16x32xf32>
    %585 = vector.shape_cast %584 : vector<1x16x32xf32> to vector<16x32xf32>
    %586 = vector.broadcast %583 : vector<16x1xf32> to vector<16x32xf32>
    %587 = arith.mulf %586, %585 : vector<16x32xf32>
    %588 = arith.addf %582, %587 : vector<16x32xf32>
    %589 = vector.extract_strided_slice %508 {offsets = [0, 14], sizes = [16, 1], strides = [1, 1]} : vector<16x16xf32> to vector<16x1xf32>
    %c2_385 = arith.constant 2 : index
    %c0_386 = arith.constant 0 : index
    %c0_387 = arith.constant 0 : index
    %590 = vector.load %arg39[%c2_385, %c0_386, %c0_387] : memref<4x16x32xf32, #tpu.memory_space<vmem>>, vector<1x16x32xf32>
    %591 = vector.shape_cast %590 : vector<1x16x32xf32> to vector<16x32xf32>
    %592 = vector.broadcast %589 : vector<16x1xf32> to vector<16x32xf32>
    %593 = arith.mulf %592, %591 : vector<16x32xf32>
    %594 = arith.addf %588, %593 : vector<16x32xf32>
    %595 = vector.extract_strided_slice %508 {offsets = [0, 15], sizes = [16, 1], strides = [1, 1]} : vector<16x16xf32> to vector<16x1xf32>
    %c3_388 = arith.constant 3 : index
    %c0_389 = arith.constant 0 : index
    %c0_390 = arith.constant 0 : index
    %596 = vector.load %arg39[%c3_388, %c0_389, %c0_390] : memref<4x16x32xf32, #tpu.memory_space<vmem>>, vector<1x16x32xf32>
    %597 = vector.shape_cast %596 : vector<1x16x32xf32> to vector<16x32xf32>
    %598 = vector.broadcast %595 : vector<16x1xf32> to vector<16x32xf32>
    %599 = arith.mulf %598, %597 : vector<16x32xf32>
    %600 = arith.addf %594, %599 : vector<16x32xf32>
    %601 = tpu.concatenate %531, %554, %577, %600 in 0 : vector<16x32xf32>, vector<16x32xf32>, vector<16x32xf32>, vector<16x32xf32> -> vector<64x32xf32>
    %c0_391 = arith.constant 0 : index
    %c0_392 = arith.constant 0 : index
    %602 = vector.load %arg40[%c0_391, %c0_392] : memref<32x64xf32, #tpu.memory_space<vmem>>, vector<32x64xf32>
    %cst_393 = arith.constant dense<0.000000e+00> : vector<32x32xf32>
    %603 = tpu.matmul %602, %601, %cst_393 {dimension_numbers = #tpu.dot_dimension_numbers<[1], [0], [0], [1], [0, 0, 1, 1], [], []>} : vector<32x64xf32>, vector<64x32xf32>, vector<32x32xf32> -> vector<32x32xf32>
    %604 = vector.extract_strided_slice %603 {offsets = [0, 0], sizes = [8, 32], strides = [1, 1]} : vector<32x32xf32> to vector<8x32xf32>
    %605 = vector.extract_strided_slice %603 {offsets = [8, 0], sizes = [8, 32], strides = [1, 1]} : vector<32x32xf32> to vector<8x32xf32>
    %606 = vector.extract_strided_slice %603 {offsets = [16, 0], sizes = [8, 32], strides = [1, 1]} : vector<32x32xf32> to vector<8x32xf32>
    %607 = vector.extract_strided_slice %603 {offsets = [24, 0], sizes = [8, 32], strides = [1, 1]} : vector<32x32xf32> to vector<8x32xf32>
    %608 = tpu.concatenate %604, %605, %606, %607 in 1 : vector<8x32xf32>, vector<8x32xf32>, vector<8x32xf32>, vector<8x32xf32> -> vector<8x128xf32>
    %c0_394 = arith.constant 0 : index
    %c0_395 = arith.constant 0 : index
    %c0_396 = arith.constant 0 : index
    %c0_397 = arith.constant 0 : index
    %609 = vector.load %arg41[%c0_394, %c0_395, %c0_396, %c0_397] : memref<1x2x8x128xf32, #tpu.memory_space<vmem>>, vector<1x1x8x128xf32>
    %610 = vector.shape_cast %609 : vector<1x1x8x128xf32> to vector<8x128xf32>
    %611 = vector.shape_cast %608 : vector<8x128xf32> to vector<1x1x8x128xf32>
    tpu.vector_store %arg41[%c0_394, %c0_395, %c0_396, %c0_397], %611 {strides = array<i32>} : memref<1x2x8x128xf32, #tpu.memory_space<vmem>>, vector<1x1x8x128xf32>,
    %c0_398 = arith.constant 0 : index
    %c1_399 = arith.constant 1 : index
    %c0_400 = arith.constant 0 : index
    %c0_401 = arith.constant 0 : index
    %612 = vector.load %arg2[%c0_398, %c1_399, %c0_400, %c0_401] : memref<1x2x7x32xf32, #tpu.memory_space<vmem>>, vector<1x1x7x32xf32>
    %613 = vector.shape_cast %612 : vector<1x1x7x32xf32> to vector<7x32xf32>
    %c0_402 = arith.constant 0 : index
    %c0_403 = arith.constant 0 : index
    %c0_404 = arith.constant 0 : index
    %c0_405 = arith.constant 0 : index
    %614 = vector.load %arg20[%c0_402, %c0_403, %c0_404, %c0_405] : memref<4x3x32x32xf32, #tpu.memory_space<vmem>>, vector<1x1x32x32xf32>
    %615 = vector.shape_cast %614 : vector<1x1x32x32xf32> to vector<32x32xf32>
    %cst_406 = arith.constant dense<0.000000e+00> : vector<7x32xf32>
    %616 = tpu.matmul %613, %615, %cst_406 {dimension_numbers = #tpu.dot_dimension_numbers<[1], [0], [0], [1], [0, 0, 1, 1], [], []>} : vector<7x32xf32>, vector<32x32xf32>, vector<7x32xf32> -> vector<7x32xf32>
    %c0_407 = arith.constant 0 : index
    %c0_408 = arith.constant 0 : index
    %c0_409 = arith.constant 0 : index
    %c0_410 = arith.constant 0 : index
    %617 = vector.load %arg21[%c0_407, %c0_408, %c0_409, %c0_410] : memref<4x3x1x32xf32, #tpu.memory_space<vmem>>, vector<1x1x1x32xf32>
    %618 = vector.shape_cast %617 : vector<1x1x1x32xf32> to vector<1x32xf32>
    %619 = vector.broadcast %618 : vector<1x32xf32> to vector<7x32xf32>
    %620 = arith.addf %616, %619 : vector<7x32xf32>
    %c0_411 = arith.constant 0 : index
    %c1_412 = arith.constant 1 : index
    %c0_413 = arith.constant 0 : index
    %c0_414 = arith.constant 0 : index
    %621 = vector.load %arg20[%c0_411, %c1_412, %c0_413, %c0_414] : memref<4x3x32x32xf32, #tpu.memory_space<vmem>>, vector<1x1x32x32xf32>
    %622 = vector.shape_cast %621 : vector<1x1x32x32xf32> to vector<32x32xf32>
    %cst_415 = arith.constant dense<0.000000e+00> : vector<7x32xf32>
    %623 = tpu.matmul %613, %622, %cst_415 {dimension_numbers = #tpu.dot_dimension_numbers<[1], [0], [0], [1], [0, 0, 1, 1], [], []>} : vector<7x32xf32>, vector<32x32xf32>, vector<7x32xf32> -> vector<7x32xf32>
    %c0_416 = arith.constant 0 : index
    %c1_417 = arith.constant 1 : index
    %c0_418 = arith.constant 0 : index
    %c0_419 = arith.constant 0 : index
    %624 = vector.load %arg21[%c0_416, %c1_417, %c0_418, %c0_419] : memref<4x3x1x32xf32, #tpu.memory_space<vmem>>, vector<1x1x1x32xf32>
    %625 = vector.shape_cast %624 : vector<1x1x1x32xf32> to vector<1x32xf32>
    %626 = vector.broadcast %625 : vector<1x32xf32> to vector<7x32xf32>
    %627 = arith.addf %623, %626 : vector<7x32xf32>
    %c0_420 = arith.constant 0 : index
    %c2_421 = arith.constant 2 : index
    %c0_422 = arith.constant 0 : index
    %c0_423 = arith.constant 0 : index
    %628 = vector.load %arg20[%c0_420, %c2_421, %c0_422, %c0_423] : memref<4x3x32x32xf32, #tpu.memory_space<vmem>>, vector<1x1x32x32xf32>
    %629 = vector.shape_cast %628 : vector<1x1x32x32xf32> to vector<32x32xf32>
    %cst_424 = arith.constant dense<0.000000e+00> : vector<7x32xf32>
    %630 = tpu.matmul %613, %629, %cst_424 {dimension_numbers = #tpu.dot_dimension_numbers<[1], [0], [0], [1], [0, 0, 1, 1], [], []>} : vector<7x32xf32>, vector<32x32xf32>, vector<7x32xf32> -> vector<7x32xf32>
    %c0_425 = arith.constant 0 : index
    %c2_426 = arith.constant 2 : index
    %c0_427 = arith.constant 0 : index
    %c0_428 = arith.constant 0 : index
    %631 = vector.load %arg21[%c0_425, %c2_426, %c0_427, %c0_428] : memref<4x3x1x32xf32, #tpu.memory_space<vmem>>, vector<1x1x1x32xf32>
    %632 = vector.shape_cast %631 : vector<1x1x1x32xf32> to vector<1x32xf32>
    %633 = vector.broadcast %632 : vector<1x32xf32> to vector<7x32xf32>
    %634 = arith.addf %630, %633 : vector<7x32xf32>
    %c0_429 = arith.constant 0 : index
    %c0_430 = arith.constant 0 : index
    %c0_431 = arith.constant 0 : index
    %635 = vector.load %arg22[%c0_429, %c0_430, %c0_431] : memref<4x32x32xf32, #tpu.memory_space<vmem>>, vector<1x32x32xf32>
    %636 = vector.shape_cast %635 : vector<1x32x32xf32> to vector<32x32xf32>
    %c0_432 = arith.constant 0 : index
    %c0_433 = arith.constant 0 : index
    %c0_434 = arith.constant 0 : index
    %637 = vector.load %arg23[%c0_432, %c0_433, %c0_434] : memref<4x1x32xf32, #tpu.memory_space<vmem>>, vector<1x1x32xf32>
    %638 = vector.shape_cast %637 : vector<1x1x32xf32> to vector<1x32xf32>
    %cst_435 = arith.constant dense<0.000000e+00> : vector<7x7xf32>
    %639 = tpu.matmul %620, %627, %cst_435 {dimension_numbers = #tpu.dot_dimension_numbers<[1], [1], [0], [0], [0, 0, 1, 0], [], []>} : vector<7x32xf32>, vector<7x32xf32>, vector<7x7xf32> -> vector<7x7xf32>
    %cst_436 = arith.constant dense<0xFF800000> : vector<7xf32>
    %640 = vector.multi_reduction <maximumf>, %639, %cst_436 [1] : vector<7x7xf32> to vector<7xf32>
    %641 = vector.shape_cast %640 : vector<7xf32> to vector<7x1xf32>
    %642 = vector.broadcast %641 : vector<7x1xf32> to vector<7x7xf32>
    %643 = arith.subf %639, %642 : vector<7x7xf32>
    %644 = math.exp %643 : vector<7x7xf32>
    %cst_437 = arith.constant dense<0.000000e+00> : vector<7xf32>
    %645 = vector.multi_reduction <add>, %644, %cst_437 [1] : vector<7x7xf32> to vector<7xf32>
    %646 = vector.shape_cast %645 : vector<7xf32> to vector<7x1xf32>
    %647 = tpu.reciprocal %646 {approx = true} : vector<7x1xf32> -> vector<7x1xf32>
    %648 = vector.broadcast %647 : vector<7x1xf32> to vector<7x7xf32>
    %649 = arith.mulf %644, %648 : vector<7x7xf32>
    %cst_438 = arith.constant dense<0.000000e+00> : vector<7x32xf32>
    %650 = tpu.matmul %649, %634, %cst_438 {dimension_numbers = #tpu.dot_dimension_numbers<[1], [0], [0], [1], [0, 0, 1, 1], [], []>} : vector<7x7xf32>, vector<7x32xf32>, vector<7x32xf32> -> vector<7x32xf32>
    %cst_439 = arith.constant dense<0.000000e+00> : vector<7x32xf32>
    %651 = tpu.matmul %650, %636, %cst_439 {dimension_numbers = #tpu.dot_dimension_numbers<[1], [0], [0], [1], [0, 0, 1, 1], [], []>} : vector<7x32xf32>, vector<32x32xf32>, vector<7x32xf32> -> vector<7x32xf32>
    %652 = vector.broadcast %638 : vector<1x32xf32> to vector<7x32xf32>
    %653 = arith.addf %651, %652 : vector<7x32xf32>
    %654 = arith.addf %613, %653 : vector<7x32xf32>
    %c0_440 = arith.constant 0 : index
    %c0_441 = arith.constant 0 : index
    %c0_442 = arith.constant 0 : index
    %655 = vector.load %arg24[%c0_440, %c0_441, %c0_442] : memref<5x1x32xf32, #tpu.memory_space<vmem>>, vector<1x1x32xf32>
    %656 = vector.shape_cast %655 : vector<1x1x32xf32> to vector<1x32xf32>
    %c0_443 = arith.constant 0 : index
    %c0_444 = arith.constant 0 : index
    %c0_445 = arith.constant 0 : index
    %657 = vector.load %arg25[%c0_443, %c0_444, %c0_445] : memref<5x1x32xf32, #tpu.memory_space<vmem>>, vector<1x1x32xf32>
    %658 = vector.shape_cast %657 : vector<1x1x32xf32> to vector<1x32xf32>
    %cst_446 = arith.constant dense<0.000000e+00> : vector<7xf32>
    %659 = vector.multi_reduction <add>, %654, %cst_446 [1] : vector<7x32xf32> to vector<7xf32>
    %660 = vector.shape_cast %659 : vector<7xf32> to vector<7x1xf32>
    %cst_447 = arith.constant 3.200000e+01 : f32
    %661 = vector.broadcast %cst_447 : f32 to vector<7x1xf32>
    %662 = arith.divf %660, %661 : vector<7x1xf32>
    %663 = vector.broadcast %662 : vector<7x1xf32> to vector<7x32xf32>
    %664 = arith.subf %654, %663 : vector<7x32xf32>
    %665 = arith.mulf %664, %664 : vector<7x32xf32>
    %cst_448 = arith.constant dense<0.000000e+00> : vector<7xf32>
    %666 = vector.multi_reduction <add>, %665, %cst_448 [1] : vector<7x32xf32> to vector<7xf32>
    %667 = vector.shape_cast %666 : vector<7xf32> to vector<7x1xf32>
    %cst_449 = arith.constant 3.200000e+01 : f32
    %668 = vector.broadcast %cst_449 : f32 to vector<7x1xf32>
    %669 = arith.divf %667, %668 : vector<7x1xf32>
    %670 = vector.broadcast %662 : vector<7x1xf32> to vector<7x32xf32>
    %671 = arith.subf %654, %670 : vector<7x32xf32>
    %cst_450 = arith.constant 9.99999974E-6 : f32
    %672 = vector.broadcast %cst_450 : f32 to vector<7x1xf32>
    %673 = arith.addf %669, %672 : vector<7x1xf32>
    %674 = math.rsqrt %673 : vector<7x1xf32>
    %675 = vector.broadcast %674 : vector<7x1xf32> to vector<7x32xf32>
    %676 = arith.mulf %671, %675 : vector<7x32xf32>
    %677 = vector.broadcast %656 : vector<1x32xf32> to vector<7x32xf32>
    %678 = arith.mulf %676, %677 : vector<7x32xf32>
    %679 = vector.broadcast %658 : vector<1x32xf32> to vector<7x32xf32>
    %680 = arith.addf %678, %679 : vector<7x32xf32>
    %681 = arith.addf %680, %613 : vector<7x32xf32>
    %c1_451 = arith.constant 1 : index
    %c0_452 = arith.constant 0 : index
    %c0_453 = arith.constant 0 : index
    %c0_454 = arith.constant 0 : index
    %682 = vector.load %arg20[%c1_451, %c0_452, %c0_453, %c0_454] : memref<4x3x32x32xf32, #tpu.memory_space<vmem>>, vector<1x1x32x32xf32>
    %683 = vector.shape_cast %682 : vector<1x1x32x32xf32> to vector<32x32xf32>
    %cst_455 = arith.constant dense<0.000000e+00> : vector<7x32xf32>
    %684 = tpu.matmul %681, %683, %cst_455 {dimension_numbers = #tpu.dot_dimension_numbers<[1], [0], [0], [1], [0, 0, 1, 1], [], []>} : vector<7x32xf32>, vector<32x32xf32>, vector<7x32xf32> -> vector<7x32xf32>
    %c1_456 = arith.constant 1 : index
    %c0_457 = arith.constant 0 : index
    %c0_458 = arith.constant 0 : index
    %c0_459 = arith.constant 0 : index
    %685 = vector.load %arg21[%c1_456, %c0_457, %c0_458, %c0_459] : memref<4x3x1x32xf32, #tpu.memory_space<vmem>>, vector<1x1x1x32xf32>
    %686 = vector.shape_cast %685 : vector<1x1x1x32xf32> to vector<1x32xf32>
    %687 = vector.broadcast %686 : vector<1x32xf32> to vector<7x32xf32>
    %688 = arith.addf %684, %687 : vector<7x32xf32>
    %c1_460 = arith.constant 1 : index
    %c0_461 = arith.constant 0 : index
    %c0_462 = arith.constant 0 : index
    %689 = vector.load %arg22[%c1_460, %c0_461, %c0_462] : memref<4x32x32xf32, #tpu.memory_space<vmem>>, vector<1x32x32xf32>
    %690 = vector.shape_cast %689 : vector<1x32x32xf32> to vector<32x32xf32>
    %c1_463 = arith.constant 1 : index
    %c0_464 = arith.constant 0 : index
    %c0_465 = arith.constant 0 : index
    %691 = vector.load %arg23[%c1_463, %c0_464, %c0_465] : memref<4x1x32xf32, #tpu.memory_space<vmem>>, vector<1x1x32xf32>
    %692 = vector.shape_cast %691 : vector<1x1x32xf32> to vector<1x32xf32>
    %cst_466 = arith.constant dense<0.000000e+00> : vector<7x16xf32>
    %693 = tpu.matmul %688, %140, %cst_466 {dimension_numbers = #tpu.dot_dimension_numbers<[1], [1], [0], [0], [0, 0, 1, 0], [], []>} : vector<7x32xf32>, vector<16x32xf32>, vector<7x16xf32> -> vector<7x16xf32>
    %cst_467 = arith.constant dense<0xFF800000> : vector<7xf32>
    %694 = vector.multi_reduction <maximumf>, %693, %cst_467 [1] : vector<7x16xf32> to vector<7xf32>
    %695 = vector.shape_cast %694 : vector<7xf32> to vector<7x1xf32>
    %696 = vector.broadcast %695 : vector<7x1xf32> to vector<7x16xf32>
    %697 = arith.subf %693, %696 : vector<7x16xf32>
    %698 = math.exp %697 : vector<7x16xf32>
    %cst_468 = arith.constant dense<0.000000e+00> : vector<7xf32>
    %699 = vector.multi_reduction <add>, %698, %cst_468 [1] : vector<7x16xf32> to vector<7xf32>
    %700 = vector.shape_cast %699 : vector<7xf32> to vector<7x1xf32>
    %701 = tpu.reciprocal %700 {approx = true} : vector<7x1xf32> -> vector<7x1xf32>
    %702 = vector.broadcast %701 : vector<7x1xf32> to vector<7x16xf32>
    %703 = arith.mulf %698, %702 : vector<7x16xf32>
    %cst_469 = arith.constant dense<0.000000e+00> : vector<7x32xf32>
    %704 = tpu.matmul %703, %147, %cst_469 {dimension_numbers = #tpu.dot_dimension_numbers<[1], [0], [0], [1], [0, 0, 1, 1], [], []>} : vector<7x16xf32>, vector<16x32xf32>, vector<7x32xf32> -> vector<7x32xf32>
    %cst_470 = arith.constant dense<0.000000e+00> : vector<7x32xf32>
    %705 = tpu.matmul %704, %690, %cst_470 {dimension_numbers = #tpu.dot_dimension_numbers<[1], [0], [0], [1], [0, 0, 1, 1], [], []>} : vector<7x32xf32>, vector<32x32xf32>, vector<7x32xf32> -> vector<7x32xf32>
    %706 = vector.broadcast %692 : vector<1x32xf32> to vector<7x32xf32>
    %707 = arith.addf %705, %706 : vector<7x32xf32>
    %708 = arith.addf %680, %707 : vector<7x32xf32>
    %c1_471 = arith.constant 1 : index
    %c0_472 = arith.constant 0 : index
    %c0_473 = arith.constant 0 : index
    %709 = vector.load %arg24[%c1_471, %c0_472, %c0_473] : memref<5x1x32xf32, #tpu.memory_space<vmem>>, vector<1x1x32xf32>
    %710 = vector.shape_cast %709 : vector<1x1x32xf32> to vector<1x32xf32>
    %c1_474 = arith.constant 1 : index
    %c0_475 = arith.constant 0 : index
    %c0_476 = arith.constant 0 : index
    %711 = vector.load %arg25[%c1_474, %c0_475, %c0_476] : memref<5x1x32xf32, #tpu.memory_space<vmem>>, vector<1x1x32xf32>
    %712 = vector.shape_cast %711 : vector<1x1x32xf32> to vector<1x32xf32>
    %cst_477 = arith.constant dense<0.000000e+00> : vector<7xf32>
    %713 = vector.multi_reduction <add>, %708, %cst_477 [1] : vector<7x32xf32> to vector<7xf32>
    %714 = vector.shape_cast %713 : vector<7xf32> to vector<7x1xf32>
    %cst_478 = arith.constant 3.200000e+01 : f32
    %715 = vector.broadcast %cst_478 : f32 to vector<7x1xf32>
    %716 = arith.divf %714, %715 : vector<7x1xf32>
    %717 = vector.broadcast %716 : vector<7x1xf32> to vector<7x32xf32>
    %718 = arith.subf %708, %717 : vector<7x32xf32>
    %719 = arith.mulf %718, %718 : vector<7x32xf32>
    %cst_479 = arith.constant dense<0.000000e+00> : vector<7xf32>
    %720 = vector.multi_reduction <add>, %719, %cst_479 [1] : vector<7x32xf32> to vector<7xf32>
    %721 = vector.shape_cast %720 : vector<7xf32> to vector<7x1xf32>
    %cst_480 = arith.constant 3.200000e+01 : f32
    %722 = vector.broadcast %cst_480 : f32 to vector<7x1xf32>
    %723 = arith.divf %721, %722 : vector<7x1xf32>
    %724 = vector.broadcast %716 : vector<7x1xf32> to vector<7x32xf32>
    %725 = arith.subf %708, %724 : vector<7x32xf32>
    %cst_481 = arith.constant 9.99999974E-6 : f32
    %726 = vector.broadcast %cst_481 : f32 to vector<7x1xf32>
    %727 = arith.addf %723, %726 : vector<7x1xf32>
    %728 = math.rsqrt %727 : vector<7x1xf32>
    %729 = vector.broadcast %728 : vector<7x1xf32> to vector<7x32xf32>
    %730 = arith.mulf %725, %729 : vector<7x32xf32>
    %731 = vector.broadcast %710 : vector<1x32xf32> to vector<7x32xf32>
    %732 = arith.mulf %730, %731 : vector<7x32xf32>
    %733 = vector.broadcast %712 : vector<1x32xf32> to vector<7x32xf32>
    %734 = arith.addf %732, %733 : vector<7x32xf32>
    %c0_482 = arith.constant 0 : index
    %c0_483 = arith.constant 0 : index
    %735 = vector.load %arg26[%c0_482, %c0_483] : memref<32x64xf32, #tpu.memory_space<vmem>>, vector<32x64xf32>
    %cst_484 = arith.constant dense<0.000000e+00> : vector<7x64xf32>
    %736 = tpu.matmul %734, %735, %cst_484 {dimension_numbers = #tpu.dot_dimension_numbers<[1], [0], [0], [1], [0, 0, 1, 1], [], []>} : vector<7x32xf32>, vector<32x64xf32>, vector<7x64xf32> -> vector<7x64xf32>
    %c0_485 = arith.constant 0 : index
    %c0_486 = arith.constant 0 : index
    %737 = vector.load %arg27[%c0_485, %c0_486] : memref<1x64xf32, #tpu.memory_space<vmem>>, vector<1x64xf32>
    %738 = vector.broadcast %737 : vector<1x64xf32> to vector<7x64xf32>
    %739 = arith.addf %736, %738 : vector<7x64xf32>
    %cst_487 = arith.constant 0.000000e+00 : f32
    %740 = vector.broadcast %cst_487 : f32 to vector<7x64xf32>
    %741 = arith.maximumf %739, %740 : vector<7x64xf32>
    %c0_488 = arith.constant 0 : index
    %c0_489 = arith.constant 0 : index
    %742 = vector.load %arg28[%c0_488, %c0_489] : memref<64x32xf32, #tpu.memory_space<vmem>>, vector<64x32xf32>
    %cst_490 = arith.constant dense<0.000000e+00> : vector<7x32xf32>
    %743 = tpu.matmul %741, %742, %cst_490 {dimension_numbers = #tpu.dot_dimension_numbers<[1], [0], [0], [1], [0, 0, 1, 1], [], []>} : vector<7x64xf32>, vector<64x32xf32>, vector<7x32xf32> -> vector<7x32xf32>
    %c0_491 = arith.constant 0 : index
    %c0_492 = arith.constant 0 : index
    %744 = vector.load %arg29[%c0_491, %c0_492] : memref<1x32xf32, #tpu.memory_space<vmem>>, vector<1x32xf32>
    %745 = vector.broadcast %744 : vector<1x32xf32> to vector<7x32xf32>
    %746 = arith.addf %743, %745 : vector<7x32xf32>
    %747 = arith.addf %734, %746 : vector<7x32xf32>
    %c2_493 = arith.constant 2 : index
    %c0_494 = arith.constant 0 : index
    %c0_495 = arith.constant 0 : index
    %748 = vector.load %arg24[%c2_493, %c0_494, %c0_495] : memref<5x1x32xf32, #tpu.memory_space<vmem>>, vector<1x1x32xf32>
    %749 = vector.shape_cast %748 : vector<1x1x32xf32> to vector<1x32xf32>
    %c2_496 = arith.constant 2 : index
    %c0_497 = arith.constant 0 : index
    %c0_498 = arith.constant 0 : index
    %750 = vector.load %arg25[%c2_496, %c0_497, %c0_498] : memref<5x1x32xf32, #tpu.memory_space<vmem>>, vector<1x1x32xf32>
    %751 = vector.shape_cast %750 : vector<1x1x32xf32> to vector<1x32xf32>
    %cst_499 = arith.constant dense<0.000000e+00> : vector<7xf32>
    %752 = vector.multi_reduction <add>, %747, %cst_499 [1] : vector<7x32xf32> to vector<7xf32>
    %753 = vector.shape_cast %752 : vector<7xf32> to vector<7x1xf32>
    %cst_500 = arith.constant 3.200000e+01 : f32
    %754 = vector.broadcast %cst_500 : f32 to vector<7x1xf32>
    %755 = arith.divf %753, %754 : vector<7x1xf32>
    %756 = vector.broadcast %755 : vector<7x1xf32> to vector<7x32xf32>
    %757 = arith.subf %747, %756 : vector<7x32xf32>
    %758 = arith.mulf %757, %757 : vector<7x32xf32>
    %cst_501 = arith.constant dense<0.000000e+00> : vector<7xf32>
    %759 = vector.multi_reduction <add>, %758, %cst_501 [1] : vector<7x32xf32> to vector<7xf32>
    %760 = vector.shape_cast %759 : vector<7xf32> to vector<7x1xf32>
    %cst_502 = arith.constant 3.200000e+01 : f32
    %761 = vector.broadcast %cst_502 : f32 to vector<7x1xf32>
    %762 = arith.divf %760, %761 : vector<7x1xf32>
    %763 = vector.broadcast %755 : vector<7x1xf32> to vector<7x32xf32>
    %764 = arith.subf %747, %763 : vector<7x32xf32>
    %cst_503 = arith.constant 9.99999974E-6 : f32
    %765 = vector.broadcast %cst_503 : f32 to vector<7x1xf32>
    %766 = arith.addf %762, %765 : vector<7x1xf32>
    %767 = math.rsqrt %766 : vector<7x1xf32>
    %768 = vector.broadcast %767 : vector<7x1xf32> to vector<7x32xf32>
    %769 = arith.mulf %764, %768 : vector<7x32xf32>
    %770 = vector.broadcast %749 : vector<1x32xf32> to vector<7x32xf32>
    %771 = arith.mulf %769, %770 : vector<7x32xf32>
    %772 = vector.broadcast %751 : vector<1x32xf32> to vector<7x32xf32>
    %773 = arith.addf %771, %772 : vector<7x32xf32>
    %774 = arith.addf %773, %613 : vector<7x32xf32>
    %c2_504 = arith.constant 2 : index
    %c1_505 = arith.constant 1 : index
    %c0_506 = arith.constant 0 : index
    %c0_507 = arith.constant 0 : index
    %775 = vector.load %arg20[%c2_504, %c1_505, %c0_506, %c0_507] : memref<4x3x32x32xf32, #tpu.memory_space<vmem>>, vector<1x1x32x32xf32>
    %776 = vector.shape_cast %775 : vector<1x1x32x32xf32> to vector<32x32xf32>
    %cst_508 = arith.constant dense<0.000000e+00> : vector<7x32xf32>
    %777 = tpu.matmul %774, %776, %cst_508 {dimension_numbers = #tpu.dot_dimension_numbers<[1], [0], [0], [1], [0, 0, 1, 1], [], []>} : vector<7x32xf32>, vector<32x32xf32>, vector<7x32xf32> -> vector<7x32xf32>
    %c2_509 = arith.constant 2 : index
    %c1_510 = arith.constant 1 : index
    %c0_511 = arith.constant 0 : index
    %c0_512 = arith.constant 0 : index
    %778 = vector.load %arg21[%c2_509, %c1_510, %c0_511, %c0_512] : memref<4x3x1x32xf32, #tpu.memory_space<vmem>>, vector<1x1x1x32xf32>
    %779 = vector.shape_cast %778 : vector<1x1x1x32xf32> to vector<1x32xf32>
    %780 = vector.broadcast %779 : vector<1x32xf32> to vector<7x32xf32>
    %781 = arith.addf %777, %780 : vector<7x32xf32>
    %c2_513 = arith.constant 2 : index
    %c2_514 = arith.constant 2 : index
    %c0_515 = arith.constant 0 : index
    %c0_516 = arith.constant 0 : index
    %782 = vector.load %arg20[%c2_513, %c2_514, %c0_515, %c0_516] : memref<4x3x32x32xf32, #tpu.memory_space<vmem>>, vector<1x1x32x32xf32>
    %783 = vector.shape_cast %782 : vector<1x1x32x32xf32> to vector<32x32xf32>
    %cst_517 = arith.constant dense<0.000000e+00> : vector<7x32xf32>
    %784 = tpu.matmul %773, %783, %cst_517 {dimension_numbers = #tpu.dot_dimension_numbers<[1], [0], [0], [1], [0, 0, 1, 1], [], []>} : vector<7x32xf32>, vector<32x32xf32>, vector<7x32xf32> -> vector<7x32xf32>
    %c2_518 = arith.constant 2 : index
    %c2_519 = arith.constant 2 : index
    %c0_520 = arith.constant 0 : index
    %c0_521 = arith.constant 0 : index
    %785 = vector.load %arg21[%c2_518, %c2_519, %c0_520, %c0_521] : memref<4x3x1x32xf32, #tpu.memory_space<vmem>>, vector<1x1x1x32xf32>
    %786 = vector.shape_cast %785 : vector<1x1x1x32xf32> to vector<1x32xf32>
    %787 = vector.broadcast %786 : vector<1x32xf32> to vector<7x32xf32>
    %788 = arith.addf %784, %787 : vector<7x32xf32>
    %c2_522 = arith.constant 2 : index
    %c0_523 = arith.constant 0 : index
    %c0_524 = arith.constant 0 : index
    %789 = vector.load %arg22[%c2_522, %c0_523, %c0_524] : memref<4x32x32xf32, #tpu.memory_space<vmem>>, vector<1x32x32xf32>
    %790 = vector.shape_cast %789 : vector<1x32x32xf32> to vector<32x32xf32>
    %c2_525 = arith.constant 2 : index
    %c0_526 = arith.constant 0 : index
    %c0_527 = arith.constant 0 : index
    %791 = vector.load %arg23[%c2_525, %c0_526, %c0_527] : memref<4x1x32xf32, #tpu.memory_space<vmem>>, vector<1x1x32xf32>
    %792 = vector.shape_cast %791 : vector<1x1x32xf32> to vector<1x32xf32>
    %cst_528 = arith.constant dense<0.000000e+00> : vector<16x7xf32>
    %793 = tpu.matmul %154, %781, %cst_528 {dimension_numbers = #tpu.dot_dimension_numbers<[1], [1], [0], [0], [0, 0, 1, 0], [], []>} : vector<16x32xf32>, vector<7x32xf32>, vector<16x7xf32> -> vector<16x7xf32>
    %cst_529 = arith.constant dense<0xFF800000> : vector<16xf32>
    %794 = vector.multi_reduction <maximumf>, %793, %cst_529 [1] : vector<16x7xf32> to vector<16xf32>
    %795 = vector.shape_cast %794 : vector<16xf32> to vector<16x1xf32>
    %796 = vector.broadcast %795 : vector<16x1xf32> to vector<16x7xf32>
    %797 = arith.subf %793, %796 : vector<16x7xf32>
    %798 = math.exp %797 : vector<16x7xf32>
    %cst_530 = arith.constant dense<0.000000e+00> : vector<16xf32>
    %799 = vector.multi_reduction <add>, %798, %cst_530 [1] : vector<16x7xf32> to vector<16xf32>
    %800 = vector.shape_cast %799 : vector<16xf32> to vector<16x1xf32>
    %801 = tpu.reciprocal %800 {approx = true} : vector<16x1xf32> -> vector<16x1xf32>
    %802 = vector.broadcast %801 : vector<16x1xf32> to vector<16x7xf32>
    %803 = arith.mulf %798, %802 : vector<16x7xf32>
    %cst_531 = arith.constant dense<0.000000e+00> : vector<16x32xf32>
    %804 = tpu.matmul %803, %788, %cst_531 {dimension_numbers = #tpu.dot_dimension_numbers<[1], [0], [0], [1], [0, 0, 1, 1], [], []>} : vector<16x7xf32>, vector<7x32xf32>, vector<16x32xf32> -> vector<16x32xf32>
    %cst_532 = arith.constant dense<0.000000e+00> : vector<16x32xf32>
    %805 = tpu.matmul %804, %790, %cst_532 {dimension_numbers = #tpu.dot_dimension_numbers<[1], [0], [0], [1], [0, 0, 1, 1], [], []>} : vector<16x32xf32>, vector<32x32xf32>, vector<16x32xf32> -> vector<16x32xf32>
    %806 = vector.broadcast %792 : vector<1x32xf32> to vector<16x32xf32>
    %807 = arith.addf %805, %806 : vector<16x32xf32>
    %808 = arith.addf %132, %807 : vector<16x32xf32>
    %c3_533 = arith.constant 3 : index
    %c0_534 = arith.constant 0 : index
    %c0_535 = arith.constant 0 : index
    %809 = vector.load %arg24[%c3_533, %c0_534, %c0_535] : memref<5x1x32xf32, #tpu.memory_space<vmem>>, vector<1x1x32xf32>
    %810 = vector.shape_cast %809 : vector<1x1x32xf32> to vector<1x32xf32>
    %c3_536 = arith.constant 3 : index
    %c0_537 = arith.constant 0 : index
    %c0_538 = arith.constant 0 : index
    %811 = vector.load %arg25[%c3_536, %c0_537, %c0_538] : memref<5x1x32xf32, #tpu.memory_space<vmem>>, vector<1x1x32xf32>
    %812 = vector.shape_cast %811 : vector<1x1x32xf32> to vector<1x32xf32>
    %cst_539 = arith.constant dense<0.000000e+00> : vector<16xf32>
    %813 = vector.multi_reduction <add>, %808, %cst_539 [1] : vector<16x32xf32> to vector<16xf32>
    %814 = vector.shape_cast %813 : vector<16xf32> to vector<16x1xf32>
    %cst_540 = arith.constant 3.200000e+01 : f32
    %815 = vector.broadcast %cst_540 : f32 to vector<16x1xf32>
    %816 = arith.divf %814, %815 : vector<16x1xf32>
    %817 = vector.broadcast %816 : vector<16x1xf32> to vector<16x32xf32>
    %818 = arith.subf %808, %817 : vector<16x32xf32>
    %819 = arith.mulf %818, %818 : vector<16x32xf32>
    %cst_541 = arith.constant dense<0.000000e+00> : vector<16xf32>
    %820 = vector.multi_reduction <add>, %819, %cst_541 [1] : vector<16x32xf32> to vector<16xf32>
    %821 = vector.shape_cast %820 : vector<16xf32> to vector<16x1xf32>
    %cst_542 = arith.constant 3.200000e+01 : f32
    %822 = vector.broadcast %cst_542 : f32 to vector<16x1xf32>
    %823 = arith.divf %821, %822 : vector<16x1xf32>
    %824 = vector.broadcast %816 : vector<16x1xf32> to vector<16x32xf32>
    %825 = arith.subf %808, %824 : vector<16x32xf32>
    %cst_543 = arith.constant 9.99999974E-6 : f32
    %826 = vector.broadcast %cst_543 : f32 to vector<16x1xf32>
    %827 = arith.addf %823, %826 : vector<16x1xf32>
    %828 = math.rsqrt %827 : vector<16x1xf32>
    %829 = vector.broadcast %828 : vector<16x1xf32> to vector<16x32xf32>
    %830 = arith.mulf %825, %829 : vector<16x32xf32>
    %831 = vector.broadcast %810 : vector<1x32xf32> to vector<16x32xf32>
    %832 = arith.mulf %830, %831 : vector<16x32xf32>
    %833 = vector.broadcast %812 : vector<1x32xf32> to vector<16x32xf32>
    %834 = arith.addf %832, %833 : vector<16x32xf32>
    %835 = arith.addf %834, %129 : vector<16x32xf32>
    %836 = arith.addf %773, %613 : vector<7x32xf32>
    %c3_544 = arith.constant 3 : index
    %c0_545 = arith.constant 0 : index
    %c0_546 = arith.constant 0 : index
    %c0_547 = arith.constant 0 : index
    %837 = vector.load %arg20[%c3_544, %c0_545, %c0_546, %c0_547] : memref<4x3x32x32xf32, #tpu.memory_space<vmem>>, vector<1x1x32x32xf32>
    %838 = vector.shape_cast %837 : vector<1x1x32x32xf32> to vector<32x32xf32>
    %cst_548 = arith.constant dense<0.000000e+00> : vector<7x32xf32>
    %839 = tpu.matmul %836, %838, %cst_548 {dimension_numbers = #tpu.dot_dimension_numbers<[1], [0], [0], [1], [0, 0, 1, 1], [], []>} : vector<7x32xf32>, vector<32x32xf32>, vector<7x32xf32> -> vector<7x32xf32>
    %c3_549 = arith.constant 3 : index
    %c0_550 = arith.constant 0 : index
    %c0_551 = arith.constant 0 : index
    %c0_552 = arith.constant 0 : index
    %840 = vector.load %arg21[%c3_549, %c0_550, %c0_551, %c0_552] : memref<4x3x1x32xf32, #tpu.memory_space<vmem>>, vector<1x1x1x32xf32>
    %841 = vector.shape_cast %840 : vector<1x1x1x32xf32> to vector<1x32xf32>
    %842 = vector.broadcast %841 : vector<1x32xf32> to vector<7x32xf32>
    %843 = arith.addf %839, %842 : vector<7x32xf32>
    %c3_553 = arith.constant 3 : index
    %c1_554 = arith.constant 1 : index
    %c0_555 = arith.constant 0 : index
    %c0_556 = arith.constant 0 : index
    %844 = vector.load %arg20[%c3_553, %c1_554, %c0_555, %c0_556] : memref<4x3x32x32xf32, #tpu.memory_space<vmem>>, vector<1x1x32x32xf32>
    %845 = vector.shape_cast %844 : vector<1x1x32x32xf32> to vector<32x32xf32>
    %cst_557 = arith.constant dense<0.000000e+00> : vector<16x32xf32>
    %846 = tpu.matmul %835, %845, %cst_557 {dimension_numbers = #tpu.dot_dimension_numbers<[1], [0], [0], [1], [0, 0, 1, 1], [], []>} : vector<16x32xf32>, vector<32x32xf32>, vector<16x32xf32> -> vector<16x32xf32>
    %c3_558 = arith.constant 3 : index
    %c1_559 = arith.constant 1 : index
    %c0_560 = arith.constant 0 : index
    %c0_561 = arith.constant 0 : index
    %847 = vector.load %arg21[%c3_558, %c1_559, %c0_560, %c0_561] : memref<4x3x1x32xf32, #tpu.memory_space<vmem>>, vector<1x1x1x32xf32>
    %848 = vector.shape_cast %847 : vector<1x1x1x32xf32> to vector<1x32xf32>
    %849 = vector.broadcast %848 : vector<1x32xf32> to vector<16x32xf32>
    %850 = arith.addf %846, %849 : vector<16x32xf32>
    %c3_562 = arith.constant 3 : index
    %c2_563 = arith.constant 2 : index
    %c0_564 = arith.constant 0 : index
    %c0_565 = arith.constant 0 : index
    %851 = vector.load %arg20[%c3_562, %c2_563, %c0_564, %c0_565] : memref<4x3x32x32xf32, #tpu.memory_space<vmem>>, vector<1x1x32x32xf32>
    %852 = vector.shape_cast %851 : vector<1x1x32x32xf32> to vector<32x32xf32>
    %cst_566 = arith.constant dense<0.000000e+00> : vector<16x32xf32>
    %853 = tpu.matmul %834, %852, %cst_566 {dimension_numbers = #tpu.dot_dimension_numbers<[1], [0], [0], [1], [0, 0, 1, 1], [], []>} : vector<16x32xf32>, vector<32x32xf32>, vector<16x32xf32> -> vector<16x32xf32>
    %c3_567 = arith.constant 3 : index
    %c2_568 = arith.constant 2 : index
    %c0_569 = arith.constant 0 : index
    %c0_570 = arith.constant 0 : index
    %854 = vector.load %arg21[%c3_567, %c2_568, %c0_569, %c0_570] : memref<4x3x1x32xf32, #tpu.memory_space<vmem>>, vector<1x1x1x32xf32>
    %855 = vector.shape_cast %854 : vector<1x1x1x32xf32> to vector<1x32xf32>
    %856 = vector.broadcast %855 : vector<1x32xf32> to vector<16x32xf32>
    %857 = arith.addf %853, %856 : vector<16x32xf32>
    %c3_571 = arith.constant 3 : index
    %c0_572 = arith.constant 0 : index
    %c0_573 = arith.constant 0 : index
    %858 = vector.load %arg22[%c3_571, %c0_572, %c0_573] : memref<4x32x32xf32, #tpu.memory_space<vmem>>, vector<1x32x32xf32>
    %859 = vector.shape_cast %858 : vector<1x32x32xf32> to vector<32x32xf32>
    %c3_574 = arith.constant 3 : index
    %c0_575 = arith.constant 0 : index
    %c0_576 = arith.constant 0 : index
    %860 = vector.load %arg23[%c3_574, %c0_575, %c0_576] : memref<4x1x32xf32, #tpu.memory_space<vmem>>, vector<1x1x32xf32>
    %861 = vector.shape_cast %860 : vector<1x1x32xf32> to vector<1x32xf32>
    %cst_577 = arith.constant dense<0.000000e+00> : vector<7x16xf32>
    %862 = tpu.matmul %843, %850, %cst_577 {dimension_numbers = #tpu.dot_dimension_numbers<[1], [1], [0], [0], [0, 0, 1, 0], [], []>} : vector<7x32xf32>, vector<16x32xf32>, vector<7x16xf32> -> vector<7x16xf32>
    %cst_578 = arith.constant dense<0xFF800000> : vector<7xf32>
    %863 = vector.multi_reduction <maximumf>, %862, %cst_578 [1] : vector<7x16xf32> to vector<7xf32>
    %864 = vector.shape_cast %863 : vector<7xf32> to vector<7x1xf32>
    %865 = vector.broadcast %864 : vector<7x1xf32> to vector<7x16xf32>
    %866 = arith.subf %862, %865 : vector<7x16xf32>
    %867 = math.exp %866 : vector<7x16xf32>
    %cst_579 = arith.constant dense<0.000000e+00> : vector<7xf32>
    %868 = vector.multi_reduction <add>, %867, %cst_579 [1] : vector<7x16xf32> to vector<7xf32>
    %869 = vector.shape_cast %868 : vector<7xf32> to vector<7x1xf32>
    %870 = tpu.reciprocal %869 {approx = true} : vector<7x1xf32> -> vector<7x1xf32>
    %871 = vector.broadcast %870 : vector<7x1xf32> to vector<7x16xf32>
    %872 = arith.mulf %867, %871 : vector<7x16xf32>
    %cst_580 = arith.constant dense<0.000000e+00> : vector<7x32xf32>
    %873 = tpu.matmul %872, %857, %cst_580 {dimension_numbers = #tpu.dot_dimension_numbers<[1], [0], [0], [1], [0, 0, 1, 1], [], []>} : vector<7x16xf32>, vector<16x32xf32>, vector<7x32xf32> -> vector<7x32xf32>
    %cst_581 = arith.constant dense<0.000000e+00> : vector<7x32xf32>
    %874 = tpu.matmul %873, %859, %cst_581 {dimension_numbers = #tpu.dot_dimension_numbers<[1], [0], [0], [1], [0, 0, 1, 1], [], []>} : vector<7x32xf32>, vector<32x32xf32>, vector<7x32xf32> -> vector<7x32xf32>
    %875 = vector.broadcast %861 : vector<1x32xf32> to vector<7x32xf32>
    %876 = arith.addf %874, %875 : vector<7x32xf32>
    %877 = arith.addf %773, %876 : vector<7x32xf32>
    %c4_582 = arith.constant 4 : index
    %c0_583 = arith.constant 0 : index
    %c0_584 = arith.constant 0 : index
    %878 = vector.load %arg24[%c4_582, %c0_583, %c0_584] : memref<5x1x32xf32, #tpu.memory_space<vmem>>, vector<1x1x32xf32>
    %879 = vector.shape_cast %878 : vector<1x1x32xf32> to vector<1x32xf32>
    %c4_585 = arith.constant 4 : index
    %c0_586 = arith.constant 0 : index
    %c0_587 = arith.constant 0 : index
    %880 = vector.load %arg25[%c4_585, %c0_586, %c0_587] : memref<5x1x32xf32, #tpu.memory_space<vmem>>, vector<1x1x32xf32>
    %881 = vector.shape_cast %880 : vector<1x1x32xf32> to vector<1x32xf32>
    %cst_588 = arith.constant dense<0.000000e+00> : vector<7xf32>
    %882 = vector.multi_reduction <add>, %877, %cst_588 [1] : vector<7x32xf32> to vector<7xf32>
    %883 = vector.shape_cast %882 : vector<7xf32> to vector<7x1xf32>
    %cst_589 = arith.constant 3.200000e+01 : f32
    %884 = vector.broadcast %cst_589 : f32 to vector<7x1xf32>
    %885 = arith.divf %883, %884 : vector<7x1xf32>
    %886 = vector.broadcast %885 : vector<7x1xf32> to vector<7x32xf32>
    %887 = arith.subf %877, %886 : vector<7x32xf32>
    %888 = arith.mulf %887, %887 : vector<7x32xf32>
    %cst_590 = arith.constant dense<0.000000e+00> : vector<7xf32>
    %889 = vector.multi_reduction <add>, %888, %cst_590 [1] : vector<7x32xf32> to vector<7xf32>
    %890 = vector.shape_cast %889 : vector<7xf32> to vector<7x1xf32>
    %cst_591 = arith.constant 3.200000e+01 : f32
    %891 = vector.broadcast %cst_591 : f32 to vector<7x1xf32>
    %892 = arith.divf %890, %891 : vector<7x1xf32>
    %893 = vector.broadcast %885 : vector<7x1xf32> to vector<7x32xf32>
    %894 = arith.subf %877, %893 : vector<7x32xf32>
    %cst_592 = arith.constant 9.99999974E-6 : f32
    %895 = vector.broadcast %cst_592 : f32 to vector<7x1xf32>
    %896 = arith.addf %892, %895 : vector<7x1xf32>
    %897 = math.rsqrt %896 : vector<7x1xf32>
    %898 = vector.broadcast %897 : vector<7x1xf32> to vector<7x32xf32>
    %899 = arith.mulf %894, %898 : vector<7x32xf32>
    %900 = vector.broadcast %879 : vector<1x32xf32> to vector<7x32xf32>
    %901 = arith.mulf %899, %900 : vector<7x32xf32>
    %902 = vector.broadcast %881 : vector<1x32xf32> to vector<7x32xf32>
    %903 = arith.addf %901, %902 : vector<7x32xf32>
    %904 = vector.extract_strided_slice %903 {offsets = [1, 0], sizes = [1, 32], strides = [1, 1]} : vector<7x32xf32> to vector<1x32xf32>
    %c0_593 = arith.constant 0 : index
    %c0_594 = arith.constant 0 : index
    %c0_595 = arith.constant 0 : index
    %905 = vector.load %arg30[%c0_593, %c0_594, %c0_595] : memref<2x32x32xf32, #tpu.memory_space<vmem>>, vector<1x32x32xf32>
    %906 = vector.shape_cast %905 : vector<1x32x32xf32> to vector<32x32xf32>
    %cst_596 = arith.constant dense<0.000000e+00> : vector<1x32xf32>
    %907 = tpu.matmul %904, %906, %cst_596 {dimension_numbers = #tpu.dot_dimension_numbers<[1], [0], [0], [1], [0, 0, 1, 1], [], []>} : vector<1x32xf32>, vector<32x32xf32>, vector<1x32xf32> -> vector<1x32xf32>
    %c0_597 = arith.constant 0 : index
    %c0_598 = arith.constant 0 : index
    %c0_599 = arith.constant 0 : index
    %908 = vector.load %arg31[%c0_597, %c0_598, %c0_599] : memref<2x1x32xf32, #tpu.memory_space<vmem>>, vector<1x1x32xf32>
    %909 = vector.shape_cast %908 : vector<1x1x32xf32> to vector<1x32xf32>
    %910 = arith.addf %907, %909 : vector<1x32xf32>
    %cst_600 = arith.constant 0.000000e+00 : f32
    %911 = vector.broadcast %cst_600 : f32 to vector<1x32xf32>
    %912 = arith.maximumf %910, %911 : vector<1x32xf32>
    %c1_601 = arith.constant 1 : index
    %c0_602 = arith.constant 0 : index
    %c0_603 = arith.constant 0 : index
    %913 = vector.load %arg30[%c1_601, %c0_602, %c0_603] : memref<2x32x32xf32, #tpu.memory_space<vmem>>, vector<1x32x32xf32>
    %914 = vector.shape_cast %913 : vector<1x32x32xf32> to vector<32x32xf32>
    %cst_604 = arith.constant dense<0.000000e+00> : vector<1x32xf32>
    %915 = tpu.matmul %912, %914, %cst_604 {dimension_numbers = #tpu.dot_dimension_numbers<[1], [0], [0], [1], [0, 0, 1, 1], [], []>} : vector<1x32xf32>, vector<32x32xf32>, vector<1x32xf32> -> vector<1x32xf32>
    %c1_605 = arith.constant 1 : index
    %c0_606 = arith.constant 0 : index
    %c0_607 = arith.constant 0 : index
    %916 = vector.load %arg31[%c1_605, %c0_606, %c0_607] : memref<2x1x32xf32, #tpu.memory_space<vmem>>, vector<1x1x32xf32>
    %917 = vector.shape_cast %916 : vector<1x1x32xf32> to vector<1x32xf32>
    %918 = arith.addf %915, %917 : vector<1x32xf32>
    %cst_608 = arith.constant 0.000000e+00 : f32
    %919 = vector.broadcast %cst_608 : f32 to vector<1x32xf32>
    %920 = arith.maximumf %918, %919 : vector<1x32xf32>
    %c0_609 = arith.constant 0 : index
    %c0_610 = arith.constant 0 : index
    %921 = vector.load %arg32[%c0_609, %c0_610] : memref<32x4xf32, #tpu.memory_space<vmem>>, vector<32x4xf32>
    %cst_611 = arith.constant dense<0.000000e+00> : vector<1x4xf32>
    %922 = tpu.matmul %920, %921, %cst_611 {dimension_numbers = #tpu.dot_dimension_numbers<[1], [0], [0], [1], [0, 0, 1, 1], [], []>} : vector<1x32xf32>, vector<32x4xf32>, vector<1x4xf32> -> vector<1x4xf32>
    %c0_612 = arith.constant 0 : index
    %c0_613 = arith.constant 0 : index
    %923 = vector.load %arg33[%c0_612, %c0_613] : memref<1x4xf32, #tpu.memory_space<vmem>>, vector<1x4xf32>
    %924 = arith.addf %922, %923 : vector<1x4xf32>
    %c0_614 = arith.constant 0 : index
    %c0_615 = arith.constant 0 : index
    %925 = vector.load %arg34[%c0_614, %c0_615] : memref<32x32xf32, #tpu.memory_space<vmem>>, vector<32x32xf32>
    %cst_616 = arith.constant dense<0.000000e+00> : vector<16x32xf32>
    %926 = tpu.matmul %834, %925, %cst_616 {dimension_numbers = #tpu.dot_dimension_numbers<[1], [0], [0], [1], [0, 0, 1, 1], [], []>} : vector<16x32xf32>, vector<32x32xf32>, vector<16x32xf32> -> vector<16x32xf32>
    %c0_617 = arith.constant 0 : index
    %c0_618 = arith.constant 0 : index
    %927 = vector.load %arg35[%c0_617, %c0_618] : memref<1x32xf32, #tpu.memory_space<vmem>>, vector<1x32xf32>
    %928 = vector.broadcast %927 : vector<1x32xf32> to vector<16x32xf32>
    %929 = arith.addf %926, %928 : vector<16x32xf32>
    %930 = arith.mulf %929, %929 : vector<16x32xf32>
    %931 = arith.mulf %929, %930 : vector<16x32xf32>
    %cst_619 = arith.constant 4.471500e-02 : f32
    %932 = vector.broadcast %cst_619 : f32 to vector<16x32xf32>
    %933 = arith.mulf %932, %931 : vector<16x32xf32>
    %934 = arith.addf %929, %933 : vector<16x32xf32>
    %cst_620 = arith.constant 0.797884583 : f32
    %935 = vector.broadcast %cst_620 : f32 to vector<16x32xf32>
    %936 = arith.mulf %935, %934 : vector<16x32xf32>
    %937 = math.tanh %936 : vector<16x32xf32>
    %cst_621 = arith.constant 1.000000e+00 : f32
    %938 = vector.broadcast %cst_621 : f32 to vector<16x32xf32>
    %939 = arith.addf %938, %937 : vector<16x32xf32>
    %cst_622 = arith.constant 5.000000e-01 : f32
    %940 = vector.broadcast %cst_622 : f32 to vector<16x32xf32>
    %941 = arith.mulf %940, %939 : vector<16x32xf32>
    %942 = arith.mulf %929, %941 : vector<16x32xf32>
    %c0_623 = arith.constant 0 : index
    %c0_624 = arith.constant 0 : index
    %943 = vector.load %arg36[%c0_623, %c0_624] : memref<32x64xf32, #tpu.memory_space<vmem>>, vector<32x64xf32>
    %cst_625 = arith.constant dense<0.000000e+00> : vector<16x64xf32>
    %944 = tpu.matmul %942, %943, %cst_625 {dimension_numbers = #tpu.dot_dimension_numbers<[1], [0], [0], [1], [0, 0, 1, 1], [], []>} : vector<16x32xf32>, vector<32x64xf32>, vector<16x64xf32> -> vector<16x64xf32>
    %c0_626 = arith.constant 0 : index
    %c0_627 = arith.constant 0 : index
    %945 = vector.load %arg37[%c0_626, %c0_627] : memref<1x64xf32, #tpu.memory_space<vmem>>, vector<1x64xf32>
    %946 = vector.broadcast %945 : vector<1x64xf32> to vector<16x64xf32>
    %947 = arith.addf %944, %946 : vector<16x64xf32>
    %948 = arith.mulf %947, %947 : vector<16x64xf32>
    %949 = arith.mulf %947, %948 : vector<16x64xf32>
    %cst_628 = arith.constant 4.471500e-02 : f32
    %950 = vector.broadcast %cst_628 : f32 to vector<16x64xf32>
    %951 = arith.mulf %950, %949 : vector<16x64xf32>
    %952 = arith.addf %947, %951 : vector<16x64xf32>
    %cst_629 = arith.constant 0.797884583 : f32
    %953 = vector.broadcast %cst_629 : f32 to vector<16x64xf32>
    %954 = arith.mulf %953, %952 : vector<16x64xf32>
    %955 = math.tanh %954 : vector<16x64xf32>
    %cst_630 = arith.constant 1.000000e+00 : f32
    %956 = vector.broadcast %cst_630 : f32 to vector<16x64xf32>
    %957 = arith.addf %956, %955 : vector<16x64xf32>
    %cst_631 = arith.constant 5.000000e-01 : f32
    %958 = vector.broadcast %cst_631 : f32 to vector<16x64xf32>
    %959 = arith.mulf %958, %957 : vector<16x64xf32>
    %960 = arith.mulf %947, %959 : vector<16x64xf32>
    %961 = tpu.concatenate %924, %924, %924, %924, %924, %924, %924, %924, %924, %924, %924, %924, %924, %924, %924, %924 in 1 : vector<1x4xf32>, vector<1x4xf32>, vector<1x4xf32>, vector<1x4xf32>, vector<1x4xf32>, vector<1x4xf32>, vector<1x4xf32>, vector<1x4xf32>, vector<1x4xf32>, vector<1x4xf32>, vector<1x4xf32>, vector<1x4xf32>, vector<1x4xf32>, vector<1x4xf32>, vector<1x4xf32>, vector<1x4xf32> -> vector<1x64xf32>
    %962 = vector.broadcast %961 : vector<1x64xf32> to vector<16x64xf32>
    %963 = arith.mulf %960, %962 : vector<16x64xf32>
    %c0_632 = arith.constant 0 : index
    %c0_633 = arith.constant 0 : index
    %964 = vector.load %arg38[%c0_632, %c0_633] : memref<64x16xf32, #tpu.memory_space<vmem>>, vector<64x16xf32>
    %cst_634 = arith.constant dense<0.000000e+00> : vector<16x16xf32>
    %965 = tpu.matmul %963, %964, %cst_634 {dimension_numbers = #tpu.dot_dimension_numbers<[1], [0], [0], [1], [0, 0, 1, 1], [], []>} : vector<16x64xf32>, vector<64x16xf32>, vector<16x16xf32> -> vector<16x16xf32>
    %966 = vector.extract_strided_slice %965 {offsets = [0, 0], sizes = [16, 1], strides = [1, 1]} : vector<16x16xf32> to vector<16x1xf32>
    %c0_635 = arith.constant 0 : index
    %c0_636 = arith.constant 0 : index
    %c0_637 = arith.constant 0 : index
    %967 = vector.load %arg39[%c0_635, %c0_636, %c0_637] : memref<4x16x32xf32, #tpu.memory_space<vmem>>, vector<1x16x32xf32>
    %968 = vector.shape_cast %967 : vector<1x16x32xf32> to vector<16x32xf32>
    %969 = vector.broadcast %966 : vector<16x1xf32> to vector<16x32xf32>
    %970 = arith.mulf %969, %968 : vector<16x32xf32>
    %971 = vector.extract_strided_slice %965 {offsets = [0, 1], sizes = [16, 1], strides = [1, 1]} : vector<16x16xf32> to vector<16x1xf32>
    %c1_638 = arith.constant 1 : index
    %c0_639 = arith.constant 0 : index
    %c0_640 = arith.constant 0 : index
    %972 = vector.load %arg39[%c1_638, %c0_639, %c0_640] : memref<4x16x32xf32, #tpu.memory_space<vmem>>, vector<1x16x32xf32>
    %973 = vector.shape_cast %972 : vector<1x16x32xf32> to vector<16x32xf32>
    %974 = vector.broadcast %971 : vector<16x1xf32> to vector<16x32xf32>
    %975 = arith.mulf %974, %973 : vector<16x32xf32>
    %976 = arith.addf %970, %975 : vector<16x32xf32>
    %977 = vector.extract_strided_slice %965 {offsets = [0, 4], sizes = [16, 1], strides = [1, 1]} : vector<16x16xf32> to vector<16x1xf32>
    %c2_641 = arith.constant 2 : index
    %c0_642 = arith.constant 0 : index
    %c0_643 = arith.constant 0 : index
    %978 = vector.load %arg39[%c2_641, %c0_642, %c0_643] : memref<4x16x32xf32, #tpu.memory_space<vmem>>, vector<1x16x32xf32>
    %979 = vector.shape_cast %978 : vector<1x16x32xf32> to vector<16x32xf32>
    %980 = vector.broadcast %977 : vector<16x1xf32> to vector<16x32xf32>
    %981 = arith.mulf %980, %979 : vector<16x32xf32>
    %982 = arith.addf %976, %981 : vector<16x32xf32>
    %983 = vector.extract_strided_slice %965 {offsets = [0, 5], sizes = [16, 1], strides = [1, 1]} : vector<16x16xf32> to vector<16x1xf32>
    %c3_644 = arith.constant 3 : index
    %c0_645 = arith.constant 0 : index
    %c0_646 = arith.constant 0 : index
    %984 = vector.load %arg39[%c3_644, %c0_645, %c0_646] : memref<4x16x32xf32, #tpu.memory_space<vmem>>, vector<1x16x32xf32>
    %985 = vector.shape_cast %984 : vector<1x16x32xf32> to vector<16x32xf32>
    %986 = vector.broadcast %983 : vector<16x1xf32> to vector<16x32xf32>
    %987 = arith.mulf %986, %985 : vector<16x32xf32>
    %988 = arith.addf %982, %987 : vector<16x32xf32>
    %989 = vector.extract_strided_slice %965 {offsets = [0, 2], sizes = [16, 1], strides = [1, 1]} : vector<16x16xf32> to vector<16x1xf32>
    %c0_647 = arith.constant 0 : index
    %c0_648 = arith.constant 0 : index
    %c0_649 = arith.constant 0 : index
    %990 = vector.load %arg39[%c0_647, %c0_648, %c0_649] : memref<4x16x32xf32, #tpu.memory_space<vmem>>, vector<1x16x32xf32>
    %991 = vector.shape_cast %990 : vector<1x16x32xf32> to vector<16x32xf32>
    %992 = vector.broadcast %989 : vector<16x1xf32> to vector<16x32xf32>
    %993 = arith.mulf %992, %991 : vector<16x32xf32>
    %994 = vector.extract_strided_slice %965 {offsets = [0, 3], sizes = [16, 1], strides = [1, 1]} : vector<16x16xf32> to vector<16x1xf32>
    %c1_650 = arith.constant 1 : index
    %c0_651 = arith.constant 0 : index
    %c0_652 = arith.constant 0 : index
    %995 = vector.load %arg39[%c1_650, %c0_651, %c0_652] : memref<4x16x32xf32, #tpu.memory_space<vmem>>, vector<1x16x32xf32>
    %996 = vector.shape_cast %995 : vector<1x16x32xf32> to vector<16x32xf32>
    %997 = vector.broadcast %994 : vector<16x1xf32> to vector<16x32xf32>
    %998 = arith.mulf %997, %996 : vector<16x32xf32>
    %999 = arith.addf %993, %998 : vector<16x32xf32>
    %1000 = vector.extract_strided_slice %965 {offsets = [0, 6], sizes = [16, 1], strides = [1, 1]} : vector<16x16xf32> to vector<16x1xf32>
    %c2_653 = arith.constant 2 : index
    %c0_654 = arith.constant 0 : index
    %c0_655 = arith.constant 0 : index
    %1001 = vector.load %arg39[%c2_653, %c0_654, %c0_655] : memref<4x16x32xf32, #tpu.memory_space<vmem>>, vector<1x16x32xf32>
    %1002 = vector.shape_cast %1001 : vector<1x16x32xf32> to vector<16x32xf32>
    %1003 = vector.broadcast %1000 : vector<16x1xf32> to vector<16x32xf32>
    %1004 = arith.mulf %1003, %1002 : vector<16x32xf32>
    %1005 = arith.addf %999, %1004 : vector<16x32xf32>
    %1006 = vector.extract_strided_slice %965 {offsets = [0, 7], sizes = [16, 1], strides = [1, 1]} : vector<16x16xf32> to vector<16x1xf32>
    %c3_656 = arith.constant 3 : index
    %c0_657 = arith.constant 0 : index
    %c0_658 = arith.constant 0 : index
    %1007 = vector.load %arg39[%c3_656, %c0_657, %c0_658] : memref<4x16x32xf32, #tpu.memory_space<vmem>>, vector<1x16x32xf32>
    %1008 = vector.shape_cast %1007 : vector<1x16x32xf32> to vector<16x32xf32>
    %1009 = vector.broadcast %1006 : vector<16x1xf32> to vector<16x32xf32>
    %1010 = arith.mulf %1009, %1008 : vector<16x32xf32>
    %1011 = arith.addf %1005, %1010 : vector<16x32xf32>
    %1012 = vector.extract_strided_slice %965 {offsets = [0, 8], sizes = [16, 1], strides = [1, 1]} : vector<16x16xf32> to vector<16x1xf32>
    %c0_659 = arith.constant 0 : index
    %c0_660 = arith.constant 0 : index
    %c0_661 = arith.constant 0 : index
    %1013 = vector.load %arg39[%c0_659, %c0_660, %c0_661] : memref<4x16x32xf32, #tpu.memory_space<vmem>>, vector<1x16x32xf32>
    %1014 = vector.shape_cast %1013 : vector<1x16x32xf32> to vector<16x32xf32>
    %1015 = vector.broadcast %1012 : vector<16x1xf32> to vector<16x32xf32>
    %1016 = arith.mulf %1015, %1014 : vector<16x32xf32>
    %1017 = vector.extract_strided_slice %965 {offsets = [0, 9], sizes = [16, 1], strides = [1, 1]} : vector<16x16xf32> to vector<16x1xf32>
    %c1_662 = arith.constant 1 : index
    %c0_663 = arith.constant 0 : index
    %c0_664 = arith.constant 0 : index
    %1018 = vector.load %arg39[%c1_662, %c0_663, %c0_664] : memref<4x16x32xf32, #tpu.memory_space<vmem>>, vector<1x16x32xf32>
    %1019 = vector.shape_cast %1018 : vector<1x16x32xf32> to vector<16x32xf32>
    %1020 = vector.broadcast %1017 : vector<16x1xf32> to vector<16x32xf32>
    %1021 = arith.mulf %1020, %1019 : vector<16x32xf32>
    %1022 = arith.addf %1016, %1021 : vector<16x32xf32>
    %1023 = vector.extract_strided_slice %965 {offsets = [0, 12], sizes = [16, 1], strides = [1, 1]} : vector<16x16xf32> to vector<16x1xf32>
    %c2_665 = arith.constant 2 : index
    %c0_666 = arith.constant 0 : index
    %c0_667 = arith.constant 0 : index
    %1024 = vector.load %arg39[%c2_665, %c0_666, %c0_667] : memref<4x16x32xf32, #tpu.memory_space<vmem>>, vector<1x16x32xf32>
    %1025 = vector.shape_cast %1024 : vector<1x16x32xf32> to vector<16x32xf32>
    %1026 = vector.broadcast %1023 : vector<16x1xf32> to vector<16x32xf32>
    %1027 = arith.mulf %1026, %1025 : vector<16x32xf32>
    %1028 = arith.addf %1022, %1027 : vector<16x32xf32>
    %1029 = vector.extract_strided_slice %965 {offsets = [0, 13], sizes = [16, 1], strides = [1, 1]} : vector<16x16xf32> to vector<16x1xf32>
    %c3_668 = arith.constant 3 : index
    %c0_669 = arith.constant 0 : index
    %c0_670 = arith.constant 0 : index
    %1030 = vector.load %arg39[%c3_668, %c0_669, %c0_670] : memref<4x16x32xf32, #tpu.memory_space<vmem>>, vector<1x16x32xf32>
    %1031 = vector.shape_cast %1030 : vector<1x16x32xf32> to vector<16x32xf32>
    %1032 = vector.broadcast %1029 : vector<16x1xf32> to vector<16x32xf32>
    %1033 = arith.mulf %1032, %1031 : vector<16x32xf32>
    %1034 = arith.addf %1028, %1033 : vector<16x32xf32>
    %1035 = vector.extract_strided_slice %965 {offsets = [0, 10], sizes = [16, 1], strides = [1, 1]} : vector<16x16xf32> to vector<16x1xf32>
    %c0_671 = arith.constant 0 : index
    %c0_672 = arith.constant 0 : index
    %c0_673 = arith.constant 0 : index
    %1036 = vector.load %arg39[%c0_671, %c0_672, %c0_673] : memref<4x16x32xf32, #tpu.memory_space<vmem>>, vector<1x16x32xf32>
    %1037 = vector.shape_cast %1036 : vector<1x16x32xf32> to vector<16x32xf32>
    %1038 = vector.broadcast %1035 : vector<16x1xf32> to vector<16x32xf32>
    %1039 = arith.mulf %1038, %1037 : vector<16x32xf32>
    %1040 = vector.extract_strided_slice %965 {offsets = [0, 11], sizes = [16, 1], strides = [1, 1]} : vector<16x16xf32> to vector<16x1xf32>
    %c1_674 = arith.constant 1 : index
    %c0_675 = arith.constant 0 : index
    %c0_676 = arith.constant 0 : index
    %1041 = vector.load %arg39[%c1_674, %c0_675, %c0_676] : memref<4x16x32xf32, #tpu.memory_space<vmem>>, vector<1x16x32xf32>
    %1042 = vector.shape_cast %1041 : vector<1x16x32xf32> to vector<16x32xf32>
    %1043 = vector.broadcast %1040 : vector<16x1xf32> to vector<16x32xf32>
    %1044 = arith.mulf %1043, %1042 : vector<16x32xf32>
    %1045 = arith.addf %1039, %1044 : vector<16x32xf32>
    %1046 = vector.extract_strided_slice %965 {offsets = [0, 14], sizes = [16, 1], strides = [1, 1]} : vector<16x16xf32> to vector<16x1xf32>
    %c2_677 = arith.constant 2 : index
    %c0_678 = arith.constant 0 : index
    %c0_679 = arith.constant 0 : index
    %1047 = vector.load %arg39[%c2_677, %c0_678, %c0_679] : memref<4x16x32xf32, #tpu.memory_space<vmem>>, vector<1x16x32xf32>
    %1048 = vector.shape_cast %1047 : vector<1x16x32xf32> to vector<16x32xf32>
    %1049 = vector.broadcast %1046 : vector<16x1xf32> to vector<16x32xf32>
    %1050 = arith.mulf %1049, %1048 : vector<16x32xf32>
    %1051 = arith.addf %1045, %1050 : vector<16x32xf32>
    %1052 = vector.extract_strided_slice %965 {offsets = [0, 15], sizes = [16, 1], strides = [1, 1]} : vector<16x16xf32> to vector<16x1xf32>
    %c3_680 = arith.constant 3 : index
    %c0_681 = arith.constant 0 : index
    %c0_682 = arith.constant 0 : index
    %1053 = vector.load %arg39[%c3_680, %c0_681, %c0_682] : memref<4x16x32xf32, #tpu.memory_space<vmem>>, vector<1x16x32xf32>
    %1054 = vector.shape_cast %1053 : vector<1x16x32xf32> to vector<16x32xf32>
    %1055 = vector.broadcast %1052 : vector<16x1xf32> to vector<16x32xf32>
    %1056 = arith.mulf %1055, %1054 : vector<16x32xf32>
    %1057 = arith.addf %1051, %1056 : vector<16x32xf32>
    %1058 = tpu.concatenate %988, %1011, %1034, %1057 in 0 : vector<16x32xf32>, vector<16x32xf32>, vector<16x32xf32>, vector<16x32xf32> -> vector<64x32xf32>
    %c0_683 = arith.constant 0 : index
    %c0_684 = arith.constant 0 : index
    %1059 = vector.load %arg40[%c0_683, %c0_684] : memref<32x64xf32, #tpu.memory_space<vmem>>, vector<32x64xf32>
    %cst_685 = arith.constant dense<0.000000e+00> : vector<32x32xf32>
    %1060 = tpu.matmul %1059, %1058, %cst_685 {dimension_numbers = #tpu.dot_dimension_numbers<[1], [0], [0], [1], [0, 0, 1, 1], [], []>} : vector<32x64xf32>, vector<64x32xf32>, vector<32x32xf32> -> vector<32x32xf32>
    %1061 = vector.extract_strided_slice %1060 {offsets = [0, 0], sizes = [8, 32], strides = [1, 1]} : vector<32x32xf32> to vector<8x32xf32>
    %1062 = vector.extract_strided_slice %1060 {offsets = [8, 0], sizes = [8, 32], strides = [1, 1]} : vector<32x32xf32> to vector<8x32xf32>
    %1063 = vector.extract_strided_slice %1060 {offsets = [16, 0], sizes = [8, 32], strides = [1, 1]} : vector<32x32xf32> to vector<8x32xf32>
    %1064 = vector.extract_strided_slice %1060 {offsets = [24, 0], sizes = [8, 32], strides = [1, 1]} : vector<32x32xf32> to vector<8x32xf32>
    %1065 = tpu.concatenate %1061, %1062, %1063, %1064 in 1 : vector<8x32xf32>, vector<8x32xf32>, vector<8x32xf32>, vector<8x32xf32> -> vector<8x128xf32>
    %c0_686 = arith.constant 0 : index
    %c1_687 = arith.constant 1 : index
    %c0_688 = arith.constant 0 : index
    %c0_689 = arith.constant 0 : index
    %1066 = vector.load %arg41[%c0_686, %c1_687, %c0_688, %c0_689] : memref<1x2x8x128xf32, #tpu.memory_space<vmem>>, vector<1x1x8x128xf32>
    %1067 = vector.shape_cast %1066 : vector<1x1x8x128xf32> to vector<8x128xf32>
    %1068 = vector.shape_cast %1065 : vector<8x128xf32> to vector<1x1x8x128xf32>
    tpu.vector_store %arg41[%c0_686, %c1_687, %c0_688, %c0_689], %1068 {strides = array<i32>} : memref<1x2x8x128xf32, #tpu.memory_space<vmem>>, vector<1x1x8x128xf32>,
    return
  }
  func.func @transform_0(%arg0: i32) -> (i32, i32, i32) {
    %c0_i32 = arith.constant 0 : i32
    %c0_i32_0 = arith.constant 0 : i32
    %c0_i32_1 = arith.constant 0 : i32
    return %arg0, %c0_i32, %c0_i32_0 : i32, i32, i32
  }
  func.func @transform_1(%arg0: i32) -> (i32, i32, i32, i32) {
    %c0_i32 = arith.constant 0 : i32
    %c0_i32_0 = arith.constant 0 : i32
    %c0_i32_1 = arith.constant 0 : i32
    %c0_i32_2 = arith.constant 0 : i32
    return %arg0, %c0_i32, %c0_i32_0, %c0_i32_1 : i32, i32, i32, i32
  }
  func.func @transform_2(%arg0: i32) -> (i32, i32) {
    %c0_i32 = arith.constant 0 : i32
    %c0_i32_0 = arith.constant 0 : i32
    %c0_i32_1 = arith.constant 0 : i32
    return %c0_i32, %c0_i32_0 : i32, i32
  }
  func.func @transform_3(%arg0: i32) -> (i32, i32) {
    %c0_i32 = arith.constant 0 : i32
    %c0_i32_0 = arith.constant 0 : i32
    %c0_i32_1 = arith.constant 0 : i32
    return %c0_i32, %c0_i32_0 : i32, i32
  }
  func.func @transform_4(%arg0: i32) -> (i32, i32) {
    %c0_i32 = arith.constant 0 : i32
    %c0_i32_0 = arith.constant 0 : i32
    %c0_i32_1 = arith.constant 0 : i32
    return %c0_i32, %c0_i32_0 : i32, i32
  }
  func.func @transform_5(%arg0: i32) -> (i32, i32) {
    %c0_i32 = arith.constant 0 : i32
    %c0_i32_0 = arith.constant 0 : i32
    %c0_i32_1 = arith.constant 0 : i32
    return %c0_i32, %c0_i32_0 : i32, i32
  }
  func.func @transform_6(%arg0: i32) -> (i32, i32, i32) {
    %c0_i32 = arith.constant 0 : i32
    %c0_i32_0 = arith.constant 0 : i32
    %c0_i32_1 = arith.constant 0 : i32
    %c0_i32_2 = arith.constant 0 : i32
    return %c0_i32, %c0_i32_0, %c0_i32_1 : i32, i32, i32
  }
  func.func @transform_7(%arg0: i32) -> (i32, i32, i32) {
    %c0_i32 = arith.constant 0 : i32
    %c0_i32_0 = arith.constant 0 : i32
    %c0_i32_1 = arith.constant 0 : i32
    %c0_i32_2 = arith.constant 0 : i32
    return %c0_i32, %c0_i32_0, %c0_i32_1 : i32, i32, i32
  }
  func.func @transform_8(%arg0: i32) -> (i32, i32) {
    %c0_i32 = arith.constant 0 : i32
    %c0_i32_0 = arith.constant 0 : i32
    %c0_i32_1 = arith.constant 0 : i32
    return %c0_i32, %c0_i32_0 : i32, i32
  }
  func.func @transform_9(%arg0: i32) -> (i32, i32) {
    %c0_i32 = arith.constant 0 : i32
    %c0_i32_0 = arith.constant 0 : i32
    %c0_i32_1 = arith.constant 0 : i32
    return %c0_i32, %c0_i32_0 : i32, i32
  }
  func.func @transform_10(%arg0: i32) -> (i32, i32, i32) {
    %c0_i32 = arith.constant 0 : i32
    %c0_i32_0 = arith.constant 0 : i32
    %c0_i32_1 = arith.constant 0 : i32
    %c0_i32_2 = arith.constant 0 : i32
    return %c0_i32, %c0_i32_0, %c0_i32_1 : i32, i32, i32
  }
  func.func @transform_11(%arg0: i32) -> (i32, i32, i32) {
    %c0_i32 = arith.constant 0 : i32
    %c0_i32_0 = arith.constant 0 : i32
    %c0_i32_1 = arith.constant 0 : i32
    %c0_i32_2 = arith.constant 0 : i32
    return %c0_i32, %c0_i32_0, %c0_i32_1 : i32, i32, i32
  }
  func.func @transform_12(%arg0: i32) -> (i32, i32) {
    %c0_i32 = arith.constant 0 : i32
    %c0_i32_0 = arith.constant 0 : i32
    %c0_i32_1 = arith.constant 0 : i32
    return %c0_i32, %c0_i32_0 : i32, i32
  }
  func.func @transform_13(%arg0: i32) -> (i32, i32) {
    %c0_i32 = arith.constant 0 : i32
    %c0_i32_0 = arith.constant 0 : i32
    %c0_i32_1 = arith.constant 0 : i32
    return %c0_i32, %c0_i32_0 : i32, i32
  }
  func.func @transform_14(%arg0: i32) -> (i32, i32) {
    %c0_i32 = arith.constant 0 : i32
    %c0_i32_0 = arith.constant 0 : i32
    %c0_i32_1 = arith.constant 0 : i32
    return %c0_i32, %c0_i32_0 : i32, i32
  }
  func.func @transform_15(%arg0: i32) -> (i32, i32) {
    %c0_i32 = arith.constant 0 : i32
    %c0_i32_0 = arith.constant 0 : i32
    %c0_i32_1 = arith.constant 0 : i32
    return %c0_i32, %c0_i32_0 : i32, i32
  }
  func.func @transform_16(%arg0: i32) -> (i32, i32) {
    %c0_i32 = arith.constant 0 : i32
    %c0_i32_0 = arith.constant 0 : i32
    %c0_i32_1 = arith.constant 0 : i32
    return %c0_i32, %c0_i32_0 : i32, i32
  }
  func.func @transform_17(%arg0: i32) -> (i32, i32) {
    %c0_i32 = arith.constant 0 : i32
    %c0_i32_0 = arith.constant 0 : i32
    %c0_i32_1 = arith.constant 0 : i32
    return %c0_i32, %c0_i32_0 : i32, i32
  }
  func.func @transform_18(%arg0: i32) -> (i32, i32) {
    %c0_i32 = arith.constant 0 : i32
    %c0_i32_0 = arith.constant 0 : i32
    %c0_i32_1 = arith.constant 0 : i32
    return %c0_i32, %c0_i32_0 : i32, i32
  }
  func.func @transform_19(%arg0: i32) -> (i32, i32, i32, i32) {
    %c0_i32 = arith.constant 0 : i32
    %c0_i32_0 = arith.constant 0 : i32
    %c0_i32_1 = arith.constant 0 : i32
    %c0_i32_2 = arith.constant 0 : i32
    %c0_i32_3 = arith.constant 0 : i32
    return %c0_i32, %c0_i32_0, %c0_i32_1, %c0_i32_2 : i32, i32, i32, i32
  }
  func.func @transform_20(%arg0: i32) -> (i32, i32, i32, i32) {
    %c0_i32 = arith.constant 0 : i32
    %c0_i32_0 = arith.constant 0 : i32
    %c0_i32_1 = arith.constant 0 : i32
    %c0_i32_2 = arith.constant 0 : i32
    %c0_i32_3 = arith.constant 0 : i32
    return %c0_i32, %c0_i32_0, %c0_i32_1, %c0_i32_2 : i32, i32, i32, i32
  }
  func.func @transform_21(%arg0: i32) -> (i32, i32, i32) {
    %c0_i32 = arith.constant 0 : i32
    %c0_i32_0 = arith.constant 0 : i32
    %c0_i32_1 = arith.constant 0 : i32
    %c0_i32_2 = arith.constant 0 : i32
    return %c0_i32, %c0_i32_0, %c0_i32_1 : i32, i32, i32
  }
  func.func @transform_22(%arg0: i32) -> (i32, i32, i32) {
    %c0_i32 = arith.constant 0 : i32
    %c0_i32_0 = arith.constant 0 : i32
    %c0_i32_1 = arith.constant 0 : i32
    %c0_i32_2 = arith.constant 0 : i32
    return %c0_i32, %c0_i32_0, %c0_i32_1 : i32, i32, i32
  }
  func.func @transform_23(%arg0: i32) -> (i32, i32, i32) {
    %c0_i32 = arith.constant 0 : i32
    %c0_i32_0 = arith.constant 0 : i32
    %c0_i32_1 = arith.constant 0 : i32
    %c0_i32_2 = arith.constant 0 : i32
    return %c0_i32, %c0_i32_0, %c0_i32_1 : i32, i32, i32
  }
  func.func @transform_24(%arg0: i32) -> (i32, i32, i32) {
    %c0_i32 = arith.constant 0 : i32
    %c0_i32_0 = arith.constant 0 : i32
    %c0_i32_1 = arith.constant 0 : i32
    %c0_i32_2 = arith.constant 0 : i32
    return %c0_i32, %c0_i32_0, %c0_i32_1 : i32, i32, i32
  }
  func.func @transform_25(%arg0: i32) -> (i32, i32) {
    %c0_i32 = arith.constant 0 : i32
    %c0_i32_0 = arith.constant 0 : i32
    %c0_i32_1 = arith.constant 0 : i32
    return %c0_i32, %c0_i32_0 : i32, i32
  }
  func.func @transform_26(%arg0: i32) -> (i32, i32) {
    %c0_i32 = arith.constant 0 : i32
    %c0_i32_0 = arith.constant 0 : i32
    %c0_i32_1 = arith.constant 0 : i32
    return %c0_i32, %c0_i32_0 : i32, i32
  }
  func.func @transform_27(%arg0: i32) -> (i32, i32) {
    %c0_i32 = arith.constant 0 : i32
    %c0_i32_0 = arith.constant 0 : i32
    %c0_i32_1 = arith.constant 0 : i32
    return %c0_i32, %c0_i32_0 : i32, i32
  }
  func.func @transform_28(%arg0: i32) -> (i32, i32) {
    %c0_i32 = arith.constant 0 : i32
    %c0_i32_0 = arith.constant 0 : i32
    %c0_i32_1 = arith.constant 0 : i32
    return %c0_i32, %c0_i32_0 : i32, i32
  }
  func.func @transform_29(%arg0: i32) -> (i32, i32, i32) {
    %c0_i32 = arith.constant 0 : i32
    %c0_i32_0 = arith.constant 0 : i32
    %c0_i32_1 = arith.constant 0 : i32
    %c0_i32_2 = arith.constant 0 : i32
    return %c0_i32, %c0_i32_0, %c0_i32_1 : i32, i32, i32
  }
  func.func @transform_30(%arg0: i32) -> (i32, i32, i32) {
    %c0_i32 = arith.constant 0 : i32
    %c0_i32_0 = arith.constant 0 : i32
    %c0_i32_1 = arith.constant 0 : i32
    %c0_i32_2 = arith.constant 0 : i32
    return %c0_i32, %c0_i32_0, %c0_i32_1 : i32, i32, i32
  }
  func.func @transform_31(%arg0: i32) -> (i32, i32) {
    %c0_i32 = arith.constant 0 : i32
    %c0_i32_0 = arith.constant 0 : i32
    %c0_i32_1 = arith.constant 0 : i32
    return %c0_i32, %c0_i32_0 : i32, i32
  }
  func.func @transform_32(%arg0: i32) -> (i32, i32) {
    %c0_i32 = arith.constant 0 : i32
    %c0_i32_0 = arith.constant 0 : i32
    %c0_i32_1 = arith.constant 0 : i32
    return %c0_i32, %c0_i32_0 : i32, i32
  }
  func.func @transform_33(%arg0: i32) -> (i32, i32) {
    %c0_i32 = arith.constant 0 : i32
    %c0_i32_0 = arith.constant 0 : i32
    %c0_i32_1 = arith.constant 0 : i32
    return %c0_i32, %c0_i32_0 : i32, i32
  }
  func.func @transform_34(%arg0: i32) -> (i32, i32) {
    %c0_i32 = arith.constant 0 : i32
    %c0_i32_0 = arith.constant 0 : i32
    %c0_i32_1 = arith.constant 0 : i32
    return %c0_i32, %c0_i32_0 : i32, i32
  }
  func.func @transform_35(%arg0: i32) -> (i32, i32) {
    %c0_i32 = arith.constant 0 : i32
    %c0_i32_0 = arith.constant 0 : i32
    %c0_i32_1 = arith.constant 0 : i32
    return %c0_i32, %c0_i32_0 : i32, i32
  }
  func.func @transform_36(%arg0: i32) -> (i32, i32) {
    %c0_i32 = arith.constant 0 : i32
    %c0_i32_0 = arith.constant 0 : i32
    %c0_i32_1 = arith.constant 0 : i32
    return %c0_i32, %c0_i32_0 : i32, i32
  }
  func.func @transform_37(%arg0: i32) -> (i32, i32) {
    %c0_i32 = arith.constant 0 : i32
    %c0_i32_0 = arith.constant 0 : i32
    %c0_i32_1 = arith.constant 0 : i32
    return %c0_i32, %c0_i32_0 : i32, i32
  }
  func.func @transform_38(%arg0: i32) -> (i32, i32, i32) {
    %c0_i32 = arith.constant 0 : i32
    %c0_i32_0 = arith.constant 0 : i32
    %c0_i32_1 = arith.constant 0 : i32
    %c0_i32_2 = arith.constant 0 : i32
    return %c0_i32, %c0_i32_0, %c0_i32_1 : i32, i32, i32
  }
  func.func @transform_39(%arg0: i32) -> (i32, i32) {
    %c0_i32 = arith.constant 0 : i32
    %c0_i32_0 = arith.constant 0 : i32
    %c0_i32_1 = arith.constant 0 : i32
    return %c0_i32, %c0_i32_0 : i32, i32
  }
  func.func @transform_40(%arg0: i32) -> (i32, i32, i32, i32) {
    %c0_i32 = arith.constant 0 : i32
    %c0_i32_0 = arith.constant 0 : i32
    %c0_i32_1 = arith.constant 0 : i32
    %c0_i32_2 = arith.constant 0 : i32
    return %arg0, %c0_i32, %c0_i32_0, %c0_i32_1 : i32, i32, i32, i32
  }
}

</mosaic_0001>

<bundles_post_ra>
// kernel: medsam_forward.1
= control target key start
LH: loop header
LB: loop body
LE: loop exit
PB: predicated region body
PF: predicated region fallthrough
CT: control target
= control target key end

     0   :  { %s11261_s6 = smov 1   ;;  %s11262_s10 = smov 2   ;;  %s12834_s0 = inlined_call_operand.smem [shape: u32[41], index: -1, kind: input, shape index: {}] }
   0x1   :  { %s11347_s5 = sld [smem:[%s12834_s0]]   ;;  %s11263_s14 = smov 3  }
   0x2   :  { %s11352_s9 = sld [smem:[%s12834_s0 + %s11261_s6]]   ;;  %s11264_s18 = smov 4  }
   0x3   :  { %s11357_s13 = sld [smem:[%s12834_s0 + %s11262_s10]]   ;;  %s11265_s22 = smov 5  }
   0x4   :  { %s11362_s17 = sld [smem:[%s12834_s0 + %s11263_s14]]   ;;  %s11266_s26 = smov 6  }
   0x5   :  { %s11367_s21 = sld [smem:[%s12834_s0 + %s11264_s18]]   ;;  %s11267_s30 = smov 7  }
   0x6   :  { %s11372_s25 = sld [smem:[%s12834_s0 + %s11265_s22]]   ;;  %s11268_s4 = smov 8  }
   0x7   :  { %12895 = sst [smem:[#allocation8_spill]] %s11347_s5  ;;  %s11269_s10 = smov 9  }
   0x8   :  { %12896 = sst [smem:[#allocation9_spill]] %s11352_s9  ;;  %s11270_s15 = smov 10  }
   0x9   :  { %12897 = sst [smem:[#allocation10_spill]] %s11357_s13  ;;  %s11271_s20 = smov 11  }
   0xa   :  { %12898 = sst [smem:[#allocation11_spill]] %s11362_s17  ;;  %s11273_s1 = smov 13  }
   0xb   :  { %12899 = sst [smem:[#allocation12_spill]] %s11367_s21  ;;  %s11274_s7 = smov 14  }
   0xc   :  { %s11377_s29 = sld [smem:[%s12834_s0 + %s11266_s26]]   ;;  %s11272_s26 = smov 12  }
   0xd   :  { %s11382_s3 = sld [smem:[%s12834_s0 + %s11267_s30]]   ;;  %s11276_s22 = smov 16  }
   0xe   :  { %s11387_s8 = sld [smem:[%s12834_s0 + %s11268_s4]]   ;;  %s11277_s28 = smov 17  }
   0xf   :  { %s11392_s14 = sld [smem:[%s12834_s0 + %s11269_s10]]  }
  0x10   :  { %s11397_s19 = sld [smem:[%s12834_s0 + %s11270_s15]]   ;;  %s11275_s15 = smov 15  }
  0x11   :  { %s11402_s24 = sld [smem:[%s12834_s0 + %s11271_s20]]  }
  0x12   :  { %s11407_s30 = sld [smem:[%s12834_s0 + %s11272_s26]]  }
  0x13   :  { %12900 = sst [smem:[#allocation13_spill]] %s11382_s3 }
  0x14   :  { %12901 = sst [smem:[#allocation14_spill]] %s11387_s8 }
  0x15   :  { %12902 = sst [smem:[#allocation15_spill]] %s11392_s14 }
  0x16   :  { %12903 = sst [smem:[#allocation16_spill]] %s11397_s19 }
  0x17   :  { %12904 = sst [smem:[#allocation17_spill]] %s11402_s24 }
  0x18   :  { %s11412_s6 = sld [smem:[%s12834_s0 + %s11273_s1]]  }
  0x19   :  { %s11417_s12 = sld [smem:[%s12834_s0 + %s11274_s7]]   ;;  %s11278_s7 = smov 18  }
  0x1a   :  { %s11422_s20 = sld [smem:[%s12834_s0 + %s11275_s15]]   ;;  %s11279_s15 = smov 19  }
  0x1b   :  { %s11427_s27 = sld [smem:[%s12834_s0 + %s11276_s22]]   ;;  %s11280_s22 = smov 20  }
  0x1c   :  { %s11432_s4 = sld [smem:[%s12834_s0 + %s11277_s28]]   ;;  %s11281_s28 = smov 21  }
  0x1d   :  { %s11437_s9 = sld [smem:[%s12834_s0 + %s11278_s7]]   ;;  %s11282_s7 = smov 22  }
  0x1e   :  { %12905 = sst [smem:[#allocation18_spill]] %s11412_s6 }
  0x1f   :  { %12906 = sst [smem:[#allocation19_spill]] %s11417_s12 }
  0x20   :  { %12907 = sst [smem:[#allocation20_spill]] %s11422_s20 }
  0x21   :  { %12908 = sst [smem:[#allocation21_spill]] %s11427_s27 }
  0x22   :  { %12909 = sst [smem:[#allocation22_spill]] %s11432_s4 }
  0x23   :  { %12910 = sst [smem:[#allocation23_spill]] %s11437_s9 }
  0x24   :  { %s11442_s13 = sld [smem:[%s12834_s0 + %s11279_s15]]   ;;  %s11283_s15 = smov 23  }
  0x25   :  { %s11447_s20 = sld [smem:[%s12834_s0 + %s11280_s22]]   ;;  %s11284_s22 = smov 24  }
  0x26   :  { %s11452_s4 = sld [smem:[%s12834_s0 + %s11281_s28]]   ;;  %s11285_s28 = smov 25  }
  0x27   :  { %s11457_s9 = sld [smem:[%s12834_s0 + %s11282_s7]]   ;;  %s11286_s7 = smov 26  }
  0x2a   :  { %12911 = sst [smem:[#allocation24_spill]] %s11442_s13 }
  0x2b   :  { %12912 = sst [smem:[#allocation25_spill]] %s11447_s20 }
  0x2c   :  { %12913 = sst [smem:[#allocation26_spill]] %s11452_s4 }
  0x2d   :  { %12914 = sst [smem:[#allocation27_spill]] %s11457_s9 }
  0x2e   :  { %s11462_s13 = sld [smem:[%s12834_s0 + %s11283_s15]]   ;;  %s11287_s15 = smov 27  }
  0x2f   :  { %s11467_s20 = sld [smem:[%s12834_s0 + %s11284_s22]]   ;;  %s11288_s22 = smov 28  }
  0x30   :  { %s11472_s4 = sld [smem:[%s12834_s0 + %s11285_s28]]   ;;  %s11289_s28 = smov 29  }
  0x31   :  { %s11477_s9 = sld [smem:[%s12834_s0 + %s11286_s7]]   ;;  %s11290_s7 = smov 30  }
  0x34   :  { %12915 = sst [smem:[#allocation28_spill]] %s11462_s13 }
  0x35   :  { %12916 = sst [smem:[#allocation29_spill]] %s11467_s20 }
  0x36   :  { %12917 = sst [smem:[#allocation30_spill]] %s11472_s4 }
  0x37   :  { %12918 = sst [smem:[#allocation31_spill]] %s11477_s9 }
  0x38   :  { %s11482_s13 = sld [smem:[%s12834_s0 + %s11287_s15]]   ;;  %s11291_s15 = smov 31  }
  0x39   :  { %s11487_s20 = sld [smem:[%s12834_s0 + %s11288_s22]]   ;;  %s11292_s22 = smov 32  }
  0x3a   :  { %s11492_s4 = sld [smem:[%s12834_s0 + %s11289_s28]]   ;;  %s11293_s28 = smov 33  }
  0x3b   :  { %s11497_s9 = sld [smem:[%s12834_s0 + %s11290_s7]]   ;;  %s11294_s7 = smov 34  }
  0x3e   :  { %12919 = sst [smem:[#allocation32_spill]] %s11482_s13 }
  0x3f   :  { %12920 = sst [smem:[#allocation33_spill]] %s11487_s20 }
  0x40   :  { %12921 = sst [smem:[#allocation34_spill]] %s11492_s4 }
  0x41   :  { %12922 = sst [smem:[#allocation35_spill]] %s11497_s9 }
  0x42   :  { %s11502_s13 = sld [smem:[%s12834_s0 + %s11291_s15]]   ;;  %s11295_s15 = smov 35  }
  0x43   :  { %s11507_s20 = sld [smem:[%s12834_s0 + %s11292_s22]]   ;;  %s11296_s22 = smov 36  }
  0x44   :  { %s11512_s4 = sld [smem:[%s12834_s0 + %s11293_s28]]   ;;  %s11297_s28 = smov 37  }
  0x45   :  { %s11517_s9 = sld [smem:[%s12834_s0 + %s11294_s7]]   ;;  %s11298_s7 = smov 38  }
  0x46   :  { %s11537_s6 = sld [smem:[%s12834_s0 + %s11298_s7]]  }
  0x48   :  { %12923 = sst [smem:[#allocation36_spill]] %s11502_s13 }
  0x49   :  { %12924 = sst [smem:[#allocation37_spill]] %s11507_s20 }
  0x4a   :  { %12925 = sst [smem:[#allocation38_spill]] %s11512_s4 }
  0x4b   :  { %12926 = sst [smem:[#allocation39_spill]] %s11517_s9 }
  0x4c   :  { %s11522_s13 = sld [smem:[%s12834_s0 + %s11295_s15]]   ;;  %s11299_s15 = smov 39  }
  0x4d   :  { %s11527_s20 = sld [smem:[%s12834_s0 + %s11296_s22]]   ;;  %s11300_s22 = smov 40  }
  0x4e   :  { %s11532_s4 = sld [smem:[%s12834_s0 + %s11297_s28]]  }
  0x4f   :  { %s11547_s27 = sld [smem:[%s12834_s0 + %s11300_s22]]  }
  0x52   :  { %12927 = sst [smem:[#allocation40_spill]] %s11522_s13 }
  0x53   :  { %12928 = sst [smem:[#allocation41_spill]] %s11527_s20 }
  0x54   :  { %s11542_s13 = sld [smem:[%s12834_s0 + %s11299_s15]]  }
  0x55   :  { %86 = vsyncpa [#allocation3], 0 }
  0x56   :  { %87 = vsyncpa [#allocation5], 0  ;;  %s11549_s28 = smov 0  }
  0x57 LB: > { %s12929_s24 = sld [smem:[#allocation17_spill]]  ;;  %s12930_s21 = sld [smem:[#allocation12_spill]]  ;;  %s11259_s28 = sphi %s11549_s28, %s93_s28  }
  0x58   : > { %s12931_s20 = sld [smem:[#allocation41_spill]]  ;;  %s12932_s19 = sld [smem:[#allocation16_spill]] }
  0x59   : > { %s12933_s17 = sld [smem:[#allocation11_spill]]  ;;  %s12935_s9 = sld [smem:[#allocation39_spill]] }
  0x5a   : > { %s12934_s12 = sld [smem:[#allocation19_spill]]  ;;  %s12936_s8 = sld [smem:[#allocation14_spill]] }
  0x5b   : > { %s12937_s3 = sld [smem:[#allocation13_spill]]  ;;  %s11555_s1 = sadd.s32 4294967295, %s11259_s28  }
  0x5c   : > { %p8885_p0 = scmp.ge.s32.totalorder %s11259_s28, 1  ;;  %p974_p1 = scmp.lt.s32.totalorder %s11259_s28, 3 }
  0x5d   : > { %p12853_p2 = scmp.eq.s32.totalorder %s11555_s1, 0  ;;  %s11301_s2 = smov [#allocation2]  }
  0x5e   : > { %p11560_p3 = pnand %p8885_p0, %p974_p1  ;;  %s1083_s7 = sshll.u32 %s11301_s2, 4  ;;  %s1084_s7 = int_to_ptr.vmem [resolvable:$true] %s1083_s7 }
  0x5f   : > { %s11302_s10 = smov [#allocation4]   ;;  %s11189_s16 = scalar_lea.hbm %s12935_s9, 16 }
  0x60   : > { %s12938_s0 = scalar_select %p11560_p3, 1, 0 }
  0x61   : > { %p10926_p4 = pneg %p11560_p3  ;;  %s1097_s11 = sshll.u32 %s11302_s10, 4  ;;  %s11572_s11 = int_to_ptr.vmem [resolvable:$true] %s1097_s11 }
  0x62   : > { %p11190_p6 = scmp.ne.s32.totalorder %s12935_s9, %s11189_s16  ;;  %p11196_p10 = scmp.lt.u32.totalorder %s11189_s16, %s12935_s9 }
  0x63   : > { %p11568_p5 = pnand %p12853_p2, %p10926_p4 }
  0x65   : > { %p11191_p7 = pneg %p11568_p5 }
  0x67   : > { %p11192_p8 = pnand %p11191_p7, %p11190_p6 }
  0x69   : > { %p11193_p9 = pneg %p11192_p8 }
  0x6b   : > { %p11198_p11 = pnand %p11196_p10, %p11193_p9 }
  0x6d   : > { %11201 = shalt.err (!%p11198_p11)
}
  0x6e   : > { %s11202_s18 = scalar_lea.vmem %s1084_s7, 16  ;;  %s11209_s22 = scalar_lea.vmem %s1084_s7, 32 }
  0x6f   : > { %p11203_p12 = scmp.ne.s32.totalorder %s1084_s7, %s11202_s18  ;;  %p11210_p1 = scmp.lt.s32.totalorder %s1084_s7, %s1084_s7 }
  0x70   : > { %p11211_p4 = scmp.lt.s32.totalorder %s11209_s22, %s11202_s18 }
  0x71   : > { %p11205_p13 = pnand %p11203_p12, %p11191_p7 }
  0x72   : > { %p11212_p2 = por %p11211_p4, %p11210_p1 }
  0x73   : > { %p11206_p0 = pneg %p11205_p13 }
  0x75   : > { %p11213_p3 = pnand %p11212_p2, %p11206_p0 }
  0x77   : > { %11216 = shalt.err (!%p11213_p3)
}
  0x78   : > { %10929 = dma.hbm_to_vmem [thread:$0]  (!%p11568_p5), %s12935_s9, 16, %s1084_s7, [#allocation3]  }
  0x79   : > { %s11217_s23 = scalar_lea.hbm %s12931_s20, 16 }
  0x7a   : > { %p11218_p6 = scmp.ne.s32.totalorder %s12931_s20, %s11217_s23  ;;  %p11224_p10 = scmp.lt.u32.totalorder %s11217_s23, %s12931_s20 }
  0x7c   : > { %p11220_p8 = pnand %p11218_p6, %p11191_p7 }
  0x7e   : > { %p11221_p9 = pneg %p11220_p8 }
  0x80   : > { %p11226_p11 = pnand %p11224_p10, %p11221_p9 }
  0x82   : > { %11229 = shalt.err (!%p11226_p11)
}
  0x83   : > { %s11230_s26 = scalar_lea.vmem %s11572_s11, 16  ;;  %s11237_s2 = scalar_lea.vmem %s11572_s11, 32 }
  0x84   : > { %p11231_p2 = scmp.ne.s32.totalorder %s11572_s11, %s11230_s26  ;;  %p11238_p13 = scmp.lt.s32.totalorder %s11572_s11, %s11572_s11 }
  0x85   : > { %p11239_p0 = scmp.lt.s32.totalorder %s11237_s2, %s11230_s26 }
  0x86   : > { %p11233_p3 = pnand %p11231_p2, %p11191_p7 }
  0x87   : > { %p11240_p1 = por %p11239_p0, %p11238_p13 }
  0x88   : > { %p11234_p12 = pneg %p11233_p3 }
  0x8a   : > { %p11241_p4 = pnand %p11240_p1, %p11234_p12 }
  0x8c   : > { %11244 = shalt.err (!%p11241_p4)
}
  0x8d   : > { %10932 = dma.hbm_to_vmem [thread:$0]  (!%p11568_p5), %s12931_s20, 16, %s11572_s11, [#allocation5]  }
  0x8e   : > { %p12940_p6 = scmp.ne.s32.totalorder %s12938_s0, 0 }
  0x8f   : > { %p12941_p8 = scmp.eq.s32.totalorder (!%p12940_p6), %s11555_s1, 0 }
  0x90   : > { %1135 = sbr.rel (%p12940_p6) target bundleno = 19181 (0x4aed), region = 180 }
  0x97   : > { %11250 = dma.done.wait (%p12941_p8), [#allocation3], 16   ;;  %p12942_p7 = pmov %p12941_p8 }
  0x99   : > { %11252 = vsyncadd (%p12942_p7), [#allocation3], 4294967280  ;;  %p12943_p9 = pmov %p12942_p7 }
  0x9a   : > { %p12944_p10 = pmov %p12942_p7 }
  0x9b   : > { %11254 = dma.done.wait (%p12943_p9), [#allocation5], 16  }
  0x9c   : > { %11256 = vsyncadd (%p12944_p10), [#allocation5], 4294967280  ;;  %s12945_s5 = sld [smem:[#allocation8_spill]]  ;;  %v11303_v0 = vmov 0.0|0.0   ;;  %p1242_p5 = scmp.lt.s32.totalorder %s11555_s1, 1  ;;  %v1261_v1 = vld [vmem:[%s12930_s21] sm:$0xff] }
  0x9d   : > { %10420 = vmatprep.subr.bf16.mxu0 %v11303_v0  ;;  %v1262_v2 = vld [vmem:[%s12930_s21 + $0x8] sm:$0xff]  ;;  %v1263_v3 = vld [vmem:[%s12930_s21 + $0x10] sm:$0xff]  ;;  %v1264_v5 = vld [vmem:[%s12930_s21 + $0x18] sm:$0xff]  ;;  %vm1292_vm0 = vcmask 523264   ;;  %vm1380_vm1 = vcmask 261120   ;;  %vm12884_vm3 = vcmask 130048  }
  0x9e   : > { %s13001_s1 = smov (!%p1242_p5, %s11555_s1), 1  ;;  %v10421_v4 = vpack.c.bf16 %v1262_v2, %v1261_v1  ;;  %v10424_v6 = vpack.c.bf16 %v1264_v5, %v1263_v3  ;;  %v1265_v7 = vld [vmem:[%s12930_s21 + $0x20] sm:$0xff]  ;;  %v1266_v8 = vld [vmem:[%s12930_s21 + $0x28] sm:$0xff]  ;;  %v1267_v10 = vld [vmem:[%s12930_s21 + $0x30] sm:$0xff]  ;;  %s12948_s14 = sld [smem:[#allocation15_spill]]  ;;  %vm11304_vm4 = vmmov 0  }
  0x9f   : > { %s9273_s0 = sshll.u32 %s13001_s1, 5  ;;  %v10427_v9 = vpack.c.bf16 %v1266_v8, %v1265_v7  ;;  %v1268_v11 = vld [vmem:[%s12930_s21 + $0x38] sm:$0xff]  ;;  %v1269_v14 = vld [vmem:[%s12930_s21 + $0x40] sm:$0xff]  ;;  %v1270_v15 = vld [vmem:[%s12930_s21 + $0x48] sm:$0xff]  ;;  %s12949_s10 = sld [smem:[#allocation21_spill]]  ;;  %vm2946_vm5 = vcmask 55296  }
  0xa0   : > { %10422 = vmatpush1.bf16.msra.mxu0 %v10421_v4  ;;  %v10430_v13 = vpack.c.bf16 %v1268_v11, %v1267_v10  ;;  %v10433_v16 = vpack.c.bf16 %v1270_v15, %v1269_v14  ;;  %v1271_v17 = vld [vmem:[%s12930_s21 + $0x50] sm:$0xff]  ;;  %v1272_v18 = vld [vmem:[%s12930_s21 + $0x58] sm:$0xff]  ;;  %v1273_v20 = vld [vmem:[%s12930_s21 + $0x60] sm:$0xff]  ;;  %s12950_s11 = sld [smem:[#allocation18_spill]]  ;;  %s12951_s15 = sld [smem:[#allocation24_spill]]  ;;  %vm2962_vm6 = vcmask 1046528  }
  0xa1   : > { %10423 = vmatprep.subr.bf16.mxu0 %v11303_v0  ;;  %v10436_v19 = vpack.c.bf16 %v1272_v18, %v1271_v17  ;;  %v1274_v21 = vld [vmem:[%s12930_s21 + $0x68] sm:$0xff]  ;;  %v1275_v23 = vld [vmem:[%s12930_s21 + $0x70] sm:$0xff]  ;;  %v1276_v24 = vld [vmem:[%s12930_s21 + $0x78] sm:$0xff]  ;;  %s12952_s16 = sld [smem:[#allocation20_spill]]  ;;  %s12953_s18 = sld [smem:[#allocation22_spill]]  ;;  %vm2958_vm7 = vcmask 56320  }
  0xa2   : > { %s11630_s7 = scalar_lea.vmem %s12945_s5, %s9273_s0  ;;  %v10439_v22 = vpack.c.bf16 %v1274_v21, %v1273_v20  ;;  %v10442_v25 = vpack.c.bf16 %v1276_v24, %v1275_v23  ;;  %v1277_v26 = vld [vmem:[%s12930_s21 + $0x80] sm:$0xff]  ;;  %v1278_v27 = vld [vmem:[%s12930_s21 + $0x88] sm:$0xff]  ;;  %v1279_v29 = vld [vmem:[%s12930_s21 + $0x90] sm:$0xff]  ;;  %s12954_s22 = sld [smem:[#allocation23_spill]]  ;;  %vm3118_vm8 = vcmask 260096   ;;  %vm3319_vm9 = vcmask 129024  }
  0xa3   : > { %v1258_v12 = vld [vmem:[%s11630_s7 + $0x8] sm:$0xff]  ;;  %v10445_v28 = vpack.c.bf16 %v1278_v27, %v1277_v26  ;;  %v1280_v30 = vld [vmem:[%s12930_s21 + $0x98] sm:$0xff]  ;;  %v1281_v32 = vld [vmem:[%s12930_s21 + $0xa0] sm:$0xff]  ;;  %s12955_s23 = sld [smem:[#allocation10_spill]]  ;;  %s12956_s26 = sld [smem:[#allocation9_spill]]  ;;  %vm12881_vm10 = vcmask 31744  }
  0xa4   : > { %10425 = vmatpush1.bf16.msra.mxu0 %v10424_v6  ;;  %8899 = vmatprep.mubr.msk.f32.mxu0 %vm1292_vm0, %v1258_v12  ;;  %v10448_v31 = vpack.c.bf16 %v1280_v30, %v1279_v29  ;;  %v1282_v33 = vld [vmem:[%s12930_s21 + $0xa8] sm:$0xff]  ;;  %v1283_v35 = vld [vmem:[%s12930_s21 + $0xb0] sm:$0xff]  ;;  %v1284_v36 = vld [vmem:[%s12930_s21 + $0xb8] sm:$0xff]  ;;  %s12855_s2 = sshll.u32 %s13001_s1, 4  ;;  %s12965_s5 = sld [smem:[#allocation33_spill]]  ;;  %vm12879_vm11 = vcmask 64512  }
  0xa5   : > { %10426 = vmatprep.subr.bf16.mxu0 %v11303_v0  ;;  %v10451_v34 = vpack.c.bf16 %v1282_v33, %v1281_v32  ;;  %v10454_v37 = vpack.c.bf16 %v1284_v36, %v1283_v35  ;;  %v1257_v38 = vld [vmem:[%s11630_s7] sm:$0xff]  ;;  %v1260_v39 = vld [vmem:[%s11630_s7 + $0x18] sm:$0xff]  ;;  %v1259_v40 = vld [vmem:[%s11630_s7 + $0x10] sm:$0xff]  ;;  %s12957_s7 = sld [smem:[#allocation25_spill]]  ;;  %s12967_s9 = sld [smem:[#allocation38_spill]]  ;;  %vm12878_vm12 = vcmask 97280  }
  0xa6   : > { %v8898_v41 = vld [vmem:[%s11372_s25] ss:$0 sm:$0xff]  ;;  %v1375_v48 = vld [vmem:[%s12933_s17 + $0x8] sm:$0xff]  ;;  %v1426_v3 = vld [vmem:[%s11377_s29 + $0x10] sm:$0xff]  ;;  %s12867_s20 = smov 4   ;;  %s12869_s21 = smov 12  }
  0xa7   : > { %v1374_v43 = vld [vmem:[%s12933_s17] sm:$0xff]  ;;  %v1425_v2 = vld [vmem:[%s11377_s29 + $0x8] sm:$0xff]  ;;  %v1427_v5 = vld [vmem:[%s11377_s29 + $0x18] sm:$0xff]  ;;  %s12971_s17 = sld [smem:[#allocation37_spill]]  ;;  %vm12880_vm13 = vcmask 162816   ;;  %vm12883_vm14 = vcmask 195584  }
  0xa8   : > { %10428 = vmatpush1.bf16.msra.mxu0 %v10427_v9  ;;  %v1424_v1 = vld [vmem:[%s11377_s29] sm:$0xff]  ;;  %v10460_v6 = vpack.c.bf16 %v1427_v5, %v1426_v3  ;;  %v8907_v8 = vld [vmem:[%s11377_s29 + $0x28] sm:$0xff]  ;;  %v8908_v24 = vld [vmem:[%s11377_s29 + $0x30] sm:$0xff]  ;;  %vm12882_vm15 = vcmask 228352  }
  0xa9   : > { %10429 = vmatprep.subr.bf16.mxu0 %v11303_v0  ;;  %v10456_v4 = vpack.c.bf16 %v1425_v2, %v1424_v1  ;;  %v8906_v7 = vld [vmem:[%s11377_s29 + $0x20] sm:$0xff]  ;;  %v8915_v30 = vld [vmem:[%s11377_s29 + $0x48] sm:$0xff]  ;;  %v8916_v32 = vld [vmem:[%s11377_s29 + $0x50] sm:$0xff]  ;;  %s11818_s0 = scalar_lea.vmem %s12956_s26, %s12855_s2  ;;  %s12962_s26 = sld [smem:[#allocation30_spill]] }
  0xaa   : > { %v10464_v9 = vpack.c.bf16 %v8907_v8, %v8906_v7  ;;  %v8901_v17 = vld [vmem:[%s12932_s19] ss:$0 sm:$0xff]  ;;  %v8917_v33 = vld [vmem:[%s11377_s29 + $0x58] sm:$0xff]  ;;  %vm11706_vm2 = vmpackc.low %vm1380_vm1, %vm1380_vm1  ;;  %s12963_s2 = sld [smem:[#allocation32_spill]] }
  0xab   : > { %10457 = vmatprep.subr.bf16.mxu1 %v10456_v4  ;;  %v8914_v29 = vld [vmem:[%s11377_s29 + $0x40] sm:$0xff]  ;;  %v1693_v7 = vld [vmem:[%s12936_s8 + $0x8] sm:$0xff] }
  0xac   : > { %10431 = vmatpush1.bf16.msra.mxu0 %v10430_v13  ;;  %10459 = vmatpush3.bf16.msra.mxu1 %v10456_v4  ;;  %v8903_v35 = vld [vmem:[%s12937_s3] ss:$0 sm:$0xff] }
  0xad   : > { %10432 = vmatprep.subr.bf16.mxu0 %v11303_v0  ;;  %10461 = vmatprep.subr.bf16.mxu1 %v10460_v6 }
  0xb0   : > { %10434 = vmatpush1.bf16.msra.mxu0 %v10433_v16  ;;  %10463 = vmatpush3.bf16.msra.mxu1 %v10460_v6  ;;  %v1692_v6 = vld [vmem:[%s12936_s8] sm:$0xff] }
  0xb1   : > { %10435 = vmatprep.subr.bf16.mxu0 %v11303_v0  ;;  %10465 = vmatprep.subr.bf16.mxu1 %v10464_v9  ;;  %v10490_v8 = vpack.c.bf16 %v1693_v7, %v1692_v6  ;;  %v2138_v6 = vld [vmem:[%s12934_s12 + $0x28] sm:$0xff] }
  0xb4   : > { %10437 = vmatpush1.bf16.msra.mxu0 %v10436_v19  ;;  %v8902_v19 = vld [vmem:[%s12929_s24] ss:$0 sm:$0xff] }
  0xb5   : > { %10438 = vmatprep.subr.bf16.mxu0 %v11303_v0 }
  0xb8   : > { %10440 = vmatpush1.bf16.msra.mxu0 %v10439_v22 }
  0xb9   : > { %10441 = vmatprep.subr.bf16.mxu0 %v11303_v0 }
  0xbc   : > { %10443 = vmatpush1.bf16.msra.mxu0 %v10442_v25  ;;  %v8909_v25 = vld [vmem:[%s11377_s29 + $0x38] sm:$0xff] }
  0xbd   : > { %10444 = vmatprep.subr.bf16.mxu0 %v11303_v0 }
  0xc0   : > { %10446 = vmatpush1.bf16.msra.mxu0 %v10445_v28  ;;  %v10468_v28 = vpack.c.bf16 %v8909_v25, %v8908_v24 }
  0xc1   : > { %10447 = vmatprep.subr.bf16.mxu0 %v11303_v0 }
  0xc4   : > { %10449 = vmatpush1.bf16.msra.mxu0 %v10448_v31  ;;  %v10472_v31 = vpack.c.bf16 %v8915_v30, %v8914_v29 }
  0xc5   : > { %10450 = vmatprep.subr.bf16.mxu0 %v11303_v0 }
  0xc8   : > { %10452 = vmatpush1.bf16.msra.mxu0 %v10451_v34  ;;  %v10476_v34 = vpack.c.bf16 %v8917_v33, %v8916_v32 }
  0xc9   : > { %10453 = vmatprep.subr.bf16.mxu0 %v11303_v0 }
  0xcc   : > { %10455 = vmatpush1.bf16.msra.mxu0 %v10454_v37 }
  0xcf   : > { %1364 = vmatmul.mubr.f32.vlgmr.msra.gmra.mrb[0].mxu0 %v1257_v38 }
  0xd0   : > { %8900 = vmatprep.mubr.msk.f32.mxu0 %vm1292_vm0, %v1260_v39  ;;  %v8911_v39 = vld [vmem:[%s12937_s3 + $0x1] ss:$0 sm:$0xff] }
  0xd3   : > { %1369 = vmatmul.mubr.f32.gmra.mrb[2].mxu0 %v1259_v40 }
 0x1a2   : > { %v1365_v42 = vpop.f32.mrb[0].mxu0 }
 0x1a3   : > { %v1366_v44 = vadd.f32 %v8898_v41, %v1365_v42  ;;  %v1367_v45 = vpop.f32.mrb[1].mxu0 }
 0x1a5   : > { %v11668_v46 = vadd.f32 %v1374_v43, %v1366_v44 }
 0x1a6   : > { %v1370_v47 = vpop.f32.mrb[2].mxu0 }
 0x1a7   : > { %v1371_v49 = vadd.f32 %v8898_v41, %v1370_v47  ;;  %v1372_v50 = vpop.f32.mrb[3].mxu0  ;;  %v1381_v51 = vsel %vm1380_vm1, %v11668_v46, 0.0  ;;  %v8919_v47 = vld [vmem:[%s12937_s3 + $0x2] ss:$0 sm:$0xff]  ;;  %s12964_s3 = sld [smem:[#allocation31_spill]] }
 0x1a8   : > { %1382 = vadd.xlane.f32.xlu0 %v1381_v51 }
 0x1a9   : > { %v11673_v52 = vadd.f32 %v1375_v48, %v1371_v49 }
 0x1ab   : > { %v1384_v53 = vsel %vm1380_vm1, %v11673_v52, 0.0 }
 0x1ac   : > { %1385 = vadd.xlane.f32.xlu0 %v1384_v53 }
 0x235   : > { %v1383_v54 = vpop.xlane.xlu0 %1382 }
 0x236   : > { %v1388_v55 = vmul.f32 0.03125, %v1383_v54 }
 0x238   : > { %v1390_v56 = vsub.f32 %v11668_v46, %v1388_v55 }
 0x239   : > { %v1386_v57 = vpop.xlane.xlu0 %1385 }
 0x23a   : > { %v1389_v58 = vmul.f32 0.03125, %v1386_v57  ;;  %v1392_v59 = vmul.f32 %v1390_v56, %v1390_v56 }
 0x23c   : > { %v1391_v60 = vsub.f32 %v11673_v52, %v1389_v58  ;;  %v1394_v61 = vsel %vm1380_vm1, %v1392_v59, 0.0 }
 0x23d   : > { %1395 = vadd.xlane.f32.xlu1 %v1394_v61 }
 0x23e   : > { %v1393_v62 = vmul.f32 %v1391_v60, %v1391_v60 }
 0x240   : > { %v1397_v63 = vsel %vm1380_vm1, %v1393_v62, 0.0 }
 0x241   : > { %1398 = vadd.xlane.f32.xlu1 %v1397_v63 }
 0x2ca   : > { %v1396_v10 = vpop.xlane.xlu1 %1395 }
 0x2cb   : > { %v1400_v11 = vmul.f32 0.03125, %v1396_v10 }
 0x2cd   : > { %v1402_v12 = vadd.f32 1e-05, %v1400_v11 }
 0x2ce   : > { %v1399_v13 = vpop.xlane.xlu1 %1398 }
 0x2cf   : > { %11087 = vrsqrt.f32 %v1402_v12  ;;  %v1401_v14 = vmul.f32 0.03125, %v1399_v13  ;;  %v1694_v12 = vld [vmem:[%s12936_s8 + $0x10] sm:$0xff]  ;;  %v1695_v13 = vld [vmem:[%s12936_s8 + $0x18] sm:$0xff]  ;;  %s12966_s8 = sld [smem:[#allocation34_spill]] }
 0x2d1   : > { %v1403_v15 = vadd.f32 1e-05, %v1401_v14 }
 0x2d3   : > { %11089 = vrsqrt.f32 %v1403_v15 }
 0x2d9   : > { %v11088_v16 = vpop.eup %11087 }
 0x2da   : > { %v1406_v18 = vmul.f32 %v11088_v16, %v1390_v56 }
 0x2dc   : > { %v1414_v20 = vmul.f32 %v8901_v17, %v1406_v18 }
 0x2dd   : > { %v11090_v21 = vpop.eup %11089 }
 0x2de   : > { %v1407_v22 = vmul.f32 %v11090_v21, %v1391_v60  ;;  %v1422_v23 = vadd.f32 %v8902_v19, %v1414_v20  ;;  %v8928_v20 = vld [vmem:[%s12948_s14] ss:$0 sm:$0xff]  ;;  %s12970_s14 = sld [smem:[#allocation40_spill]] }
 0x2e0   : > { %v1415_v26 = vmul.f32 %v8901_v17, %v1407_v22  ;;  %9662 = vmatprep.mubr.msk.f32.mxu1 %vm1380_vm1, %v1422_v23  ;;  %v10494_v17 = vpack.c.bf16 %v1695_v13, %v1694_v12  ;;  %v2234_v12 = vld [vmem:[%s12949_s10 + $0x8] sm:$0xff] }
 0x2e2   : > { %v1423_v27 = vadd.f32 %v8902_v19, %v1415_v26 }
 0x2e4   : > { %9663 = vmatmul.mubr.msk.f32.vlgmr.msra.gmra.mrb[0].mxu1 %vm1380_vm1, %v1423_v27 }
 0x2e5   : > { %10467 = vmatpush3.bf16.msra.mxu1 %v10464_v9  ;;  %9673 = vmatprep.mubr.msk.f32.mxu1 %vm1380_vm1, %v1422_v23 }
 0x2e6   : > { %10469 = vmatprep.subr.bf16.mxu1 %v10468_v28 }
 0x2e9   : > { %10471 = vmatpush3.bf16.msra.mxu1 %v10468_v28 }
 0x2ea   : > { %10473 = vmatprep.subr.bf16.mxu1 %v10472_v31 }
 0x2ec   : > { %9674 = vmatmul.mubr.msk.f32.vlgmr.msra.gmra.mrb[2].mxu1 %vm1380_vm1, %v1423_v27 }
 0x2ed   : > { %10475 = vmatpush3.bf16.msra.mxu1 %v10472_v31  ;;  %9684 = vmatprep.mubr.msk.f32.mxu1 %vm1380_vm1, %v1422_v23 }
 0x2ee   : > { %10477 = vmatprep.subr.bf16.mxu1 %v10476_v34 }
 0x2f1   : > { %10479 = vmatpush3.bf16.msra.mxu1 %v10476_v34 }
 0x2f4   : > { %9685 = vmatmul.mubr.msk.f32.vlgmr.msra.gmra.mrb[4].mxu1 %vm1380_vm1, %v1423_v27 }
 0x3b7   : > { %v9664_v36 = vpop.f32.mrb[0].mxu1 }
 0x3b8   : > { %v1507_v37 = vpop.f32.mrb[1].mxu1  ;;  %v1513_v53 = vadd.f32 %v9664_v36, %v8903_v35 }
 0x3b9   : > { %v1508_v38 = vadd.f32 %v8903_v35, %v1507_v37  ;;  %v2023_v37 = vld [vmem:[%s11407_s30] sm:$0xff] }
 0x3bb   : > { %9691 = vmatprep.mubr.msk.f32.mxu1 %vm1380_vm1, %v1508_v38  ;;  %v2024_v38 = vld [vmem:[%s11407_s30 + $0x8] sm:$0xff] }
 0x3bf   : > { %v9675_v40 = vpop.f32.mrb[2].mxu1 }
 0x3c0   : > { %v1601_v41 = vadd.f32 %v9675_v40, %v8911_v39  ;;  %v1595_v42 = vpop.f32.mrb[3].mxu1  ;;  %v10498_v40 = vpack.c.bf16 %v2024_v38, %v2023_v37  ;;  %v2235_v37 = vld [vmem:[%s12949_s10 + $0x10] sm:$0xff]  ;;  %v2236_v38 = vld [vmem:[%s12949_s10 + $0x18] sm:$0xff] }
 0x3c1   : > { %v1596_v43 = vadd.f32 %v8911_v39, %v1595_v42  ;;  %v2025_v39 = vld [vmem:[%s11407_s30 + $0x10] sm:$0xff] }
 0x3c3   : > { %v10480_v45 = vpack.c.bf16 %v1601_v41, %v1596_v43  ;;  %v2026_v41 = vld [vmem:[%s11407_s30 + $0x18] sm:$0xff] }
 0x3c4   : > { %v10502_v42 = vpack.c.bf16 %v2026_v41, %v2025_v39  ;;  %v10526_v39 = vpack.c.bf16 %v2236_v38, %v2235_v37  ;;  %v8954_v41 = vld [vmem:[%s12951_s15 + $0xa8] sm:$0xff] }
 0x3c5   : > { %10482 = vmatprep.subr.msk.bf16.mxu1 %vm11706_vm2, %v10480_v45 }
 0x3c6   : > { %10485 = vmatpush3.bf16.xpose.msk.msra.mxu1 %vm11706_vm2, %v10480_v45 }
 0x3c7   : > { %v9686_v48 = vpop.f32.mrb[4].mxu1 }
 0x3c8   : > { %v1689_v49 = vadd.f32 %v9686_v48, %v8919_v47  ;;  %v1683_v50 = vpop.f32.mrb[5].mxu1 }
 0x3c9   : > { %v1684_v51 = vadd.f32 %v8919_v47, %v1683_v50 }
 0x3cb   : > { %v10486_v54 = vpack.c.bf16 %v1689_v49, %v1684_v51 }
 0x3cd   : > { %9692 = vmatmul.mubr.msk.f32.vlgmr.msra.gmra.mrb[6].mxu1 %vm1380_vm1, %v1513_v53  ;;  %10487 = vmatprep.subr.bf16.mxu1 %v10486_v54  ;;  %v8933_v53 = vld [vmem:[%s12932_s19 + $0x1] ss:$0 sm:$0xff]  ;;  %s12866_s19 = smov 8  }
 0x3ce   : > { %10489 = vmatpush3.bf16.msra.mxu1 %v10486_v54 }
 0x3cf   : > { %10491 = vmatprep.subr.bf16.mxu1 %v10490_v8 }
 0x4a0   : > { %v9693_v55 = vpop.f32.mrb[6].mxu1 }
 0x4a1   : > { %v1775_v56 = vpop.f32.mrb[7].mxu1  ;;  %v1788_v57 = vsel %vm12884_vm3, %v9693_v55, -inf }
 0x4a2   : > { %1789 = vmax.xlane.f32.xlu1 %v1788_v57  ;;  %v1785_v58 = vsel %vm12884_vm3, %v1775_v56, -inf  ;;  %v8934_v57 = vld [vmem:[%s12929_s24 + $0x1] ss:$0 sm:$0xff]  ;;  %s12868_s24 = smov 20  }
 0x4a3   : > { %1786 = vmax.xlane.f32.xlu0 %v1785_v58 }
 0x52f   : > { %v1790_v59 = vpop.xlane.xlu1 %1789 }
 0x530   : > { %v1792_v60 = vsub.f32 %v9693_v55, %v1790_v59  ;;  %v1787_v61 = vpop.xlane.xlu0 %1786 }
 0x531   : > { %v1791_v62 = vsub.f32 %v1775_v56, %v1787_v61 }
 0x532   : > { %v1795_v63 = vmul.f32 1.442695, %v1792_v60 }
 0x533   : > { %v1793_v1 = vmul.f32 1.442695, %v1791_v62  ;;  %v2133_v62 = vld [vmem:[%s12934_s12] sm:$0xff] }
 0x534   : > { %11091 = vpow2.f32 %v1795_v63  ;;  %v2134_v63 = vld [vmem:[%s12934_s12 + $0x8] sm:$0xff] }
 0x535   : > { %11093 = vpow2.f32 %v1793_v1  ;;  %v10506_v1 = vpack.c.bf16 %v2134_v63, %v2133_v62  ;;  %v8941_v63 = vld [vmem:[%s12953_s18] ss:$0 sm:$0xff]  ;;  %s12960_s18 = sld [smem:[#allocation28_spill]] }
 0x537   : > { %10507 = vmatprep.subr.bf16.mxu0 %v10506_v1 }
 0x538   : > { %10509 = vmatpush3.bf16.msra.mxu0 %v10506_v1 }
 0x53e   : > { %v11092_v2 = vpop.eup %11091 }
 0x53f   : > { %v11094_v3 = vpop.eup %11093  ;;  %v1800_v4 = vsel %vm12884_vm3, %v11092_v2, 0.0 }
 0x540   : > { %1801 = vadd.xlane.f32.xlu1 %v1800_v4  ;;  %v1797_v5 = vsel %vm12884_vm3, %v11094_v3, 0.0 }
 0x541   : > { %1798 = vadd.xlane.f32.xlu0 %v1797_v5  ;;  %v2137_v5 = vld [vmem:[%s12934_s12 + $0x20] sm:$0xff] }
 0x542   : > { %v10514_v7 = vpack.c.bf16 %v2138_v6, %v2137_v5  ;;  %v2615_v5 = vld [vmem:[%s12951_s15] sm:$0xff]  ;;  %v2616_v6 = vld [vmem:[%s12951_s15 + $0x8] sm:$0xff] }
 0x5cd   : > { %v1802_v9 = vpop.xlane.xlu1 %1801 }
 0x5ce   : > { %11095 = vrcp.f32 %v1802_v9  ;;  %v1799_v10 = vpop.xlane.xlu0 %1798  ;;  %v2140_v9 = vld [vmem:[%s12934_s12 + $0x38] sm:$0xff] }
 0x5cf   : > { %11097 = vrcp.f32 %v1799_v10 }
 0x5d8   : > { %v11096_v11 = vpop.eup %11095 }
 0x5d9   : > { %v11098_v14 = vpop.eup %11097  ;;  %v1806_v16 = vmul.f32 %v11096_v11, %v11092_v2  ;;  %v2135_v2 = vld [vmem:[%s12934_s12 + $0x10] sm:$0xff]  ;;  %v2233_v11 = vld [vmem:[%s12949_s10] sm:$0xff]  ;;  %s12968_s10 = sld [smem:[#allocation36_spill]] }
 0x5da   : > { %v1805_v15 = vmul.f32 %v11098_v14, %v11094_v3  ;;  %v2136_v3 = vld [vmem:[%s12934_s12 + $0x18] sm:$0xff]  ;;  %v10522_v13 = vpack.c.bf16 %v2234_v12, %v2233_v11  ;;  %v8935_v14 = vld [vmem:[%s12950_s11] ss:$0 sm:$0xff]  ;;  %v8963_v12 = vld [vmem:[%s12951_s15 + $0xd0] sm:$0xff]  ;;  %s12958_s11 = sld [smem:[#allocation26_spill]] }
 0x5db   : > { %v10510_v4 = vpack.c.bf16 %v2136_v3, %v2135_v2  ;;  %v8944_v2 = vld [vmem:[%s12954_s22] ss:$0 sm:$0xff]  ;;  %s12961_s22 = sld [smem:[#allocation29_spill]] }
 0x5dc   : > { %9698 = vmatprep.mubr.msk.f32.mxu1 %vm12884_vm3, %v1805_v15 }
 0x5dd   : > { %9699 = vmatmul.mubr.msk.f32.vlgmr.msra.gmra.mrb[8].mxu1 %vm12884_vm3, %v1806_v16  ;;  %10511 = vmatprep.subr.bf16.mxu0 %v10510_v4 }
 0x5de   : > { %10493 = vmatpush3.bf16.msra.mxu1 %v10490_v8  ;;  %10513 = vmatpush3.bf16.msra.mxu0 %v10510_v4  ;;  %v2139_v8 = vld [vmem:[%s12934_s12 + $0x30] sm:$0xff]  ;;  %s12969_s12 = sld [smem:[#allocation35_spill]] }
 0x5df   : > { %10495 = vmatprep.subr.bf16.mxu1 %v10494_v17  ;;  %10515 = vmatprep.subr.bf16.mxu0 %v10514_v7  ;;  %v10518_v10 = vpack.c.bf16 %v2140_v9, %v2139_v8  ;;  %v11789_v9 = vld [vmem:[%s12955_s23] sm:$0xff] }
 0x5e2   : > { %10497 = vmatpush3.bf16.msra.mxu1 %v10494_v17  ;;  %10517 = vmatpush3.bf16.msra.mxu0 %v10514_v7 }
 0x5e3   : > { %10499 = vmatprep.subr.bf16.mxu1 %v10498_v40  ;;  %10519 = vmatprep.subr.bf16.mxu0 %v10518_v10 }
 0x5e6   : > { %10521 = vmatpush3.bf16.msra.mxu0 %v10518_v10  ;;  %v11792_v10 = vld [vmem:[%s12955_s23 + $0x8] sm:$0xff] }
 0x6b0   : > { %v9700_v18 = vpop.f32.mrb[8].mxu1 }
 0x6b1   : > { %v1879_v19 = vpop.f32.mrb[9].mxu1 }
 0x6b2   : > { %9709 = vmatprep.mubr.msk.f32.mxu1 %vm1380_vm1, %v1879_v19 }
 0x6b3   : > { %9710 = vmatmul.mubr.msk.f32.vlgmr.msra.gmra.mrb[10].mxu1 %vm1380_vm1, %v9700_v18 }
 0x6b4   : > { %10501 = vmatpush3.bf16.msra.mxu1 %v10498_v40  ;;  %v8953_v40 = vld [vmem:[%s12951_s15 + $0xa0] sm:$0xff] }
 0x6b5   : > { %10503 = vmatprep.subr.bf16.mxu1 %v10502_v42 }
 0x6b8   : > { %10505 = vmatpush3.bf16.msra.mxu1 %v10502_v42  ;;  %v10538_v42 = vpack.c.bf16 %v8954_v41, %v8953_v40  ;;  %v11849_v41 = vld [vmem:[%s12957_s7 + $0x6] ss:$0 sm:$0xff] }
 0x6b9   : > { %10523 = vmatprep.subr.bf16.mxu1 %v10522_v13 }
 0x6ba   : > { %10539 = vmatprep.subr.bf16.mxu0 %v10538_v42 }
 0x786   : > { %v9711_v21 = vpop.f32.mrb[10].mxu1 }
 0x787   : > { %v1972_v22 = vadd.f32 %v9711_v21, %v8928_v20  ;;  %v1966_v23 = vpop.f32.mrb[11].mxu1 }
 0x788   : > { %v1967_v24 = vadd.f32 %v8928_v20, %v1966_v23 }
 0x789   : > { %v11730_v25 = vadd.f32 %v1972_v22, %v11673_v52 }
 0x78a   : > { %v11733_v26 = vadd.f32 %v1967_v24, %v11668_v46 }
 0x78b   : > { %v1984_v27 = vsel %vm1380_vm1, %v11730_v25, 0.0 }
 0x78c   : > { %1985 = vadd.xlane.f32.xlu1 %v1984_v27  ;;  %v1981_v28 = vsel %vm1380_vm1, %v11733_v26, 0.0 }
 0x78d   : > { %1982 = vadd.xlane.f32.xlu0 %v1981_v28 }
 0x819   : > { %v1986_v29 = vpop.xlane.xlu1 %1985 }
 0x81a   : > { %v1988_v30 = vmul.f32 0.03125, %v1986_v29  ;;  %v1983_v31 = vpop.xlane.xlu0 %1982 }
 0x81b   : > { %v1987_v52 = vmul.f32 0.03125, %v1983_v31 }
 0x81c   : > { %v1990_v32 = vsub.f32 %v11730_v25, %v1988_v30 }
 0x81d   : > { %v1989_v46 = vsub.f32 %v11733_v26, %v1987_v52 }
 0x81e   : > { %v1992_v33 = vmul.f32 %v1990_v32, %v1990_v32 }
 0x81f   : > { %v1991_v34 = vmul.f32 %v1989_v46, %v1989_v46 }
 0x820   : > { %v1996_v35 = vsel %vm1380_vm1, %v1992_v33, 0.0 }
 0x821   : > { %1997 = vadd.xlane.f32.xlu1 %v1996_v35  ;;  %v1993_v36 = vsel %vm1380_vm1, %v1991_v34, 0.0 }
 0x822   : > { %1994 = vadd.xlane.f32.xlu0 %v1993_v36 }
 0x8ae   : > { %v1998_v43 = vpop.xlane.xlu1 %1997 }
 0x8af   : > { %v2000_v45 = vmul.f32 0.03125, %v1998_v43  ;;  %v1995_v47 = vpop.xlane.xlu0 %1994 }
 0x8b0   : > { %v1999_v48 = vmul.f32 0.03125, %v1995_v47  ;;  %v8940_v47 = vld [vmem:[%s12952_s16] ss:$0 sm:$0xff]  ;;  %s12959_s16 = sld [smem:[#allocation27_spill]] }
 0x8b1   : > { %v2002_v49 = vadd.f32 1e-05, %v2000_v45 }
 0x8b2   : > { %v2001_v50 = vadd.f32 1e-05, %v1999_v48 }
 0x8b3   : > { %11099 = vrsqrt.f32 %v2002_v49 }
 0x8b4   : > { %11101 = vrsqrt.f32 %v2001_v50 }
 0x8bd   : > { %v11100_v51 = vpop.eup %11099 }
 0x8be   : > { %v11102_v54 = vpop.eup %11101  ;;  %v2006_v55 = vmul.f32 %v11100_v51, %v1990_v32 }
 0x8bf   : > { %v2005_v56 = vmul.f32 %v11102_v54, %v1989_v46  ;;  %v8946_v54 = vld [vmem:[%s12951_s15 + $0x88] sm:$0xff] }
 0x8c0   : > { %v2014_v58 = vmul.f32 %v8933_v53, %v2006_v55 }
 0x8c1   : > { %v2013_v59 = vmul.f32 %v8933_v53, %v2005_v56  ;;  %v8945_v53 = vld [vmem:[%s12951_s15 + $0x80] sm:$0xff]  ;;  %v8955_v56 = vld [vmem:[%s12951_s15 + $0xb0] sm:$0xff] }
 0x8c2   : > { %v2022_v61 = vadd.f32 %v8934_v57, %v2014_v58  ;;  %v10530_v55 = vpack.c.bf16 %v8946_v54, %v8945_v53  ;;  %v8947_v58 = vld [vmem:[%s12951_s15 + $0x90] sm:$0xff] }
 0x8c3   : > { %v2021_v60 = vadd.f32 %v8934_v57, %v2013_v59 }
 0x8c5   : > { %9720 = vmatprep.mubr.msk.f32.mxu1 %vm1380_vm1, %v2021_v60  ;;  %v8961_v60 = vld [vmem:[%s12951_s15 + $0xc0] sm:$0xff] }
 0x8c6   : > { %9721 = vmatmul.mubr.msk.f32.vlgmr.msra.gmra.mrb[12].mxu1 %vm1380_vm1, %v2022_v61  ;;  %v8962_v61 = vld [vmem:[%s12951_s15 + $0xc8] sm:$0xff] }
 0x8c7   : > { %10525 = vmatpush3.bf16.msra.mxu1 %v10522_v13  ;;  %v10546_v62 = vpack.c.bf16 %v8962_v61, %v8961_v60  ;;  %v8964_v13 = vld [vmem:[%s12951_s15 + $0xd8] sm:$0xff] }
 0x8c8   : > { %10527 = vmatprep.subr.bf16.mxu1 %v10526_v39 }
 0x8cb   : > { %10529 = vmatpush3.bf16.msra.mxu1 %v10526_v39 }
 0x8cc   : > { %10531 = vmatprep.subr.bf16.mxu1 %v10530_v55 }
 0x999   : > { %v9722_v15 = vpop.f32.mrb[12].mxu1 }
 0x99a   : > { %v2112_v16 = vadd.f32 %v9722_v15, %v8935_v14  ;;  %v2106_v17 = vpop.f32.mrb[13].mxu1  ;;  %v2617_v15 = vld [vmem:[%s12951_s15 + $0x10] sm:$0xff] }
 0x99b   : > { %v2107_v18 = vadd.f32 %v8935_v14, %v2106_v17  ;;  %v10555_v14 = vpack.c.bf16 %v2616_v6, %v2615_v5  ;;  %v8983_v5 = vld [vmem:[%s12957_s7 + $0x2] ss:$0 sm:$0xff] }
 0x99c   : > { %v2116_v19 = vmul.f32 %v2112_v16, %v2112_v16 }
 0x99d   : > { %v2115_v20 = vmul.f32 %v2107_v18, %v2107_v18 }
 0x99e   : > { %v2118_v21 = vmul.f32 %v2116_v19, %v2112_v16  ;;  %v10550_v19 = vpack.c.bf16 %v8964_v13, %v8963_v12 }
 0x99f   : > { %v2117_v22 = vmul.f32 %v2115_v20, %v2107_v18 }
 0x9a0   : > { %v2120_v23 = vmul.f32 0.044715, %v2118_v21  ;;  %v8971_v21 = vld [vmem:[%s12951_s15 + $0x20] sm:$0xff] }
 0x9a1   : > { %v2119_v24 = vmul.f32 0.044715, %v2117_v22  ;;  %v8972_v22 = vld [vmem:[%s12951_s15 + $0x28] sm:$0xff] }
 0x9a2   : > { %v2122_v27 = vadd.f32 %v2120_v23, %v2112_v16  ;;  %v11305_v23 = vmov 0.0  }
 0x9a3   : > { %v2121_v28 = vadd.f32 %v2119_v24, %v2107_v18  ;;  %v10561_v24 = vpack.c.bf16 %v8972_v22, %v8971_v21 }
 0x9a4   : > { %v2124_v29 = vmul.f32 0.7978846, %v2122_v27  ;;  %v11824_v27 = vld [vmem:[%s11818_s0] sm:$0x7f] }
 0x9a5   : > { %v2123_v30 = vmul.f32 0.7978846, %v2121_v28  ;;  %v8973_v28 = vld [vmem:[%s12951_s15 + $0x30] sm:$0xff] }
 0x9a6   : > { %11103 = vtanh.f32 %v2124_v29  ;;  %v8974_v29 = vld [vmem:[%s12951_s15 + $0x38] sm:$0xff] }
 0x9a7   : > { %11105 = vtanh.f32 %v2123_v30  ;;  %v10564_v30 = vpack.c.bf16 %v8974_v29, %v8973_v28  ;;  %v8989_v28 = vld [vmem:[%s12959_s16] ss:$0 sm:$0xff] }
 0x9b0   : > { %v11104_v31 = vpop.eup %11103 }
 0x9b1   : > { %v11106_v52 = vpop.eup %11105  ;;  %v2128_v32 = vadd.f32 1.0, %v11104_v31  ;;  %v8958_v31 = vld [vmem:[%s12957_s7 + $0x5] ss:$0 sm:$0xff] }
 0x9b2   : > { %v2127_v46 = vadd.f32 1.0, %v11106_v52 }
 0x9b3   : > { %v2130_v33 = vmul.f32 0.5, %v2128_v32  ;;  %v8950_v32 = vld [vmem:[%s12957_s7 + $0x4] ss:$0 sm:$0xff] }
 0x9b4   : > { %v2129_v34 = vmul.f32 0.5, %v2127_v46 }
 0x9b5   : > { %v2132_v36 = vmul.f32 %v2130_v33, %v2112_v16  ;;  %v2618_v16 = vld [vmem:[%s12951_s15 + $0x18] sm:$0xff] }
 0x9b6   : > { %v2131_v35 = vmul.f32 %v2129_v34, %v2107_v18  ;;  %v10558_v20 = vpack.c.bf16 %v2618_v16, %v2617_v15  ;;  %v2866_v15 = vld [vmem:[%s12958_s11 + $0x8] sm:$0xff] }
 0x9b8   : > { %9739 = vmatprep.mubr.msk.f32.mxu0 %vm1292_vm0, %v2131_v35 }
 0x9b9   : > { %9740 = vmatmul.mubr.msk.f32.vlgmr.msra.gmra.mrb[4].mxu0 %vm1292_vm0, %v2132_v36 }
 0x9ba   : > { %10541 = vmatpush3.bf16.msra.mxu0 %v10538_v42 }
 0xa8c   : > { %v9741_v43 = vpop.f32.mrb[4].mxu0 }
 0xa8d   : > { %v2223_v45 = vadd.f32 %v9741_v43, %v11730_v25  ;;  %v2213_v48 = vpop.f32.mrb[5].mxu0  ;;  %v8956_v25 = vld [vmem:[%s12951_s15 + $0xb8] sm:$0xff] }
 0xa8e   : > { %v2222_v49 = vadd.f32 %v2213_v48, %v11733_v26  ;;  %v10542_v57 = vpack.c.bf16 %v8956_v25, %v8955_v56  ;;  %v8948_v26 = vld [vmem:[%s12951_s15 + $0x98] sm:$0xff]  ;;  %v8978_v56 = vld [vmem:[%s12951_s15 + $0x40] sm:$0xff]  ;;  %v8979_v25 = vld [vmem:[%s12951_s15 + $0x48] sm:$0xff] }
 0xa8f   : > { %v2232_v51 = vadd.f32 %v8940_v47, %v2223_v45  ;;  %v10534_v59 = vpack.c.bf16 %v8948_v26, %v8947_v58  ;;  %v10567_v58 = vpack.c.bf16 %v8979_v25, %v8978_v56  ;;  %v8981_v26 = vld [vmem:[%s12951_s15 + $0x58] sm:$0xff]  ;;  %v8992_v25 = vld [vmem:[%s12961_s22] ss:$0 sm:$0xff] }
 0xa90   : > { %v2231_v50 = vadd.f32 %v8940_v47, %v2222_v49  ;;  %10543 = vmatprep.subr.bf16.mxu0 %v10542_v57  ;;  %v8976_v49 = vld [vmem:[%s12957_s7 + $0x1] ss:$0 sm:$0xff] }
 0xa91   : > { %10545 = vmatpush3.bf16.msra.mxu0 %v10542_v57  ;;  %v8980_v57 = vld [vmem:[%s12951_s15 + $0x50] sm:$0xff] }
 0xa92   : > { %9750 = vmatprep.mubr.msk.f32.mxu1 %vm1380_vm1, %v2231_v50  ;;  %10554 = vmatprep.subr.bf16.mxu0 %v11303_v0  ;;  %v8969_v50 = vld [vmem:[%s12957_s7] ss:$0 sm:$0xff] }
 0xa93   : > { %9751 = vmatmul.mubr.msk.f32.vlgmr.msra.gmra.mrb[14].mxu1 %vm1380_vm1, %v2232_v51 }
 0xa94   : > { %10533 = vmatpush3.bf16.msra.mxu1 %v10530_v55 }
 0xa95   : > { %10535 = vmatprep.subr.bf16.mxu1 %v10534_v59 }
 0xa98   : > { %10537 = vmatpush3.bf16.msra.mxu1 %v10534_v59  ;;  %v10570_v59 = vpack.c.bf16 %v8981_v26, %v8980_v57 }
 0xa99   : > { %10547 = vmatprep.subr.bf16.mxu1 %v10546_v62 }
 0xb66   : > { %v9752_v1 = vpop.f32.mrb[14].mxu1 }
 0xb67   : > { %v2322_v3 = vadd.f32 %v9752_v1, %v8941_v63  ;;  %v2316_v4 = vpop.f32.mrb[15].mxu1 }
 0xb68   : > { %v2317_v7 = vadd.f32 %v8941_v63, %v2316_v4 }
 0xb69   : > { %v11786_v8 = vadd.f32 %v8944_v2, %v2322_v3 }
 0xb6a   : > { %v11794_v11 = vadd.f32 %v8944_v2, %v2317_v7 }
 0xb6b   : > { %v2337_v18 = vadd.f32 %v11786_v8, %v11792_v10 }
 0xb6c   : > { %9772 = vmatprep.mubr.msk.f32.mxu0 %vm1380_vm1, %v11794_v11  ;;  %v2336_v17 = vadd.f32 %v11794_v11, %v11789_v9 }
 0xb6d   : > { %9773 = vmatmul.mubr.msk.f32.vlgmr.msra.gmra.mrb[6].mxu0 %vm1380_vm1, %v11786_v8 }
 0xb6e   : > { %9761 = vmatprep.mubr.msk.f32.mxu1 %vm1380_vm1, %v2336_v17  ;;  %10556 = vmatpush3.bf16.msra.mxu0 %v10555_v14  ;;  %v2865_v14 = vld [vmem:[%s12958_s11] sm:$0xff] }
 0xb6f   : > { %9762 = vmatmul.mubr.msk.f32.vlgmr.msra.gmra.mrb[16].mxu1 %vm1380_vm1, %v2337_v18  ;;  %10557 = vmatprep.subr.bf16.mxu0 %v11303_v0 }
 0xb70   : > { %10549 = vmatpush3.bf16.msra.mxu1 %v10546_v62  ;;  %9783 = vmatprep.mubr.msk.f32.mxu1 %vm1380_vm1, %v2336_v17  ;;  %v10573_v17 = vpack.c.bf16 %v2866_v15, %v2865_v14  ;;  %v9001_v14 = vld [vmem:[%s12958_s11 + $0x28] sm:$0xff] }
 0xb71   : > { %10551 = vmatprep.subr.bf16.mxu1 %v10550_v19  ;;  %9794 = vmatprep.mubr.msk.f32.mxu0 %vm11304_vm4, %v11305_v23 }
 0xb72   : > { %10559 = vmatpush3.bf16.msra.mxu0 %v10558_v20  ;;  %v2868_v20 = vld [vmem:[%s12958_s11 + $0x18] sm:$0xff] }
 0xb73   : > { %10566 = vmatprep.subr.bf16.mxu0 %v11303_v0 }
 0xb74   : > { %10553 = vmatpush3.bf16.msra.mxu1 %v10550_v19  ;;  %v2867_v19 = vld [vmem:[%s12958_s11 + $0x10] sm:$0xff] }
 0xb75   : > { %10560 = vmatprep.subr.bf16.mxu1 %v11303_v0  ;;  %9795 = vmatmul.mubr.msk.f32.vlgmr.msra.gmra.mrb[8].mxu0 %vm1380_vm1, %v11824_v27  ;;  %v10576_v21 = vpack.c.bf16 %v2868_v20, %v2867_v19  ;;  %v9003_v19 = vld [vmem:[%s12958_s11 + $0x38] sm:$0xff] }
 0xb76   : > { %9816 = vmatprep.mubr.msk.f32.mxu0 %vm11304_vm4, %v11305_v23  ;;  %10568 = vmatpush3.bf16.msra.mxu0 %v10567_v58 }
 0xb77   : > { %9784 = vmatmul.mubr.msk.f32.vlgmr.msra.gmra.mrb[18].mxu1 %vm1380_vm1, %v2337_v18  ;;  %10569 = vmatprep.subr.bf16.mxu0 %v11303_v0 }
 0xb78   : > { %10562 = vmatpush3.bf16.msra.mxu1 %v10561_v24  ;;  %9805 = vmatprep.mubr.msk.f32.mxu1 %vm11304_vm4, %v11305_v23 }
 0xb79   : > { %10563 = vmatprep.subr.bf16.mxu1 %v11303_v0 }
 0xb7a   : > { %10571 = vmatpush3.bf16.msra.mxu0 %v10570_v59  ;;  %v8998_v59 = vld [vmem:[%s12957_s7 + $0x3] ss:$0 sm:$0xff] }
 0xb7b   : > { %10578 = vmatprep.subr.bf16.mxu0 %v11303_v0 }
 0xb7c   : > { %10565 = vmatpush3.bf16.msra.mxu1 %v10564_v30 }
 0xb7d   : > { %9819 = vmatprep.subr.mxu1 %v11305_v23  ;;  %9817 = vmatmul.mubr.msk.f32.vlgmr.msra.gmra.mrb[10].mxu0 %vm1380_vm1, %v11824_v27 }
 0xb7e   : > { %9848 = vmatprep.mubr.msk.f32.mxu0 %vm11304_vm4, %v11305_v23 }
 0xb7f   : > { %9806 = vmatmul.mubr.msk.f32.vlgmr.msra.gmra.mrb[20].mxu1 %vm1380_vm1, %v11824_v27 }
 0xb80   : > { %9821 = vmatprep.mubr.msk.f32.mxu1 %vm11304_vm4, %v11305_v23 }
 0xc40   : > { %v9774_v52 = vpop.f32.mrb[6].mxu0 }
 0xc41   : > { %v2523_v46 = vadd.f32 %v9774_v52, %v8958_v31  ;;  %v2517_v33 = vpop.f32.mrb[7].mxu0 }
 0xc42   : > { %v2518_v34 = vadd.f32 %v8958_v31, %v2517_v33  ;;  %v9763_v35 = vpop.f32.mrb[16].mxu1 }
 0xc43   : > { %v2429_v36 = vadd.f32 %v9763_v35, %v8950_v32  ;;  %v2423_v37 = vpop.f32.mrb[17].mxu1 }
 0xc44   : > { %v11844_v38 = vpack.c.bf16 %v2523_v46, %v2518_v34  ;;  %v2424_v39 = vadd.f32 %v8950_v32, %v2423_v37  ;;  %v8993_v37 = vld [vmem:[%s12951_s15 + $0x60] sm:$0xff] }
 0xc46   : > { %v11846_v40 = vpack.c.bf16 %v2429_v36, %v2424_v39  ;;  %v8994_v39 = vld [vmem:[%s12951_s15 + $0x68] sm:$0xff] }
 0xc48   : > { %v2695_v42 = vpop.f32.mrb[8].mxu0 }
 0xc49   : > { %v9796_v43 = vpop.f32.mrb[9].mxu0  ;;  %v2696_v55 = vadd.f32 %v8969_v50, %v2695_v42  ;;  %v10579_v42 = vpack.c.bf16 %v8994_v39, %v8993_v37  ;;  %v3516_v37 = vld [vmem:[%s12962_s26 + $0x8] sm:$0xff] }
 0xc4a   : > { %v9785_v45 = vpop.f32.mrb[18].mxu1  ;;  %v8995_v43 = vld [vmem:[%s12951_s15 + $0x70] sm:$0xff] }
 0xc4b   : > { %v11852_v47 = vadd.f32 %v9785_v45, %v11849_v41  ;;  %v11854_v48 = vpop.f32.mrb[19].mxu1  ;;  %10580 = vmatpush3.bf16.msra.mxu0 %v10579_v42  ;;  %v8996_v45 = vld [vmem:[%s12951_s15 + $0x78] sm:$0xff]  ;;  %v3517_v42 = vld [vmem:[%s12962_s26 + $0x10] sm:$0xff] }
 0xc4c   : > { %10581 = vmatprep.subr.bf16.mxu0 %v11303_v0 }
 0xc50   : > { %v2861_v6 = vpop.f32.mrb[10].mxu0 }
 0xc51   : > { %v2862_v7 = vadd.f32 %v8983_v5, %v2861_v6  ;;  %v9818_v12 = vpop.f32.mrb[11].mxu0 }
 0xc52   : > { %v2778_v51 = vpop.f32.mrb[20].mxu1 }
 0xc53   : > { %v2779_v53 = vadd.f32 %v8976_v49, %v2778_v51  ;;  %v9807_v54 = vpop.f32.mrb[21].mxu1  ;;  %v10582_v49 = vpack.c.bf16 %v8996_v45, %v8995_v43  ;;  %v3518_v43 = vld [vmem:[%s12962_s26 + $0x18] sm:$0xff] }
 0xc54   : > { %v10601_v45 = vpack.c.bf16 %v3518_v43, %v3517_v42  ;;  %v9022_v42 = vld [vmem:[%s12961_s22 + $0x2] ss:$0 sm:$0xff] }
 0xc55   : > { %9820 = vmatpush3.xpose.msk.msra.mxu1 %vm1380_vm1, %v2779_v53  ;;  %10583 = vmatpush3.bf16.msra.mxu0 %v10582_v49  ;;  %v3600_v49 = vld [vmem:[%s12963_s2] sm:$0xff] }
 0xc56   : > { %9824 = vmatprep.subr.mxu1 %v11305_v23  ;;  %10588 = vmatprep.subr.bf16.mxu0 %v11303_v0 }
 0xc58   : > { %9822 = vmatmul.mubr.msk.f32.vlgmr.msra.gmra.mrb[22].mxu1 %vm1380_vm1, %v2696_v55  ;;  %v8991_v55 = vld [vmem:[%s12960_s18] ss:$0 sm:$0xff] }
 0xc59   : > { %9826 = vmatprep.mubr.msk.f32.mxu1 %vm11304_vm4, %v11305_v23  ;;  %9825 = vmatpush3.msk.msra.mxu1 %vm2962_vm6, %v2862_v7 }
 0xc5a   : > { %10572 = vmatprep.subr.bf16.mxu1 %v11303_v0 }
 0xd2b   : > { %v2942_v60 = vpop.f32.mrb[22].mxu1 }
 0xd2c   : > { %v9823_v61 = vpop.f32.mrb[23].mxu1  ;;  %v2947_v62 = vsel %vm2946_vm5, %v2942_v60, -inf }
 0xd2d   : > { %2948 = vmax.xlane.f32.xlu0 %v2947_v62 }
 0xdba   : > { %v2949_v63 = vpop.xlane.xlu0 %2948 }
 0xdbb   : > { %v2950_v1 = vsub.f32 %v2942_v60, %v2949_v63 }
 0xdbd   : > { %v2951_v2 = vmul.f32 1.442695, %v2950_v1 }
 0xdbf   : > { %11107 = vpow2.f32 %v2951_v2 }
 0xdc9   : > { %v11108_v3 = vpop.eup %11107 }
 0xdca   : > { %v2953_v4 = vsel %vm2946_vm5, %v11108_v3, 0.0 }
 0xdcb   : > { %2954 = vadd.xlane.f32.xlu1 %v2953_v4 }
 0xe58   : > { %v2955_v13 = vpop.xlane.xlu1 %2954 }
 0xe59   : > { %11109 = vrcp.f32 %v2955_v13  ;;  %v9000_v13 = vld [vmem:[%s12958_s11 + $0x20] sm:$0xff] }
 0xe63   : > { %v11110_v16 = vpop.eup %11109 }
 0xe64   : > { %v2957_v18 = vmul.f32 %v11110_v16, %v11108_v3  ;;  %v10592_v16 = vpack.c.bf16 %v9001_v14, %v9000_v13 }
 0xe66   : > { %9827 = vmatmul.mubr.msk.f32.vlgmr.msra.gmra.mrb[24].mxu1 %vm2958_vm7, %v2957_v18  ;;  %v9002_v18 = vld [vmem:[%s12958_s11 + $0x30] sm:$0xff] }
 0xe67   : > { %10574 = vmatpush3.bf16.msra.mxu1 %v10573_v17  ;;  %9837 = vmatprep.mubr.msk.f32.mxu1 %vm11304_vm4, %v11305_v23  ;;  %v10595_v20 = vpack.c.bf16 %v9003_v19, %v9002_v18 }
 0xe68   : > { %10575 = vmatprep.subr.bf16.mxu1 %v11303_v0 }
 0xe6b   : > { %10577 = vmatpush3.bf16.msra.mxu1 %v10576_v21 }
 0xe6c   : > { %10584 = vmatprep.subr.bf16.mxu1 %v11303_v0 }
 0xf39   : > { %v3032_v22 = vpop.f32.mrb[24].mxu1 }
 0xf3a   : > { %v9828_v24 = vpop.f32.mrb[25].mxu1  ;;  %9838 = vmatmul.mubr.msk.f32.vlgmr.msra.gmra.mrb[26].mxu1 %vm1380_vm1, %v3032_v22 }
 0xf3b   : > { %10587 = vmatpush3.bf16.xpose.msk.msra.mxu1 %vm11706_vm2, %v11846_v40  ;;  %9855 = vmatprep.mubr.msk.f32.mxu1 %vm11304_vm4, %v11305_v23  ;;  %v9009_v24 = vld [vmem:[%s12959_s16 + $0x1] ss:$0 sm:$0xff] }
 0xf3c   : > { %10597 = vmatprep.subr.bf16.mxu1 %v11303_v0 }
0x100d   : > { %v3111_v29 = vpop.f32.mrb[26].mxu1 }
0x100e   : > { %v3112_v30 = vadd.f32 %v8989_v28, %v3111_v29  ;;  %v9839_v31 = vpop.f32.mrb[27].mxu1 }
0x1010   : > { %v3115_v52 = vadd.f32 %v3112_v30, %v11824_v27 }
0x1012   : > { %v3119_v32 = vsel %vm3118_vm8, %v3115_v52, 0.0 }
0x1013   : > { %3120 = vadd.xlane.f32.xlu0 %v3119_v32 }
0x10a0   : > { %v3121_v46 = vpop.xlane.xlu0 %3120 }
0x10a1   : > { %v3122_v33 = vmul.f32 0.03125, %v3121_v46 }
0x10a3   : > { %v3123_v34 = vsub.f32 %v3115_v52, %v3122_v33 }
0x10a5   : > { %v3124_v35 = vmul.f32 %v3123_v34, %v3123_v34 }
0x10a7   : > { %v3125_v36 = vsel %vm3118_vm8, %v3124_v35, 0.0 }
0x10a8   : > { %3126 = vadd.xlane.f32.xlu1 %v3125_v36  ;;  %v3515_v36 = vld [vmem:[%s12962_s26] sm:$0xff] }
0x10a9   : > { %v10598_v39 = vpack.c.bf16 %v3516_v37, %v3515_v36  ;;  %v9021_v37 = vld [vmem:[%s12960_s18 + $0x2] ss:$0 sm:$0xff] }
0x1135   : > { %v3127_v50 = vpop.xlane.xlu1 %3126 }
0x1136   : > { %v3128_v51 = vmul.f32 0.03125, %v3127_v50  ;;  %v3601_v50 = vld [vmem:[%s12963_s2 + $0x8] sm:$0xff] }
0x1138   : > { %v3129_v53 = vadd.f32 1e-05, %v3128_v51  ;;  %v3602_v51 = vld [vmem:[%s12963_s2 + $0x10] sm:$0xff] }
0x113a   : > { %11111 = vrsqrt.f32 %v3129_v53  ;;  %v10604_v53 = vpack.c.bf16 %v3601_v50, %v3600_v49  ;;  %v9031_v49 = vld [vmem:[%s12951_s15 + $0x108] sm:$0xff] }
0x1144   : > { %v11112_v54 = vpop.eup %11111 }
0x1145   : > { %v3131_v56 = vmul.f32 %v11112_v54, %v3123_v34  ;;  %v3603_v54 = vld [vmem:[%s12963_s2 + $0x18] sm:$0xff] }
0x1147   : > { %v3138_v57 = vmul.f32 %v8991_v55, %v3131_v56  ;;  %v10607_v55 = vpack.c.bf16 %v3603_v54, %v3602_v51  ;;  %v3604_v56 = vld [vmem:[%s12963_s2 + $0x20] sm:$0xff]  ;;  %v9032_v54 = vld [vmem:[%s12951_s15 + $0x110] sm:$0xff] }
0x1149   : > { %v3145_v58 = vadd.f32 %v8992_v25, %v3138_v57  ;;  %v3605_v25 = vld [vmem:[%s12963_s2 + $0x28] sm:$0xff] }
0x114a   : > { %v10610_v57 = vpack.c.bf16 %v3605_v25, %v3604_v56  ;;  %v9028_v25 = vld [vmem:[%s12957_s7 + $0x7] ss:$0 sm:$0xff] }
0x114b   : > { %v3146_v26 = vadd.f32 %v3145_v58, %v11824_v27 }
0x114d   : > { %9849 = vmatmul.mubr.msk.f32.vlgmr.msra.gmra.mrb[12].mxu0 %vm1380_vm1, %v3146_v26 }
0x114e   : > { %10590 = vmatpush3.bf16.msra.mxu0 %v11844_v38  ;;  %9862 = vmatprep.mubr.msk.f32.mxu0 %vm11304_vm4, %v11305_v23 }
0x114f   : > { %10591 = vmatprep.subr.bf16.mxu0 %v11303_v0 }
0x1220   : > { %v3229_v60 = vpop.f32.mrb[12].mxu0 }
0x1221   : > { %v3230_v61 = vadd.f32 %v8998_v59, %v3229_v60  ;;  %v9850_v62 = vpop.f32.mrb[13].mxu0 }
0x1223   : > { %9856 = vmatmul.mubr.msk.f32.vlgmr.msra.gmra.mrb[28].mxu1 %vm1380_vm1, %v3230_v61  ;;  %v9013_v61 = vld [vmem:[%s12960_s18 + $0x1] ss:$0 sm:$0xff] }
0x1224   : > { %9884 = vmatprep.mubr.msk.f32.mxu1 %vm11304_vm4, %v11305_v23  ;;  %10599 = vmatpush3.bf16.msra.mxu1 %v10598_v39 }
0x1225   : > { %10600 = vmatprep.subr.bf16.mxu1 %v11303_v0 }
0x1228   : > { %10602 = vmatpush3.bf16.msra.mxu1 %v10601_v45  ;;  %v9030_v45 = vld [vmem:[%s12951_s15 + $0x100] sm:$0xff] }
0x1229   : > { %10615 = vmatprep.subr.bf16.mxu1 %v11303_v0  ;;  %v10622_v51 = vpack.c.bf16 %v9031_v49, %v9030_v45 }
0x12f6   : > { %v3315_v63 = vpop.f32.mrb[28].mxu1 }
0x12f7   : > { %v9857_v1 = vpop.f32.mrb[29].mxu1  ;;  %v3320_v2 = vsel %vm3319_vm9, %v3315_v63, -inf }
0x12f8   : > { %3321 = vmax.xlane.f32.xlu0 %v3320_v2 }
0x1385   : > { %v3322_v3 = vpop.xlane.xlu0 %3321 }
0x1386   : > { %v3323_v4 = vsub.f32 %v3315_v63, %v3322_v3  ;;  %v9014_v63 = vld [vmem:[%s12961_s22 + $0x1] ss:$0 sm:$0xff]  ;;  %v3606_v3 = vld [vmem:[%s12963_s2 + $0x30] sm:$0xff] }
0x1388   : > { %v3324_v5 = vmul.f32 1.442695, %v3323_v4  ;;  %v3607_v4 = vld [vmem:[%s12963_s2 + $0x38] sm:$0xff] }
0x138a   : > { %11113 = vpow2.f32 %v3324_v5  ;;  %v10613_v5 = vpack.c.bf16 %v3607_v4, %v3606_v3 }
0x1394   : > { %v11114_v6 = vpop.eup %11113 }
0x1395   : > { %v3326_v7 = vsel %vm3319_vm9, %v11114_v6, 0.0 }
0x1396   : > { %3327 = vadd.xlane.f32.xlu1 %v3326_v7 }
0x1423   : > { %v3328_v12 = vpop.xlane.xlu1 %3327 }
0x1424   : > { %11115 = vrcp.f32 %v3328_v12 }
0x142e   : > { %v11116_v15 = vpop.eup %11115 }
0x142f   : > { %v3330_v17 = vmul.f32 %v11116_v15, %v11114_v6  ;;  %v9015_v6 = vld [vmem:[%s12964_s3] ss:$0 sm:$0xff]  ;;  %v11958_v15 = vadd.f32 %v11849_v41, %v11854_v48 }
0x1431   : > { %9863 = vmatmul.mubr.msk.f32.vlgmr.msra.gmra.mrb[14].mxu0 %vm12884_vm3, %v3330_v17 }
0x1432   : > { %10593 = vmatpush3.bf16.msra.mxu0 %v10592_v16  ;;  %9873 = vmatprep.mubr.msk.f32.mxu0 %vm11304_vm4, %v11305_v23  ;;  %v9017_v16 = vld [vmem:[%s12965_s5] ss:$0 sm:$0xff] }
0x1433   : > { %10594 = vmatprep.subr.bf16.mxu0 %v11303_v0 }
0x1436   : > { %10596 = vmatpush3.bf16.msra.mxu0 %v10595_v20 }
0x1437   : > { %10603 = vmatprep.subr.bf16.mxu0 %v11303_v0 }
0x1504   : > { %v3400_v21 = vpop.f32.mrb[14].mxu0 }
0x1505   : > { %v9864_v22 = vpop.f32.mrb[15].mxu0  ;;  %9874 = vmatmul.mubr.msk.f32.vlgmr.msra.gmra.mrb[16].mxu0 %vm1380_vm1, %v3400_v21 }
0x1506   : > { %9903 = vmatprep.mubr.msk.f32.mxu0 %vm11304_vm4, %v11305_v23  ;;  %10605 = vmatpush3.bf16.msra.mxu0 %v10604_v53 }
0x1507   : > { %10606 = vmatprep.subr.bf16.mxu0 %v11303_v0 }
0x150a   : > { %10608 = vmatpush3.bf16.msra.mxu0 %v10607_v55  ;;  %v9033_v55 = vld [vmem:[%s12951_s15 + $0x118] sm:$0xff] }
0x150b   : > { %10609 = vmatprep.subr.bf16.mxu0 %v11303_v0  ;;  %v10625_v56 = vpack.c.bf16 %v9033_v55, %v9032_v54 }
0x150e   : > { %10611 = vmatpush3.bf16.msra.mxu0 %v10610_v57 }
0x150f   : > { %10612 = vmatprep.subr.bf16.mxu0 %v11303_v0 }
0x1512   : > { %10614 = vmatpush3.bf16.msra.mxu0 %v10613_v5 }
0x15d8   : > { %v3479_v28 = vpop.f32.mrb[16].mxu0 }
0x15d9   : > { %v3480_v29 = vadd.f32 %v9009_v24, %v3479_v28  ;;  %v9875_v30 = vpop.f32.mrb[17].mxu0 }
0x15da   : > { %v9024_v30 = vld [vmem:[%s12951_s15 + $0xe8] sm:$0xff] }
0x15db   : > { %v3483_v31 = vadd.f32 %v3480_v29, %v3145_v58  ;;  %v9023_v29 = vld [vmem:[%s12951_s15 + $0xe0] sm:$0xff] }
0x15dd   : > { %v3488_v52 = vsel %vm3118_vm8, %v3483_v31, 0.0 }
0x15de   : > { %3489 = vadd.xlane.f32.xlu0 %v3488_v52  ;;  %v9025_v52 = vld [vmem:[%s12951_s15 + $0xf0] sm:$0xff] }
0x166b   : > { %v3490_v32 = vpop.xlane.xlu0 %3489 }
0x166c   : > { %v3491_v46 = vmul.f32 0.03125, %v3490_v32  ;;  %v9026_v32 = vld [vmem:[%s12951_s15 + $0xf8] sm:$0xff] }
0x166e   : > { %v3492_v33 = vsub.f32 %v3483_v31, %v3491_v46  ;;  %v10616_v31 = vpack.c.bf16 %v9024_v30, %v9023_v29  ;;  %v10619_v46 = vpack.c.bf16 %v9026_v32, %v9025_v52  ;;  %v9056_v29 = vld [vmem:[%s12951_s15 + $0x128] sm:$0xff] }
0x1670   : > { %v3493_v34 = vmul.f32 %v3492_v33, %v3492_v33 }
0x1672   : > { %v3494_v35 = vsel %vm3118_vm8, %v3493_v34, 0.0 }
0x1673   : > { %3495 = vadd.xlane.f32.xlu1 %v3494_v35 }
0x1700   : > { %v3496_v58 = vpop.xlane.xlu1 %3495 }
0x1701   : > { %v3497_v26 = vmul.f32 0.03125, %v3496_v58 }
0x1703   : > { %v3498_v59 = vadd.f32 1e-05, %v3497_v26  ;;  %v9035_v26 = vld [vmem:[%s12957_s7 + $0x8] ss:$0 sm:$0xff] }
0x1705   : > { %11117 = vrsqrt.f32 %v3498_v59 }
0x170f   : > { %v11118_v60 = vpop.eup %11117 }
0x1710   : > { %v3500_v62 = vmul.f32 %v11118_v60, %v3492_v33 }
0x1712   : > { %v3507_v1 = vmul.f32 %v9013_v61, %v3500_v62 }
0x1714   : > { %v3514_v2 = vadd.f32 %v9014_v63, %v3507_v1 }
0x1716   : > { %9885 = vmatmul.mubr.msk.f32.vlgmr.msra.gmra.mrb[30].mxu1 %vm1380_vm1, %v3514_v2 }
0x1717   : > { %9914 = vmatprep.mubr.msk.f32.mxu1 %vm11304_vm4, %v11305_v23  ;;  %10617 = vmatpush3.bf16.msra.mxu1 %v10616_v31 }
0x1718   : > { %10618 = vmatprep.subr.bf16.mxu1 %v11303_v0 }
0x171b   : > { %10620 = vmatpush3.bf16.msra.mxu1 %v10619_v46 }
0x171c   : > { %10621 = vmatprep.subr.bf16.mxu1 %v11303_v0 }
0x17e9   : > { %v3595_v7 = vpop.f32.mrb[30].mxu1 }
0x17ea   : > { %v3596_v12 = vadd.f32 %v9015_v6, %v3595_v7  ;;  %v9886_v13 = vpop.f32.mrb[31].mxu1 }
0x17ec   : > { %v3599_v14 = vmax.f32 %v3596_v12, 0.0 }
0x17ee   : > { %9904 = vmatmul.mubr.msk.f32.vlgmr.msra.gmra.mrb[18].mxu0 %vm1292_vm0, %v3599_v14 }
0x17ef   : > { %9930 = vmatprep.mubr.msk.f32.mxu0 %vm1380_vm1, %v11958_v15 }
0x18c1   : > { %v3684_v17 = vpop.f32.mrb[18].mxu0 }
0x18c2   : > { %v3685_v18 = vadd.f32 %v9017_v16, %v3684_v17  ;;  %v9905_v19 = vpop.f32.mrb[19].mxu0 }
0x18c3   : > { %v9038_v19 = vld [vmem:[%s12958_s11 + $0x48] sm:$0xff] }
0x18c4   : > { %v3688_v20 = vadd.f32 %v3685_v18, %v3514_v2  ;;  %v9037_v18 = vld [vmem:[%s12958_s11 + $0x40] sm:$0xff] }
0x18c6   : > { %v3693_v21 = vsel %vm3118_vm8, %v3688_v20, 0.0 }
0x18c7   : > { %3694 = vadd.xlane.f32.xlu0 %v3693_v21  ;;  %v10627_v21 = vpack.c.bf16 %v9038_v19, %v9037_v18 }
0x1954   : > { %v3695_v22 = vpop.xlane.xlu0 %3694 }
0x1955   : > { %v3696_v41 = vmul.f32 0.03125, %v3695_v22  ;;  %v9040_v22 = vld [vmem:[%s12958_s11 + $0x58] sm:$0xff] }
0x1957   : > { %v3697_v48 = vsub.f32 %v3688_v20, %v3696_v41  ;;  %v9039_v20 = vld [vmem:[%s12958_s11 + $0x50] sm:$0xff] }
0x1958   : > { %v10631_v41 = vpack.c.bf16 %v9040_v22, %v9039_v20 }
0x1959   : > { %v3698_v24 = vmul.f32 %v3697_v48, %v3697_v48 }
0x195b   : > { %v3699_v28 = vsel %vm3118_vm8, %v3698_v24, 0.0 }
0x195c   : > { %3700 = vadd.xlane.f32.xlu1 %v3699_v28  ;;  %v9055_v28 = vld [vmem:[%s12951_s15 + $0x120] sm:$0xff] }
0x195d   : > { %v10636_v32 = vpack.c.bf16 %v9056_v29, %v9055_v28  ;;  %v9053_v28 = vld [vmem:[%s12960_s18 + $0x3] ss:$0 sm:$0xff] }
0x19e9   : > { %v3701_v33 = vpop.xlane.xlu1 %3700 }
0x19ea   : > { %v3702_v34 = vmul.f32 0.03125, %v3701_v33  ;;  %v9057_v33 = vld [vmem:[%s12951_s15 + $0x130] sm:$0xff] }
0x19ec   : > { %v3703_v35 = vadd.f32 1e-05, %v3702_v34  ;;  %v9058_v34 = vld [vmem:[%s12951_s15 + $0x138] sm:$0xff] }
0x19ee   : > { %11119 = vrsqrt.f32 %v3703_v35  ;;  %v10639_v35 = vpack.c.bf16 %v9058_v34, %v9057_v33 }
0x19f8   : > { %v11120_v36 = vpop.eup %11119 }
0x19f9   : > { %v3705_v39 = vmul.f32 %v11120_v36, %v3697_v48 }
0x19fb   : > { %v3712_v43 = vmul.f32 %v9021_v37, %v3705_v39 }
0x19fd   : > { %v11976_v50 = vadd.f32 %v9022_v42, %v3712_v43  ;;  %v9048_v43 = vld [vmem:[%s12959_s16 + $0x2] ss:$0 sm:$0xff] }
0x19ff   : > { %v11980_v53 = vadd.f32 %v11976_v50, %v11824_v27 }
0x1a01   : > { %9915 = vmatmul.mubr.msk.f32.vlgmr.msra.gmra.mrb[32].mxu1 %vm1380_vm1, %v11980_v53 }
0x1a02   : > { %10623 = vmatpush3.bf16.msra.mxu1 %v10622_v51  ;;  %9925 = vmatprep.mubr.msk.f32.mxu1 %vm11304_vm4, %v11305_v23 }
0x1a03   : > { %10624 = vmatprep.subr.bf16.mxu1 %v11303_v0 }
0x1a06   : > { %10626 = vmatpush3.bf16.msra.mxu1 %v10625_v56 }
0x1a09   : > { %9926 = vmatmul.mubr.msk.f32.vlgmr.msra.gmra.mrb[34].mxu1 %vm1380_vm1, %v11976_v50 }
0x1ad4   : > { %v3803_v27 = vpop.f32.mrb[32].mxu1 }
0x1ad5   : > { %v3804_v57 = vadd.f32 %v9028_v25, %v3803_v27  ;;  %v9916_v58 = vpop.f32.mrb[33].mxu1 }
0x1ad7   : > { %9928 = vmatprep.subr.msk.mxu0 %vm1380_vm1, %v3804_v57 }
0x1ad8   : > { %9929 = vmatpush3.xpose.msk.msra.mxu0 %vm1380_vm1, %v3804_v57 }
0x1ad9   : > { %10628 = vmatprep.subr.bf16.mxu0 %v10627_v21 }
0x1adb   : > { %9931 = vmatmul.mubr.msk.f32.vlgmr.msra.gmra.mrb[20].mxu0 %vm1380_vm1, %v11852_v47 }
0x1adc   : > { %v3889_v59 = vpop.f32.mrb[34].mxu1  ;;  %10630 = vmatpush3.bf16.msra.mxu0 %v10627_v21 }
0x1add   : > { %v3890_v60 = vadd.f32 %v9035_v26, %v3889_v59  ;;  %v9927_v61 = vpop.f32.mrb[35].mxu1  ;;  %10632 = vmatprep.subr.bf16.mxu0 %v10631_v41 }
0x1adf   : > { %9933 = vmatprep.subr.msk.mxu1 %vm2962_vm6, %v3890_v60 }
0x1ae0   : > { %9934 = vmatpush3.msk.msra.mxu1 %vm2962_vm6, %v3890_v60  ;;  %10634 = vmatpush3.bf16.msra.mxu0 %v10631_v41 }
0x1ae1   : > { %10635 = vmatprep.subr.bf16.mxu1 %v11303_v0 }
0x1bae   : > { %v9932_v62 = vpop.f32.mrb[20].mxu0 }
0x1baf   : > { %v3975_v63 = vpop.f32.mrb[21].mxu0  ;;  %v3987_v1 = vsel %vm2958_vm7, %v9932_v62, -inf }
0x1bb0   : > { %3988 = vmax.xlane.f32.xlu1 %v3987_v1  ;;  %v3984_v2 = vsel %vm2958_vm7, %v3975_v63, -inf }
0x1bb1   : > { %3985 = vmax.xlane.f32.xlu0 %v3984_v2  ;;  %v9070_v2 = vld [vmem:[%s12951_s15 + $0x160] sm:$0xff] }
0x1c3d   : > { %v3989_v3 = vpop.xlane.xlu1 %3988 }
0x1c3e   : > { %v3991_v4 = vsub.f32 %v9932_v62, %v3989_v3  ;;  %v3986_v5 = vpop.xlane.xlu0 %3985  ;;  %v9071_v3 = vld [vmem:[%s12951_s15 + $0x168] sm:$0xff] }
0x1c3f   : > { %v3990_v6 = vsub.f32 %v3975_v63, %v3986_v5  ;;  %v10649_v5 = vpack.c.bf16 %v9071_v3, %v9070_v2  ;;  %v9079_v2 = vld [vmem:[%s12958_s11 + $0x68] sm:$0xff] }
0x1c40   : > { %v3994_v7 = vmul.f32 1.442695, %v3991_v4  ;;  %v9062_v4 = vld [vmem:[%s12951_s15 + $0x140] sm:$0xff] }
0x1c41   : > { %v3992_v12 = vmul.f32 1.442695, %v3990_v6  ;;  %v9063_v6 = vld [vmem:[%s12951_s15 + $0x148] sm:$0xff] }
0x1c42   : > { %11121 = vpow2.f32 %v3994_v7  ;;  %v9072_v7 = vld [vmem:[%s12951_s15 + $0x170] sm:$0xff] }
0x1c43   : > { %11123 = vpow2.f32 %v3992_v12  ;;  %v9073_v12 = vld [vmem:[%s12951_s15 + $0x178] sm:$0xff] }
0x1c4c   : > { %v11122_v13 = vpop.eup %11121 }
0x1c4d   : > { %v11124_v14 = vpop.eup %11123  ;;  %v3999_v16 = vsel %vm2958_vm7, %v11122_v13, 0.0 }
0x1c4e   : > { %4000 = vadd.xlane.f32.xlu1 %v3999_v16  ;;  %v3996_v17 = vsel %vm2958_vm7, %v11124_v14, 0.0  ;;  %v9064_v16 = vld [vmem:[%s12951_s15 + $0x150] sm:$0xff] }
0x1c4f   : > { %3997 = vadd.xlane.f32.xlu0 %v3996_v17  ;;  %v9065_v17 = vld [vmem:[%s12951_s15 + $0x158] sm:$0xff] }
0x1c50   : > { %v10645_v18 = vpack.c.bf16 %v9065_v17, %v9064_v16  ;;  %v9087_v16 = vld [vmem:[%s12959_s16 + $0x3] ss:$0 sm:$0xff] }
0x1cdb   : > { %v4001_v48 = vpop.xlane.xlu1 %4000 }
0x1cdc   : > { %11125 = vrcp.f32 %v4001_v48  ;;  %v3998_v24 = vpop.xlane.xlu0 %3997 }
0x1cdd   : > { %11127 = vrcp.f32 %v3998_v24 }
0x1ce6   : > { %v11126_v30 = vpop.eup %11125 }
0x1ce7   : > { %v11128_v31 = vpop.eup %11127  ;;  %v4005_v46 = vmul.f32 %v11126_v30, %v11122_v13  ;;  %v10641_v13 = vpack.c.bf16 %v9063_v6, %v9062_v4  ;;  %v9080_v6 = vld [vmem:[%s12958_s11 + $0x70] sm:$0xff] }
0x1ce8   : > { %v4004_v52 = vmul.f32 %v11128_v31, %v11124_v14  ;;  %v10653_v14 = vpack.c.bf16 %v9073_v12, %v9072_v7  ;;  %v9054_v31 = vld [vmem:[%s12961_s22 + $0x3] ss:$0 sm:$0xff]  ;;  %v9081_v7 = vld [vmem:[%s12958_s11 + $0x78] sm:$0xff] }
0x1ce9   : > { %10642 = vmatprep.subr.bf16.mxu0 %v10641_v13  ;;  %v10668_v12 = vpack.c.bf16 %v9081_v7, %v9080_v6  ;;  %v4943_v6 = vld [vmem:[%s12968_s10 + $0x18] sm:$0xff] }
0x1cea   : > { %9935 = vmatprep.mubr.msk.f32.mxu1 %vm2958_vm7, %v4004_v52 }
0x1ceb   : > { %9936 = vmatmul.mubr.msk.f32.vlgmr.msra.gmra.mrb[36].mxu1 %vm2958_vm7, %v4005_v46 }
0x1cec   : > { %10637 = vmatpush3.bf16.msra.mxu1 %v10636_v32  ;;  %9957 = vmatprep.mubr.msk.f32.mxu1 %vm11304_vm4, %v11305_v23 }
0x1ced   : > { %10638 = vmatprep.subr.bf16.mxu1 %v11303_v0 }
0x1cf0   : > { %10640 = vmatpush3.bf16.msra.mxu1 %v10639_v35 }
0x1cf1   : > { %10650 = vmatprep.subr.bf16.mxu1 %v10649_v5 }
0x1cf3   : > { %9958 = vmatmul.mubr.msk.f32.vlgmr.msra.gmra.mrb[38].mxu1 %vm1380_vm1, %v11980_v53 }
0x1cf4   : > { %10652 = vmatpush3.bf16.msra.mxu1 %v10649_v5 }
0x1cf5   : > { %10654 = vmatprep.subr.bf16.mxu1 %v10653_v14 }
0x1cf8   : > { %10656 = vmatpush3.bf16.msra.mxu1 %v10653_v14 }
0x1cf9   : > { %10661 = vmatprep.subr.bf16.mxu1 %v11303_v0 }
0x1dbe   : > { %v9937_v36 = vpop.f32.mrb[36].mxu1 }
0x1dbf   : > { %v4081_v37 = vpop.f32.mrb[37].mxu1 }
0x1dc0   : > { %9946 = vmatprep.mubr.msk.f32.mxu0 %vm1380_vm1, %v4081_v37  ;;  %v9075_v37 = vld [vmem:[%s12957_s7 + $0xb] ss:$0 sm:$0xff] }
0x1dc1   : > { %9947 = vmatmul.mubr.msk.f32.vlgmr.msra.gmra.mrb[22].mxu0 %vm1380_vm1, %v9937_v36 }
0x1dc2   : > { %10644 = vmatpush3.bf16.msra.mxu0 %v10641_v13 }
0x1dc3   : > { %10646 = vmatprep.subr.bf16.mxu0 %v10645_v18 }
0x1dc6   : > { %v12021_v39 = vpop.f32.mrb[38].mxu1  ;;  %10648 = vmatpush3.bf16.msra.mxu0 %v10645_v18 }
0x1dc7   : > { %v9959_v42 = vpop.f32.mrb[39].mxu1  ;;  %10657 = vmatprep.subr.bf16.mxu0 %v11303_v0 }
0x1e94   : > { %v9948_v45 = vpop.f32.mrb[22].mxu0 }
0x1e95   : > { %v4174_v49 = vadd.f32 %v9948_v45, %v9048_v43  ;;  %v4168_v51 = vpop.f32.mrb[23].mxu0 }
0x1e96   : > { %v4169_v54 = vadd.f32 %v9048_v43, %v4168_v51 }
0x1e97   : > { %v4178_v55 = vadd.f32 %v4174_v49, %v11786_v8 }
0x1e98   : > { %v4177_v56 = vadd.f32 %v4169_v54, %v11794_v11 }
0x1e99   : > { %v4186_v53 = vsel %vm1380_vm1, %v4178_v55, 0.0 }
0x1e9a   : > { %4187 = vadd.xlane.f32.xlu1 %v4186_v53  ;;  %v4183_v25 = vsel %vm1380_vm1, %v4177_v56, 0.0 }
0x1e9b   : > { %4184 = vadd.xlane.f32.xlu0 %v4183_v25  ;;  %v9060_v25 = vld [vmem:[%s12957_s7 + $0x9] ss:$0 sm:$0xff] }
0x1f27   : > { %v4188_v27 = vpop.xlane.xlu1 %4187 }
0x1f28   : > { %v4190_v57 = vmul.f32 0.03125, %v4188_v27  ;;  %v4185_v58 = vpop.xlane.xlu0 %4184  ;;  %v4307_v27 = vadd.f32 %v9060_v25, %v12021_v39 }
0x1f29   : > { %v4189_v26 = vmul.f32 0.03125, %v4185_v58 }
0x1f2a   : > { %v4192_v59 = vsub.f32 %v4178_v55, %v4190_v57 }
0x1f2b   : > { %v4191_v60 = vsub.f32 %v4177_v56, %v4189_v26 }
0x1f2c   : > { %v4194_v61 = vmul.f32 %v4192_v59, %v4192_v59 }
0x1f2d   : > { %v4193_v62 = vmul.f32 %v4191_v60, %v4191_v60 }
0x1f2e   : > { %v4198_v63 = vsel %vm1380_vm1, %v4194_v61, 0.0 }
0x1f2f   : > { %4199 = vadd.xlane.f32.xlu1 %v4198_v63  ;;  %v4195_v1 = vsel %vm1380_vm1, %v4193_v62, 0.0 }
0x1f30   : > { %4196 = vadd.xlane.f32.xlu0 %v4195_v1  ;;  %v9078_v1 = vld [vmem:[%s12958_s11 + $0x60] sm:$0xff] }
0x1f31   : > { %v10665_v4 = vpack.c.bf16 %v9079_v2, %v9078_v1 }
0x1fbc   : > { %v4200_v19 = vpop.xlane.xlu1 %4199 }
0x1fbd   : > { %v4202_v20 = vmul.f32 0.03125, %v4200_v19  ;;  %v4197_v21 = vpop.xlane.xlu0 %4196 }
0x1fbe   : > { %v4201_v22 = vmul.f32 0.03125, %v4197_v21 }
0x1fbf   : > { %v4204_v41 = vadd.f32 1e-05, %v4202_v20 }
0x1fc0   : > { %v4203_v48 = vadd.f32 1e-05, %v4201_v22 }
0x1fc1   : > { %11129 = vrsqrt.f32 %v4204_v41 }
0x1fc2   : > { %11131 = vrsqrt.f32 %v4203_v48 }
0x1fcb   : > { %v11130_v24 = vpop.eup %11129 }
0x1fcc   : > { %v11132_v29 = vpop.eup %11131  ;;  %v4208_v30 = vmul.f32 %v11130_v24, %v4192_v59 }
0x1fcd   : > { %v4207_v52 = vmul.f32 %v11132_v29, %v4191_v60  ;;  %v4779_v29 = vld [vmem:[%s12966_s8] sm:$0xff] }
0x1fce   : > { %v4216_v32 = vmul.f32 %v9053_v28, %v4208_v30  ;;  %v4780_v30 = vld [vmem:[%s12966_s8 + $0x8] sm:$0xff] }
0x1fcf   : > { %v4215_v46 = vmul.f32 %v9053_v28, %v4207_v52  ;;  %v4781_v52 = vld [vmem:[%s12966_s8 + $0x10] sm:$0xff] }
0x1fd0   : > { %v12042_v33 = vadd.f32 %v9054_v31, %v4216_v32  ;;  %v4782_v32 = vld [vmem:[%s12966_s8 + $0x18] sm:$0xff] }
0x1fd1   : > { %v12044_v34 = vadd.f32 %v9054_v31, %v4215_v46  ;;  %v10671_v31 = vpack.c.bf16 %v4780_v30, %v4779_v29  ;;  %v9094_v46 = vld [vmem:[%s12966_s8 + $0x20] sm:$0xff] }
0x1fd2   : > { %v4226_v36 = vadd.f32 %v12042_v33, %v11792_v10 }
0x1fd3   : > { %9979 = vmatprep.mubr.msk.f32.mxu1 %vm1380_vm1, %v12044_v34  ;;  %v4225_v35 = vadd.f32 %v12044_v34, %v11789_v9  ;;  %v9067_v9 = vld [vmem:[%s12957_s7 + $0xa] ss:$0 sm:$0xff] }
0x1fd4   : > { %9980 = vmatmul.mubr.msk.f32.vlgmr.msra.gmra.mrb[40].mxu1 %vm1380_vm1, %v12042_v33 }
0x1fd5   : > { %9968 = vmatprep.mubr.msk.f32.mxu0 %vm1380_vm1, %v4225_v35  ;;  %9993 = vmatprep.mubr.msk.f32.mxu1 %vm11304_vm4, %v11305_v23  ;;  %v9095_v35 = vld [vmem:[%s12966_s8 + $0x28] sm:$0xff] }
0x1fd6   : > { %9969 = vmatmul.mubr.msk.f32.vlgmr.msra.gmra.mrb[24].mxu0 %vm1380_vm1, %v4226_v36  ;;  %v10677_v36 = vpack.c.bf16 %v9095_v35, %v9094_v46 }
0x1fd7   : > { %9986 = vmatprep.mubr.msk.f32.mxu0 %vm11304_vm4, %v11305_v23 }
0x20a7   : > { %v9981_v42 = vpop.f32.mrb[40].mxu1 }
0x20a8   : > { %v4495_v43 = vadd.f32 %v9981_v42, %v9075_v37  ;;  %v4489_v45 = vpop.f32.mrb[41].mxu1 }
0x20a9   : > { %v4490_v49 = vadd.f32 %v9075_v37, %v4489_v45  ;;  %v9970_v51 = vpop.f32.mrb[24].mxu0  ;;  %v9091_v45 = vld [vmem:[%s12960_s18 + $0x4] ss:$0 sm:$0xff] }
0x20aa   : > { %v4401_v54 = vadd.f32 %v9970_v51, %v9067_v9  ;;  %v4395_v10 = vpop.f32.mrb[25].mxu0  ;;  %v9092_v51 = vld [vmem:[%s12961_s22 + $0x4] ss:$0 sm:$0xff] }
0x20ab   : > { %v10662_v55 = vpack.c.bf16 %v4495_v43, %v4490_v49  ;;  %v4396_v56 = vadd.f32 %v9067_v9, %v4395_v10 }
0x20ad   : > { %v10658_v53 = vpack.c.bf16 %v4401_v54, %v4396_v56  ;;  %10663 = vmatpush3.bf16.msra.mxu1 %v10662_v55  ;;  %v9096_v56 = vld [vmem:[%s12966_s8 + $0x30] sm:$0xff] }
0x20ae   : > { %10664 = vmatprep.subr.bf16.mxu1 %v11303_v0 }
0x20af   : > { %10660 = vmatpush3.bf16.xpose.msk.msra.mxu0 %vm11706_vm2, %v10658_v53  ;;  %v9097_v53 = vld [vmem:[%s12966_s8 + $0x38] sm:$0xff] }
0x20b0   : > { %10670 = vmatprep.subr.bf16.mxu0 %v11303_v0  ;;  %v10680_v25 = vpack.c.bf16 %v9097_v53, %v9096_v56 }
0x20b6   : > { %9987 = vmatmul.mubr.msk.f32.vlgmr.msra.gmra.mrb[26].mxu0 %vm1380_vm1, %v4307_v27  ;;  %v5018_v27 = vld [vmem:[%s12967_s9] sm:$0xff] }
0x20b7   : > { %10015 = vmatprep.mubr.msk.f32.mxu0 %vm11304_vm4, %v11305_v23  ;;  %10672 = vmatpush3.bf16.msra.mxu0 %v10671_v31 }
0x20b8   : > { %10673 = vmatprep.subr.bf16.mxu0 %v11303_v0 }
0x2189   : > { %v4580_v57 = vpop.f32.mrb[26].mxu0 }
0x218a   : > { %v9988_v58 = vpop.f32.mrb[27].mxu0  ;;  %v4584_v26 = vsel %vm3319_vm9, %v4580_v57, -inf }
0x218b   : > { %4585 = vmax.xlane.f32.xlu0 %v4584_v26  ;;  %v4940_v26 = vld [vmem:[%s12968_s10] sm:$0xff] }
0x2218   : > { %v4586_v59 = vpop.xlane.xlu0 %4585 }
0x2219   : > { %v4587_v60 = vsub.f32 %v4580_v57, %v4586_v59  ;;  %v5019_v57 = vld [vmem:[%s12967_s9 + $0x8] sm:$0xff] }
0x221a   : > { %v10688_v58 = vpack.c.bf16 %v5019_v57, %v5018_v27  ;;  %v4941_v59 = vld [vmem:[%s12968_s10 + $0x8] sm:$0xff]  ;;  %v5312_v27 = vld [vmem:[%s11532_s4] sm:$0xff] }
0x221b   : > { %v4588_v61 = vmul.f32 1.442695, %v4587_v60  ;;  %v10683_v60 = vpack.c.bf16 %v4941_v59, %v4940_v26  ;;  %v5313_v57 = vld [vmem:[%s11532_s4 + $0x8] sm:$0xff]  ;;  %v5314_v26 = vld [vmem:[%s11532_s4 + $0x10] sm:$0xff]  ;;  %v5315_v59 = vld [vmem:[%s11532_s4 + $0x18] sm:$0xff] }
0x221d   : > { %11133 = vpow2.f32 %v4588_v61  ;;  %v4783_v61 = vld [vmem:[%s12969_s12] sm:$0x1] }
0x2227   : > { %v11134_v62 = vpop.eup %11133 }
0x2228   : > { %v4590_v39 = vsel %vm3319_vm9, %v11134_v62, 0.0 }
0x2229   : > { %4591 = vadd.xlane.f32.xlu1 %v4590_v39  ;;  %v5020_v39 = vld [vmem:[%s12967_s9 + $0x10] sm:$0xff] }
0x22b6   : > { %v4592_v63 = vpop.xlane.xlu1 %4591 }
0x22b7   : > { %11135 = vrcp.f32 %v4592_v63  ;;  %v5021_v63 = vld [vmem:[%s12967_s9 + $0x18] sm:$0xff] }
0x22c1   : > { %v11136_v3 = vpop.eup %11135 }
0x22c2   : > { %v4594_v5 = vmul.f32 %v11136_v3, %v11134_v62 }
0x22c4   : > { %9994 = vmatmul.mubr.msk.f32.vlgmr.msra.gmra.mrb[42].mxu1 %vm12884_vm3, %v4594_v5  ;;  %v4942_v5 = vld [vmem:[%s12968_s10 + $0x10] sm:$0xff] }
0x22c5   : > { %10666 = vmatpush3.bf16.msra.mxu1 %v10665_v4  ;;  %10004 = vmatprep.mubr.msk.f32.mxu1 %vm11304_vm4, %v11305_v23  ;;  %v10692_v4 = vpack.c.bf16 %v5021_v63, %v5020_v39  ;;  %v10686_v7 = vpack.c.bf16 %v4943_v6, %v4942_v5  ;;  %v5318_v63 = vld [vmem:[%s11532_s4 + $0x30] sm:$0xff] }
0x22c6   : > { %10667 = vmatprep.subr.bf16.mxu1 %v11303_v0 }
0x22c9   : > { %10669 = vmatpush3.bf16.msra.mxu1 %v10668_v12  ;;  %v5122_v12 = vld [vmem:[%s12970_s14] sm:$0xff] }
0x22ca   : > { %10676 = vmatprep.subr.bf16.mxu1 %v11303_v0 }
0x2397   : > { %v4664_v13 = vpop.f32.mrb[42].mxu1 }
0x2398   : > { %v9995_v14 = vpop.f32.mrb[43].mxu1  ;;  %10005 = vmatmul.mubr.msk.f32.vlgmr.msra.gmra.mrb[44].mxu1 %vm1380_vm1, %v4664_v13  ;;  %v5123_v13 = vld [vmem:[%s12970_s14 + $0x8] sm:$0xff] }
0x2399   : > { %10026 = vmatprep.mubr.msk.f32.mxu1 %vm11304_vm4, %v11305_v23  ;;  %10678 = vmatpush3.bf16.msra.mxu1 %v10677_v36  ;;  %v10696_v14 = vpack.c.bf16 %v5123_v13, %v5122_v12 }
0x239a   : > { %10679 = vmatprep.subr.bf16.mxu1 %v11303_v0 }
0x239d   : > { %10681 = vmatpush3.bf16.msra.mxu1 %v10680_v25 }
0x239e   : > { %10689 = vmatprep.subr.bf16.mxu1 %v10688_v58 }
0x246b   : > { %v4743_v17 = vpop.f32.mrb[44].mxu1 }
0x246c   : > { %v4744_v18 = vadd.f32 %v9087_v16, %v4743_v17  ;;  %v10006_v19 = vpop.f32.mrb[45].mxu1  ;;  %v9098_v16 = vld [vmem:[%s12969_s12 + $0x1] sm:$0x1] }
0x246d   : > { %v5125_v19 = vld [vmem:[%s12970_s14 + $0x18] sm:$0xff] }
0x246e   : > { %v4747_v20 = vadd.f32 %v4744_v18, %v11976_v50  ;;  %v10674_v50 = vpack.c.bf16 %v4782_v32, %v4781_v52  ;;  %v5124_v18 = vld [vmem:[%s12970_s14 + $0x10] sm:$0xff] }
0x2470   : > { %v4752_v21 = vsel %vm3118_vm8, %v4747_v20, 0.0  ;;  %10675 = vmatpush3.bf16.msra.mxu0 %v10674_v50 }
0x2471   : > { %4753 = vadd.xlane.f32.xlu0 %v4752_v21  ;;  %10682 = vmatprep.subr.bf16.mxu0 %v11303_v0 }
0x24fe   : > { %v4754_v22 = vpop.xlane.xlu0 %4753 }
0x24ff   : > { %v4755_v41 = vmul.f32 0.03125, %v4754_v22  ;;  %v10700_v22 = vpack.c.bf16 %v5125_v19, %v5124_v18 }
0x2501   : > { %v4756_v48 = vsub.f32 %v4747_v20, %v4755_v41  ;;  %v9101_v41 = vld [vmem:[#allocation2] ss:$0 sm:$0xff] }
0x2503   : > { %v4757_v24 = vmul.f32 %v4756_v48, %v4756_v48 }
0x2505   : > { %v4758_v28 = vsel %vm3118_vm8, %v4757_v24, 0.0 }
0x2506   : > { %4759 = vadd.xlane.f32.xlu1 %v4758_v28 }
0x2593   : > { %v4760_v37 = vpop.xlane.xlu1 %4759 }
0x2594   : > { %v4761_v42 = vmul.f32 0.03125, %v4760_v37 }
0x2596   : > { %v4762_v9 = vadd.f32 1e-05, %v4761_v42 }
0x2598   : > { %11137 = vrsqrt.f32 %v4762_v9 }
0x25a2   : > { %v11138_v43 = vpop.eup %11137 }
0x25a3   : > { %v4764_v49 = vmul.f32 %v11138_v43, %v4756_v48 }
0x25a5   : > { %v4771_v54 = vmul.f32 %v9091_v45, %v4764_v49 }
0x25a7   : > { %v4778_v10 = vadd.f32 %v9092_v51, %v4771_v54 }
0x25a9   : > { %v4785_v55 = vrot.slane %v4778_v10, 1 }
0x25ab   : > { %10016 = vmatmul.mubr.msk.f32.vlgmr.msra.gmra.mrb[28].mxu0 %vm1380_vm1, %v4785_v55  ;;  %v4944_v55 = vld [vmem:[%s12971_s17] sm:$0x1] }
0x25ac   : > { %10037 = vmatprep.mubr.msk.f32.mxu0 %vm11304_vm4, %v11305_v23  ;;  %10684 = vmatpush3.bf16.msra.mxu0 %v10683_v60  ;;  %v10708_v60 = vpack.c.bf16 %v5315_v59, %v5314_v26 }
0x25ad   : > { %10685 = vmatprep.subr.bf16.mxu0 %v11303_v0 }
0x25b0   : > { %10687 = vmatpush3.bf16.msra.mxu0 %v10686_v7  ;;  %v9104_v7 = vld [vmem:[#allocation4] ss:$0 sm:$0xff] }
0x25b1   : > { %10697 = vmatprep.subr.bf16.mxu0 %v10696_v14 }
0x267e   : > { %v4854_v62 = vpop.f32.mrb[28].mxu0 }
0x267f   : > { %v4855_v1 = vadd.f32 %v4854_v62, %v4783_v61  ;;  %v10017_v2 = vpop.f32.mrb[29].mxu0  ;;  %v5316_v61 = vld [vmem:[%s11532_s4 + $0x20] sm:$0xff]  ;;  %v5317_v62 = vld [vmem:[%s11532_s4 + $0x28] sm:$0xff] }
0x2680   : > { %v10712_v39 = vpack.c.bf16 %v5317_v62, %v5316_v61 }
0x2681   : > { %v4858_v3 = vmax.f32 %v4855_v1, 0.0  ;;  %v5319_v1 = vld [vmem:[%s11532_s4 + $0x38] sm:$0xff] }
0x2682   : > { %v10716_v2 = vpack.c.bf16 %v5319_v1, %v5318_v63 }
0x2683   : > { %10027 = vmatmul.mubr.msk.f32.vlgmr.msra.gmra.mrb[46].mxu1 %vm1380_vm1, %v4858_v3  ;;  %v12885_v3 = vmov 1  }
0x2684   : > { %10691 = vmatpush3.bf16.msra.mxu1 %v10688_v58  ;;  %10048 = vmatprep.mubr.msk.f32.mxu1 %vm1380_vm1, %v12044_v34  ;;  %v10704_v58 = vpack.c.bf16 %v5313_v57, %v5312_v27 }
0x2685   : > { %10693 = vmatprep.subr.bf16.mxu1 %v10692_v4  ;;  %11024 = vset.pattern.permute.xlu1 %v12885_v3 }
0x2688   : > { %10695 = vmatpush3.bf16.msra.mxu1 %v10692_v4  ;;  %v12888_v4 = vmov 0  }
0x2689   : > { %10705 = vmatprep.subr.bf16.mxu1 %v10704_v58  ;;  %11023 = vset.pattern.permute.xlu0 %v12888_v4 }
0x268b   : > { %10049 = vmatmul.mubr.msk.f32.vlgmr.msra.gmra.mrb[48].mxu1 %vm1380_vm1, %v12042_v33 }
0x268c   : > { %10707 = vmatpush3.bf16.msra.mxu1 %v10704_v58 }
0x268d   : > { %10709 = vmatprep.subr.bf16.mxu1 %v10708_v60 }
0x2690   : > { %10711 = vmatpush3.bf16.msra.mxu1 %v10708_v60 }
0x2691   : > { %10713 = vmatprep.subr.bf16.mxu1 %v10712_v39 }
0x2694   : > { %10715 = vmatpush3.bf16.msra.mxu1 %v10712_v39 }
0x2695   : > { %10717 = vmatprep.subr.bf16.mxu1 %v10716_v2 }
0x2698   : > { %10719 = vmatpush3.bf16.msra.mxu1 %v10716_v2 }
0x2699   : > { %10736 = vmatprep.subr.bf16.mxu1 %v11303_v0 }
0x2756   : > { %v4935_v17 = vpop.f32.mrb[46].mxu1 }
0x2757   : > { %v4936_v20 = vadd.f32 %v9098_v16, %v4935_v17  ;;  %v10028_v21 = vpop.f32.mrb[47].mxu1 }
0x2759   : > { %v4939_v34 = vmax.f32 %v4936_v20, 0.0 }
0x275b   : > { %10038 = vmatmul.mubr.msk.f32.vlgmr.msra.gmra.mrb[30].mxu0 %vm1380_vm1, %v4939_v34 }
0x275c   : > { %10699 = vmatpush3.bf16.msra.mxu0 %v10696_v14 }
0x275d   : > { %10701 = vmatprep.subr.bf16.mxu0 %v10700_v22 }
0x275e   : > { %v10050_v33 = vpop.f32.mrb[48].mxu1 }
0x275f   : > { %v5101_v48 = vadd.f32 %v10050_v33, %v9101_v41  ;;  %v5095_v24 = vpop.f32.mrb[49].mxu1 }
0x2760   : > { %v5096_v28 = vadd.f32 %v9101_v41, %v5095_v24  ;;  %10703 = vmatpush3.bf16.msra.mxu0 %v10700_v22 }
0x2761   : > { %v5105_v29 = vmul.f32 %v5101_v48, %v5101_v48 }
0x2762   : > { %v5104_v30 = vmul.f32 %v5096_v28, %v5096_v28 }
0x2763   : > { %v5107_v31 = vmul.f32 %v5105_v29, %v5101_v48 }
0x2764   : > { %v5106_v52 = vmul.f32 %v5104_v30, %v5096_v28 }
0x2765   : > { %v5109_v32 = vmul.f32 0.044715, %v5107_v31 }
0x2766   : > { %v5108_v50 = vmul.f32 0.044715, %v5106_v52 }
0x2767   : > { %v5111_v46 = vadd.f32 %v5109_v32, %v5101_v48 }
0x2768   : > { %v5110_v35 = vadd.f32 %v5108_v50, %v5096_v28 }
0x2769   : > { %v5113_v36 = vmul.f32 0.7978846, %v5111_v46 }
0x276a   : > { %v5112_v37 = vmul.f32 0.7978846, %v5110_v35 }
0x276b   : > { %11139 = vtanh.f32 %v5113_v36 }
0x276c   : > { %11141 = vtanh.f32 %v5112_v37 }
0x2775   : > { %v11140_v42 = vpop.eup %11139 }
0x2776   : > { %v11142_v9 = vpop.eup %11141  ;;  %v5117_v43 = vadd.f32 1.0, %v11140_v42 }
0x2777   : > { %v5116_v45 = vadd.f32 1.0, %v11142_v9 }
0x2778   : > { %v5119_v49 = vmul.f32 0.5, %v5117_v43 }
0x2779   : > { %v5118_v51 = vmul.f32 0.5, %v5116_v45 }
0x277a   : > { %v5121_v10 = vmul.f32 %v5119_v49, %v5101_v48 }
0x277b   : > { %v5120_v54 = vmul.f32 %v5118_v51, %v5096_v28  ;;  %v5306_v51 = vlaneseq }
0x277d   : > { %10059 = vmatprep.mubr.msk.f32.mxu0 %vm1380_vm1, %v5120_v54  ;;  %v12195_v57 = vshrl.u32 %v5306_v51, 7 }
0x277e   : > { %10060 = vmatmul.mubr.msk.f32.vlgmr.msra.gmra.mrb[32].mxu0 %vm1380_vm1, %v5121_v10 }
0x277f   : > { %v5308_v62 = vsub.s32 0, %v12195_v57  ;;  %v12996_v57 = vmov 0  }
0x282e   : > { %v5014_v56 = vpop.f32.mrb[30].mxu0 }
0x282f   : > { %v12129_v53 = vadd.f32 %v5014_v56, %v4944_v55  ;;  %v10039_v25 = vpop.f32.mrb[31].mxu0 }
0x2831   : > { %5236 = vrot.lane.b32.xlu1 %v12129_v53, %s12866_s19  ;;  %5233 = vrot.lane.b32.xlu0 %v12129_v53, %s12867_s20  ;;  %s12870_s19 = smov 16   ;;  %s12871_s20 = smov 28  }
0x2835   : > { %5239 = vrot.lane.b32.xlu1 %v12129_v53, %s12869_s21  ;;  %5245 = vrot.lane.b32.xlu0 %v12129_v53, %s12868_s24  ;;  %s12872_s24 = smov 24   ;;  %s12873_s21 = smov 36  }
0x2839   : > { %5242 = vrot.lane.b32.xlu1 %v12129_v53, %s12870_s19  ;;  %5251 = vrot.lane.b32.xlu0 %v12129_v53, %s12871_s20  ;;  %s12875_s19 = smov 32   ;;  %s12874_s20 = smov 44  }
0x283d   : > { %5248 = vrot.lane.b32.xlu1 %v12129_v53, %s12872_s24  ;;  %5257 = vrot.lane.b32.xlu0 %v12129_v53, %s12873_s21  ;;  %s12877_s24 = smov 40   ;;  %s12892_s21 = smov 52  }
0x2841   : > { %5254 = vrot.lane.b32.xlu1 %v12129_v53, %s12875_s19  ;;  %5263 = vrot.lane.b32.xlu0 %v12129_v53, %s12874_s20  ;;  %s12891_s20 = smov 48   ;;  %s12890_s19 = smov 60  }
0x2845   : > { %5260 = vrot.lane.b32.xlu1 %v12129_v53, %s12877_s24  ;;  %5269 = vrot.lane.b32.xlu0 %v12129_v53, %s12892_s21  ;;  %s12889_s24 = smov 56   ;;  %s12978_s21 = smov 16  }
0x2849   : > { %5266 = vrot.lane.b32.xlu1 %v12129_v53, %s12891_s20  ;;  %5275 = vrot.lane.b32.xlu0 %v12129_v53, %s12890_s19  ;;  %s12976_s19 = smov 12   ;;  %s12977_s20 = smov 20  }
0x284d   : > { %5272 = vrot.lane.b32.xlu1 %v12129_v53, %s12889_s24  ;;  %s12975_s24 = smov 4  }
0x2851   : > { %v10061_v5 = vpop.f32.mrb[32].mxu0 }
0x2852   : > { %v5205_v6 = vpop.f32.mrb[33].mxu0  ;;  %v12172_v12 = vadd.f32 %v10061_v5, %v9104_v7 }
0x2853   : > { %v12174_v13 = vadd.f32 %v9104_v7, %v5205_v6 }
0x2854   : > { %v5215_v14 = vmul.f32 %v12172_v12, %v12172_v12 }
0x2855   : > { %v5214_v16 = vmul.f32 %v12174_v13, %v12174_v13 }
0x2856   : > { %v5217_v17 = vmul.f32 %v5215_v14, %v12172_v12 }
0x2857   : > { %v5216_v18 = vmul.f32 %v5214_v16, %v12174_v13 }
0x2858   : > { %v5219_v19 = vmul.f32 0.044715, %v5217_v17 }
0x2859   : > { %v5218_v20 = vmul.f32 0.044715, %v5216_v18 }
0x285a   : > { %v5221_v22 = vadd.f32 %v5219_v19, %v12172_v12 }
0x285b   : > { %v5220_v41 = vadd.f32 %v5218_v20, %v12174_v13  ;;  %v11325_v20 = vmov 2  }
0x285c   : > { %v5223_v28 = vmul.f32 0.7978846, %v5221_v22  ;;  %v11328_v22 = vmov 9  }
0x285d   : > { %v5222_v29 = vmul.f32 0.7978846, %v5220_v41  ;;  %v11329_v41 = vmov 7  }
0x285e   : > { %11143 = vtanh.f32 %v5223_v28  ;;  %v11333_v28 = vmov 13  }
0x285f   : > { %11145 = vtanh.f32 %v5222_v29  ;;  %v11334_v29 = vmov 11  }
0x2868   : > { %v11144_v49 = vpop.eup %11143 }
0x2869   : > { %v11146_v54 = vpop.eup %11145 }
0x286a   : > { %v5226_v25 = vadd.f32 1.0, %v11146_v54 }
0x286c   : > { %v5228_v61 = vmul.f32 0.5, %v5226_v25 }
0x286e   : > { %v5230_v7 = vmul.f32 %v5228_v61, %v12174_v13  ;;  %v11324_v13 = vmov 5   ;;  %v12290_v61 = vld [vmem:[%s11537_s6 + $0x8] sm:$0xff] }
0x28a3   : > { %v5237_v21 = vpop.permute.xlu1 %5236  ;;  %v5234_v34 = vpop.permute.xlu0 %5233 }
0x28a4   : > { %v5279_v33 = vsel %vm12881_vm10, %v12129_v53, %v5234_v34  ;;  %vm5298_vm10 = vcmask 392192   ;;  %v5227_v53 = vadd.f32 1.0, %v11144_v49  ;;  %v11327_v34 = vmov 3  }
0x28a5   : > { %v5281_v30 = vsel %vm12879_vm11, %v5279_v33, %v5237_v21  ;;  %vm5294_vm11 = vcmask 326656   ;;  %v11326_v21 = vmov 6   ;;  %v11330_v33 = vmov 10  }
0x28a6   : > { %v5229_v60 = vmul.f32 0.5, %v5227_v53 }
0x28a7   : > { %v5240_v48 = vpop.permute.xlu1 %5239  ;;  %v5246_v24 = vpop.permute.xlu0 %5245 }
0x28a8   : > { %v5283_v31 = vsel %vm12878_vm12, %v5281_v30, %v5240_v48  ;;  %vm5292_vm12 = vcmask 293888   ;;  %v5231_v6 = vmul.f32 %v5229_v60, %v12172_v12  ;;  %v11323_v12 = vmov 4   ;;  %v12287_v60 = vld [vmem:[%s11537_s6 + $0x18] sm:$0xff] }
0x28a9   : > { %v11331_v48 = vmov 8   ;;  %v11335_v30 = vmov 14  }
0x28ab   : > { %v5243_v52 = vpop.permute.xlu1 %5242  ;;  %v5252_v32 = vpop.permute.xlu0 %5251 }
0x28ac   : > { %v5284_v50 = vsel %vm12884_vm3, %v5283_v31, %v5243_v52  ;;  %vm5304_vm3 = vcmask 490496   ;;  %v12886_v31 = vmov 15   ;;  %v5598_v52 = vld [vmem:[%s11542_s13] sm:$0xff] }
0x28ad   : > { %v5286_v35 = vsel %vm12880_vm13, %v5284_v50, %v5246_v24  ;;  %vm5296_vm13 = vcmask 359424   ;;  %v11332_v24 = vmov 12   ;;  %10097 = vmatprep.mubr.msk.f32.mxu0 %vm1292_vm0, %v5598_v52  ;;  %v5719_v50 = vld [vmem:[%s12951_s15 + $0x8] sm:$0xff] }
0x28af   : > { %v5249_v46 = vpop.permute.xlu1 %5248  ;;  %v5258_v36 = vpop.permute.xlu0 %5257 }
0x28b0   : > { %v5288_v37 = vsel %vm12883_vm14, %v5286_v35, %v5249_v46  ;;  %vm5302_vm14 = vcmask 457728   ;;  %v5720_v35 = vld [vmem:[%s12951_s15 + $0x10] sm:$0xff] }
0x28b1   : > { %v5290_v9 = vsel %vm12882_vm15, %v5288_v37, %v5252_v32  ;;  %vm5300_vm15 = vcmask 424960   ;;  %v5718_v32 = vld [vmem:[%s12951_s15] sm:$0xff] }
0x28b2   : > { %v10737_v46 = vpack.c.bf16 %v5719_v50, %v5718_v32  ;;  %v12310_v32 = vld [vmem:[%s11537_s6 + $0x38] sm:$0xff] }
0x28b3   : > { %v5255_v42 = vpop.permute.xlu1 %5254  ;;  %v5264_v45 = vpop.permute.xlu0 %5263 }
0x28b4   : > { %v5291_v43 = vsel %vm1380_vm1, %v5290_v9, %v5255_v42  ;;  %v12270_v42 = vld [vmem:[%s11818_s0 + $0x8] sm:$0x7f]  ;;  %s12974_s0 = smov 8  }
0x28b5   : > { %v5293_v55 = vsel %vm5292_vm12, %v5291_v43, %v5258_v36  ;;  %v5721_v36 = vld [vmem:[%s12951_s15 + $0x18] sm:$0xff] }
0x28b6   : > { %v10740_v37 = vpack.c.bf16 %v5721_v36, %v5720_v35  ;;  %v12314_v36 = vld [vmem:[%s11537_s6 + $0x30] sm:$0xff] }
0x28b7   : > { %v5261_v10 = vpop.permute.xlu1 %5260  ;;  %v5270_v27 = vpop.permute.xlu0 %5269 }
0x28b8   : > { %v5295_v56 = vsel %vm5294_vm11, %v5293_v55, %v5261_v10 }
0x28b9   : > { %v5297_v26 = vsel %vm5296_vm13, %v5295_v56, %v5264_v45 }
0x28bb   : > { %v5267_v58 = vpop.permute.xlu1 %5266  ;;  %v5276_v1 = vpop.permute.xlu0 %5275 }
0x28bc   : > { %v5299_v59 = vsel %vm5298_vm10, %v5297_v26, %v5267_v58 }
0x28bd   : > { %v5301_v63 = vsel %vm5300_vm15, %v5299_v59, %v5270_v27 }
0x28bf   : > { %v5273_v39 = vpop.permute.xlu1 %5272 }
0x28c0   : > { %v5303_v2 = vsel %vm5302_vm14, %v5301_v63, %v5273_v39  ;;  %v12293_v63 = vld [vmem:[%s11537_s6 + $0x28] sm:$0xff] }
0x28c1   : > { %v5305_v5 = vsel %vm5304_vm3, %v5303_v2, %v5276_v1 }
0x28c2   : > { %v5309_v14 = vrot.slane %v5305_v5, %v5308_v62 }
0x28c4   : > { %v5310_v16 = vmul.f32 %v5309_v14, %v5230_v7  ;;  %v5311_v17 = vmul.f32 %v5309_v14, %v5231_v6  ;;  %v12299_v6 = vld [vmem:[%s11537_s6 + $0x20] sm:$0xff]  ;;  %v12302_v14 = vld [vmem:[%s11537_s6 + $0x10] sm:$0xff] }
0x28c6   : > { %10078 = vmatprep.mubr.msk.f32.mxu1 %vm1292_vm0, %v5310_v16  ;;  %v12305_v16 = vld [vmem:[%s11537_s6] sm:$0xff] }
0x28c7   : > { %10079 = vmatmul.mubr.msk.f32.vlgmr.msra.gmra.mrb[50].mxu1 %vm1292_vm0, %v5311_v17 }
0x28c8   : > { %10111 = vmatprep.mubr.msk.f32.mxu1 %vm11304_vm4, %v11305_v23  ;;  %10738 = vmatpush3.bf16.msra.mxu1 %v10737_v46 }
0x28c9   : > { %10739 = vmatprep.subr.bf16.mxu1 %v11303_v0 }
0x28cc   : > { %10741 = vmatpush3.bf16.msra.mxu1 %v10740_v37 }
0x28cd   : > { %10748 = vmatprep.subr.bf16.mxu1 %v11303_v0 }
0x28cf   : > { %10112 = vmatmul.mubr.msk.f32.vlgmr.msra.gmra.mrb[52].mxu1 %vm1380_vm1, %v12270_v42 }
0x28d0   : > { %10133 = vmatprep.mubr.msk.f32.mxu1 %vm11304_vm4, %v11305_v23 }
0x299a   : > { %v10080_v18 = vpop.f32.mrb[50].mxu1 }
0x299b   : > { %5423 = vperm.xlu1 %11024, %v10080_v18   ;;  %5410 = vperm.xlu0 %11023, %v10080_v18   ;;  %v12211_v19 = vpop.f32.mrb[51].mxu1 }
0x299f   : > { %11025 = vset.pattern.permute.xlu1 %v11323_v12  ;;  %11026 = vset.pattern.permute.xlu0 %v11324_v13 }
0x29a0   : > { %5438 = vperm.xlu1 %11025, %v10080_v18   ;;  %5453 = vperm.xlu0 %11026, %v10080_v18  }
0x29a4   : > { %11027 = vset.pattern.permute.xlu1 %v11325_v20  ;;  %11029 = vset.pattern.permute.xlu0 %v11326_v21 }
0x29a5   : > { %5465 = vperm.xlu1 %11027, %v10080_v18   ;;  %5487 = vperm.xlu0 %11029, %v10080_v18  }
0x29a9   : > { %11028 = vset.pattern.permute.xlu1 %v11327_v34  ;;  %11032 = vset.pattern.permute.xlu0 %v11328_v22 }
0x29aa   : > { %5475 = vperm.xlu1 %11028, %v10080_v18   ;;  %5521 = vperm.xlu0 %11032, %v10080_v18  }
0x29ae   : > { %11030 = vset.pattern.permute.xlu1 %v11329_v41  ;;  %11035 = vset.pattern.permute.xlu0 %v11330_v33 }
0x29af   : > { %5499 = vperm.xlu1 %11030, %v10080_v18   ;;  %5557 = vperm.xlu0 %11035, %v10080_v18  }
0x29b3   : > { %11031 = vset.pattern.permute.xlu1 %v11331_v48  ;;  %11040 = vset.pattern.permute.xlu0 %v11323_v12 }
0x29b4   : > { %5511 = vperm.xlu1 %11031, %v10080_v18   ;;  %5434 = vperm.xlu0 %11040, %v12211_v19  }
0x29b8   : > { %11033 = vset.pattern.permute.xlu1 %v11332_v24  ;;  %11043 = vset.pattern.permute.xlu0 %v11327_v34 }
0x29b9   : > { %5533 = vperm.xlu1 %11033, %v10080_v18   ;;  %5471 = vperm.xlu0 %11043, %v12211_v19  }
0x29bd   : > { %11034 = vset.pattern.permute.xlu1 %v11333_v28  ;;  %11046 = vset.pattern.permute.xlu0 %v11331_v48 }
0x29be   : > { %5545 = vperm.xlu1 %11034, %v10080_v18   ;;  %5507 = vperm.xlu0 %11046, %v12211_v19  }
0x29c2   : > { %11036 = vset.pattern.permute.xlu1 %v11334_v29  ;;  %11049 = vset.pattern.permute.xlu0 %v11333_v28 }
0x29c3   : > { %5567 = vperm.xlu1 %11036, %v10080_v18   ;;  %5541 = vperm.xlu0 %11049, %v12211_v19  }
0x29c7   : > { %11037 = vset.pattern.permute.xlu1 %v11335_v30  ;;  %11052 = vset.pattern.permute.xlu0 %v11335_v30 }
0x29c8   : > { %5579 = vperm.xlu1 %11037, %v10080_v18   ;;  %5575 = vperm.xlu0 %11052, %v12211_v19  }
0x29cc   : > { %11038 = vset.pattern.permute.xlu1 %v12888_v4  ;;  %11054 = vset.pattern.permute.xlu0 %v12886_v31 }
0x29cd   : > { %5591 = vperm.xlu0 %11054, %v10080_v18   ;;  %5405 = vperm.xlu1 %11038, %v12211_v19  }
0x29d1   : > { %11039 = vset.pattern.permute.xlu1 %v12885_v3  ;;  %11055 = vset.pattern.permute.xlu0 %v12888_v4 }
0x29d2   : > { %5419 = vperm.xlu1 %11039, %v12211_v19  }
0x29d6   : > { %11041 = vset.pattern.permute.xlu1 %v11324_v13 }
0x29d7   : > { %5449 = vperm.xlu1 %11041, %v12211_v19  }
0x29db   : > { %11042 = vset.pattern.permute.xlu1 %v11325_v20 }
0x29dc   : > { %5461 = vperm.xlu1 %11042, %v12211_v19  }
0x29e0   : > { %11044 = vset.pattern.permute.xlu1 %v11326_v21 }
0x29e1   : > { %5483 = vperm.xlu1 %11044, %v12211_v19  }
0x29e5   : > { %11045 = vset.pattern.permute.xlu1 %v11329_v41 }
0x29e6   : > { %5495 = vperm.xlu1 %11045, %v12211_v19  }
0x29ea   : > { %11047 = vset.pattern.permute.xlu1 %v11328_v22 }
0x29eb   : > { %5517 = vperm.xlu1 %11047, %v12211_v19  }
0x29ef   : > { %11048 = vset.pattern.permute.xlu1 %v11332_v24 }
0x29f0   : > { %5529 = vperm.xlu1 %11048, %v12211_v19  }
0x29f4   : > { %11050 = vset.pattern.permute.xlu1 %v11330_v33 }
0x29f5   : > { %5553 = vperm.xlu1 %11050, %v12211_v19  }
0x29f9   : > { %11051 = vset.pattern.permute.xlu1 %v11334_v29 }
0x29fa   : > { %5563 = vperm.xlu1 %11051, %v12211_v19  }
0x29fe   : > { %11053 = vset.pattern.permute.xlu1 %v12886_v31 }
0x29ff   : > { %5587 = vperm.xlu1 %11053, %v12211_v19  }
0x2a03   : > { %11056 = vset.pattern.permute.xlu1 %v12885_v3 }
0x2a1a   : > { %v5424_v9 = vpop.permute.xlu1 %5423  ;;  %v5411_v54 = vpop.permute.xlu0 %5410 }
0x2a1b   : > { %v5427_v1 = vmul.f32 %v12287_v60, %v5424_v9  ;;  %v5414_v2 = vmul.f32 %v5411_v54, %v12290_v61 }
0x2a1d   : > { %v5429_v52 = vadd.f32 %v5427_v1, %v5414_v2 }
0x2a1f   : > { %v5439_v43 = vpop.permute.xlu1 %5438  ;;  %v5454_v56 = vpop.permute.xlu0 %5453 }
0x2a20   : > { %v5442_v5 = vmul.f32 %v12293_v63, %v5439_v43  ;;  %v5457_v43 = vmul.f32 %v12310_v32, %v5454_v56 }
0x2a22   : > { %v5444_v35 = vadd.f32 %v5442_v5, %v5429_v52 }
0x2a24   : > { %v5466_v45 = vpop.permute.xlu1 %5465  ;;  %v5488_v25 = vpop.permute.xlu0 %5487  ;;  %v5459_v3 = vadd.f32 %v5457_v43, %v5444_v35 }
0x2a25   : > { %v5469_v2 = vmul.f32 %v5466_v45, %v12290_v61 }
0x2a29   : > { %v5476_v49 = vpop.permute.xlu1 %5475  ;;  %v5522_v58 = vpop.permute.xlu0 %5521 }
0x2a2a   : > { %v5479_v1 = vmul.f32 %v12287_v60, %v5476_v49 }
0x2a2c   : > { %v5481_v5 = vadd.f32 %v5479_v1, %v5469_v2 }
0x2a2e   : > { %v5500_v51 = vpop.permute.xlu1 %5499  ;;  %v12284_v59 = vpop.permute.xlu0 %5557 }
0x2a33   : > { %v5512_v10 = vpop.permute.xlu1 %5511  ;;  %v5435_v7 = vpop.permute.xlu0 %5434 }
0x2a34   : > { %v5441_v50 = vmul.f32 %v12299_v6, %v5435_v7 }
0x2a38   : > { %v12276_v55 = vpop.permute.xlu1 %5533  ;;  %v5472_v7 = vpop.permute.xlu0 %5471 }
0x2a39   : > { %v5478_v56 = vmul.f32 %v12302_v14, %v5472_v7 }
0x2a3d   : > { %v12278_v53 = vpop.permute.xlu1 %5545  ;;  %v5508_v35 = vpop.permute.xlu0 %5507 }
0x2a3e   : > { %v5514_v1 = vmul.f32 %v5508_v35, %v12305_v16  ;;  %v5561_v35 = vmul.f32 %v12284_v59, %v12290_v61 }
0x2a42   : > { %v12280_v27 = vpop.permute.xlu1 %5567  ;;  %v5542_v2 = vpop.permute.xlu0 %5541 }
0x2a47   : > { %v12282_v26 = vpop.permute.xlu1 %5579 }
0x2a4c   : > { %v5406_v39 = vpop.permute.xlu1 %5405 }
0x2a4d   : > { %v5413_v18 = vmul.f32 %v5406_v39, %v12305_v16 }
0x2a51   : > { %v5420_v17 = vpop.permute.xlu1 %5419 }
0x2a52   : > { %v5426_v19 = vmul.f32 %v12302_v14, %v5420_v17 }
0x2a54   : > { %v5428_v46 = vadd.f32 %v5426_v19, %v5413_v18  ;;  %v5491_v19 = vmul.f32 %v12293_v63, %v5488_v25 }
0x2a56   : > { %v5443_v37 = vadd.f32 %v5441_v50, %v5428_v46  ;;  %v5450_v9 = vpop.permute.xlu1 %5449  ;;  %v5493_v50 = vadd.f32 %v5491_v19, %v5481_v5 }
0x2a57   : > { %v5456_v54 = vmul.f32 %v12314_v36, %v5450_v9 }
0x2a59   : > { %v5458_v31 = vadd.f32 %v5456_v54, %v5443_v37  ;;  %v5515_v54 = vmul.f32 %v5512_v10, %v12290_v61 }
0x2a5b   : > { %v5462_v39 = vpop.permute.xlu1 %5461  ;;  %v10720_v4 = vpack.c.bf16 %v5459_v3, %v5458_v31  ;;  %v5503_v3 = vmul.f32 %v12310_v32, %v5500_v51  ;;  %v5537_v51 = vmul.f32 %v12293_v63, %v12276_v55 }
0x2a5c   : > { %v5468_v17 = vmul.f32 %v5462_v39, %v12305_v16  ;;  %v5525_v39 = vmul.f32 %v12287_v60, %v5522_v58  ;;  %v5576_v58 = vpop.permute.xlu0 %5575 }
0x2a5d   : > { %10721 = vmatprep.subr.bf16.mxu0 %v10720_v4 }
0x2a5e   : > { %10723 = vmatpush3.bf16.msra.mxu0 %v10720_v4  ;;  %v5480_v31 = vadd.f32 %v5478_v56, %v5468_v17  ;;  %v5505_v4 = vadd.f32 %v5503_v3, %v5493_v50  ;;  %v5527_v5 = vadd.f32 %v5525_v39, %v5515_v54  ;;  %v5549_v17 = vmul.f32 %v12310_v32, %v12278_v53 }
0x2a5f   : > { %v5548_v56 = vmul.f32 %v12314_v36, %v5542_v2  ;;  %v9125_v2 = vld [vmem:[%s12951_s15 + $0x38] sm:$0xff] }
0x2a60   : > { %v5484_v18 = vpop.permute.xlu1 %5483  ;;  %v5539_v19 = vadd.f32 %v5537_v51, %v5527_v5  ;;  %v5798_v5 = vpop.f32.mrb[52].mxu1 }
0x2a61   : > { %v5490_v52 = vmul.f32 %v12299_v6, %v5484_v18 }
0x2a62   : > { %v5551_v50 = vadd.f32 %v5549_v17, %v5539_v19  ;;  %v10113_v17 = vpop.f32.mrb[53].mxu1 }
0x2a63   : > { %v5492_v46 = vadd.f32 %v5490_v52, %v5480_v31 }
0x2a65   : > { %v5496_v49 = vpop.permute.xlu1 %5495 }
0x2a66   : > { %v5502_v45 = vmul.f32 %v12314_v36, %v5496_v49  ;;  %v5571_v49 = vmul.f32 %v12287_v60, %v12280_v27 }
0x2a68   : > { %v5504_v37 = vadd.f32 %v5502_v45, %v5492_v46  ;;  %v5592_v45 = vpop.permute.xlu0 %5591  ;;  %v5573_v27 = vadd.f32 %v5571_v49, %v5561_v35  ;;  %v9129_v49 = vld [vmem:[%s12951_s15 + $0x40] sm:$0xff] }
0x2a69   : > { %v5595_v60 = vmul.f32 %v12310_v32, %v5592_v45  ;;  %v5600_v32 = vld [vmem:[%s11542_s13 + $0x10] sm:$0xff] }
0x2a6a   : > { %v5518_v9 = vpop.permute.xlu1 %5517  ;;  %v10724_v43 = vpack.c.bf16 %v5505_v4, %v5504_v37  ;;  %v5583_v37 = vmul.f32 %v12293_v63, %v12282_v26  ;;  %v9122_v26 = vld [vmem:[%s12951_s15 + $0x20] sm:$0xff]  ;;  %v9123_v63 = vld [vmem:[%s12951_s15 + $0x28] sm:$0xff]  ;;  %v9131_v45 = vld [vmem:[%s12951_s15 + $0x50] sm:$0xff] }
0x2a6b   : > { %v5524_v25 = vmul.f32 %v12302_v14, %v5518_v9  ;;  %v5582_v9 = vmul.f32 %v12299_v6, %v5576_v58  ;;  %v10743_v51 = vpack.c.bf16 %v9123_v63, %v9122_v26  ;;  %v5964_v26 = vld [vmem:[%s12958_s11] sm:$0xff]  ;;  %v5965_v63 = vld [vmem:[%s12958_s11 + $0x8] sm:$0xff] }
0x2a6c   : > { %10725 = vmatprep.subr.bf16.mxu0 %v10724_v43 }
0x2a6d   : > { %10727 = vmatpush3.bf16.msra.mxu0 %v10724_v43  ;;  %v5526_v18 = vadd.f32 %v5524_v25, %v5514_v1  ;;  %v5585_v25 = vadd.f32 %v5583_v37, %v5573_v27  ;;  %v9124_v1 = vld [vmem:[%s12951_s15 + $0x30] sm:$0xff] }
0x2a6f   : > { %v5530_v7 = vpop.permute.xlu1 %5529  ;;  %v5597_v39 = vadd.f32 %v5595_v60, %v5585_v25 }
0x2a70   : > { %v5536_v10 = vmul.f32 %v12299_v6, %v5530_v7  ;;  %v5599_v6 = vld [vmem:[%s11542_s13 + $0x8] sm:$0xff]  ;;  %v10746_v7 = vpack.c.bf16 %v9125_v2, %v9124_v1 }
0x2a72   : > { %v5538_v52 = vadd.f32 %v5536_v10, %v5526_v18 }
0x2a74   : > { %v5550_v3 = vadd.f32 %v5548_v56, %v5538_v52  ;;  %v5554_v31 = vpop.permute.xlu1 %5553  ;;  %v9127_v52 = vld [vmem:[%s12957_s7 + $0x1] ss:$0 sm:$0xff] }
0x2a75   : > { %v5560_v53 = vmul.f32 %v5554_v31, %v12305_v16 }
0x2a76   : > { %v10728_v55 = vpack.c.bf16 %v5551_v50, %v5550_v3  ;;  %v9120_v50 = vld [vmem:[%s12957_s7] ss:$0 sm:$0xff] }
0x2a78   : > { %10729 = vmatprep.subr.bf16.mxu0 %v10728_v55 }
0x2a79   : > { %10731 = vmatpush3.bf16.msra.mxu0 %v10728_v55  ;;  %v5564_v46 = vpop.permute.xlu1 %5563  ;;  %v5799_v55 = vadd.f32 %v9120_v50, %v5798_v5 }
0x2a7a   : > { %v5570_v4 = vmul.f32 %v12302_v14, %v5564_v46  ;;  %v9130_v46 = vld [vmem:[%s12951_s15 + $0x48] sm:$0xff] }
0x2a7c   : > { %v5572_v43 = vadd.f32 %v5570_v4, %v5560_v53  ;;  %v10749_v53 = vpack.c.bf16 %v9130_v46, %v9129_v49  ;;  %v9132_v4 = vld [vmem:[%s12951_s15 + $0x58] sm:$0xff] }
0x2a7d   : > { %v10752_v35 = vpack.c.bf16 %v9132_v4, %v9131_v45  ;;  %v9144_v4 = vld [vmem:[%s12951_s15 + $0x60] sm:$0xff] }
0x2a7e   : > { %v5584_v54 = vadd.f32 %v5582_v9, %v5572_v43  ;;  %v5588_v16 = vpop.permute.xlu1 %5587  ;;  %10750 = vmatpush3.bf16.msra.mxu1 %v10749_v53 }
0x2a7f   : > { %v5594_v14 = vmul.f32 %v12314_v36, %v5588_v16  ;;  %v5601_v36 = vld [vmem:[%s11542_s13 + $0x18] sm:$0xff]  ;;  %10751 = vmatprep.subr.bf16.mxu1 %v11303_v0 }
0x2a81   : > { %v5596_v59 = vadd.f32 %v5594_v14, %v5584_v54 }
0x2a82   : > { %10753 = vmatpush3.bf16.msra.mxu1 %v10752_v35  ;;  %v9145_v35 = vld [vmem:[%s12951_s15 + $0x68] sm:$0xff] }
0x2a83   : > { %v10732_v61 = vpack.c.bf16 %v5597_v39, %v5596_v59  ;;  %10754 = vmatprep.subr.bf16.mxu1 %v11303_v0  ;;  %v9134_v39 = vld [vmem:[%s12957_s7 + $0x2] ss:$0 sm:$0xff] }
0x2a85   : > { %10733 = vmatprep.subr.bf16.mxu0 %v10732_v61  ;;  %10134 = vmatmul.mubr.msk.f32.vlgmr.msra.gmra.mrb[54].mxu1 %vm1380_vm1, %v12270_v42 }
0x2a86   : > { %10735 = vmatpush3.bf16.msra.mxu0 %v10732_v61  ;;  %10154 = vmatprep.mubr.msk.f32.mxu1 %vm11304_vm4, %v11305_v23 }
0x2a87   : > { %10742 = vmatprep.subr.bf16.mxu0 %v11303_v0 }
0x2a89   : > { %10098 = vmatmul.mubr.msk.f32.vlgmr.msra.gmra.mrb[34].mxu0 %vm1292_vm0, %v5599_v6  ;;  %v5966_v6 = vld [vmem:[%s12958_s11 + $0x10] sm:$0xff] }
0x2a8a   : > { %10744 = vmatpush3.bf16.msra.mxu0 %v10743_v51  ;;  %10100 = vmatprep.mubr.msk.f32.mxu0 %vm1292_vm0, %v5600_v32  ;;  %v10755_v51 = vpack.c.bf16 %v5965_v63, %v5964_v26  ;;  %v5967_v32 = vld [vmem:[%s12958_s11 + $0x18] sm:$0xff] }
0x2a8b   : > { %10745 = vmatprep.subr.bf16.mxu0 %v11303_v0  ;;  %v10758_v1 = vpack.c.bf16 %v5967_v32, %v5966_v6  ;;  %v9149_v6 = vld [vmem:[%s12957_s7 + $0x3] ss:$0 sm:$0xff] }
0x2a8c   : > { %10756 = vmatpush3.bf16.msra.mxu1 %v10755_v51 }
0x2a8d   : > { %10101 = vmatmul.mubr.msk.f32.gmra.mrb[36].mxu0 %vm1292_vm0, %v5601_v36  ;;  %10757 = vmatprep.subr.bf16.mxu1 %v11303_v0 }
0x2a8e   : > { %10747 = vmatpush3.bf16.msra.mxu0 %v10746_v7  ;;  %10122 = vmatprep.mubr.msk.f32.mxu0 %vm11304_vm4, %v11305_v23 }
0x2a8f   : > { %10136 = vmatprep.subr.mxu0 %v11305_v23 }
0x2a90   : > { %10759 = vmatpush3.bf16.msra.mxu1 %v10758_v1 }
0x2a91   : > { %10123 = vmatmul.mubr.msk.f32.vlgmr.msra.gmra.mrb[38].mxu0 %vm1380_vm1, %v12270_v42  ;;  %10766 = vmatprep.subr.bf16.mxu1 %v11303_v0 }
0x2a92   : > { %10138 = vmatprep.mubr.msk.f32.mxu0 %vm11304_vm4, %v11305_v23 }
0x2b58   : > { %v5960_v14 = vpop.f32.mrb[54].mxu1 }
0x2b59   : > { %v10135_v59 = vpop.f32.mrb[55].mxu1  ;;  %v5961_v61 = vadd.f32 %v9134_v39, %v5960_v14  ;;  %v9142_v14 = vld [vmem:[%s12960_s18] ss:$0 sm:$0xff] }
0x2b5a   : > { %v9143_v59 = vld [vmem:[%s12961_s22] ss:$0 sm:$0xff] }
0x2b5c   : > { %v12366_v18 = vpop.f32.mrb[34].mxu0 }
0x2b5d   : > { %v12368_v10 = vpop.f32.mrb[35].mxu0 }
0x2b60   : > { %v12370_v19 = vpop.f32.mrb[36].mxu0 }
0x2b61   : > { %v12372_v56 = vpop.f32.mrb[37].mxu0 }
0x2b64   : > { %v5879_v58 = vpop.f32.mrb[38].mxu0 }
0x2b65   : > { %v5880_v3 = vadd.f32 %v9127_v52, %v5879_v58  ;;  %v10124_v31 = vpop.f32.mrb[39].mxu0  ;;  %v9140_v52 = vld [vmem:[%s12959_s16] ss:$0 sm:$0xff] }
0x2b67   : > { %10137 = vmatpush3.xpose.msk.msra.mxu0 %vm1380_vm1, %v5880_v3 }
0x2b68   : > { %10141 = vmatprep.subr.mxu0 %v11305_v23 }
0x2b6a   : > { %10139 = vmatmul.mubr.msk.f32.vlgmr.msra.gmra.mrb[40].mxu0 %vm1380_vm1, %v5799_v55 }
0x2b6b   : > { %10143 = vmatprep.mubr.msk.f32.mxu0 %vm11304_vm4, %v11305_v23  ;;  %10142 = vmatpush3.msk.msra.mxu0 %vm2962_vm6, %v5961_v61 }
0x2b6c   : > { %10760 = vmatprep.subr.bf16.mxu0 %v11303_v0 }
0x2c3d   : > { %v6041_v37 = vpop.f32.mrb[40].mxu0 }
0x2c3e   : > { %v10140_v9 = vpop.f32.mrb[41].mxu0  ;;  %v6045_v43 = vsel %vm2946_vm5, %v6041_v37, -inf }
0x2c3f   : > { %6046 = vmax.xlane.f32.xlu1 %v6045_v43  ;;  %v9146_v9 = vld [vmem:[%s12951_s15 + $0x70] sm:$0xff]  ;;  %v9147_v43 = vld [vmem:[%s12951_s15 + $0x78] sm:$0xff] }
0x2ccc   : > { %v6047_v27 = vpop.xlane.xlu1 %6046 }
0x2ccd   : > { %v6048_v60 = vsub.f32 %v6041_v37, %v6047_v27  ;;  %v10761_v37 = vpack.c.bf16 %v9145_v35, %v9144_v4  ;;  %v10764_v27 = vpack.c.bf16 %v9147_v43, %v9146_v9 }
0x2ccf   : > { %v6049_v54 = vmul.f32 1.442695, %v6048_v60 }
0x2cd1   : > { %11147 = vpow2.f32 %v6049_v54 }
0x2cdb   : > { %v11148_v16 = vpop.eup %11147 }
0x2cdc   : > { %v6051_v25 = vsel %vm2946_vm5, %v11148_v16, 0.0  ;;  %vm12972_vm5 = vcmask 130048  }
0x2cdd   : > { %6052 = vadd.xlane.f32.xlu0 %v6051_v25 }
0x2d6a   : > { %v6053_v2 = vpop.xlane.xlu0 %6052 }
0x2d6b   : > { %11149 = vrcp.f32 %v6053_v2 }
0x2d75   : > { %v11150_v36 = vpop.eup %11149 }
0x2d76   : > { %v6055_v7 = vmul.f32 %v11150_v36, %v11148_v16 }
0x2d78   : > { %10144 = vmatmul.mubr.msk.f32.vlgmr.msra.gmra.mrb[42].mxu0 %vm2958_vm7, %v6055_v7 }
0x2d79   : > { %10165 = vmatprep.mubr.msk.f32.mxu0 %vm11304_vm4, %v11305_v23  ;;  %10762 = vmatpush3.bf16.msra.mxu0 %v10761_v37  ;;  %v9160_v37 = vld [vmem:[%s12959_s16 + $0x1] ss:$0 sm:$0xff] }
0x2d7a   : > { %10763 = vmatprep.subr.bf16.mxu0 %v11303_v0 }
0x2d7d   : > { %10765 = vmatpush3.bf16.msra.mxu0 %v10764_v27 }
0x2d7e   : > { %10770 = vmatprep.subr.bf16.mxu0 %v11303_v0 }
0x2e4b   : > { %v6128_v5 = vpop.f32.mrb[42].mxu0 }
0x2e4c   : > { %v10145_v17 = vpop.f32.mrb[43].mxu0  ;;  %10155 = vmatmul.mubr.msk.f32.vlgmr.msra.gmra.mrb[56].mxu1 %vm1380_vm1, %v6128_v5 }
0x2e4d   : > { %10769 = vmatpush3.bf16.xpose.msk.msra.mxu1 %vm11706_vm2, %v11846_v40  ;;  %10172 = vmatprep.mubr.msk.f32.mxu1 %vm11304_vm4, %v11305_v23 }
0x2e4e   : > { %10779 = vmatprep.subr.bf16.mxu1 %v11303_v0 }
0x2f1f   : > { %v6207_v50 = vpop.f32.mrb[56].mxu1 }
0x2f20   : > { %v6208_v58 = vadd.f32 %v9140_v52, %v6207_v50  ;;  %v10156_v3 = vpop.f32.mrb[57].mxu1 }
0x2f21   : > { %v9151_v3 = vld [vmem:[%s12958_s11 + $0x20] sm:$0xff] }
0x2f22   : > { %v6211_v31 = vadd.f32 %v12270_v42, %v6208_v58 }
0x2f24   : > { %v6214_v55 = vsel %vm3118_vm8, %v6211_v31, 0.0 }
0x2f25   : > { %6215 = vadd.xlane.f32.xlu0 %v6214_v55 }
0x2fb2   : > { %v6216_v49 = vpop.xlane.xlu0 %6215 }
0x2fb3   : > { %v6217_v40 = vmul.f32 0.03125, %v6216_v49 }
0x2fb5   : > { %v6218_v46 = vsub.f32 %v6211_v31, %v6217_v40  ;;  %v9152_v31 = vld [vmem:[%s12958_s11 + $0x28] sm:$0xff] }
0x2fb6   : > { %v10774_v49 = vpack.c.bf16 %v9152_v31, %v9151_v3 }
0x2fb7   : > { %v6219_v45 = vmul.f32 %v6218_v46, %v6218_v46 }
0x2fb9   : > { %v6220_v53 = vsel %vm3118_vm8, %v6219_v45, 0.0  ;;  %v9154_v45 = vld [vmem:[%s12958_s11 + $0x38] sm:$0xff] }
0x2fba   : > { %6221 = vadd.xlane.f32.xlu1 %v6220_v53 }
0x3047   : > { %v6222_v60 = vpop.xlane.xlu1 %6221 }
0x3048   : > { %v6223_v54 = vmul.f32 0.03125, %v6222_v60 }
0x304a   : > { %v6224_v16 = vadd.f32 1e-05, %v6223_v54 }
0x304c   : > { %11151 = vrsqrt.f32 %v6224_v16 }
0x3056   : > { %v11152_v25 = vpop.eup %11151 }
0x3057   : > { %v6226_v39 = vmul.f32 %v11152_v25, %v6218_v46  ;;  %v9153_v46 = vld [vmem:[%s12958_s11 + $0x30] sm:$0xff] }
0x3058   : > { %v10777_v53 = vpack.c.bf16 %v9154_v45, %v9153_v46  ;;  %v9165_v46 = vld [vmem:[%s12961_s22 + $0x1] ss:$0 sm:$0xff] }
0x3059   : > { %v6233_v61 = vmul.f32 %v9142_v14, %v6226_v39 }
0x305b   : > { %v6240_v26 = vadd.f32 %v9143_v59, %v6233_v61  ;;  %v6597_v61 = vld [vmem:[%s12962_s26] sm:$0xff] }
0x305d   : > { %v6241_v63 = vadd.f32 %v12270_v42, %v6240_v26 }
0x305f   : > { %10166 = vmatmul.mubr.msk.f32.vlgmr.msra.gmra.mrb[44].mxu0 %vm1380_vm1, %v6241_v63  ;;  %v6598_v63 = vld [vmem:[%s12962_s26 + $0x8] sm:$0xff] }
0x3060   : > { %10772 = vmatpush3.bf16.msra.mxu0 %v11844_v38  ;;  %10179 = vmatprep.mubr.msk.f32.mxu0 %vm11304_vm4, %v11305_v23 }
0x3061   : > { %10773 = vmatprep.subr.bf16.mxu0 %v11303_v0 }
0x3132   : > { %v6322_v51 = vpop.f32.mrb[44].mxu0 }
0x3133   : > { %v6323_v32 = vadd.f32 %v9149_v6, %v6322_v51  ;;  %v10167_v1 = vpop.f32.mrb[45].mxu0  ;;  %v10780_v6 = vpack.c.bf16 %v6598_v63, %v6597_v61  ;;  %v6600_v51 = vld [vmem:[%s12962_s26 + $0x18] sm:$0xff] }
0x3134   : > { %v6682_v1 = vld [vmem:[%s12963_s2] sm:$0xff] }
0x3135   : > { %10173 = vmatmul.mubr.msk.f32.vlgmr.msra.gmra.mrb[58].mxu1 %vm1380_vm1, %v6323_v32 }
0x3136   : > { %10201 = vmatprep.mubr.msk.f32.mxu1 %vm11304_vm4, %v11305_v23  ;;  %10781 = vmatpush3.bf16.msra.mxu1 %v10780_v6 }
0x3137   : > { %10782 = vmatprep.subr.bf16.mxu1 %v11303_v0 }
0x3208   : > { %v6400_v2 = vpop.f32.mrb[58].mxu1 }
0x3209   : > { %v10174_v36 = vpop.f32.mrb[59].mxu1  ;;  %v6404_v38 = vsel %vm3319_vm9, %v6400_v2, -inf }
0x320a   : > { %6405 = vmax.xlane.f32.xlu0 %v6404_v38  ;;  %v6684_v36 = vld [vmem:[%s12963_s2 + $0x10] sm:$0xff] }
0x3297   : > { %v6406_v7 = vpop.xlane.xlu0 %6405 }
0x3298   : > { %v6407_v5 = vsub.f32 %v6400_v2, %v6406_v7  ;;  %v6683_v2 = vld [vmem:[%s12963_s2 + $0x8] sm:$0xff]  ;;  %v6685_v7 = vld [vmem:[%s12963_s2 + $0x18] sm:$0xff] }
0x3299   : > { %v10786_v38 = vpack.c.bf16 %v6683_v2, %v6682_v1  ;;  %v9174_v1 = vld [vmem:[%s12951_s15 + $0xe0] sm:$0xff] }
0x329a   : > { %v6408_v17 = vmul.f32 1.442695, %v6407_v5  ;;  %v10789_v5 = vpack.c.bf16 %v6685_v7, %v6684_v36  ;;  %v9176_v36 = vld [vmem:[%s12951_s15 + $0xf0] sm:$0xff] }
0x329c   : > { %11153 = vpow2.f32 %v6408_v17  ;;  %v6686_v17 = vld [vmem:[%s12963_s2 + $0x20] sm:$0xff] }
0x32a6   : > { %v11154_v52 = vpop.eup %11153 }
0x32a7   : > { %v6410_v50 = vsel %vm3319_vm9, %v11154_v52, 0.0 }
0x32a8   : > { %6411 = vadd.xlane.f32.xlu1 %v6410_v50 }
0x3335   : > { %v6412_v58 = vpop.xlane.xlu1 %6411 }
0x3336   : > { %11155 = vrcp.f32 %v6412_v58 }
0x3340   : > { %v11156_v55 = vpop.eup %11155 }
0x3341   : > { %v6414_v40 = vmul.f32 %v11156_v55, %v11154_v52  ;;  %v6687_v52 = vld [vmem:[%s12963_s2 + $0x28] sm:$0xff] }
0x3342   : > { %v10792_v50 = vpack.c.bf16 %v6687_v52, %v6686_v17 }
0x3343   : > { %10180 = vmatmul.mubr.msk.f32.vlgmr.msra.gmra.mrb[46].mxu0 %vm12972_vm5, %v6414_v40 }
0x3344   : > { %10775 = vmatpush3.bf16.msra.mxu0 %v10774_v49  ;;  %10190 = vmatprep.mubr.msk.f32.mxu0 %vm11304_vm4, %v11305_v23  ;;  %v9164_v49 = vld [vmem:[%s12960_s18 + $0x1] ss:$0 sm:$0xff] }
0x3345   : > { %10776 = vmatprep.subr.bf16.mxu0 %v11303_v0 }
0x3348   : > { %10778 = vmatpush3.bf16.msra.mxu0 %v10777_v53 }
0x3349   : > { %10785 = vmatprep.subr.bf16.mxu0 %v11303_v0 }
0x3416   : > { %v6484_v4 = vpop.f32.mrb[46].mxu0 }
0x3417   : > { %v10181_v35 = vpop.f32.mrb[47].mxu0  ;;  %10191 = vmatmul.mubr.msk.f32.vlgmr.msra.gmra.mrb[48].mxu0 %vm1380_vm1, %v6484_v4  ;;  %v6688_v4 = vld [vmem:[%s12963_s2 + $0x30] sm:$0xff] }
0x3418   : > { %10220 = vmatprep.mubr.msk.f32.mxu0 %vm11304_vm4, %v11305_v23  ;;  %10787 = vmatpush3.bf16.msra.mxu0 %v10786_v38  ;;  %v6689_v35 = vld [vmem:[%s12963_s2 + $0x38] sm:$0xff]  ;;  %s12983_s2 = smov 44  }
0x3419   : > { %10788 = vmatprep.subr.bf16.mxu0 %v11303_v0  ;;  %v9177_v38 = vld [vmem:[%s12951_s15 + $0xf8] sm:$0xff] }
0x341a   : > { %v10801_v7 = vpack.c.bf16 %v9177_v38, %v9176_v36  ;;  %v9188_v38 = vld [vmem:[%s12958_s11 + $0x40] sm:$0xff] }
0x341c   : > { %10790 = vmatpush3.bf16.msra.mxu0 %v10789_v5 }
0x341d   : > { %10791 = vmatprep.subr.bf16.mxu0 %v11303_v0 }
0x3420   : > { %10793 = vmatpush3.bf16.msra.mxu0 %v10792_v50 }
0x3421   : > { %10794 = vmatprep.subr.bf16.mxu0 %v11303_v0 }
0x34ea   : > { %v6563_v9 = vpop.f32.mrb[48].mxu0 }
0x34eb   : > { %v6564_v43 = vadd.f32 %v9160_v37, %v6563_v9  ;;  %v10192_v27 = vpop.f32.mrb[49].mxu0  ;;  %v10795_v37 = vpack.c.bf16 %v6689_v35, %v6688_v4  ;;  %v9166_v9 = vld [vmem:[%s12964_s3] ss:$0 sm:$0xff]  ;;  %v9183_v4 = vld [vmem:[%s12951_s15 + $0x110] sm:$0xff]  ;;  %v9184_v35 = vld [vmem:[%s12951_s15 + $0x118] sm:$0xff]  ;;  %s12986_s3 = smov 48  }
0x34ed   : > { %v6567_v60 = vadd.f32 %v6564_v43, %v6240_v26  ;;  %v6599_v26 = vld [vmem:[%s12962_s26 + $0x10] sm:$0xff]  ;;  %10796 = vmatpush3.bf16.msra.mxu0 %v10795_v37  ;;  %v10807_v37 = vpack.c.bf16 %v9184_v35, %v9183_v4 }
0x34ee   : > { %v10783_v32 = vpack.c.bf16 %v6600_v51, %v6599_v26 }
0x34ef   : > { %v6570_v54 = vsel %vm3118_vm8, %v6567_v60, 0.0 }
0x34f0   : > { %6571 = vadd.xlane.f32.xlu0 %v6570_v54  ;;  %10784 = vmatpush3.bf16.msra.mxu1 %v10783_v32 }
0x34f1   : > { %10797 = vmatprep.subr.bf16.mxu1 %v11303_v0 }
0x357d   : > { %v6572_v16 = vpop.xlane.xlu0 %6571 }
0x357e   : > { %v6573_v25 = vmul.f32 0.03125, %v6572_v16  ;;  %v9168_v16 = vld [vmem:[%s12965_s5] ss:$0 sm:$0xff] }
0x3580   : > { %v6574_v14 = vsub.f32 %v6567_v60, %v6573_v25 }
0x3582   : > { %v6575_v39 = vmul.f32 %v6574_v14, %v6574_v14 }
0x3584   : > { %v6576_v59 = vsel %vm3118_vm8, %v6575_v39, 0.0 }
0x3585   : > { %6577 = vadd.xlane.f32.xlu1 %v6576_v59 }
0x3612   : > { %v6578_v58 = vpop.xlane.xlu1 %6577 }
0x3613   : > { %v6579_v3 = vmul.f32 0.03125, %v6578_v58  ;;  %v9172_v58 = vld [vmem:[%s12960_s18 + $0x2] ss:$0 sm:$0xff] }
0x3615   : > { %v6580_v31 = vadd.f32 1e-05, %v6579_v3 }
0x3617   : > { %11157 = vrsqrt.f32 %v6580_v31  ;;  %v9173_v31 = vld [vmem:[%s12961_s22 + $0x2] ss:$0 sm:$0xff] }
0x3621   : > { %v11158_v55 = vpop.eup %11157 }
0x3622   : > { %v6582_v40 = vmul.f32 %v11158_v55, %v6574_v14 }
0x3624   : > { %v6589_v45 = vmul.f32 %v9164_v49, %v6582_v40  ;;  %v9181_v49 = vld [vmem:[%s12951_s15 + $0x100] sm:$0xff]  ;;  %v9182_v40 = vld [vmem:[%s12951_s15 + $0x108] sm:$0xff] }
0x3626   : > { %v6596_v53 = vadd.f32 %v9165_v46, %v6589_v45  ;;  %v10804_v45 = vpack.c.bf16 %v9182_v40, %v9181_v49 }
0x3628   : > { %10202 = vmatmul.mubr.msk.f32.vlgmr.msra.gmra.mrb[60].mxu1 %vm1380_vm1, %v6596_v53 }
0x3629   : > { %10231 = vmatprep.mubr.msk.f32.mxu1 %vm11304_vm4, %v11305_v23 }
0x36fb   : > { %v6677_v43 = vpop.f32.mrb[60].mxu1 }
0x36fc   : > { %v6678_v27 = vadd.f32 %v9166_v9, %v6677_v43  ;;  %v10203_v60 = vpop.f32.mrb[61].mxu1  ;;  %v9179_v9 = vld [vmem:[%s12957_s7 + $0x7] ss:$0 sm:$0xff] }
0x36fd   : > { %v9186_v60 = vld [vmem:[%s12957_s7 + $0x8] ss:$0 sm:$0xff] }
0x36fe   : > { %v6681_v54 = vmax.f32 %v6678_v27, 0.0 }
0x3700   : > { %10221 = vmatmul.mubr.msk.f32.vlgmr.msra.gmra.mrb[50].mxu0 %vm1292_vm0, %v6681_v54 }
0x3701   : > { %10247 = vmatprep.mubr.msk.f32.mxu0 %vm1380_vm1, %v11958_v15  ;;  %v9175_v15 = vld [vmem:[%s12951_s15 + $0xe8] sm:$0xff] }
0x3702   : > { %v10798_v2 = vpack.c.bf16 %v9175_v15, %v9174_v1 }
0x3704   : > { %10799 = vmatpush3.bf16.msra.mxu1 %v10798_v2 }
0x3705   : > { %10800 = vmatprep.subr.bf16.mxu1 %v11303_v0 }
0x3708   : > { %10802 = vmatpush3.bf16.msra.mxu1 %v10801_v7  ;;  %v9189_v7 = vld [vmem:[%s12958_s11 + $0x48] sm:$0xff] }
0x3709   : > { %10803 = vmatprep.subr.bf16.mxu1 %v11303_v0 }
0x37d3   : > { %v6766_v25 = vpop.f32.mrb[50].mxu0 }
0x37d4   : > { %v6767_v14 = vadd.f32 %v9168_v16, %v6766_v25  ;;  %v10222_v39 = vpop.f32.mrb[51].mxu0 }
0x37d6   : > { %v6770_v59 = vadd.f32 %v6767_v14, %v6596_v53 }
0x37d8   : > { %v6773_v61 = vsel %vm3118_vm8, %v6770_v59, 0.0 }
0x37d9   : > { %6774 = vadd.xlane.f32.xlu0 %v6773_v61 }
0x3866   : > { %v6775_v63 = vpop.xlane.xlu0 %6774 }
0x3867   : > { %v6776_v6 = vmul.f32 0.03125, %v6775_v63 }
0x3869   : > { %v6777_v26 = vsub.f32 %v6770_v59, %v6776_v6 }
0x386b   : > { %v6778_v51 = vmul.f32 %v6777_v26, %v6777_v26 }
0x386d   : > { %v6779_v32 = vsel %vm3118_vm8, %v6778_v51, 0.0 }
0x386e   : > { %6780 = vadd.xlane.f32.xlu1 %v6779_v32 }
0x38fb   : > { %v6781_v5 = vpop.xlane.xlu1 %6780 }
0x38fc   : > { %v6782_v17 = vmul.f32 0.03125, %v6781_v5  ;;  %v9190_v5 = vld [vmem:[%s12958_s11 + $0x50] sm:$0xff] }
0x38fe   : > { %v6783_v52 = vadd.f32 1e-05, %v6782_v17  ;;  %v10809_v17 = vpack.c.bf16 %v9189_v7, %v9188_v38  ;;  %v9221_v38 = vld [vmem:[%s12951_s15 + $0x160] sm:$0xff]  ;;  %v9222_v7 = vld [vmem:[%s12951_s15 + $0x168] sm:$0xff] }
0x3900   : > { %11159 = vrsqrt.f32 %v6783_v52  ;;  %v9191_v52 = vld [vmem:[%s12958_s11 + $0x58] sm:$0xff] }
0x390a   : > { %v11160_v50 = vpop.eup %11159 }
0x390b   : > { %v6785_v3 = vmul.f32 %v11160_v50, %v6777_v26  ;;  %v10813_v50 = vpack.c.bf16 %v9191_v52, %v9190_v5  ;;  %v10831_v5 = vpack.c.bf16 %v9222_v7, %v9221_v38  ;;  %v9214_v52 = vld [vmem:[%s12951_s15 + $0x148] sm:$0xff] }
0x390d   : > { %v6792_v55 = vmul.f32 %v9172_v58, %v6785_v3 }
0x390f   : > { %v12490_v46 = vadd.f32 %v9173_v31, %v6792_v55  ;;  %v9206_v31 = vld [vmem:[%s12951_s15 + $0x120] sm:$0xff]  ;;  %v9207_v55 = vld [vmem:[%s12951_s15 + $0x128] sm:$0xff] }
0x3910   : > { %v10818_v4 = vpack.c.bf16 %v9207_v55, %v9206_v31  ;;  %v9215_v31 = vld [vmem:[%s12951_s15 + $0x150] sm:$0xff]  ;;  %v9216_v55 = vld [vmem:[%s12951_s15 + $0x158] sm:$0xff] }
0x3911   : > { %v12494_v53 = vadd.f32 %v12270_v42, %v12490_v46 }
0x3913   : > { %10232 = vmatmul.mubr.msk.f32.vlgmr.msra.gmra.mrb[62].mxu1 %vm1380_vm1, %v12494_v53 }
0x3914   : > { %10805 = vmatpush3.bf16.msra.mxu1 %v10804_v45  ;;  %10242 = vmatprep.mubr.msk.f32.mxu1 %vm11304_vm4, %v11305_v23 }
0x3915   : > { %10806 = vmatprep.subr.bf16.mxu1 %v11303_v0 }
0x3918   : > { %10808 = vmatpush3.bf16.msra.mxu1 %v10807_v37  ;;  %v9208_v37 = vld [vmem:[%s12951_s15 + $0x130] sm:$0xff] }
0x391b   : > { %10243 = vmatmul.mubr.msk.f32.vlgmr.msra.gmra.mrb[64].mxu1 %vm1380_vm1, %v12490_v46 }
0x39e6   : > { %v6881_v42 = vpop.f32.mrb[62].mxu1 }
0x39e7   : > { %v6882_v43 = vadd.f32 %v9179_v9, %v6881_v42  ;;  %v10233_v27 = vpop.f32.mrb[63].mxu1  ;;  %v9209_v9 = vld [vmem:[%s12951_s15 + $0x138] sm:$0xff] }
0x39e8   : > { %v10821_v42 = vpack.c.bf16 %v9209_v9, %v9208_v37 }
0x39e9   : > { %10245 = vmatprep.subr.msk.mxu0 %vm1380_vm1, %v6882_v43 }
0x39ea   : > { %10246 = vmatpush3.xpose.msk.msra.mxu0 %vm1380_vm1, %v6882_v43 }
0x39eb   : > { %10810 = vmatprep.subr.bf16.mxu0 %v10809_v17 }
0x39ed   : > { %10248 = vmatmul.mubr.msk.f32.vlgmr.msra.gmra.mrb[52].mxu0 %vm1380_vm1, %v11852_v47 }
0x39ee   : > { %v6965_v54 = vpop.f32.mrb[64].mxu1  ;;  %10812 = vmatpush3.bf16.msra.mxu0 %v10809_v17  ;;  %v9213_v17 = vld [vmem:[%s12951_s15 + $0x140] sm:$0xff] }
0x39ef   : > { %v6966_v16 = vadd.f32 %v9186_v60, %v6965_v54  ;;  %v10244_v25 = vpop.f32.mrb[65].mxu1  ;;  %10814 = vmatprep.subr.bf16.mxu0 %v10813_v50 }
0x39f1   : > { %10250 = vmatprep.subr.msk.mxu1 %vm2962_vm6, %v6966_v16 }
0x39f2   : > { %10251 = vmatpush3.msk.msra.mxu1 %vm2962_vm6, %v6966_v16  ;;  %10816 = vmatpush3.bf16.msra.mxu0 %v10813_v50  ;;  %v9199_v16 = vld [vmem:[%s12959_s16 + $0x2] ss:$0 sm:$0xff]  ;;  %v9223_v50 = vld [vmem:[%s12951_s15 + $0x170] sm:$0xff]  ;;  %vm12990_vm6 = vcmask 64512  }
0x39f3   : > { %10817 = vmatprep.subr.bf16.mxu1 %v11303_v0 }
0x3ac0   : > { %v10249_v14 = vpop.f32.mrb[52].mxu0 }
0x3ac1   : > { %v7043_v39 = vpop.f32.mrb[53].mxu0  ;;  %v7055_v59 = vsel %vm2958_vm7, %v10249_v14, -inf }
0x3ac2   : > { %7056 = vmax.xlane.f32.xlu1 %v7055_v59  ;;  %v7052_v61 = vsel %vm2958_vm7, %v7043_v39, -inf }
0x3ac3   : > { %7053 = vmax.xlane.f32.xlu0 %v7052_v61 }
0x3b4f   : > { %v7057_v47 = vpop.xlane.xlu1 %7056 }
0x3b50   : > { %v7059_v63 = vsub.f32 %v10249_v14, %v7057_v47  ;;  %v7054_v6 = vpop.xlane.xlu0 %7053 }
0x3b51   : > { %v7058_v26 = vsub.f32 %v7043_v39, %v7054_v6 }
0x3b52   : > { %v7062_v51 = vmul.f32 1.442695, %v7059_v63 }
0x3b53   : > { %v7060_v32 = vmul.f32 1.442695, %v7058_v26 }
0x3b54   : > { %11161 = vpow2.f32 %v7062_v51 }
0x3b55   : > { %11163 = vpow2.f32 %v7060_v32 }
0x3b5e   : > { %v11162_v1 = vpop.eup %11161 }
0x3b5f   : > { %v11164_v15 = vpop.eup %11163  ;;  %v7067_v2 = vsel %vm2958_vm7, %v11162_v1, 0.0 }
0x3b60   : > { %7068 = vadd.xlane.f32.xlu1 %v7067_v2  ;;  %v7064_v36 = vsel %vm2958_vm7, %v11164_v15, 0.0 }
0x3b61   : > { %7065 = vadd.xlane.f32.xlu0 %v7064_v36 }
0x3bed   : > { %v7069_v58 = vpop.xlane.xlu1 %7068 }
0x3bee   : > { %11165 = vrcp.f32 %v7069_v58  ;;  %v7066_v3 = vpop.xlane.xlu0 %7065  ;;  %v10823_v58 = vpack.c.bf16 %v9214_v52, %v9213_v17  ;;  %v9211_v52 = vld [vmem:[%s12957_s7 + $0x9] ss:$0 sm:$0xff] }
0x3bef   : > { %11167 = vrcp.f32 %v7066_v3  ;;  %v9224_v3 = vld [vmem:[%s12951_s15 + $0x178] sm:$0xff] }
0x3bf0   : > { %10824 = vmatprep.subr.bf16.mxu0 %v10823_v58 }
0x3bf8   : > { %v11166_v49 = vpop.eup %11165 }
0x3bf9   : > { %v11168_v40 = vpop.eup %11167  ;;  %v7073_v35 = vmul.f32 %v11166_v49, %v11162_v1  ;;  %v10835_v49 = vpack.c.bf16 %v9224_v3, %v9223_v50 }
0x3bfa   : > { %v7072_v45 = vmul.f32 %v11168_v40, %v11164_v15  ;;  %v10827_v40 = vpack.c.bf16 %v9216_v55, %v9215_v31 }
0x3bfc   : > { %10252 = vmatprep.mubr.msk.f32.mxu1 %vm2958_vm7, %v7072_v45 }
0x3bfd   : > { %10253 = vmatmul.mubr.msk.f32.vlgmr.msra.gmra.mrb[66].mxu1 %vm2958_vm7, %v7073_v35  ;;  %vm12991_vm7 = vcmask 97280  }
0x3bfe   : > { %10819 = vmatpush3.bf16.msra.mxu1 %v10818_v4  ;;  %10274 = vmatprep.mubr.msk.f32.mxu1 %vm11304_vm4, %v11305_v23 }
0x3bff   : > { %10820 = vmatprep.subr.bf16.mxu1 %v11303_v0 }
0x3c02   : > { %10822 = vmatpush3.bf16.msra.mxu1 %v10821_v42 }
0x3c03   : > { %10832 = vmatprep.subr.bf16.mxu1 %v10831_v5 }
0x3c05   : > { %10275 = vmatmul.mubr.msk.f32.vlgmr.msra.gmra.mrb[68].mxu1 %vm1380_vm1, %v12494_v53 }
0x3c06   : > { %10834 = vmatpush3.bf16.msra.mxu1 %v10831_v5 }
0x3c07   : > { %10836 = vmatprep.subr.bf16.mxu1 %v10835_v49 }
0x3c0a   : > { %10838 = vmatpush3.bf16.msra.mxu1 %v10835_v49 }
0x3c0b   : > { %10843 = vmatprep.subr.bf16.mxu1 %v11303_v0 }
0x3cd0   : > { %v10254_v43 = vpop.f32.mrb[66].mxu1 }
0x3cd1   : > { %v7149_v27 = vpop.f32.mrb[67].mxu1 }
0x3cd2   : > { %10263 = vmatprep.mubr.msk.f32.mxu0 %vm1380_vm1, %v7149_v27  ;;  %v9204_v27 = vld [vmem:[%s12960_s18 + $0x3] ss:$0 sm:$0xff] }
0x3cd3   : > { %10264 = vmatmul.mubr.msk.f32.vlgmr.msra.gmra.mrb[54].mxu0 %vm1380_vm1, %v10254_v43 }
0x3cd4   : > { %10826 = vmatpush3.bf16.msra.mxu0 %v10823_v58 }
0x3cd5   : > { %10828 = vmatprep.subr.bf16.mxu0 %v10827_v40 }
0x3cd8   : > { %v12535_v60 = vpop.f32.mrb[68].mxu1  ;;  %10830 = vmatpush3.bf16.msra.mxu0 %v10827_v40 }
0x3cd9   : > { %v10276_v54 = vpop.f32.mrb[69].mxu1  ;;  %10839 = vmatprep.subr.bf16.mxu0 %v11303_v0  ;;  %v7371_v50 = vadd.f32 %v9211_v52, %v12535_v60 }
0x3da6   : > { %v10265_v25 = vpop.f32.mrb[54].mxu0 }
0x3da7   : > { %v7242_v14 = vadd.f32 %v10265_v25, %v9199_v16  ;;  %v7236_v39 = vpop.f32.mrb[55].mxu0  ;;  %v9205_v25 = vld [vmem:[%s12961_s22 + $0x3] ss:$0 sm:$0xff] }
0x3da8   : > { %v7237_v59 = vadd.f32 %v9199_v16, %v7236_v39 }
0x3da9   : > { %v7246_v61 = vadd.f32 %v7242_v14, %v11786_v8 }
0x3daa   : > { %v7245_v47 = vadd.f32 %v7237_v59, %v11794_v11 }
0x3dab   : > { %v7252_v53 = vsel %vm1380_vm1, %v7246_v61, 0.0 }
0x3dac   : > { %7253 = vadd.xlane.f32.xlu1 %v7252_v53  ;;  %v7249_v63 = vsel %vm1380_vm1, %v7245_v47, 0.0  ;;  %v11187_v53 = vld [vmem:[%s12955_s23] sm:$0xff] }
0x3dad   : > { %7250 = vadd.xlane.f32.xlu0 %v7249_v63 }
0x3e39   : > { %v7254_v6 = vpop.xlane.xlu1 %7253 }
0x3e3a   : > { %v7256_v26 = vmul.f32 0.03125, %v7254_v6  ;;  %v7251_v51 = vpop.xlane.xlu0 %7250  ;;  %v11188_v6 = vld [vmem:[%s12955_s23 + $0x8] sm:$0xff] }
0x3e3b   : > { %v7255_v32 = vmul.f32 0.03125, %v7251_v51  ;;  %v9226_v51 = vld [vmem:[%s12957_s7 + $0xb] ss:$0 sm:$0xff] }
0x3e3c   : > { %v7258_v1 = vsub.f32 %v7246_v61, %v7256_v26 }
0x3e3d   : > { %v7257_v8 = vsub.f32 %v7245_v47, %v7255_v32 }
0x3e3e   : > { %v7260_v11 = vmul.f32 %v7258_v1, %v7258_v1 }
0x3e3f   : > { %v7259_v15 = vmul.f32 %v7257_v8, %v7257_v8 }
0x3e40   : > { %v7264_v2 = vsel %vm1380_vm1, %v7260_v11, 0.0 }
0x3e41   : > { %7265 = vadd.xlane.f32.xlu1 %v7264_v2  ;;  %v7261_v36 = vsel %vm1380_vm1, %v7259_v15, 0.0 }
0x3e42   : > { %7262 = vadd.xlane.f32.xlu0 %v7261_v36 }
0x3ece   : > { %v7266_v45 = vpop.xlane.xlu1 %7265 }
0x3ecf   : > { %v7268_v4 = vmul.f32 0.03125, %v7266_v45  ;;  %v7263_v35 = vpop.xlane.xlu0 %7262 }
0x3ed0   : > { %v7267_v37 = vmul.f32 0.03125, %v7263_v35  ;;  %v9230_v35 = vld [vmem:[%s12958_s11 + $0x68] sm:$0xff] }
0x3ed1   : > { %v7270_v9 = vadd.f32 1e-05, %v7268_v4  ;;  %v9229_v4 = vld [vmem:[%s12958_s11 + $0x60] sm:$0xff] }
0x3ed2   : > { %v7269_v42 = vadd.f32 1e-05, %v7267_v37 }
0x3ed3   : > { %11169 = vrsqrt.f32 %v7270_v9  ;;  %v10847_v9 = vpack.c.bf16 %v9230_v35, %v9229_v4  ;;  %v9248_v4 = vld [vmem:[%s12966_s8 + $0x38] sm:$0xff] }
0x3ed4   : > { %11171 = vrsqrt.f32 %v7269_v42 }
0x3edd   : > { %v11170_v43 = vpop.eup %11169 }
0x3ede   : > { %v11172_v54 = vpop.eup %11171  ;;  %v7274_v16 = vmul.f32 %v11170_v43, %v7258_v1  ;;  %v9218_v1 = vld [vmem:[%s12957_s7 + $0xa] ss:$0 sm:$0xff]  ;;  %v9231_v43 = vld [vmem:[%s12958_s11 + $0x70] sm:$0xff] }
0x3edf   : > { %v7273_v14 = vmul.f32 %v11172_v54, %v7257_v8 }
0x3ee0   : > { %v7282_v39 = vmul.f32 %v9204_v27, %v7274_v16 }
0x3ee1   : > { %v7281_v59 = vmul.f32 %v9204_v27, %v7273_v14  ;;  %v9232_v27 = vld [vmem:[%s12958_s11 + $0x78] sm:$0xff]  ;;  %v9238_v14 = vld [vmem:[%s12959_s16 + $0x3] ss:$0 sm:$0xff] }
0x3ee2   : > { %v12556_v61 = vadd.f32 %v9205_v25, %v7282_v39  ;;  %v10850_v54 = vpack.c.bf16 %v9232_v27, %v9231_v43  ;;  %v7994_v43 = vld [vmem:[%s12968_s10] sm:$0xff]  ;;  %v7995_v27 = vld [vmem:[%s12968_s10 + $0x8] sm:$0xff] }
0x3ee3   : > { %v12558_v47 = vadd.f32 %v9205_v25, %v7281_v59 }
0x3ee4   : > { %v7292_v26 = vadd.f32 %v11188_v6, %v12556_v61 }
0x3ee5   : > { %10296 = vmatprep.mubr.msk.f32.mxu1 %vm1380_vm1, %v12558_v47  ;;  %v7291_v63 = vadd.f32 %v11187_v53, %v12558_v47 }
0x3ee6   : > { %10297 = vmatmul.mubr.msk.f32.vlgmr.msra.gmra.mrb[70].mxu1 %vm1380_vm1, %v12556_v61 }
0x3ee7   : > { %10285 = vmatprep.mubr.msk.f32.mxu0 %vm1380_vm1, %v7291_v63  ;;  %10310 = vmatprep.mubr.msk.f32.mxu1 %vm11304_vm4, %v11305_v23 }
0x3ee8   : > { %10286 = vmatmul.mubr.msk.f32.vlgmr.msra.gmra.mrb[56].mxu0 %vm1380_vm1, %v7292_v26 }
0x3ee9   : > { %10303 = vmatprep.mubr.msk.f32.mxu0 %vm11304_vm4, %v11305_v23 }
0x3fb9   : > { %v10298_v32 = vpop.f32.mrb[70].mxu1 }
0x3fba   : > { %v7555_v8 = vadd.f32 %v10298_v32, %v9226_v51  ;;  %v7549_v11 = vpop.f32.mrb[71].mxu1 }
0x3fbb   : > { %v7550_v15 = vadd.f32 %v9226_v51, %v7549_v11  ;;  %v10287_v2 = vpop.f32.mrb[56].mxu0  ;;  %v7835_v11 = vld [vmem:[%s12966_s8] sm:$0xff] }
0x3fbc   : > { %v7463_v36 = vadd.f32 %v10287_v2, %v9218_v1  ;;  %v7457_v38 = vpop.f32.mrb[57].mxu0 }
0x3fbd   : > { %v10844_v7 = vpack.c.bf16 %v7555_v8, %v7550_v15  ;;  %v7458_v5 = vadd.f32 %v9218_v1, %v7457_v38  ;;  %v7836_v15 = vld [vmem:[%s12966_s8 + $0x8] sm:$0xff]  ;;  %v7838_v38 = vld [vmem:[%s12966_s8 + $0x18] sm:$0xff] }
0x3fbe   : > { %v10853_v2 = vpack.c.bf16 %v7836_v15, %v7835_v11  ;;  %v8178_v15 = vld [vmem:[%s12970_s14 + $0x10] sm:$0xff] }
0x3fbf   : > { %v10840_v17 = vpack.c.bf16 %v7463_v36, %v7458_v5  ;;  %10845 = vmatpush3.bf16.msra.mxu1 %v10844_v7  ;;  %v7837_v36 = vld [vmem:[%s12966_s8 + $0x10] sm:$0xff]  ;;  %v9245_v7 = vld [vmem:[%s12966_s8 + $0x20] sm:$0xff]  ;;  %v9246_v5 = vld [vmem:[%s12966_s8 + $0x28] sm:$0xff] }
0x3fc0   : > { %10846 = vmatprep.subr.bf16.mxu1 %v11303_v0 }
0x3fc1   : > { %10842 = vmatpush3.bf16.xpose.msk.msra.mxu0 %vm11706_vm2, %v10840_v17  ;;  %vm12973_vm2 = vmmov %vm12972_vm5  ;;  %v10859_v17 = vpack.c.bf16 %v9246_v5, %v9245_v7  ;;  %v9252_v7 = vld [vmem:[#allocation2] ss:$0 sm:$0xff]  ;;  %vm12994_vm5 = vcmask 195584  }
0x3fc2   : > { %10852 = vmatprep.subr.bf16.mxu0 %v11303_v0 }
0x3fc8   : > { %10304 = vmatmul.mubr.msk.f32.vlgmr.msra.gmra.mrb[58].mxu0 %vm1380_vm1, %v7371_v50 }
0x3fc9   : > { %10332 = vmatprep.mubr.msk.f32.mxu0 %vm11304_vm4, %v11305_v23  ;;  %10854 = vmatpush3.bf16.msra.mxu0 %v10853_v2  ;;  %v8179_v2 = vld [vmem:[%s12970_s14 + $0x18] sm:$0xff] }
0x3fca   : > { %10855 = vmatprep.subr.bf16.mxu0 %v11303_v0 }
0x409b   : > { %v7638_v58 = vpop.f32.mrb[58].mxu0 }
0x409c   : > { %v10305_v3 = vpop.f32.mrb[59].mxu0  ;;  %v7642_v31 = vsel %vm3319_vm9, %v7638_v58, -inf }
0x409d   : > { %7643 = vmax.xlane.f32.xlu0 %v7642_v31  ;;  %v9242_v31 = vld [vmem:[%s12960_s18 + $0x4] ss:$0 sm:$0xff] }
0x412a   : > { %v7644_v44 = vpop.xlane.xlu0 %7643 }
0x412b   : > { %v7645_v55 = vsub.f32 %v7638_v58, %v7644_v44 }
0x412d   : > { %v7646_v49 = vmul.f32 1.442695, %v7645_v55  ;;  %v9243_v55 = vld [vmem:[%s12961_s22 + $0x4] ss:$0 sm:$0xff] }
0x412f   : > { %11173 = vpow2.f32 %v7646_v49 }
0x4139   : > { %v11174_v40 = vpop.eup %11173 }
0x413a   : > { %v7648_v60 = vsel %vm3319_vm9, %v11174_v40, 0.0  ;;  %vm12993_vm9 = vcmask 162816  }
0x413b   : > { %7649 = vadd.xlane.f32.xlu1 %v7648_v60 }
0x41c8   : > { %v7650_v45 = vpop.xlane.xlu1 %7649 }
0x41c9   : > { %11175 = vrcp.f32 %v7650_v45  ;;  %v9247_v45 = vld [vmem:[%s12966_s8 + $0x30] sm:$0xff] }
0x41ca   : > { %v10862_v35 = vpack.c.bf16 %v9248_v4, %v9247_v45 }
0x41d3   : > { %v11176_v37 = vpop.eup %11175 }
0x41d4   : > { %v7652_v42 = vmul.f32 %v11176_v37, %v11174_v40  ;;  %v8072_v37 = vld [vmem:[%s12967_s9] sm:$0xff] }
0x41d6   : > { %10311 = vmatmul.mubr.msk.f32.vlgmr.msra.gmra.mrb[72].mxu1 %vm12973_vm2, %v7652_v42 }
0x41d7   : > { %10848 = vmatpush3.bf16.msra.mxu1 %v10847_v9  ;;  %10321 = vmatprep.mubr.msk.f32.mxu1 %vm11304_vm4, %v11305_v23  ;;  %v8073_v9 = vld [vmem:[%s12967_s9 + $0x8] sm:$0xff] }
0x41d8   : > { %10849 = vmatprep.subr.bf16.mxu1 %v11303_v0  ;;  %v10870_v42 = vpack.c.bf16 %v8073_v9, %v8072_v37 }
0x41db   : > { %10851 = vmatpush3.bf16.msra.mxu1 %v10850_v54  ;;  %v10865_v54 = vpack.c.bf16 %v7995_v27, %v7994_v43 }
0x41dc   : > { %10858 = vmatprep.subr.bf16.mxu1 %v11303_v0 }
0x42a9   : > { %v7722_v16 = vpop.f32.mrb[72].mxu1 }
0x42aa   : > { %v10312_v25 = vpop.f32.mrb[73].mxu1  ;;  %10322 = vmatmul.mubr.msk.f32.vlgmr.msra.gmra.mrb[74].mxu1 %vm1380_vm1, %v7722_v16  ;;  %v7839_v16 = vld [vmem:[%s12969_s12] sm:$0x1] }
0x42ab   : > { %10343 = vmatprep.mubr.msk.f32.mxu1 %vm11304_vm4, %v11305_v23  ;;  %10860 = vmatpush3.bf16.msra.mxu1 %v10859_v17  ;;  %v8074_v25 = vld [vmem:[%s12967_s9 + $0x10] sm:$0xff] }
0x42ac   : > { %10861 = vmatprep.subr.bf16.mxu1 %v11303_v0 }
0x42af   : > { %10863 = vmatpush3.bf16.msra.mxu1 %v10862_v35 }
0x42b0   : > { %10871 = vmatprep.subr.bf16.mxu1 %v10870_v42 }
0x437d   : > { %v7801_v39 = vpop.f32.mrb[74].mxu1 }
0x437e   : > { %v7802_v59 = vadd.f32 %v9238_v14, %v7801_v39  ;;  %v10323_v53 = vpop.f32.mrb[75].mxu1  ;;  %v8075_v14 = vld [vmem:[%s12967_s9 + $0x18] sm:$0xff] }
0x4380   : > { %v7805_v63 = vadd.f32 %v7802_v59, %v12490_v46  ;;  %v10856_v46 = vpack.c.bf16 %v7838_v38, %v7837_v36 }
0x4382   : > { %v7808_v6 = vsel %vm3118_vm8, %v7805_v63, 0.0  ;;  %10857 = vmatpush3.bf16.msra.mxu0 %v10856_v46  ;;  %v10882_v46 = vpack.c.bf16 %v8179_v2, %v8178_v15 }
0x4383   : > { %7809 = vadd.xlane.f32.xlu0 %v7808_v6  ;;  %10864 = vmatprep.subr.bf16.mxu0 %v11303_v0  ;;  %v7997_v6 = vld [vmem:[%s12968_s10 + $0x18] sm:$0xff] }
0x4410   : > { %v7810_v26 = vpop.xlane.xlu0 %7809 }
0x4411   : > { %v7811_v51 = vmul.f32 0.03125, %v7810_v26 }
0x4413   : > { %v7812_v32 = vsub.f32 %v7805_v63, %v7811_v51  ;;  %v10874_v63 = vpack.c.bf16 %v8075_v14, %v8074_v25  ;;  %v8176_v51 = vld [vmem:[%s12970_s14] sm:$0xff] }
0x4415   : > { %v7813_v1 = vmul.f32 %v7812_v32, %v7812_v32 }
0x4417   : > { %v7814_v8 = vsel %vm3118_vm8, %v7813_v1, 0.0  ;;  %vm12992_vm8 = vmmov %vm12973_vm2  ;;  %vm12995_vm2 = vcmask 228352  }
0x4418   : > { %7815 = vadd.xlane.f32.xlu1 %v7814_v8  ;;  %v9249_v8 = vld [vmem:[%s12969_s12 + $0x1] sm:$0x1] }
0x44a5   : > { %v7816_v52 = vpop.xlane.xlu1 %7815 }
0x44a6   : > { %v7817_v50 = vmul.f32 0.03125, %v7816_v52 }
0x44a8   : > { %v7818_v58 = vadd.f32 1e-05, %v7817_v50 }
0x44aa   : > { %11177 = vrsqrt.f32 %v7818_v58 }
0x44b4   : > { %v11178_v3 = vpop.eup %11177 }
0x44b5   : > { %v7820_v44 = vmul.f32 %v11178_v3, %v7812_v32  ;;  %v8177_v32 = vld [vmem:[%s12970_s14 + $0x8] sm:$0xff] }
0x44b6   : > { %v10878_v1 = vpack.c.bf16 %v8177_v32, %v8176_v51  ;;  %v8358_v51 = vld [vmem:[%s11532_s4 + $0x28] sm:$0xff] }
0x44b7   : > { %v7827_v49 = vmul.f32 %v9242_v31, %v7820_v44 }
0x44b9   : > { %v7834_v40 = vadd.f32 %v9243_v55, %v7827_v49 }
0x44bb   : > { %v7841_v60 = vrot.slane %v7834_v40, 1 }
0x44bd   : > { %10333 = vmatmul.mubr.msk.f32.vlgmr.msra.gmra.mrb[60].mxu0 %vm1380_vm1, %v7841_v60 }
0x44be   : > { %10354 = vmatprep.mubr.msk.f32.mxu0 %vm11304_vm4, %v11305_v23  ;;  %10866 = vmatpush3.bf16.msra.mxu0 %v10865_v54  ;;  %vm12989_vm4 = vcmask 31744  }
0x44bf   : > { %10867 = vmatprep.subr.bf16.mxu0 %v11303_v0  ;;  %v7996_v0 = vld [vmem:[%s12968_s10 + $0x10] sm:$0xff] }
0x44c0   : > { %v10868_v26 = vpack.c.bf16 %v7997_v6, %v7996_v0  ;;  %v8356_v0 = vld [vmem:[%s11532_s4 + $0x18] sm:$0xff] }
0x44c2   : > { %10869 = vmatpush3.bf16.msra.mxu0 %v10868_v26  ;;  %v8357_v26 = vld [vmem:[%s11532_s4 + $0x20] sm:$0xff] }
0x44c3   : > { %10879 = vmatprep.subr.bf16.mxu0 %v10878_v1  ;;  %v10894_v32 = vpack.c.bf16 %v8358_v51, %v8357_v26 }
0x4590   : > { %v7910_v23 = vpop.f32.mrb[60].mxu0 }
0x4591   : > { %v7911_v39 = vadd.f32 %v7910_v23, %v7839_v16  ;;  %v10334_v59 = vpop.f32.mrb[61].mxu0  ;;  %v7998_v16 = vld [vmem:[%s12971_s17] sm:$0x1] }
0x4592   : > { %v8354_v59 = vld [vmem:[%s11532_s4 + $0x8] sm:$0xff] }
0x4593   : > { %v7914_v53 = vmax.f32 %v7911_v39, 0.0  ;;  %v8353_v39 = vld [vmem:[%s11532_s4] sm:$0xff] }
0x4595   : > { %10344 = vmatmul.mubr.msk.f32.vlgmr.msra.gmra.mrb[76].mxu1 %vm1380_vm1, %v7914_v53  ;;  %v10886_v53 = vpack.c.bf16 %v8354_v59, %v8353_v39 }
0x4596   : > { %10873 = vmatpush3.bf16.msra.mxu1 %v10870_v42  ;;  %10365 = vmatprep.mubr.msk.f32.mxu1 %vm1380_vm1, %v12558_v47 }
0x4597   : > { %10875 = vmatprep.subr.bf16.mxu1 %v10874_v63 }
0x459a   : > { %10877 = vmatpush3.bf16.msra.mxu1 %v10874_v63  ;;  %v8355_v63 = vld [vmem:[%s11532_s4 + $0x10] sm:$0xff] }
0x459b   : > { %10887 = vmatprep.subr.bf16.mxu1 %v10886_v53  ;;  %v10890_v6 = vpack.c.bf16 %v8356_v0, %v8355_v63 }
0x459d   : > { %10366 = vmatmul.mubr.msk.f32.vlgmr.msra.gmra.mrb[78].mxu1 %vm1380_vm1, %v12556_v61 }
0x459e   : > { %10889 = vmatpush3.bf16.msra.mxu1 %v10886_v53 }
0x459f   : > { %10891 = vmatprep.subr.bf16.mxu1 %v10890_v6 }
0x45a2   : > { %10893 = vmatpush3.bf16.msra.mxu1 %v10890_v6 }
0x45a3   : > { %10895 = vmatprep.subr.bf16.mxu1 %v10894_v32 }
0x45a6   : > { %10897 = vmatpush3.bf16.msra.mxu1 %v10894_v32 }
0x4668   : > { %v7989_v11 = vpop.f32.mrb[76].mxu1 }
0x4669   : > { %v7990_v36 = vadd.f32 %v9249_v8, %v7989_v11  ;;  %v10345_v38 = vpop.f32.mrb[77].mxu1  ;;  %v8360_v8 = vld [vmem:[%s11532_s4 + $0x38] sm:$0xff] }
0x466b   : > { %v7993_v47 = vmax.f32 %v7990_v36, 0.0  ;;  %v9255_v36 = vld [vmem:[#allocation4] ss:$0 sm:$0xff] }
0x466d   : > { %10355 = vmatmul.mubr.msk.f32.vlgmr.msra.gmra.mrb[62].mxu0 %vm1380_vm1, %v7993_v47 }
0x466e   : > { %10881 = vmatpush3.bf16.msra.mxu0 %v10878_v1  ;;  %v8359_v1 = vld [vmem:[%s11532_s4 + $0x30] sm:$0xff] }
0x466f   : > { %10883 = vmatprep.subr.bf16.mxu0 %v10882_v46  ;;  %v10898_v11 = vpack.c.bf16 %v8360_v8, %v8359_v1 }
0x4670   : > { %v10367_v61 = vpop.f32.mrb[78].mxu1 }
0x4671   : > { %v8155_v5 = vadd.f32 %v10367_v61, %v9252_v7  ;;  %v8149_v17 = vpop.f32.mrb[79].mxu1  ;;  %10899 = vmatprep.subr.bf16.mxu1 %v10898_v11 }
0x4672   : > { %v8150_v52 = vadd.f32 %v9252_v7, %v8149_v17  ;;  %10885 = vmatpush3.bf16.msra.mxu0 %v10882_v46  ;;  %10901 = vmatpush3.bf16.msra.mxu1 %v10898_v11 }
0x4673   : > { %v8159_v50 = vmul.f32 %v8155_v5, %v8155_v5 }
0x4674   : > { %v8158_v58 = vmul.f32 %v8150_v52, %v8150_v52 }
0x4675   : > { %v8161_v3 = vmul.f32 %v8159_v50, %v8155_v5 }
0x4676   : > { %v8160_v31 = vmul.f32 %v8158_v58, %v8150_v52 }
0x4677   : > { %v8163_v44 = vmul.f32 0.044715, %v8161_v3 }
0x4678   : > { %v8162_v55 = vmul.f32 0.044715, %v8160_v31 }
0x4679   : > { %v8165_v49 = vadd.f32 %v8163_v44, %v8155_v5 }
0x467a   : > { %v8164_v40 = vadd.f32 %v8162_v55, %v8150_v52 }
0x467b   : > { %v8167_v60 = vmul.f32 0.7978846, %v8165_v49 }
0x467c   : > { %v8166_v45 = vmul.f32 0.7978846, %v8164_v40 }
0x467d   : > { %11179 = vtanh.f32 %v8167_v60 }
0x467e   : > { %11181 = vtanh.f32 %v8166_v45 }
0x4687   : > { %v11180_v4 = vpop.eup %11179 }
0x4688   : > { %v11182_v35 = vpop.eup %11181  ;;  %v8171_v37 = vadd.f32 1.0, %v11180_v4 }
0x4689   : > { %v8170_v9 = vadd.f32 1.0, %v11182_v35 }
0x468a   : > { %v8173_v42 = vmul.f32 0.5, %v8171_v37 }
0x468b   : > { %v8172_v43 = vmul.f32 0.5, %v8170_v9 }
0x468c   : > { %v8175_v54 = vmul.f32 %v8173_v42, %v8155_v5 }
0x468d   : > { %v8174_v27 = vmul.f32 %v8172_v43, %v8150_v52 }
0x468f   : > { %10376 = vmatprep.mubr.msk.f32.mxu0 %vm1380_vm1, %v8174_v27 }
0x4690   : > { %10377 = vmatmul.mubr.msk.f32.vlgmr.msra.gmra.mrb[64].mxu0 %vm1380_vm1, %v8175_v54 }
0x4740   : > { %v8068_v23 = vpop.f32.mrb[62].mxu0 }
0x4741   : > { %v8069_v25 = vadd.f32 %v8068_v23, %v7998_v16  ;;  %v10356_v14 = vpop.f32.mrb[63].mxu0 }
0x4743   : > { %8290 = vrot.lane.b32.xlu1 %v8069_v25, %s12974_s0  ;;  %8287 = vrot.lane.b32.xlu0 %v8069_v25, %s12975_s24  ;;  %s12979_s0 = smov 28   ;;  %s12980_s24 = smov 24  }
0x4747   : > { %8293 = vrot.lane.b32.xlu1 %v8069_v25, %s12976_s19  ;;  %8299 = vrot.lane.b32.xlu0 %v8069_v25, %s12977_s20  ;;  %s12981_s19 = smov 36   ;;  %s12982_s20 = smov 32  }
0x474b   : > { %8296 = vrot.lane.b32.xlu1 %v8069_v25, %s12978_s21  ;;  %8305 = vrot.lane.b32.xlu0 %v8069_v25, %s12979_s0  ;;  %s12984_s21 = smov 40   ;;  %s12985_s0 = smov 52  }
0x474f   : > { %8302 = vrot.lane.b32.xlu1 %v8069_v25, %s12980_s24  ;;  %8311 = vrot.lane.b32.xlu0 %v8069_v25, %s12981_s19  ;;  %s12987_s24 = smov 60   ;;  %s12988_s19 = smov 56  }
0x4753   : > { %8308 = vrot.lane.b32.xlu1 %v8069_v25, %s12982_s20  ;;  %8317 = vrot.lane.b32.xlu0 %v8069_v25, %s12983_s2  ;;  %s11338_s2 = smov 96  }
0x4757   : > { %8314 = vrot.lane.b32.xlu1 %v8069_v25, %s12984_s21  ;;  %8323 = vrot.lane.b32.xlu0 %v8069_v25, %s12985_s0  ;;  %s12999_s21 = sshll.u32 %s13001_s1, 4 }
0x4758   : > { %s1256_s0 = scalar_lea.vmem %s11547_s27, %s12999_s21 }
0x475b   : > { %8320 = vrot.lane.b32.xlu1 %v8069_v25, %s12986_s3  ;;  %8329 = vrot.lane.b32.xlu0 %v8069_v25, %s12987_s24  ;;  %s11337_s3 = smov 64  }
0x475f   : > { %8326 = vrot.lane.b32.xlu1 %v8069_v25, %s12988_s19 }
0x4763   : > { %v10378_v15 = vpop.f32.mrb[64].mxu0 }
0x4764   : > { %v8259_v2 = vpop.f32.mrb[65].mxu0  ;;  %v8265_v38 = vadd.f32 %v10378_v15, %v9255_v36 }
0x4765   : > { %v8260_v47 = vadd.f32 %v9255_v36, %v8259_v2 }
0x4766   : > { %v8269_v46 = vmul.f32 %v8265_v38, %v8265_v38 }
0x4767   : > { %v8268_v7 = vmul.f32 %v8260_v47, %v8260_v47 }
0x4768   : > { %v8271_v61 = vmul.f32 %v8269_v46, %v8265_v38 }
0x4769   : > { %v8270_v5 = vmul.f32 %v8268_v7, %v8260_v47 }
0x476a   : > { %v8273_v17 = vmul.f32 0.044715, %v8271_v61 }
0x476b   : > { %v8272_v52 = vmul.f32 0.044715, %v8270_v5 }
0x476c   : > { %v8275_v3 = vadd.f32 %v8273_v17, %v8265_v38 }
0x476d   : > { %v8274_v31 = vadd.f32 %v8272_v52, %v8260_v47 }
0x476e   : > { %v8277_v40 = vmul.f32 0.7978846, %v8275_v3 }
0x476f   : > { %v8276_v60 = vmul.f32 0.7978846, %v8274_v31 }
0x4770   : > { %11183 = vtanh.f32 %v8277_v40 }
0x4771   : > { %11185 = vtanh.f32 %v8276_v60 }
0x477a   : > { %v11184_v39 = vpop.eup %11183 }
0x477b   : > { %v11186_v59 = vpop.eup %11185  ;;  %v8281_v6 = vadd.f32 1.0, %v11184_v39  ;;  %v12779_v39 = vld [vmem:[%s11537_s6 + $0x30] sm:$0xff] }
0x477c   : > { %v8280_v26 = vadd.f32 1.0, %v11186_v59 }
0x477d   : > { %v8283_v11 = vmul.f32 0.5, %v8281_v6 }
0x477e   : > { %v8282_v15 = vmul.f32 0.5, %v8280_v26 }
0x477f   : > { %v8285_v5 = vmul.f32 %v8283_v11, %v8265_v38 }
0x4780   : > { %v8284_v17 = vmul.f32 %v8282_v15, %v8260_v47  ;;  %v12752_v47 = vld [vmem:[%s11537_s6 + $0x18] sm:$0xff] }
0x47b5   : > { %v8291_v50 = vpop.permute.xlu1 %8290  ;;  %v8288_v58 = vpop.permute.xlu0 %8287 }
0x47b6   : > { %v8332_v44 = vsel %vm12989_vm4, %v8069_v25, %v8288_v58 }
0x47b7   : > { %v8333_v45 = vsel %vm12990_vm6, %v8332_v44, %v8291_v50  ;;  %v12755_v44 = vld [vmem:[%s11537_s6 + $0x8] sm:$0xff] }
0x47b9   : > { %v8294_v55 = vpop.permute.xlu1 %8293  ;;  %v8300_v49 = vpop.permute.xlu0 %8299 }
0x47ba   : > { %v8334_v4 = vsel %vm12991_vm7, %v8333_v45, %v8294_v55 }
0x47bd   : > { %v8297_v35 = vpop.permute.xlu1 %8296  ;;  %v8306_v37 = vpop.permute.xlu0 %8305 }
0x47be   : > { %v8335_v9 = vsel %vm12992_vm8, %v8334_v4, %v8297_v35  ;;  %v12764_v4 = vld [vmem:[%s11537_s6 + $0x20] sm:$0xff] }
0x47bf   : > { %v8336_v43 = vsel %vm12993_vm9, %v8335_v9, %v8300_v49  ;;  %v12758_v49 = vld [vmem:[%s11537_s6 + $0x28] sm:$0xff]  ;;  %v12770_v9 = vld [vmem:[%s11537_s6] sm:$0xff] }
0x47c1   : > { %v8303_v42 = vpop.permute.xlu1 %8302  ;;  %v8312_v27 = vpop.permute.xlu0 %8311 }
0x47c2   : > { %v8337_v54 = vsel %vm12994_vm5, %v8336_v43, %v8303_v42 }
0x47c3   : > { %v8338_v23 = vsel %vm12995_vm2, %v8337_v54, %v8306_v37  ;;  %v12767_v37 = vld [vmem:[%s11537_s6 + $0x10] sm:$0xff] }
0x47c5   : > { %v8309_v16 = vpop.permute.xlu1 %8308  ;;  %v8318_v14 = vpop.permute.xlu0 %8317 }
0x47c6   : > { %v8339_v25 = vsel %vm1380_vm1, %v8338_v23, %v8309_v16  ;;  %v12775_v16 = vld [vmem:[%s11537_s6 + $0x38] sm:$0xff] }
0x47c7   : > { %v8340_v63 = vsel %vm5292_vm12, %v8339_v25, %v8312_v27 }
0x47c9   : > { %v8315_v53 = vpop.permute.xlu1 %8314  ;;  %v8324_v51 = vpop.permute.xlu0 %8323 }
0x47ca   : > { %v8341_v0 = vsel %vm5294_vm11, %v8340_v63, %v8315_v53 }
0x47cb   : > { %v8342_v1 = vsel %vm5296_vm13, %v8341_v0, %v8318_v14 }
0x47cd   : > { %v8321_v32 = vpop.permute.xlu1 %8320  ;;  %v8330_v46 = vpop.permute.xlu0 %8329 }
0x47ce   : > { %v8343_v8 = vsel %vm5298_vm10, %v8342_v1, %v8321_v32 }
0x47cf   : > { %v8344_v36 = vsel %vm5300_vm15, %v8343_v8, %v8324_v51 }
0x47d1   : > { %v8327_v2 = vpop.permute.xlu1 %8326 }
0x47d2   : > { %v8345_v7 = vsel %vm5302_vm14, %v8344_v36, %v8327_v2 }
0x47d3   : > { %v8346_v61 = vsel %vm5304_vm3, %v8345_v7, %v8330_v46  ;;  %vm5713_vm3 = vcmask 785408  }
0x47d4   : > { %v8350_v52 = vrot.slane %v8346_v61, %v5308_v62  ;;  %v12997_v62 = vmov 15  }
0x47d6   : > { %v8351_v50 = vmul.f32 %v8350_v52, %v8284_v17  ;;  %v8352_v58 = vmul.f32 %v8350_v52, %v8285_v5 }
0x47d8   : > { %10395 = vmatprep.mubr.msk.f32.mxu1 %vm1292_vm0, %v8351_v50 }
0x47d9   : > { %10396 = vmatmul.mubr.msk.f32.vlgmr.msra.gmra.mrb[80].mxu1 %vm1292_vm0, %v8352_v58 }
0x48ac   : > { %v10397_v3 = vpop.f32.mrb[80].mxu1 }
0x48ad   : > { %8463 = vperm.xlu1 %11056, %v10397_v3   ;;  %8451 = vperm.xlu0 %11055, %v10397_v3   ;;  %v12685_v31 = vpop.f32.mrb[81].mxu1 }
0x48b1   : > { %11057 = vset.pattern.permute.xlu1 %v11323_v12  ;;  %11058 = vset.pattern.permute.xlu0 %v11324_v13 }
0x48b2   : > { %8477 = vperm.xlu1 %11057, %v10397_v3   ;;  %8491 = vperm.xlu0 %11058, %v10397_v3  }
0x48b6   : > { %11059 = vset.pattern.permute.xlu1 %v11325_v20  ;;  %11061 = vset.pattern.permute.xlu0 %v11326_v21 }
0x48b7   : > { %8503 = vperm.xlu1 %11059, %v10397_v3   ;;  %8525 = vperm.xlu0 %11061, %v10397_v3  }
0x48bb   : > { %11060 = vset.pattern.permute.xlu1 %v11327_v34  ;;  %11064 = vset.pattern.permute.xlu0 %v11328_v22 }
0x48bc   : > { %8513 = vperm.xlu1 %11060, %v10397_v3   ;;  %8559 = vperm.xlu0 %11064, %v10397_v3  }
0x48c0   : > { %11062 = vset.pattern.permute.xlu1 %v11329_v41  ;;  %11067 = vset.pattern.permute.xlu0 %v11330_v33 }
0x48c1   : > { %8537 = vperm.xlu1 %11062, %v10397_v3   ;;  %8595 = vperm.xlu0 %11067, %v10397_v3  }
0x48c5   : > { %11063 = vset.pattern.permute.xlu1 %v11331_v48  ;;  %11072 = vset.pattern.permute.xlu0 %v11323_v12  ;;  %v12998_v12 = vmov 1  }
0x48c6   : > { %8549 = vperm.xlu1 %11063, %v10397_v3   ;;  %8473 = vperm.xlu0 %11072, %v12685_v31  }
0x48ca   : > { %11065 = vset.pattern.permute.xlu1 %v11332_v24  ;;  %11075 = vset.pattern.permute.xlu0 %v11327_v34 }
0x48cb   : > { %8571 = vperm.xlu1 %11065, %v10397_v3   ;;  %8509 = vperm.xlu0 %11075, %v12685_v31  }
0x48cf   : > { %11066 = vset.pattern.permute.xlu1 %v11333_v28  ;;  %11078 = vset.pattern.permute.xlu0 %v11331_v48 }
0x48d0   : > { %8583 = vperm.xlu1 %11066, %v10397_v3   ;;  %8545 = vperm.xlu0 %11078, %v12685_v31  }
0x48d4   : > { %11068 = vset.pattern.permute.xlu1 %v11334_v29  ;;  %11081 = vset.pattern.permute.xlu0 %v11333_v28 }
0x48d5   : > { %8605 = vperm.xlu1 %11068, %v10397_v3   ;;  %8579 = vperm.xlu0 %11081, %v12685_v31  }
0x48d9   : > { %11069 = vset.pattern.permute.xlu1 %v11335_v30  ;;  %11084 = vset.pattern.permute.xlu0 %v11335_v30 }
0x48da   : > { %8617 = vperm.xlu1 %11069, %v10397_v3   ;;  %8613 = vperm.xlu0 %11084, %v12685_v31  }
0x48de   : > { %11070 = vset.pattern.permute.xlu1 %v12996_v57  ;;  %11086 = vset.pattern.permute.xlu0 %v12997_v62 }
0x48df   : > { %8629 = vperm.xlu0 %11086, %v10397_v3   ;;  %8446 = vperm.xlu1 %11070, %v12685_v31  }
0x48e3   : > { %5704 = vrot.lane.b32.xlu0 %v12372_v56, %s11337_s3  ;;  %11071 = vset.pattern.permute.xlu1 %v12998_v12 }
0x48e4   : > { %8459 = vperm.xlu1 %11071, %v12685_v31  }
0x48e7   : > { %5708 = vrot.lane.b32.xlu0 %v12370_v19, %s11338_s2 }
0x48e8   : > { %11073 = vset.pattern.permute.xlu1 %v11324_v13  ;;  %v8636_v13 = vld [vmem:[%s11542_s13] sm:$0xff] }
0x48e9   : > { %8487 = vperm.xlu1 %11073, %v12685_v31   ;;  %10414 = vmatprep.mubr.msk.f32.mxu0 %vm1292_vm0, %v8636_v13 }
0x48ed   : > { %11074 = vset.pattern.permute.xlu1 %v11325_v20 }
0x48ee   : > { %8499 = vperm.xlu1 %11074, %v12685_v31  }
0x48f2   : > { %11076 = vset.pattern.permute.xlu1 %v11326_v21 }
0x48f3   : > { %8521 = vperm.xlu1 %11076, %v12685_v31  }
0x48f7   : > { %11077 = vset.pattern.permute.xlu1 %v11329_v41 }
0x48f8   : > { %8533 = vperm.xlu1 %11077, %v12685_v31  }
0x48fc   : > { %11079 = vset.pattern.permute.xlu1 %v11328_v22 }
0x48fd   : > { %8555 = vperm.xlu1 %11079, %v12685_v31  }
0x4901   : > { %11080 = vset.pattern.permute.xlu1 %v11332_v24 }
0x4902   : > { %8567 = vperm.xlu1 %11080, %v12685_v31  }
0x4906   : > { %11082 = vset.pattern.permute.xlu1 %v11330_v33 }
0x4907   : > { %8591 = vperm.xlu1 %11082, %v12685_v31  }
0x490b   : > { %11083 = vset.pattern.permute.xlu1 %v11334_v29 }
0x490c   : > { %8601 = vperm.xlu1 %11083, %v12685_v31  }
0x4910   : > { %11085 = vset.pattern.permute.xlu1 %v12997_v62 }
0x4911   : > { %8625 = vperm.xlu1 %11085, %v12685_v31  }
0x4915   : > { %5700 = vrot.lane.b32.xlu1 %v12366_v18, %s12982_s20 }
0x492c   : > { %v8464_v20 = vpop.permute.xlu1 %8463  ;;  %v8452_v33 = vpop.permute.xlu0 %8451 }
0x492d   : > { %v8467_v40 = vmul.f32 %v12752_v47, %v8464_v20  ;;  %v8455_v60 = vmul.f32 %v8452_v33, %v12755_v44 }
0x492f   : > { %v8469_v54 = vadd.f32 %v8467_v40, %v8455_v60 }
0x4931   : > { %v8478_v21 = vpop.permute.xlu1 %8477  ;;  %v8492_v28 = vpop.permute.xlu0 %8491 }
0x4932   : > { %v8481_v45 = vmul.f32 %v12758_v49, %v8478_v21  ;;  %v8495_v63 = vmul.f32 %v12775_v16, %v8492_v28 }
0x4934   : > { %v8483_v14 = vadd.f32 %v8481_v45, %v8469_v54 }
0x4936   : > { %v8504_v34 = vpop.permute.xlu1 %8503  ;;  %v8526_v30 = vpop.permute.xlu0 %8525  ;;  %v8497_v6 = vadd.f32 %v8495_v63, %v8483_v14 }
0x4937   : > { %v8507_v8 = vmul.f32 %v8504_v34, %v12755_v44  ;;  %v8529_v46 = vmul.f32 %v12758_v49, %v8526_v30 }
0x493b   : > { %v8514_v22 = vpop.permute.xlu1 %8513  ;;  %v8560_v19 = vpop.permute.xlu0 %8559 }
0x493c   : > { %v8517_v1 = vmul.f32 %v12752_v47, %v8514_v22  ;;  %v8563_v22 = vmul.f32 %v12752_v47, %v8560_v19 }
0x493e   : > { %v8519_v15 = vadd.f32 %v8517_v1, %v8507_v8  ;;  %v8637_v8 = vld [vmem:[%s11542_s13 + $0x8] sm:$0xff] }
0x4940   : > { %v8538_v41 = vpop.permute.xlu1 %8537  ;;  %v12749_v38 = vpop.permute.xlu0 %8595  ;;  %v8531_v5 = vadd.f32 %v8529_v46, %v8519_v15 }
0x4941   : > { %v8541_v17 = vmul.f32 %v12775_v16, %v8538_v41 }
0x4943   : > { %v8543_v57 = vadd.f32 %v8541_v17, %v8531_v5 }
0x4945   : > { %v8550_v48 = vpop.permute.xlu1 %8549  ;;  %v8474_v35 = vpop.permute.xlu0 %8473 }
0x4946   : > { %v8480_v23 = vmul.f32 %v12764_v4, %v8474_v35  ;;  %v8553_v20 = vmul.f32 %v8550_v48, %v12755_v44 }
0x4948   : > { %v8565_v30 = vadd.f32 %v8563_v22, %v8553_v20 }
0x494a   : > { %v12741_v24 = vpop.permute.xlu1 %8571  ;;  %v8510_v11 = vpop.permute.xlu0 %8509 }
0x494b   : > { %v8516_v7 = vmul.f32 %v12767_v37, %v8510_v11  ;;  %v8575_v41 = vmul.f32 %v12758_v49, %v12741_v24  ;;  %v8639_v11 = vld [vmem:[%s11542_s13 + $0x18] sm:$0xff] }
0x494d   : > { %v8577_v60 = vadd.f32 %v8575_v41, %v8565_v30 }
0x494f   : > { %v12743_v29 = vpop.permute.xlu1 %8583  ;;  %v8546_v58 = vpop.permute.xlu0 %8545 }
0x4950   : > { %v8552_v33 = vmul.f32 %v8546_v58, %v12770_v9 }
0x4954   : > { %v12745_v18 = vpop.permute.xlu1 %8605  ;;  %v8580_v21 = vpop.permute.xlu0 %8579 }
0x4955   : > { %v8586_v45 = vmul.f32 %v12779_v39, %v8580_v21 }
0x4959   : > { %v12747_v56 = vpop.permute.xlu1 %8617  ;;  %v8614_v35 = vpop.permute.xlu0 %8613 }
0x495a   : > { %v8620_v63 = vmul.f32 %v12764_v4, %v8614_v35 }
0x495e   : > { %v8447_v55 = vpop.permute.xlu1 %8446  ;;  %v8630_v24 = vpop.permute.xlu0 %8629 }
0x495f   : > { %v8454_v43 = vmul.f32 %v8447_v55, %v12770_v9  ;;  %v8587_v55 = vmul.f32 %v12775_v16, %v12743_v29 }
0x4963   : > { %v8460_v42 = vpop.permute.xlu1 %8459 }
0x4964   : > { %v8466_v27 = vmul.f32 %v12767_v37, %v8460_v42 }
0x4966   : > { %v8468_v25 = vadd.f32 %v8466_v27, %v8454_v43  ;;  %v8589_v43 = vadd.f32 %v8587_v55, %v8577_v60 }
0x4968   : > { %v8482_v59 = vadd.f32 %v8480_v23, %v8468_v25  ;;  %v8488_v53 = vpop.permute.xlu1 %8487  ;;  %v8609_v23 = vmul.f32 %v12752_v47, %v12745_v18  ;;  %v8633_v18 = vmul.f32 %v12775_v16, %v8630_v24  ;;  %v5705_v47 = vpop.permute.xlu0 %5704 }
0x4969   : > { %v8494_v0 = vmul.f32 %v12779_v39, %v8488_v53  ;;  %v8621_v53 = vmul.f32 %v12758_v49, %v12747_v56 }
0x496b   : > { %v8496_v26 = vadd.f32 %v8494_v0, %v8482_v59  ;;  %v8599_v59 = vmul.f32 %v12749_v38, %v12755_v44 }
0x496c   : > { %v5709_v16 = vpop.permute.xlu0 %5708 }
0x496d   : > { %v8500_v51 = vpop.permute.xlu1 %8499  ;;  %v10902_v32 = vpack.c.bf16 %v8497_v6, %v8496_v26  ;;  %v8611_v6 = vadd.f32 %v8609_v23, %v8599_v59 }
0x496e   : > { %v8506_v2 = vmul.f32 %v8500_v51, %v12770_v9 }
0x496f   : > { %10903 = vmatprep.subr.bf16.mxu0 %v10902_v32  ;;  %v8623_v51 = vadd.f32 %v8621_v53, %v8611_v6 }
0x4970   : > { %10905 = vmatpush3.bf16.msra.mxu0 %v10902_v32  ;;  %v8518_v52 = vadd.f32 %v8516_v7, %v8506_v2 }
0x4971   : > { %v8635_v38 = vadd.f32 %v8633_v18, %v8623_v51 }
0x4972   : > { %v8522_v36 = vpop.permute.xlu1 %8521 }
0x4973   : > { %v8528_v61 = vmul.f32 %v12764_v4, %v8522_v36 }
0x4975   : > { %v8530_v3 = vadd.f32 %v8528_v61, %v8518_v52 }
0x4977   : > { %v8534_v50 = vpop.permute.xlu1 %8533 }
0x4978   : > { %v8540_v31 = vmul.f32 %v12779_v39, %v8534_v50 }
0x497a   : > { %v8542_v62 = vadd.f32 %v8540_v31, %v8530_v3 }
0x497c   : > { %v8556_v12 = vpop.permute.xlu1 %8555  ;;  %v10906_v13 = vpack.c.bf16 %v8543_v57, %v8542_v62 }
0x497d   : > { %v8562_v34 = vmul.f32 %v12767_v37, %v8556_v12 }
0x497e   : > { %10907 = vmatprep.subr.bf16.mxu0 %v10906_v13 }
0x497f   : > { %10909 = vmatpush3.bf16.msra.mxu0 %v10906_v13  ;;  %v8564_v40 = vadd.f32 %v8562_v34, %v8552_v33 }
0x4981   : > { %v8568_v28 = vpop.permute.xlu1 %8567 }
0x4982   : > { %v8574_v48 = vmul.f32 %v12764_v4, %v8568_v28 }
0x4984   : > { %v8576_v42 = vadd.f32 %v8574_v48, %v8564_v40 }
0x4986   : > { %v8588_v19 = vadd.f32 %v8586_v45, %v8576_v42  ;;  %v8592_v27 = vpop.permute.xlu1 %8591 }
0x4987   : > { %v8598_v29 = vmul.f32 %v8592_v27, %v12770_v9 }
0x4988   : > { %v10910_v54 = vpack.c.bf16 %v8589_v43, %v8588_v19 }
0x498a   : > { %10911 = vmatprep.subr.bf16.mxu0 %v10910_v54 }
0x498b   : > { %10913 = vmatpush3.bf16.msra.mxu0 %v10910_v54  ;;  %v8602_v25 = vpop.permute.xlu1 %8601 }
0x498c   : > { %v8608_v14 = vmul.f32 %v12767_v37, %v8602_v25 }
0x498e   : > { %v8610_v0 = vadd.f32 %v8608_v14, %v8598_v29 }
0x4990   : > { %v8622_v26 = vadd.f32 %v8620_v63, %v8610_v0  ;;  %v8626_v9 = vpop.permute.xlu1 %8625 }
0x4991   : > { %v8632_v37 = vmul.f32 %v12779_v39, %v8626_v9  ;;  %v8638_v39 = vld [vmem:[%s11542_s13 + $0x10] sm:$0xff] }
0x4993   : > { %v8634_v44 = vadd.f32 %v8632_v37, %v8622_v26 }
0x4994   : > { %v5701_v56 = vpop.permute.xlu1 %5700 }
0x4995   : > { %v5711_v49 = vsel %vm1380_vm1, %v12368_v10, %v5701_v56  ;;  %v10914_v4 = vpack.c.bf16 %v8635_v38, %v8634_v44 }
0x4996   : > { %v5712_v32 = vsel %vm1292_vm0, %v5711_v49, %v5705_v47 }
0x4997   : > { %10915 = vmatprep.subr.bf16.mxu0 %v10914_v4  ;;  %v5714_v1 = vsel %vm5713_vm3, %v5712_v32, %v5709_v16 }
0x4998   : > { %10917 = vmatpush3.bf16.msra.mxu0 %v10914_v4  ;;  %5715 = vst [vmem:[%s1256_s0] sm:$0xff] %v5714_v1 }
0x499b   : > { %10415 = vmatmul.mubr.msk.f32.vlgmr.msra.gmra.mrb[66].mxu0 %vm1292_vm0, %v8637_v8 }
0x499c   : > { %10417 = vmatprep.mubr.msk.f32.mxu0 %vm1292_vm0, %v8638_v39 }
0x499f   : > { %10418 = vmatmul.mubr.msk.f32.gmra.mrb[68].mxu0 %vm1292_vm0, %v8639_v11 }
0x4a6e   : > { %v10416_v10 = vpop.f32.mrb[66].mxu0 }
0x4a6f   : > { %8738 = vrot.lane.b32.xlu1 %v10416_v10, %s12982_s20  ;;  %v8718_v15 = vpop.f32.mrb[67].mxu0 }
0x4a72   : > { %v10419_v2 = vpop.f32.mrb[68].mxu0 }
0x4a73   : > { %v8728_v36 = vpop.f32.mrb[69].mxu0 }
0x4a74   : > { %8742 = vrot.lane.b32.xlu1 %v8728_v36, %s11337_s3 }
0x4a78   : > { %8746 = vrot.lane.b32.xlu1 %v10419_v2, %s11338_s2 }
0x4ae1   : > { %v8739_v46 = vpop.permute.xlu1 %8738 }
0x4ae2   : > { %v8749_v61 = vsel %vm1380_vm1, %v8718_v15, %v8739_v46 }
0x4ae6   : > { %v8743_v7 = vpop.permute.xlu1 %8742 }
0x4ae7   : > { %v8750_v5 = vsel %vm1292_vm0, %v8749_v61, %v8743_v7 }
0x4aea   : > { %v8747_v17 = vpop.permute.xlu1 %8746 }
0x4aeb   : > { %v8751_v52 = vsel %vm5713_vm3, %v8750_v5, %v8747_v17 }
0x4aec   : > { %9270 = vst [vmem:[%s1256_s0 + $0x8] sm:$0xff] %v8751_v52 }
0x4aed PF: > { %s93_s28 = sadd.s32 1, %s11259_s28  }
0x4aee   : > { %p90_p11 = scmp.ge.s32.totalorder %s93_s28, 4  }
0x4af0   :  { %92 = sbr.rel (!%p90_p11) target bundleno = 87 (0x57), region = 311 }
0x4af7   :  { %8775 = vsyncpa [#allocation3], 1 }
0x4af8   :  { %8777 = vsyncpa [#allocation3 + $0x1], 1 }
0x4af9   :  { %8778 = vsyncpa [#allocation5], 1 }

</bundles_post_ra>
